<compile_context>
chip_gen: v5e
topology: v5e:2x2
jax: 0.10.0
libtpu: 0.0.40
codegen_flags: <defaults>
</compile_context>

<pallas_src>
import functools

import jax
import jax.numpy as jnp
from jax import lax
from jax.experimental import pallas as pl
from jax.experimental.pallas import tpu as pltpu

IN_H, IN_W = 232, 300
IN_SIZE = IN_H * IN_W  # 69600

# K-tile for the layer-1 matmul. 34816 = 272 * 128, and
# round_up(69600, 34816) = 69632 -> a 2-step K grid (weight DMA ~2.2 MB/step).
TK = 34816


def _round_up(x, m):
    return ((x + m - 1) // m) * m


def _pad_axis(x, target, axis):
    pad = target - x.shape[axis]
    if pad == 0:
        return x
    widths = [(0, 0)] * x.ndim
    widths[axis] = (0, pad)
    return jnp.pad(x, widths)


def _k_tiling(K, target=TK):
    """Return (tk, K_pad): tk is a multiple of 128 and K_pad % tk == 0."""
    K128 = _round_up(K, 128)
    if K128 <= target:
        return K128, K128
    return target, _round_up(K, target)


# ---------------------------------------------------------------------------
# Fused MLP kernel: K-tiled layer 1 + (hidden layers + final layer) epilogue
# ---------------------------------------------------------------------------
def _fused_mlp_kernel(*refs, n_layers):
    # refs = x, (w1T, b1), (w2, b2), ..., (wL, bL), out, acc_scratch
    x_ref = refs[0]
    wb = refs[1:1 + 2 * n_layers]
    o_ref = refs[1 + 2 * n_layers]
    acc_ref = refs[2 + 2 * n_layers]

    k = pl.program_id(0)

    @pl.when(k == 0)
    def _init():
        acc_ref[...] = jnp.zeros_like(acc_ref)

    # Layer-1 partial product on this K tile. w1 is stored transposed
    # (N1, K_pad) so BOTH operands are lane-dense (minor dim = K, multiple of
    # 128); contract the last dim of each. bf16 inputs, f32 accumulation.
    acc_ref[...] += lax.dot_general(
        x_ref[...],                       # (M, tk)  bf16
        wb[0][...],                       # (N1, tk) bf16
        dimension_numbers=(((1,), (1,)), ((), ())),
        preferred_element_type=jnp.float32,
    )

    @pl.when(k == pl.num_programs(0) - 1)
    def _epilogue():
        a = acc_ref[...] + wb[1][...]
        if n_layers > 1:            # layer 1 is a hidden layer -> ReLU
            a = jnp.maximum(a, 0.0)
        for li in range(1, n_layers):
            a = jnp.dot(
                a, wb[2 * li][...], preferred_element_type=jnp.float32
            ) + wb[2 * li + 1][...]
            if li < n_layers - 1:   # hidden layers get ReLU, final does not
                a = jnp.maximum(a, 0.0)
        o_ref[...] = a.astype(o_ref.dtype)


def _fused_mlp(x, weights, biases, tk):
    """x: (M_pad, K_pad) bf16 with K_pad % tk == 0.

    weights[0]: (N1, K_pad) bf16  -- TRANSPOSED, lane-dense layer-1 weight.
    weights[i>0]: small (N_{i-1}, N_i) f32 full blocks (VMEM resident).
    biases[i]: (1, N_i) f32. Returns (M_pad, C) f32 logits.
    """
    M, K_pad = x.shape
    n_layers = len(weights)
    N1 = weights[0].shape[0]
    C = weights[-1].shape[1] if n_layers > 1 else weights[0].shape[0]
    assert K_pad % tk == 0

    in_specs = [
        pl.BlockSpec((M, tk), lambda k: (0, k)),      # x: K-tiled, bf16
        pl.BlockSpec((N1, tk), lambda k: (0, k)),     # w1T: K-tiled, lane-dense
        pl.BlockSpec((1, N1), lambda k: (0, 0)),      # b1
    ]
    inputs = [x, weights[0], biases[0]]
    for w, b in zip(weights[1:], biases[1:]):
        in_specs.append(pl.BlockSpec(w.shape, lambda k: (0, 0)))  # VMEM-resident
        in_specs.append(pl.BlockSpec(b.shape, lambda k: (0, 0)))
        inputs.extend([w, b])

    kernel = functools.partial(_fused_mlp_kernel, n_layers=n_layers)
    return pl.pallas_call(
        kernel,
        out_shape=jax.ShapeDtypeStruct((M, C), jnp.float32),
        grid_spec=pltpu.PrefetchScalarGridSpec(
            num_scalar_prefetch=0,
            grid=(K_pad // tk,),
            in_specs=in_specs,
            out_specs=pl.BlockSpec((M, C), lambda k: (0, 0)),
            scratch_shapes=[pltpu.VMEM((M, N1), jnp.float32)],
        ),
        compiler_params=pltpu.CompilerParams(
            dimension_semantics=("arbitrary",),       # K is a reduction axis
            vmem_limit_bytes=32 * 1024 * 1024,        # safe on v5e/v6e/v7x
        ),
    )(*inputs)


# ---------------------------------------------------------------------------
# Entwork parameters: init, one-time layout prep, forward
# ---------------------------------------------------------------------------
def init_entwork_params(key, hiddens, output_class_count=2):
    """Deterministic init mimicking nn.Linear's U(-1/sqrt(in), 1/sqrt(in)).

    Weights stored as (in_features, out_features) f32 (math layout)."""
    params = []
    in_size = IN_SIZE
    for size in list(hiddens) + [output_class_count]:
        key, kw, kb = jax.random.split(key, 3)
        bound = 1.0 / jnp.sqrt(jnp.float32(in_size))
        w = jax.random.uniform(kw, (in_size, size), jnp.float32, -bound, bound)
        b = jax.random.uniform(kb, (size,), jnp.float32, -bound, bound)
        params.append((w, b))
        in_size = size
    return params


def prepare_entwork_params(params):
    """One-time layout prep (keep OUT of the forward pass):
       - layer-1 weight: zero-padded along K to a multiple of the K tile,
         TRANSPOSED to (N1, K_pad) so the lane (minor) dim is K, cast to bf16.
       - other (tiny) weights: f32 full blocks; biases reshaped to (1, N) f32.
    """
    weights, biases = [], []

    w0, b0 = params[0]
    w0 = jnp.asarray(w0, jnp.float32)
    tk, K_pad = _k_tiling(w0.shape[0])
    w0 = _pad_axis(w0, K_pad, 0)                          # zero-pad K: exact
    weights.append(jnp.asarray(w0.T, jnp.bfloat16))       # (N1, K_pad), lane-dense
    biases.append(jnp.asarray(b0, jnp.float32).reshape(1, -1))

    for w, b in params[1:]:
        weights.append(jnp.asarray(w, jnp.float32))
        biases.append(jnp.asarray(b, jnp.float32).reshape(1, -1))

    return {"weights": weights, "biases": biases, "tk": tk, "k_pad": K_pad}


def entwork_forward(x, prep):
    """x: (B, 232, 300) f32 -> logits (B, output_class_count) f32."""
    weights, biases = prep["weights"], prep["biases"]
    tk, K_pad = prep["tk"], prep["k_pad"]
    B = x.shape[0]

    # bf16 activations halve the x HBM stream; the cast fuses with the pad
    # that is needed anyway. Zero padding of M / K is numerically exact.
    a = x.reshape(B, -1).astype(jnp.bfloat16)
    M_pad = _round_up(max(B, 8), 8)
    a = _pad_axis(_pad_axis(a, M_pad, 0), K_pad, 1)

    out = _fused_mlp(a, weights, biases, tk)
    return out[:B, :]


def entwork_forward_ref(x, params):
    """Pure-JAX f32 reference for correctness checking."""
    B = x.shape[0]
    a = x.reshape(B, IN_SIZE).astype(jnp.float32)
    n_layers = len(params)
    for li, (w, b) in enumerate(params):
        a = a @ w + b
        if li < n_layers - 1:
            a = jnp.maximum(a, 0.0)
    return a


if __name__ == "__main__":
    key = jax.random.PRNGKey(0)
    k_x, k_p = jax.random.split(key)

    hiddens = [32, 32]
    output_class_count = 2
    batch = 2

    x = jax.random.normal(k_x, (batch, IN_H, IN_W), dtype=jnp.float32)
    params = init_entwork_params(k_p, hiddens, output_class_count)
    prep = prepare_entwork_params(params)   # one-time weight layout/padding

    out = entwork_forward(x, prep)
    out = jax.block_until_ready(out)

    ref = entwork_forward_ref(x, params)
    assert out.shape == (batch, output_class_count), out.shape
    # Layer-1 weight/activations are stored in bf16 (f32 MXU accumulation);
    # expected |err| over the K=69600 reduction is a few e-4 at the logits,
    # so 5e-3 gives ample margin while still catching any structural bug.
    assert jnp.allclose(out, ref, atol=5e-3, rtol=5e-3), (out, ref)

    print("KERNEL_OK")
</pallas_src>

<mosaic_0001>
module attributes {stable_mosaic.version = 11 : i64} {
  func.func @_fused_mlp_kernel(%arg0: i32, %arg1: memref<8x34816xbf16, #tpu.memory_space<vmem>>, %arg2: memref<32x34816xbf16, #tpu.memory_space<vmem>>, %arg3: memref<1x32xf32, #tpu.memory_space<vmem>>, %arg4: memref<32x32xf32, #tpu.memory_space<vmem>>, %arg5: memref<1x32xf32, #tpu.memory_space<vmem>>, %arg6: memref<32x2xf32, #tpu.memory_space<vmem>>, %arg7: memref<1x2xf32, #tpu.memory_space<vmem>>, %arg8: memref<8x2xf32, #tpu.memory_space<vmem>>, %arg9: memref<8x32xf32, #tpu.memory_space<vmem>>) attributes {dimension_semantics = [#tpu.dimension_semantics<arbitrary>], iteration_bounds = array<i64: 2>, scalar_prefetch = 0 : i64, scratch_operands = 1 : i64, tpu.core_type = #tpu.core_type<tc>, window_params = [{transform_indices = @transform_0, window_bounds = array<i64: 8, 34816>}, {transform_indices = @transform_1, window_bounds = array<i64: 32, 34816>}, {pipeline_mode = #tpu.pipeline_mode<synchronous>, transform_indices = @transform_2, window_bounds = array<i64: 1, 32>}, {pipeline_mode = #tpu.pipeline_mode<synchronous>, transform_indices = @transform_3, window_bounds = array<i64: 32, 32>}, {pipeline_mode = #tpu.pipeline_mode<synchronous>, transform_indices = @transform_4, window_bounds = array<i64: 1, 32>}, {pipeline_mode = #tpu.pipeline_mode<synchronous>, transform_indices = @transform_5, window_bounds = array<i64: 32, 2>}, {pipeline_mode = #tpu.pipeline_mode<synchronous>, transform_indices = @transform_6, window_bounds = array<i64: 1, 2>}, {pipeline_mode = #tpu.pipeline_mode<synchronous>, transform_indices = @transform_7, window_bounds = array<i64: 8, 2>}]} {
    %c0_i32 = arith.constant 0 : i32
    %0 = arith.cmpi eq, %arg0, %c0_i32 : i32
    %1 = arith.extui %0 : i1 to i32
    %c0_i32_0 = arith.constant 0 : i32
    %2 = arith.cmpi ne, %1, %c0_i32_0 : i32
    scf.if %2 {
      %cst_9 = arith.constant 0.000000e+00 : f32
      %12 = vector.broadcast %cst_9 : f32 to vector<8x32xf32>
      %c0_10 = arith.constant 0 : index
      %c0_11 = arith.constant 0 : index
      %13 = vector.load %arg9[%c0_10, %c0_11] : memref<8x32xf32, #tpu.memory_space<vmem>>, vector<8x32xf32>
      tpu.vector_store %arg9[%c0_10, %c0_11], %12 {strides = array<i32>} : memref<8x32xf32, #tpu.memory_space<vmem>>, vector<8x32xf32>,
    } else {
    }
    %c0 = arith.constant 0 : index
    %c0_1 = arith.constant 0 : index
    %3 = vector.load %arg9[%c0, %c0_1] : memref<8x32xf32, #tpu.memory_space<vmem>>, vector<8x32xf32>
    %c0_2 = arith.constant 0 : index
    %c0_3 = arith.constant 0 : index
    %4 = vector.load %arg1[%c0_2, %c0_3] : memref<8x34816xbf16, #tpu.memory_space<vmem>>, vector<8x34816xbf16>
    %c0_4 = arith.constant 0 : index
    %c0_5 = arith.constant 0 : index
    %5 = vector.load %arg2[%c0_4, %c0_5] : memref<32x34816xbf16, #tpu.memory_space<vmem>>, vector<32x34816xbf16>
    %cst = arith.constant dense<0.000000e+00> : vector<8x32xf32>
    %6 = tpu.matmul %4, %5, %cst {dimension_numbers = #tpu.dot_dimension_numbers<[1], [1], [0], [0], [0, 0, 1, 0], [], []>} : vector<8x34816xbf16>, vector<32x34816xbf16>, vector<8x32xf32> -> vector<8x32xf32>
    %7 = arith.addf %3, %6 : vector<8x32xf32>
    %c0_6 = arith.constant 0 : index
    %c0_7 = arith.constant 0 : index
    %8 = vector.load %arg9[%c0_6, %c0_7] : memref<8x32xf32, #tpu.memory_space<vmem>>, vector<8x32xf32>
    tpu.vector_store %arg9[%c0_6, %c0_7], %7 {strides = array<i32>} : memref<8x32xf32, #tpu.memory_space<vmem>>, vector<8x32xf32>,
    %c1_i32 = arith.constant 1 : i32
    %9 = arith.cmpi eq, %arg0, %c1_i32 : i32
    %10 = arith.extui %9 : i1 to i32
    %c0_i32_8 = arith.constant 0 : i32
    %11 = arith.cmpi ne, %10, %c0_i32_8 : i32
    scf.if %11 {
      %c0_9 = arith.constant 0 : index
      %c0_10 = arith.constant 0 : index
      %12 = vector.load %arg9[%c0_9, %c0_10] : memref<8x32xf32, #tpu.memory_space<vmem>>, vector<8x32xf32>
      %c0_11 = arith.constant 0 : index
      %c0_12 = arith.constant 0 : index
      %13 = vector.load %arg3[%c0_11, %c0_12] : memref<1x32xf32, #tpu.memory_space<vmem>>, vector<1x32xf32>
      %14 = vector.broadcast %13 : vector<1x32xf32> to vector<8x32xf32>
      %15 = arith.addf %12, %14 : vector<8x32xf32>
      %cst_13 = arith.constant 0.000000e+00 : f32
      %16 = vector.broadcast %cst_13 : f32 to vector<8x32xf32>
      %17 = arith.maximumf %15, %16 : vector<8x32xf32>
      %c0_14 = arith.constant 0 : index
      %c0_15 = arith.constant 0 : index
      %18 = vector.load %arg4[%c0_14, %c0_15] : memref<32x32xf32, #tpu.memory_space<vmem>>, vector<32x32xf32>
      %cst_16 = arith.constant dense<0.000000e+00> : vector<8x32xf32>
      %19 = tpu.matmul %17, %18, %cst_16 {dimension_numbers = #tpu.dot_dimension_numbers<[1], [0], [0], [1], [0, 0, 1, 1], [], []>} : vector<8x32xf32>, vector<32x32xf32>, vector<8x32xf32> -> vector<8x32xf32>
      %c0_17 = arith.constant 0 : index
      %c0_18 = arith.constant 0 : index
      %20 = vector.load %arg5[%c0_17, %c0_18] : memref<1x32xf32, #tpu.memory_space<vmem>>, vector<1x32xf32>
      %21 = vector.broadcast %20 : vector<1x32xf32> to vector<8x32xf32>
      %22 = arith.addf %19, %21 : vector<8x32xf32>
      %cst_19 = arith.constant 0.000000e+00 : f32
      %23 = vector.broadcast %cst_19 : f32 to vector<8x32xf32>
      %24 = arith.maximumf %22, %23 : vector<8x32xf32>
      %c0_20 = arith.constant 0 : index
      %c0_21 = arith.constant 0 : index
      %25 = vector.load %arg6[%c0_20, %c0_21] : memref<32x2xf32, #tpu.memory_space<vmem>>, vector<32x2xf32>
      %cst_22 = arith.constant dense<0.000000e+00> : vector<8x2xf32>
      %26 = tpu.matmul %24, %25, %cst_22 {dimension_numbers = #tpu.dot_dimension_numbers<[1], [0], [0], [1], [0, 0, 1, 1], [], []>} : vector<8x32xf32>, vector<32x2xf32>, vector<8x2xf32> -> vector<8x2xf32>
      %c0_23 = arith.constant 0 : index
      %c0_24 = arith.constant 0 : index
      %27 = vector.load %arg7[%c0_23, %c0_24] : memref<1x2xf32, #tpu.memory_space<vmem>>, vector<1x2xf32>
      %28 = vector.broadcast %27 : vector<1x2xf32> to vector<8x2xf32>
      %29 = arith.addf %26, %28 : vector<8x2xf32>
      %c0_25 = arith.constant 0 : index
      %c0_26 = arith.constant 0 : index
      %30 = vector.load %arg8[%c0_25, %c0_26] : memref<8x2xf32, #tpu.memory_space<vmem>>, vector<8x2xf32>
      tpu.vector_store %arg8[%c0_25, %c0_26], %29 {strides = array<i32>} : memref<8x2xf32, #tpu.memory_space<vmem>>, vector<8x2xf32>,
    } else {
    }
    return
  }
  func.func @transform_0(%arg0: i32) -> (i32, i32) {
    %c0_i32 = arith.constant 0 : i32
    %c0_i32_0 = arith.constant 0 : i32
    return %c0_i32, %arg0 : i32, i32
  }
  func.func @transform_1(%arg0: i32) -> (i32, i32) {
    %c0_i32 = arith.constant 0 : i32
    %c0_i32_0 = arith.constant 0 : i32
    return %c0_i32, %arg0 : i32, i32
  }
  func.func @transform_2(%arg0: i32) -> (i32, i32) {
    %c0_i32 = arith.constant 0 : i32
    %c0_i32_0 = arith.constant 0 : i32
    %c0_i32_1 = arith.constant 0 : i32
    return %c0_i32, %c0_i32_0 : i32, i32
  }
  func.func @transform_3(%arg0: i32) -> (i32, i32) {
    %c0_i32 = arith.constant 0 : i32
    %c0_i32_0 = arith.constant 0 : i32
    %c0_i32_1 = arith.constant 0 : i32
    return %c0_i32, %c0_i32_0 : i32, i32
  }
  func.func @transform_4(%arg0: i32) -> (i32, i32) {
    %c0_i32 = arith.constant 0 : i32
    %c0_i32_0 = arith.constant 0 : i32
    %c0_i32_1 = arith.constant 0 : i32
    return %c0_i32, %c0_i32_0 : i32, i32
  }
  func.func @transform_5(%arg0: i32) -> (i32, i32) {
    %c0_i32 = arith.constant 0 : i32
    %c0_i32_0 = arith.constant 0 : i32
    %c0_i32_1 = arith.constant 0 : i32
    return %c0_i32, %c0_i32_0 : i32, i32
  }
  func.func @transform_6(%arg0: i32) -> (i32, i32) {
    %c0_i32 = arith.constant 0 : i32
    %c0_i32_0 = arith.constant 0 : i32
    %c0_i32_1 = arith.constant 0 : i32
    return %c0_i32, %c0_i32_0 : i32, i32
  }
  func.func @transform_7(%arg0: i32) -> (i32, i32) {
    %c0_i32 = arith.constant 0 : i32
    %c0_i32_0 = arith.constant 0 : i32
    %c0_i32_1 = arith.constant 0 : i32
    return %c0_i32, %c0_i32_0 : i32, i32
  }
}

</mosaic_0001>

<bundles_post_ra>
// kernel: tpu_custom_call.1
= control target key start
LH: loop header
LB: loop body
LE: loop exit
PB: predicated region body
PF: predicated region fallthrough
CT: control target
= control target key end

     0   :  { %s12993_s0 = inlined_call_operand.hbm [shape: bf16[8,69632], index: 0, kind: input, shape index: {}]   ;;  %s12994_s1 = inlined_call_operand.hbm [shape: bf16[32,69632], index: 1, kind: input, shape index: {}]   ;;  %s12995_s2 = inlined_call_operand.hbm [shape: f32[1,32], index: 2, kind: input, shape index: {}]   ;;  %s12996_s3 = inlined_call_operand.hbm [shape: f32[32,32], index: 3, kind: input, shape index: {}]   ;;  %s12997_s4 = inlined_call_operand.hbm [shape: f32[1,32], index: 4, kind: input, shape index: {}]   ;;  %s12998_s5 = inlined_call_operand.vmem [shape: f32[32,2], index: 5, kind: input, shape index: {}]   ;;  %s12999_s6 = inlined_call_operand.hbm [shape: f32[1,2], index: 6, kind: input, shape index: {}]   ;;  %s13000_s7 = inlined_call_operand.vmem [shape: f32[8,2], index: 7, kind: output, shape index: {}]  }
   0x1   :  { %13001 = sst [smem:[#allocation18_spill]] %s12995_s2 }
   0x2   :  { %13002 = sst [smem:[#allocation19_spill]] %s12996_s3 }
   0x3   :  { %12 = vsyncpa [#allocation4], 0 }
   0x4   :  { %14 = vsyncpa [#allocation4 + $0x1], 0 }
   0x5   :  { %15 = vsyncpa [#allocation6], 0 }
   0x6   :  { %17 = vsyncpa [#allocation6 + $0x1], 0 }
   0x7   :  { %18 = vsyncpa [#allocation9], 0 }
   0x8   :  { %19 = vsyncpa [#allocation12], 0  ;;  %s11585_s24 = smov 0   ;;  %s11587_s25 = smov 0  }
   0x9   :  { %s11589_s26 = smov 0   ;;  %s11591_s27 = smov 0  }
   0xa LB: > { %s13003_s2 = sld [smem:[#allocation18_spill]]  ;;  %s11609_s8 = sadd.s32 4294967295, %s11533_s27   ;;  %s11533_s27 = sphi %s11591_s27, %s13012_s27   ;;  %s11529_s26 = sphi %s11589_s26, %s13011_s26   ;;  %s11525_s25 = sphi %s11587_s25, %s13010_s25   ;;  %s11521_s24 = sphi %s11585_s24, %s13009_s24  }
   0xb   : > { %p8464_p0 = scmp.ge.s32.totalorder %s11533_s27, 1  ;;  %p46_p1 = scmp.eq.s32.totalorder %s11609_s8, 0 }
   0xc   : > { %p208_p2 = scmp.lt.s32.totalorder %s11533_s27, 3  ;;  %p8465_p3 = scmp.ne.s32.totalorder %s11609_s8, 0 }
   0xd   : > { %s11535_s10 = smov [#allocation7]   ;;  %s13005_s3 = sld [smem:[#allocation19_spill]] }
   0xe   : > { %p11615_p4 = pnand %p8464_p0, %p208_p2  ;;  %s222_s11 = sshll.u32 %s11535_s10, 4  ;;  %s223_s11 = int_to_ptr.vmem [resolvable:$true] %s222_s11 }
   0xf   : > { %s11536_s16 = smov [#allocation8]   ;;  %s11537_s18 = smov 128  }
  0x10   : > { %s220_s30 = sshll.u32 %s13003_s2, 4  ;;  %p11229_p5 = pneg %p11615_p4  ;;  %s221_s30 = int_to_ptr.hbm [resolvable:$true] %s220_s30 }
  0x11   : > { %s233_s17 = sshll.u32 %s11536_s16, 4  ;;  %s11538_s19 = smov 8   ;;  %s234_s17 = int_to_ptr.vmem [resolvable:$true] %s233_s17 }
  0x12   : > { %p11626_p6 = pnand %p11229_p5, %p46_p1  ;;  %s246_s22 = sshll.u32 %s12997_s4, 4  ;;  %s247_s22 = int_to_ptr.hbm [resolvable:$true] %s246_s22 }
  0x13   : > { %s231_s14 = sshll.u32 %s13005_s3, 4  ;;  %s11539_s23 = smov [#allocation10]   ;;  %s232_s14 = int_to_ptr.hbm [resolvable:$true] %s231_s14 }
  0x14   : > { %11232 = dma.hbm_to_vmem [thread:$0]  (!%p11626_p6), %s221_s30, 16, %s223_s11, [#allocation6]  }
  0x15   : > { %11235 = dma.hbm_to_vmem [thread:$0]  (!%p11626_p6), %s232_s14, 512, %s234_s17, [#allocation9], %s11537_s18, %s11537_s18, %s11538_s19  }
  0x16   : > { %s248_s28 = sshll.u32 %s11539_s23, 4  ;;  %s261_s10 = sshll.u32 %s12999_s6, 4  ;;  %s249_s28 = int_to_ptr.vmem [resolvable:$true] %s248_s28  ;;  %s262_s10 = int_to_ptr.hbm [resolvable:$true] %s261_s10 }
  0x17   : > { %11238 = dma.hbm_to_vmem [thread:$0]  (!%p11626_p6), %s247_s22, 16, %s249_s28, [#allocation9]  }
  0x18   : > { %s11540_s11 = smov [#allocation11]   ;;  %s11645_s13 = sadd.s32 1, %s11533_s27  }
  0x19   : > { %s263_s12 = sshll.u32 %s11540_s11, 4  ;;  %s32_s14 = sadd.s32 1, %s11529_s26  ;;  %s264_s12 = int_to_ptr.vmem [resolvable:$true] %s263_s12 }
  0x1a   : > { %11241 = dma.hbm_to_vmem [thread:$0]  (!%p11626_p6), %s262_s10, 16, %s264_s12, [#allocation12]  }
  0x1b   : > { %s29_s16 = ssub.s32 %s11533_s27, %s11645_s13  ;;  %p39_p7 = scmp.ne.s32.totalorder %s11529_s26, %s11525_s25 }
  0x1c   : > { %p30_p8 = scmp.eq.s32.totalorder %s29_s16, 0  ;;  %p40_p9 = scmp.eq.s32.totalorder %s11533_s27, 0 }
  0x1d   : > { %p45_p10 = scmp.ne.s32.totalorder %s11525_s25, %s11521_s24  ;;  %p11253_p11 = scmp.lt.s32.totalorder %s11533_s27, 2 }
  0x1e   : > { %s11657_s17 = scalar_select %p30_p8, %s11529_s26, %s32_s14  }
  0x1f   : > { %p41_p12 = por %p40_p9, %p39_p7  ;;  %p11661_p13 = por %p46_p1, %p45_p10 }
  0x20   : > { %s11666_s15 = sand.u32 1, %s11529_s26   ;;  %s10659_s19 = smul.u32 1088, %s11533_s27 }
  0x21   : > { %s11205_s20 = smul.u32 1088, %s11666_s15  ;;  %p11673_p0 = pnand %p11253_p11, %p41_p12 }
  0x22   : > { %s283_s23 = scalar_lea.hbm %s12993_s0, %s10659_s19  ;;  %s275_s10 = scalar_lea.sflag [#allocation4], %s11666_s15 }
  0x23   : > { %s285_s28 = sshll.u32 %s283_s23, 4  ;;  %s278_s29 = scalar_lea.vmem [#allocation3], %s11205_s20  ;;  %s286_s28 = int_to_ptr.hbm [resolvable:$true] %s285_s28 }
  0x24   : > { %s287_s30 = sshll.u32 %s278_s29, 4  ;;  %s11423_s11 = sshra.s32 %s286_s28, 4  ;;  %s288_s30 = int_to_ptr.vmem [resolvable:$true] %s287_s30  ;;  %s11424_s11 = int_to_ptr.hbm [resolvable:$true] %s11423_s11 }
  0x25   : > { %s11425_s12 = scalar_lea.hbm %s11424_s11, 1088  ;;  %p11427_p5 = pneg %p11673_p0 }
  0x26   : > { %p11426_p2 = scmp.ne.s32.totalorder %s11424_s11, %s11425_s12  ;;  %s11430_s21 = scalar_lea.hbm %s12993_s0, 2176 }
  0x27   : > { %p11431_p8 = scmp.lt.s32.totalorder %s11424_s11, %s12993_s0  ;;  %p11432_p9 = scmp.lt.s32.totalorder %s11430_s21, %s11425_s12 }
  0x28   : > { %p11428_p6 = pnand %p11427_p5, %p11426_p2 }
  0x29   : > { %p11433_p10 = por %p11432_p9, %p11431_p8 }
  0x2a   : > { %p11429_p7 = pneg %p11428_p6 }
  0x2c   : > { %p11434_p11 = pnand %p11433_p10, %p11429_p7 }
  0x2e   : > { %11437 = shalt.err (!%p11434_p11)
}
  0x2f   : > { %11245 = dma.hbm_to_vmem [thread:$0]  (!%p11673_p0), %s286_s28, 17408, %s288_s30, %s275_s10  }
  0x30   : > { %s11206_s20 = smul.u32 4352, %s11666_s15  ;;  %s303_s14 = scalar_lea.hbm %s12994_s1, %s10659_s19 }
  0x31   : > { %s304_s16 = sshll.u32 %s303_s14, 4  ;;  %s294_s3 = sand.u32 1, %s11533_s27   ;;  %s305_s16 = int_to_ptr.hbm [resolvable:$true] %s304_s16 }
  0x32   : > { %s298_s22 = scalar_lea.vmem [#allocation5], %s11206_s20  ;;  %s295_s12 = scalar_lea.sflag [#allocation6], %s294_s3 }
  0x33   : > { %s306_s11 = sshll.u32 %s298_s22, 4  ;;  %s11453_s21 = sshra.s32 %s305_s16, 4  ;;  %s307_s11 = int_to_ptr.vmem [resolvable:$true] %s306_s11  ;;  %s11454_s21 = int_to_ptr.hbm [resolvable:$true] %s11453_s21 }
  0x34   : > { %s11455_s23 = scalar_lea.hbm %s11454_s21, 4352  ;;  %s11460_s2 = scalar_lea.hbm %s12994_s1, 8704 }
  0x35   : > { %p11456_p12 = scmp.ne.s32.totalorder %s11454_s21, %s11455_s23  ;;  %p11461_p7 = scmp.lt.s32.totalorder %s11454_s21, %s12994_s1 }
  0x36   : > { %p11462_p8 = scmp.lt.s32.totalorder %s11460_s2, %s11455_s23 }
  0x37   : > { %p11458_p2 = pnand %p11456_p12, %p11427_p5 }
  0x38   : > { %p11463_p9 = por %p11462_p8, %p11461_p7 }
  0x39   : > { %p11459_p6 = pneg %p11458_p2 }
  0x3b   : > { %p11464_p10 = pnand %p11463_p9, %p11459_p6 }
  0x3d   : > { %11467 = shalt.err (!%p11464_p10)
}
  0x3e   : > { %s11541_s3 = smov 34816   ;;  %s11542_s27 = smov 17408  }
  0x3f   : > { %s11543_s10 = smov 1088   ;;  %318 = sbr.rel (%p11615_p4) target bundleno = 1590 (0x636), region = 48 }
  0x40   : > { %11248 = dma.hbm_to_vmem [thread:$0]  (!%p11673_p0), %s305_s16, 69632, %s307_s11, %s295_s12, %s11541_s3, %s11542_s27, %s11543_s10  }
  0x41   : > { %s320_s20 = sand.u32 (!%p11615_p4), 1, %s11525_s25  }
  0x42   : > { %s11207_s29 = smul.u32 (!%p11615_p4), 1088, %s320_s20  ;;  %s321_s14 = scalar_lea.sflag (!%p11615_p4), [#allocation4], %s320_s20 }
  0x44   : > { %s11710_s22 = scalar_lea.vmem [#allocation3], %s11207_s29 }
  0x45   : > { %11500 = dma.done.wait (%p11661_p13), %s321_s14, 17408  }
  0x46   : > { %11502 = vsyncadd (%p11661_p13), %s321_s14, 4294949888  ;;  %s330_s21 = sand.u32 1, %s11609_s8   ;;  %s11208_s24 = smul.u32 4352, %s320_s20 }
  0x47   : > { %s331_s16 = scalar_lea.sflag [#allocation6], %s330_s21 }
  0x48   : > { %s11717_s11 = scalar_lea.vmem [#allocation5], %s11208_s24 }
  0x49   : > { %11504 = dma.done.wait (%p11661_p13), %s331_s16, 69632  }
  0x4a   : > { %11506 = vsyncadd (%p11661_p13), %s331_s16, 4294897664 }
  0x4b   : > { %11508 = dma.done.wait (%p46_p1), [#allocation6], 16  }
  0x4c   : > { %11510 = vsyncadd (%p46_p1), [#allocation6], 4294967280 }
  0x4d   : > { %11512 = dma.done.wait (%p46_p1), [#allocation9], 528  }
  0x4e   : > { %11514 = vsyncadd (%p46_p1), [#allocation9], 4294966768 }
  0x4f   : > { %11516 = dma.done.wait (%p46_p1), [#allocation12], 16  }
  0x50   : > { %11518 = vsyncadd (%p46_p1), [#allocation12], 4294967280  ;;  %392 = sbr.rel (%p8465_p3) target bundleno = 87 (0x57), region = 76 }
  0x55   : > { %vm393_vm0 = vcmask 261120   ;;  %v11544_v0 = vmov 0.0  }
  0x56   : > { %394 = vst.msk [vmem:[#allocation2] sm:$0xff] %vm393_vm0, %v11544_v0 }
  0x57 PF: > { %v9568_v1 = vld [vmem:[%s11717_s11 + $0x880] sm:$0xf]  ;;  %v10933_v3 = vld [vmem:[%s11717_s11 + $0x884] sm:$0xf]  ;;  %v9576_v6 = vld [vmem:[%s11717_s11 + $0x888] sm:$0xf] }
  0x58   : > { %v11069_v2 = vld [vmem:[%s11717_s11 + $0xcbc] sm:$0xf0]  ;;  %v9570_v5 = vld [vmem:[%s11717_s11 + $0xcc0] sm:$0xf0]  ;;  %v11070_v7 = vld [vmem:[%s11717_s11 + $0xcc4] sm:$0xf0] }
  0x59   : > { %v9569_v4 = vor.u32 %v11069_v2, %v9568_v1  ;;  %v9573_v8 = vor.u32 %v10933_v3, %v9570_v5  ;;  %v9577_v9 = vor.u32 %v11070_v7, %v9576_v6  ;;  %v10934_v10 = vld [vmem:[%s11717_s11 + $0x88c] sm:$0xf]  ;;  %v8480_v13 = vld [vmem:[%s11717_s11] sm:$0xf]  ;;  %v10661_v15 = vld [vmem:[%s11717_s11 + $0x4] sm:$0xf] }
  0x5a   : > { %v9578_v11 = vld [vmem:[%s11717_s11 + $0xcc8] sm:$0xf0]  ;;  %v10797_v14 = vld [vmem:[%s11717_s11 + $0x43c] sm:$0xf0]  ;;  %v8482_v16 = vld [vmem:[%s11717_s11 + $0x440] sm:$0xf0] }
  0x5b   : > { %4754 = vmatpush.bf16.xpose.msra.mxu0 %v9569_v4  ;;  %v9581_v12 = vor.u32 %v10934_v10, %v9578_v11  ;;  %4767 = vmatpush.bf16.xpose.msra.mxu1 %v9573_v8  ;;  %v8488_v17 = vld [vmem:[%s11717_s11 + $0x8] sm:$0xf]  ;;  %v10662_v19 = vld [vmem:[%s11717_s11 + $0xc] sm:$0xf]  ;;  %v396_v21 = vld [vmem:[%s11710_s22] sm:$0xff]  ;;  %v8481_v25 = vor.u32 %v10797_v14, %v8480_v13  ;;  %v8485_v29 = vor.u32 %v10661_v15, %v8482_v16  ;;  %vm8285_vm1 = vcmask 261120  }
  0x5c   : > { %4780 = vmatpush.bf16.xpose.msra.mxu2 %v9577_v9  ;;  %v10798_v18 = vld [vmem:[%s11717_s11 + $0x444] sm:$0xf0]  ;;  %v8490_v20 = vld [vmem:[%s11717_s11 + $0x448] sm:$0xf0]  ;;  %v9592_v22 = vld [vmem:[%s11717_s11 + $0x898] sm:$0xf]  ;;  %v1212_v36 = vunpack.c.l.b16 %v396_v21  ;;  %v1213_v39 = vunpack.c.h.b16 %v396_v21 }
  0x5d   : > { %4793 = vmatpush.bf16.xpose.msra.mxu3 %v9581_v12  ;;  %v11072_v23 = vld [vmem:[%s11717_s11 + $0xcd4] sm:$0xf0]  ;;  %v10936_v24 = vld [vmem:[%s11717_s11 + $0x89c] sm:$0xf]  ;;  %v9584_v27 = vld [vmem:[%s11717_s11 + $0x890] sm:$0xf]  ;;  %v8489_v30 = vor.u32 %v10798_v18, %v8488_v17  ;;  %v8493_v34 = vor.u32 %v10662_v19, %v8490_v20 }
  0x5e   : > { %v9594_v26 = vld [vmem:[%s11717_s11 + $0xcd8] sm:$0xf0]  ;;  %v11071_v28 = vld [vmem:[%s11717_s11 + $0xccc] sm:$0xf0]  ;;  %v397_v31 = vld [vmem:[%s11710_s22 + $0x8] sm:$0xff]  ;;  %v9593_v35 = vor.u32 %v11072_v23, %v9592_v22  ;;  %v1484_v45 = vpack.c.b16 %v1212_v36, %v1212_v36  ;;  %v1485_v49 = vpack.c.b16 %v1213_v39, %v1213_v39  ;;  %p10654_p1 = scmp.ne.s32.totalorder %s11609_s8, 1 }
  0x5f   : > { %v10935_v32 = vld [vmem:[%s11717_s11 + $0x894] sm:$0xf]  ;;  %v9597_v37 = vor.u32 %v10936_v24, %v9594_v26  ;;  %v9585_v38 = vor.u32 %v11071_v28, %v9584_v27  ;;  %v1214_v40 = vunpack.c.l.b16 %v397_v31  ;;  %v1215_v42 = vunpack.c.h.b16 %v397_v31  ;;  %v8504_v43 = vld [vmem:[%s11717_s11 + $0x18] sm:$0xf]  ;;  %v10664_v46 = vld [vmem:[%s11717_s11 + $0x1c] sm:$0xf] }
  0x60   : > { %v9586_v33 = vld [vmem:[%s11717_s11 + $0xcd0] sm:$0xf0]  ;;  %v10800_v44 = vld [vmem:[%s11717_s11 + $0x454] sm:$0xf0]  ;;  %v8506_v47 = vld [vmem:[%s11717_s11 + $0x458] sm:$0xf0] }
  0x61   : > { %v9589_v41 = vor.u32 %v10935_v32, %v9586_v33  ;;  %v8496_v48 = vld [vmem:[%s11717_s11 + $0x10] sm:$0xf]  ;;  %v1486_v50 = vpack.c.b16 %v1214_v40, %v1214_v40  ;;  %v10663_v52 = vld [vmem:[%s11717_s11 + $0x14] sm:$0xf]  ;;  %v1487_v54 = vpack.c.b16 %v1215_v42, %v1215_v42  ;;  %v9608_v55 = vld [vmem:[%s11717_s11 + $0x8a8] sm:$0xf]  ;;  %v8505_v58 = vor.u32 %v10800_v44, %v8504_v43 }
  0x62   : > { %v10799_v51 = vld [vmem:[%s11717_s11 + $0x44c] sm:$0xf0]  ;;  %v8498_v53 = vld [vmem:[%s11717_s11 + $0x450] sm:$0xf0]  ;;  %v11074_v56 = vld [vmem:[%s11717_s11 + $0xce4] sm:$0xf0]  ;;  %v8509_v62 = vor.u32 %v10664_v46, %v8506_v47 }
  0x63   : > { %4755 = vmatpush.bf16.xpose.msra.mxu0 %v8481_v25  ;;  %4768 = vmatpush.bf16.xpose.msra.mxu1 %v8485_v29  ;;  %v10938_v57 = vld [vmem:[%s11717_s11 + $0x8ac] sm:$0xf]  ;;  %v9600_v60 = vld [vmem:[%s11717_s11 + $0x8a0] sm:$0xf]  ;;  %v8497_v63 = vor.u32 %v10799_v51, %v8496_v48  ;;  %v10937_v0 = vld [vmem:[%s11717_s11 + $0x8a4] sm:$0xf]  ;;  %v8501_v2 = vor.u32 %v10663_v52, %v8498_v53  ;;  %v9609_v3 = vor.u32 %v11074_v56, %v9608_v55 }
  0x64   : > { %4781 = vmatpush.bf16.xpose.msra.mxu2 %v8489_v30  ;;  %v9610_v59 = vld [vmem:[%s11717_s11 + $0xce8] sm:$0xf0]  ;;  %v11073_v61 = vld [vmem:[%s11717_s11 + $0xcdc] sm:$0xf0]  ;;  %v9602_v1 = vld [vmem:[%s11717_s11 + $0xce0] sm:$0xf0] }
  0x65   : > { %4794 = vmatpush.bf16.xpose.msra.mxu3 %v8493_v34  ;;  %v9613_v4 = vor.u32 %v10938_v57, %v9610_v59  ;;  %v9601_v5 = vor.u32 %v11073_v61, %v9600_v60  ;;  %v9605_v6 = vor.u32 %v10937_v0, %v9602_v1  ;;  %v398_v7 = vld [vmem:[%s11710_s22 + $0x10] sm:$0xff]  ;;  %v399_v8 = vld [vmem:[%s11710_s22 + $0x18] sm:$0xff]  ;;  %v8520_v9 = vld [vmem:[%s11717_s11 + $0x28] sm:$0xf] }
  0x66   : > { %v10802_v10 = vld [vmem:[%s11717_s11 + $0x464] sm:$0xf0]  ;;  %v10666_v11 = vld [vmem:[%s11717_s11 + $0x2c] sm:$0xf]  ;;  %v8512_v13 = vld [vmem:[%s11717_s11 + $0x20] sm:$0xf]  ;;  %v1216_v15 = vunpack.c.l.b16 %v398_v7  ;;  %v1217_v18 = vunpack.c.h.b16 %v398_v7  ;;  %v1218_v19 = vunpack.c.l.b16 %v399_v8  ;;  %v1219_v21 = vunpack.c.h.b16 %v399_v8 }
  0x67   : > { %v8522_v12 = vld [vmem:[%s11717_s11 + $0x468] sm:$0xf0]  ;;  %v10801_v14 = vld [vmem:[%s11717_s11 + $0x45c] sm:$0xf0]  ;;  %v10665_v16 = vld [vmem:[%s11717_s11 + $0x24] sm:$0xf]  ;;  %v8521_v20 = vor.u32 %v10802_v10, %v8520_v9 }
  0x68   : > { %v8514_v17 = vld [vmem:[%s11717_s11 + $0x460] sm:$0xf0]  ;;  %v8525_v22 = vor.u32 %v10666_v11, %v8522_v12  ;;  %v8513_v23 = vor.u32 %v10801_v14, %v8512_v13  ;;  %v9624_v25 = vld [vmem:[%s11717_s11 + $0x8b8] sm:$0xf]  ;;  %v10940_v27 = vld [vmem:[%s11717_s11 + $0x8bc] sm:$0xf]  ;;  %v1488_v28 = vpack.c.b16 %v1216_v15, %v1216_v15  ;;  %v1489_v32 = vpack.c.b16 %v1217_v18, %v1217_v18 }
  0x69   : > { %v8517_v24 = vor.u32 %v10665_v16, %v8514_v17  ;;  %v11076_v26 = vld [vmem:[%s11717_s11 + $0xcf4] sm:$0xf0]  ;;  %v9626_v29 = vld [vmem:[%s11717_s11 + $0xcf8] sm:$0xf0]  ;;  %v9616_v30 = vld [vmem:[%s11717_s11 + $0x8b0] sm:$0xf]  ;;  %v1490_v33 = vpack.c.b16 %v1218_v19, %v1218_v19  ;;  %v1491_v36 = vpack.c.b16 %v1219_v21, %v1219_v21 }
  0x6a   : > { %4756 = vmatmul.bf16.vlgmr.msra.gmra.mxu0 %v1484_v45  ;;  %4769 = vmatmul.bf16.vlgmr.msra.gmra.mxu1 %v1485_v49  ;;  %v11075_v31 = vld [vmem:[%s11717_s11 + $0xcec] sm:$0xf0]  ;;  %v10939_v34 = vld [vmem:[%s11717_s11 + $0x8b4] sm:$0xf]  ;;  %v10804_v42 = vld [vmem:[%s11717_s11 + $0x474] sm:$0xf0] }
  0x6b   : > { %4806 = vmatpush.bf16.xpose.msrb.mxu0 %v9585_v38  ;;  %4819 = vmatpush.bf16.xpose.msrb.mxu1 %v9589_v41  ;;  %v9629_v38 = vor.u32 %v10940_v27, %v9626_v29  ;;  %v9617_v39 = vor.u32 %v11075_v31, %v9616_v30  ;;  %v8536_v41 = vld [vmem:[%s11717_s11 + $0x38] sm:$0xf]  ;;  %v10668_v43 = vld [vmem:[%s11717_s11 + $0x3c] sm:$0xf]  ;;  %v8528_v45 = vld [vmem:[%s11717_s11 + $0x30] sm:$0xf] }
  0x6c   : > { %4832 = vmatpush.bf16.xpose.msrb.mxu2 %v9593_v35  ;;  %4795 = vmatmul.bf16.vlgmr.msra.gmra.mxu3 %v1487_v54  ;;  %v9618_v35 = vld [vmem:[%s11717_s11 + $0xcf0] sm:$0xf0]  ;;  %v8538_v44 = vld [vmem:[%s11717_s11 + $0x478] sm:$0xf0]  ;;  %v10803_v46 = vld [vmem:[%s11717_s11 + $0x46c] sm:$0xf0]  ;;  %v8537_v51 = vor.u32 %v10804_v42, %v8536_v41 }
  0x6d   : > { %4845 = vmatpush.bf16.xpose.msrb.mxu3 %v9597_v37  ;;  %4782 = vmatmul.bf16.vlgmr.msra.gmra.mxu2 %v1486_v50  ;;  %v9625_v37 = vor.u32 %v11076_v26, %v9624_v25  ;;  %v9621_v40 = vor.u32 %v10939_v34, %v9618_v35  ;;  %v400_v47 = vld [vmem:[%s11710_s22 + $0x20] sm:$0xff]  ;;  %v10667_v48 = vld [vmem:[%s11717_s11 + $0x34] sm:$0xf]  ;;  %v401_v50 = vld [vmem:[%s11710_s22 + $0x28] sm:$0xff]  ;;  %v8541_v52 = vor.u32 %v10668_v43, %v8538_v44 }
  0x6e   : > { %v8530_v49 = vld [vmem:[%s11717_s11 + $0x470] sm:$0xf0]  ;;  %v8529_v53 = vor.u32 %v10803_v46, %v8528_v45  ;;  %v1220_v54 = vunpack.c.l.b16 %v400_v47  ;;  %v1221_v56 = vunpack.c.h.b16 %v400_v47  ;;  %v1222_v57 = vunpack.c.l.b16 %v401_v50  ;;  %v9640_v59 = vld [vmem:[%s11717_s11 + $0x8c8] sm:$0xf]  ;;  %v10942_v61 = vld [vmem:[%s11717_s11 + $0x8cc] sm:$0xf] }
  0x6f   : > { %v8533_v55 = vor.u32 %v10667_v48, %v8530_v49  ;;  %v11078_v60 = vld [vmem:[%s11717_s11 + $0xd04] sm:$0xf0]  ;;  %v9632_v0 = vld [vmem:[%s11717_s11 + $0x8c0] sm:$0xf]  ;;  %v10670_v13 = vld [vmem:[%s11717_s11 + $0x4c] sm:$0xf] }
  0x70   : > { %v11077_v1 = vld [vmem:[%s11717_s11 + $0xcfc] sm:$0xf0]  ;;  %v9641_v7 = vor.u32 %v11078_v60, %v9640_v59  ;;  %v8552_v11 = vld [vmem:[%s11717_s11 + $0x48] sm:$0xf]  ;;  %v8554_v14 = vld [vmem:[%s11717_s11 + $0x488] sm:$0xf0] }
  0x71   : > { %v9633_v9 = vor.u32 %v11077_v1, %v9632_v0  ;;  %v10806_v12 = vld [vmem:[%s11717_s11 + $0x484] sm:$0xf0]  ;;  %v8544_v15 = vld [vmem:[%s11717_s11 + $0x40] sm:$0xf]  ;;  %v402_v17 = vld [vmem:[%s11710_s22 + $0x30] sm:$0xff] }
  0x72   : > { %v10805_v16 = vld [vmem:[%s11717_s11 + $0x47c] sm:$0xf0]  ;;  %v10669_v18 = vld [vmem:[%s11717_s11 + $0x44] sm:$0xf]  ;;  %v8553_v21 = vor.u32 %v10806_v12, %v8552_v11  ;;  %v1225_v26 = vunpack.c.h.b16 %v402_v17  ;;  %v9656_v29 = vld [vmem:[%s11717_s11 + $0x8d8] sm:$0xf] }
  0x73   : > { %4807 = vmatpush.bf16.xpose.msrb.mxu0 %v8497_v63  ;;  %4820 = vmatpush.bf16.xpose.msrb.mxu1 %v8501_v2  ;;  %v9642_v63 = vld [vmem:[%s11717_s11 + $0xd08] sm:$0xf0]  ;;  %v1493_v2 = vpack.c.b16 %v1221_v56, %v1221_v56  ;;  %v8546_v19 = vld [vmem:[%s11717_s11 + $0x480] sm:$0xf0]  ;;  %v11080_v30 = vld [vmem:[%s11717_s11 + $0xd14] sm:$0xf0] }
  0x74   : > { %4833 = vmatpush.bf16.xpose.msrb.mxu2 %v8505_v58  ;;  %v1223_v58 = vunpack.c.h.b16 %v401_v50  ;;  %v9645_v8 = vor.u32 %v10942_v61, %v9642_v63  ;;  %v8549_v25 = vor.u32 %v10669_v18, %v8546_v19  ;;  %v10944_v31 = vld [vmem:[%s11717_s11 + $0x8dc] sm:$0xf]  ;;  %v9648_v34 = vld [vmem:[%s11717_s11 + $0x8d0] sm:$0xf]  ;;  %v9657_v41 = vor.u32 %v11080_v30, %v9656_v29  ;;  %v8568_v45 = vld [vmem:[%s11717_s11 + $0x58] sm:$0xf] }
  0x75   : > { %4846 = vmatpush.bf16.xpose.msrb.mxu3 %v8509_v62  ;;  %v1492_v62 = vpack.c.b16 %v1220_v54, %v1220_v54  ;;  %v11079_v35 = vld [vmem:[%s11717_s11 + $0xd0c] sm:$0xf0]  ;;  %v10808_v46 = vld [vmem:[%s11717_s11 + $0x494] sm:$0xf0]  ;;  %v10672_v47 = vld [vmem:[%s11717_s11 + $0x5c] sm:$0xf] }
  0x76   : > { %v9649_v43 = vor.u32 %v11079_v35, %v9648_v34  ;;  %v8570_v48 = vld [vmem:[%s11717_s11 + $0x498] sm:$0xf0]  ;;  %v8560_v49 = vld [vmem:[%s11717_s11 + $0x50] sm:$0xf]  ;;  %v405_v54 = vld [vmem:[%s11710_s22 + $0x48] sm:$0xff] }
  0x77   : > { %v10807_v50 = vld [vmem:[%s11717_s11 + $0x48c] sm:$0xf0]  ;;  %v8573_v56 = vor.u32 %v10672_v47, %v8570_v48  ;;  %v1230_v61 = vunpack.c.l.b16 %v405_v54  ;;  %v9672_v63 = vld [vmem:[%s11717_s11 + $0x8e8] sm:$0xf]  ;;  %v10946_v1 = vld [vmem:[%s11717_s11 + $0x8ec] sm:$0xf] }
  0x78   : > { %v11082_v0 = vld [vmem:[%s11717_s11 + $0xd24] sm:$0xf0]  ;;  %v8586_v18 = vld [vmem:[%s11717_s11 + $0x4a8] sm:$0xf0]  ;;  %v8576_v19 = vld [vmem:[%s11717_s11 + $0x60] sm:$0xf] }
  0x79   : > { %v9673_v11 = vor.u32 %v11082_v0, %v9672_v63  ;;  %v11084_v34 = vld [vmem:[%s11717_s11 + $0xd34] sm:$0xf0]  ;;  %v10948_v35 = vld [vmem:[%s11717_s11 + $0x8fc] sm:$0xf] }
  0x7a   : > { %4808 = vmatmul.bf16.vlgmr.msrb.gmra.mxu0 %v1488_v28  ;;  %4821 = vmatmul.bf16.vlgmr.msrb.gmra.mxu1 %v1489_v32 }
  0x7b   : > { %4858 = vmatpush.bf16.xpose.msra.mxu0 %v9601_v5  ;;  %4871 = vmatpush.bf16.xpose.msra.mxu1 %v9605_v6  ;;  %v9634_v5 = vld [vmem:[%s11717_s11 + $0xd00] sm:$0xf0]  ;;  %v1495_v6 = vpack.c.b16 %v1223_v58, %v1223_v58 }
  0x7c   : > { %4884 = vmatpush.bf16.xpose.msra.mxu2 %v9609_v3  ;;  %4847 = vmatmul.bf16.vlgmr.msrb.gmra.mxu3 %v1491_v36  ;;  %v1494_v3 = vpack.c.b16 %v1222_v57, %v1222_v57  ;;  %v1497_v36 = vpack.c.b16 %v1225_v26, %v1225_v26  ;;  %v8561_v57 = vor.u32 %v10807_v50, %v8560_v49  ;;  %v8600_v49 = vld [vmem:[%s11717_s11 + $0x78] sm:$0xf] }
  0x7d   : > { %4897 = vmatpush.bf16.xpose.msra.mxu3 %v9613_v4  ;;  %4834 = vmatmul.bf16.vlgmr.msrb.gmra.mxu2 %v1490_v33  ;;  %v10941_v4 = vld [vmem:[%s11717_s11 + $0x8c4] sm:$0xf]  ;;  %v9658_v33 = vld [vmem:[%s11717_s11 + $0xd18] sm:$0xf0]  ;;  %v10812_v50 = vld [vmem:[%s11717_s11 + $0x4b4] sm:$0xf0] }
  0x7e   : > { %v9637_v10 = vor.u32 %v10941_v4, %v9634_v5  ;;  %v9661_v42 = vor.u32 %v10944_v31, %v9658_v33  ;;  %v9664_v4 = vld [vmem:[%s11717_s11 + $0x8e0] sm:$0xf]  ;;  %v9688_v33 = vld [vmem:[%s11717_s11 + $0x8f8] sm:$0xf] }
  0x7f   : > { %v11081_v5 = vld [vmem:[%s11717_s11 + $0xd1c] sm:$0xf0] }
  0x83   : > { %4859 = vmatpush.bf16.xpose.msra.mxu0 %v8513_v23  ;;  %4872 = vmatpush.bf16.xpose.msra.mxu1 %v8517_v24  ;;  %v8545_v23 = vor.u32 %v10805_v16, %v8544_v15  ;;  %v1224_v24 = vunpack.c.l.b16 %v402_v17  ;;  %v8584_v15 = vld [vmem:[%s11717_s11 + $0x68] sm:$0xf]  ;;  %v10674_v17 = vld [vmem:[%s11717_s11 + $0x6c] sm:$0xf] }
  0x84   : > { %4885 = vmatpush.bf16.xpose.msra.mxu2 %v8521_v20  ;;  %v403_v20 = vld [vmem:[%s11710_s22 + $0x38] sm:$0xff]  ;;  %v10810_v16 = vld [vmem:[%s11717_s11 + $0x4a4] sm:$0xf0]  ;;  %v8589_v26 = vor.u32 %v10674_v17, %v8586_v18 }
  0x85   : > { %4898 = vmatpush.bf16.xpose.msra.mxu3 %v8525_v22  ;;  %v8557_v22 = vor.u32 %v10670_v13, %v8554_v14  ;;  %v1226_v27 = vunpack.c.l.b16 %v403_v20  ;;  %v1227_v28 = vunpack.c.h.b16 %v403_v20  ;;  %v1496_v32 = vpack.c.b16 %v1224_v24, %v1224_v24  ;;  %v10809_v20 = vld [vmem:[%s11717_s11 + $0x49c] sm:$0xf0]  ;;  %v407_v24 = vld [vmem:[%s11710_s22 + $0x58] sm:$0xff] }
  0x86   : > { %v9665_v13 = vor.u32 %v11081_v5, %v9664_v4  ;;  %v1234_v31 = vunpack.c.l.b16 %v407_v24  ;;  %v11086_v4 = vld [vmem:[%s11717_s11 + $0xd44] sm:$0xf0]  ;;  %v10950_v5 = vld [vmem:[%s11717_s11 + $0x90c] sm:$0xf] }
  0x8a   : > { %4860 = vmatmul.bf16.vlgmr.msra.gmra.mxu0 %v1492_v62  ;;  %4873 = vmatmul.bf16.vlgmr.msra.gmra.mxu1 %v1493_v2  ;;  %v1231_v62 = vunpack.c.h.b16 %v405_v54  ;;  %v10811_v54 = vld [vmem:[%s11717_s11 + $0x4ac] sm:$0xf0] }
  0x8b   : > { %4910 = vmatpush.bf16.xpose.msrb.mxu0 %v9617_v39  ;;  %4923 = vmatpush.bf16.xpose.msrb.mxu1 %v9621_v40  ;;  %v9650_v39 = vld [vmem:[%s11717_s11 + $0xd10] sm:$0xf0]  ;;  %v1499_v40 = vpack.c.b16 %v1227_v28, %v1227_v28 }
  0x8c   : > { %4936 = vmatpush.bf16.xpose.msrb.mxu2 %v9625_v37  ;;  %4899 = vmatmul.bf16.vlgmr.msra.gmra.mxu3 %v1495_v6  ;;  %v1498_v37 = vpack.c.b16 %v1226_v27, %v1226_v27  ;;  %v8577_v27 = vor.u32 %v10809_v20, %v8576_v19  ;;  %v8616_v19 = vld [vmem:[%s11717_s11 + $0x88] sm:$0xf] }
  0x8d   : > { %4949 = vmatpush.bf16.xpose.msrb.mxu3 %v9629_v38  ;;  %4886 = vmatmul.bf16.vlgmr.msra.gmra.mxu2 %v1494_v3  ;;  %v10943_v38 = vld [vmem:[%s11717_s11 + $0x8d4] sm:$0xf]  ;;  %v9674_v3 = vld [vmem:[%s11717_s11 + $0xd28] sm:$0xf0]  ;;  %v10814_v20 = vld [vmem:[%s11717_s11 + $0x4c4] sm:$0xf0] }
  0x8e   : > { %v9653_v44 = vor.u32 %v10943_v38, %v9650_v39  ;;  %v9677_v12 = vor.u32 %v10946_v1, %v9674_v3  ;;  %v9680_v38 = vld [vmem:[%s11717_s11 + $0x8f0] sm:$0xf]  ;;  %v9704_v3 = vld [vmem:[%s11717_s11 + $0x908] sm:$0xf] }
  0x8f   : > { %v11083_v39 = vld [vmem:[%s11717_s11 + $0xd2c] sm:$0xf0] }
  0x90   : > { %v9681_v47 = vor.u32 %v11083_v39, %v9680_v38  ;;  %v11088_v38 = vld [vmem:[%s11717_s11 + $0xd54] sm:$0xf0]  ;;  %v10952_v39 = vld [vmem:[%s11717_s11 + $0x91c] sm:$0xf] }
  0x93   : > { %4911 = vmatpush.bf16.xpose.msrb.mxu0 %v8529_v53  ;;  %4924 = vmatpush.bf16.xpose.msrb.mxu1 %v8533_v55  ;;  %v8562_v53 = vld [vmem:[%s11717_s11 + $0x490] sm:$0xf0]  ;;  %v8569_v55 = vor.u32 %v10808_v46, %v8568_v45  ;;  %v9689_v45 = vor.u32 %v11084_v34, %v9688_v33 }
  0x94   : > { %4937 = vmatpush.bf16.xpose.msrb.mxu2 %v8537_v51  ;;  %v404_v51 = vld [vmem:[%s11710_s22 + $0x40] sm:$0xff] }
  0x95   : > { %4950 = vmatpush.bf16.xpose.msrb.mxu3 %v8541_v52  ;;  %v10671_v52 = vld [vmem:[%s11717_s11 + $0x54] sm:$0xf]  ;;  %v1228_v58 = vunpack.c.l.b16 %v404_v51  ;;  %v1229_v60 = vunpack.c.h.b16 %v404_v51  ;;  %v10676_v51 = vld [vmem:[%s11717_s11 + $0x7c] sm:$0xf] }
  0x96   : > { %v8565_v59 = vor.u32 %v10671_v52, %v8562_v53  ;;  %v8602_v52 = vld [vmem:[%s11717_s11 + $0x4b8] sm:$0xf0]  ;;  %v8592_v53 = vld [vmem:[%s11717_s11 + $0x70] sm:$0xf] }
  0x97   : > { %v1500_v2 = vpack.c.b16 %v1228_v58, %v1228_v58  ;;  %v1501_v6 = vpack.c.b16 %v1229_v60, %v1229_v60  ;;  %v409_v58 = vld [vmem:[%s11710_s22 + $0x68] sm:$0xff]  ;;  %v8605_v60 = vor.u32 %v10676_v51, %v8602_v52 }
  0x98   : > { %v1238_v1 = vunpack.c.l.b16 %v409_v58 }
  0x9a   : > { %4912 = vmatmul.bf16.vlgmr.msrb.gmra.mxu0 %v1496_v32  ;;  %4925 = vmatmul.bf16.vlgmr.msrb.gmra.mxu1 %v1497_v36  ;;  %v1235_v32 = vunpack.c.h.b16 %v407_v24  ;;  %v10813_v24 = vld [vmem:[%s11717_s11 + $0x4bc] sm:$0xf0] }
  0x9b   : > { %4962 = vmatpush.bf16.xpose.msra.mxu0 %v9633_v9  ;;  %4975 = vmatpush.bf16.xpose.msra.mxu1 %v9637_v10  ;;  %v9666_v9 = vld [vmem:[%s11717_s11 + $0xd20] sm:$0xf0]  ;;  %v1503_v10 = vpack.c.b16 %v1231_v62, %v1231_v62 }
  0x9c   : > { %4988 = vmatpush.bf16.xpose.msra.mxu2 %v9641_v7  ;;  %4951 = vmatmul.bf16.vlgmr.msrb.gmra.mxu3 %v1499_v40  ;;  %v1502_v7 = vpack.c.b16 %v1230_v61, %v1230_v61  ;;  %v8593_v61 = vor.u32 %v10811_v54, %v8592_v53  ;;  %v8632_v53 = vld [vmem:[%s11717_s11 + $0x98] sm:$0xf] }
  0x9d   : > { %5001 = vmatpush.bf16.xpose.msra.mxu3 %v9645_v8  ;;  %4938 = vmatmul.bf16.vlgmr.msrb.gmra.mxu2 %v1498_v37  ;;  %v10945_v8 = vld [vmem:[%s11717_s11 + $0x8e4] sm:$0xf]  ;;  %v9690_v37 = vld [vmem:[%s11717_s11 + $0xd38] sm:$0xf0]  ;;  %v10816_v54 = vld [vmem:[%s11717_s11 + $0x4d4] sm:$0xf0] }
  0x9e   : > { %v9669_v14 = vor.u32 %v10945_v8, %v9666_v9  ;;  %v9693_v46 = vor.u32 %v10948_v35, %v9690_v37  ;;  %v9696_v8 = vld [vmem:[%s11717_s11 + $0x900] sm:$0xf]  ;;  %v9720_v37 = vld [vmem:[%s11717_s11 + $0x918] sm:$0xf] }
  0x9f   : > { %v11085_v9 = vld [vmem:[%s11717_s11 + $0xd3c] sm:$0xf0] }
  0xa0   : > { %v9697_v17 = vor.u32 %v11085_v9, %v9696_v8  ;;  %v11090_v8 = vld [vmem:[%s11717_s11 + $0xd64] sm:$0xf0]  ;;  %v10954_v9 = vld [vmem:[%s11717_s11 + $0x92c] sm:$0xf] }
  0xa3   : > { %4963 = vmatpush.bf16.xpose.msra.mxu0 %v8545_v23  ;;  %4976 = vmatpush.bf16.xpose.msra.mxu1 %v8549_v25  ;;  %v8578_v23 = vld [vmem:[%s11717_s11 + $0x4a0] sm:$0xf0]  ;;  %v8585_v25 = vor.u32 %v10810_v16, %v8584_v15  ;;  %v9705_v15 = vor.u32 %v11086_v4, %v9704_v3 }
  0xa4   : > { %4989 = vmatpush.bf16.xpose.msra.mxu2 %v8553_v21  ;;  %v406_v21 = vld [vmem:[%s11710_s22 + $0x50] sm:$0xff] }
  0xa5   : > { %5002 = vmatpush.bf16.xpose.msra.mxu3 %v8557_v22  ;;  %v10673_v22 = vld [vmem:[%s11717_s11 + $0x64] sm:$0xf]  ;;  %v1232_v28 = vunpack.c.l.b16 %v406_v21  ;;  %v1233_v30 = vunpack.c.h.b16 %v406_v21  ;;  %v10678_v21 = vld [vmem:[%s11717_s11 + $0x8c] sm:$0xf] }
  0xa6   : > { %v8581_v29 = vor.u32 %v10673_v22, %v8578_v23  ;;  %v8618_v22 = vld [vmem:[%s11717_s11 + $0x4c8] sm:$0xf0]  ;;  %v8608_v23 = vld [vmem:[%s11717_s11 + $0x80] sm:$0xf] }
  0xa7   : > { %v1504_v36 = vpack.c.b16 %v1232_v28, %v1232_v28  ;;  %v1505_v40 = vpack.c.b16 %v1233_v30, %v1233_v30  ;;  %v411_v28 = vld [vmem:[%s11710_s22 + $0x78] sm:$0xff]  ;;  %v8621_v30 = vor.u32 %v10678_v21, %v8618_v22 }
  0xa8   : > { %v1242_v35 = vunpack.c.l.b16 %v411_v28 }
  0xaa   : > { %4964 = vmatmul.bf16.vlgmr.msra.gmra.mxu0 %v1500_v2  ;;  %4977 = vmatmul.bf16.vlgmr.msra.gmra.mxu1 %v1501_v6  ;;  %v1239_v2 = vunpack.c.h.b16 %v409_v58  ;;  %v10815_v58 = vld [vmem:[%s11717_s11 + $0x4cc] sm:$0xf0] }
  0xab   : > { %5014 = vmatpush.bf16.xpose.msrb.mxu0 %v9649_v43  ;;  %5027 = vmatpush.bf16.xpose.msrb.mxu1 %v9653_v44  ;;  %v9682_v43 = vld [vmem:[%s11717_s11 + $0xd30] sm:$0xf0]  ;;  %v1507_v44 = vpack.c.b16 %v1235_v32, %v1235_v32 }
  0xac   : > { %5040 = vmatpush.bf16.xpose.msrb.mxu2 %v9657_v41  ;;  %5003 = vmatmul.bf16.vlgmr.msra.gmra.mxu3 %v1503_v10  ;;  %v1506_v41 = vpack.c.b16 %v1234_v31, %v1234_v31  ;;  %v8609_v31 = vor.u32 %v10813_v24, %v8608_v23 }
  0xad   : > { %5053 = vmatpush.bf16.xpose.msrb.mxu3 %v9661_v42  ;;  %4990 = vmatmul.bf16.vlgmr.msra.gmra.mxu2 %v1502_v7  ;;  %v10947_v42 = vld [vmem:[%s11717_s11 + $0x8f4] sm:$0xf]  ;;  %v9706_v7 = vld [vmem:[%s11717_s11 + $0xd48] sm:$0xf0] }
  0xae   : > { %v9685_v48 = vor.u32 %v10947_v42, %v9682_v43  ;;  %v9709_v16 = vor.u32 %v10950_v5, %v9706_v7  ;;  %v9712_v42 = vld [vmem:[%s11717_s11 + $0x910] sm:$0xf]  ;;  %v9736_v7 = vld [vmem:[%s11717_s11 + $0x928] sm:$0xf] }
  0xaf   : > { %v11087_v43 = vld [vmem:[%s11717_s11 + $0xd4c] sm:$0xf0]  ;;  %v9737_v21 = vor.u32 %v11090_v8, %v9736_v7  ;;  %v8664_v8 = vld [vmem:[%s11717_s11 + $0xb8] sm:$0xf] }
  0xb0   : > { %v9713_v51 = vor.u32 %v11087_v43, %v9712_v42 }
  0xb3   : > { %5015 = vmatpush.bf16.xpose.msrb.mxu0 %v8561_v57  ;;  %5028 = vmatpush.bf16.xpose.msrb.mxu1 %v8565_v59  ;;  %v8594_v57 = vld [vmem:[%s11717_s11 + $0x4b0] sm:$0xf0]  ;;  %v8601_v59 = vor.u32 %v10812_v50, %v8600_v49  ;;  %v9721_v49 = vor.u32 %v11088_v38, %v9720_v37  ;;  %v10681_v37 = vld [vmem:[%s11717_s11 + $0xa4] sm:$0xf] }
  0xb4   : > { %5041 = vmatpush.bf16.xpose.msrb.mxu2 %v8569_v55  ;;  %v408_v55 = vld [vmem:[%s11710_s22 + $0x60] sm:$0xff] }
  0xb5   : > { %5054 = vmatpush.bf16.xpose.msrb.mxu3 %v8573_v56  ;;  %v10675_v56 = vld [vmem:[%s11717_s11 + $0x74] sm:$0xf]  ;;  %v1236_v62 = vunpack.c.l.b16 %v408_v55  ;;  %v1237_v0 = vunpack.c.h.b16 %v408_v55  ;;  %v10680_v55 = vld [vmem:[%s11717_s11 + $0x9c] sm:$0xf]  ;;  %v8642_v38 = vld [vmem:[%s11717_s11 + $0x4e0] sm:$0xf0] }
  0xb6   : > { %v8597_v63 = vor.u32 %v10675_v56, %v8594_v57  ;;  %v8634_v56 = vld [vmem:[%s11717_s11 + $0x4d8] sm:$0xf0]  ;;  %v8624_v57 = vld [vmem:[%s11717_s11 + $0x90] sm:$0xf] }
  0xb7   : > { %v1508_v6 = vpack.c.b16 %v1236_v62, %v1236_v62  ;;  %v1509_v10 = vpack.c.b16 %v1237_v0, %v1237_v0  ;;  %v413_v62 = vld [vmem:[%s11710_s22 + $0x88] sm:$0xff]  ;;  %v8637_v0 = vor.u32 %v10680_v55, %v8634_v56  ;;  %v9754_v55 = vld [vmem:[%s11717_s11 + $0xd78] sm:$0xf0]  ;;  %v9744_v56 = vld [vmem:[%s11717_s11 + $0x930] sm:$0xf] }
  0xb8   : > { %v1246_v5 = vunpack.c.l.b16 %v413_v62 }
  0xba   : > { %5016 = vmatmul.bf16.vlgmr.msrb.gmra.mxu0 %v1504_v36  ;;  %5029 = vmatmul.bf16.vlgmr.msrb.gmra.mxu1 %v1505_v40  ;;  %v1243_v36 = vunpack.c.h.b16 %v411_v28  ;;  %v10682_v28 = vld [vmem:[%s11717_s11 + $0xac] sm:$0xf] }
  0xbb   : > { %5066 = vmatpush.bf16.xpose.msra.mxu0 %v9665_v13  ;;  %5079 = vmatpush.bf16.xpose.msra.mxu1 %v9669_v14  ;;  %v9698_v13 = vld [vmem:[%s11717_s11 + $0xd40] sm:$0xf0]  ;;  %v1511_v14 = vpack.c.b16 %v1239_v2, %v1239_v2 }
  0xbc   : > { %5092 = vmatpush.bf16.xpose.msra.mxu2 %v9673_v11  ;;  %5055 = vmatmul.bf16.vlgmr.msrb.gmra.mxu3 %v1507_v44  ;;  %v1510_v11 = vpack.c.b16 %v1238_v1, %v1238_v1  ;;  %v8625_v1 = vor.u32 %v10815_v58, %v8624_v57  ;;  %v11091_v57 = vld [vmem:[%s11717_s11 + $0xd6c] sm:$0xf0] }
  0xbd   : > { %5105 = vmatpush.bf16.xpose.msra.mxu3 %v9677_v12  ;;  %5042 = vmatmul.bf16.vlgmr.msrb.gmra.mxu2 %v1506_v41  ;;  %v10949_v12 = vld [vmem:[%s11717_s11 + $0x904] sm:$0xf]  ;;  %v9722_v41 = vld [vmem:[%s11717_s11 + $0xd58] sm:$0xf0] }
  0xbe   : > { %v9701_v18 = vor.u32 %v10949_v12, %v9698_v13  ;;  %v9725_v50 = vor.u32 %v10952_v39, %v9722_v41  ;;  %v9728_v12 = vld [vmem:[%s11717_s11 + $0x920] sm:$0xf] }
  0xbf   : > { %v11089_v13 = vld [vmem:[%s11717_s11 + $0xd5c] sm:$0xf0] }
  0xc0   : > { %v9729_v24 = vor.u32 %v11089_v13, %v9728_v12  ;;  %v8666_v12 = vld [vmem:[%s11717_s11 + $0x4f8] sm:$0xf0]  ;;  %v8656_v13 = vld [vmem:[%s11717_s11 + $0xb0] sm:$0xf] }
  0xc3   : > { %5067 = vmatpush.bf16.xpose.msra.mxu0 %v8577_v27  ;;  %5080 = vmatpush.bf16.xpose.msra.mxu1 %v8581_v29  ;;  %v8610_v27 = vld [vmem:[%s11717_s11 + $0x4c0] sm:$0xf0]  ;;  %v8617_v29 = vor.u32 %v10814_v20, %v8616_v19 }
  0xc4   : > { %5093 = vmatpush.bf16.xpose.msra.mxu2 %v8585_v25  ;;  %v410_v25 = vld [vmem:[%s11710_s22 + $0x70] sm:$0xff] }
  0xc5   : > { %5106 = vmatpush.bf16.xpose.msra.mxu3 %v8589_v26  ;;  %v10677_v26 = vld [vmem:[%s11717_s11 + $0x84] sm:$0xf]  ;;  %v1240_v32 = vunpack.c.l.b16 %v410_v25  ;;  %v1241_v34 = vunpack.c.h.b16 %v410_v25 }
  0xc6   : > { %v8613_v33 = vor.u32 %v10677_v26, %v8610_v27  ;;  %v8648_v26 = vld [vmem:[%s11717_s11 + $0xa8] sm:$0xf] }
  0xc7   : > { %v1512_v40 = vpack.c.b16 %v1240_v32, %v1240_v32  ;;  %v1513_v44 = vpack.c.b16 %v1241_v34, %v1241_v34  ;;  %v10818_v27 = vld [vmem:[%s11717_s11 + $0x4e4] sm:$0xf0]  ;;  %v10817_v32 = vld [vmem:[%s11717_s11 + $0x4dc] sm:$0xf0] }
  0xc8   : > { %v8649_v41 = vor.u32 %v10818_v27, %v8648_v26 }
  0xca   : > { %5068 = vmatmul.bf16.vlgmr.msra.gmra.mxu0 %v1508_v6  ;;  %5081 = vmatmul.bf16.vlgmr.msra.gmra.mxu1 %v1509_v10  ;;  %v1247_v6 = vunpack.c.h.b16 %v413_v62  ;;  %v10955_v62 = vld [vmem:[%s11717_s11 + $0x934] sm:$0xf] }
  0xcb   : > { %5118 = vmatpush.bf16.xpose.msrb.mxu0 %v9681_v47  ;;  %5131 = vmatpush.bf16.xpose.msrb.mxu1 %v9685_v48  ;;  %v9714_v47 = vld [vmem:[%s11717_s11 + $0xd50] sm:$0xf0]  ;;  %v1515_v48 = vpack.c.b16 %v1243_v36, %v1243_v36 }
  0xcc   : > { %5144 = vmatpush.bf16.xpose.msrb.mxu2 %v9689_v45  ;;  %5107 = vmatmul.bf16.vlgmr.msra.gmra.mxu3 %v1511_v14  ;;  %v1514_v45 = vpack.c.b16 %v1242_v35, %v1242_v35  ;;  %v1519_v20 = vpack.c.b16 %v1247_v6, %v1247_v6  ;;  %v414_v36 = vld [vmem:[%s11710_s22 + $0x90] sm:$0xff] }
  0xcd   : > { %5157 = vmatpush.bf16.xpose.msrb.mxu3 %v9693_v46  ;;  %5094 = vmatmul.bf16.vlgmr.msra.gmra.mxu2 %v1510_v11  ;;  %v10951_v46 = vld [vmem:[%s11717_s11 + $0x914] sm:$0xf]  ;;  %v9738_v11 = vld [vmem:[%s11717_s11 + $0xd68] sm:$0xf0] }
  0xce   : > { %v9717_v52 = vor.u32 %v10951_v46, %v9714_v47  ;;  %v9741_v23 = vor.u32 %v10954_v9, %v9738_v11  ;;  %v8645_v46 = vor.u32 %v10681_v37, %v8642_v38  ;;  %v1249_v47 = vunpack.c.h.b16 %v414_v36  ;;  %v10820_v9 = vld [vmem:[%s11717_s11 + $0x4f4] sm:$0xf0]  ;;  %v9770_v37 = vld [vmem:[%s11717_s11 + $0xd88] sm:$0xf0]  ;;  %v9760_v38 = vld [vmem:[%s11717_s11 + $0x940] sm:$0xf] }
  0xd3   : > { %5119 = vmatpush.bf16.xpose.msrb.mxu0 %v8593_v61  ;;  %5132 = vmatpush.bf16.xpose.msrb.mxu1 %v8597_v63  ;;  %v8626_v61 = vld [vmem:[%s11717_s11 + $0x4d0] sm:$0xf0]  ;;  %v8633_v63 = vor.u32 %v10816_v54, %v8632_v53 }
  0xd4   : > { %5145 = vmatpush.bf16.xpose.msrb.mxu2 %v8601_v59  ;;  %v412_v59 = vld [vmem:[%s11710_s22 + $0x80] sm:$0xff] }
  0xd5   : > { %5158 = vmatpush.bf16.xpose.msrb.mxu3 %v8605_v60  ;;  %v10679_v60 = vld [vmem:[%s11717_s11 + $0x94] sm:$0xf]  ;;  %v1244_v2 = vunpack.c.l.b16 %v412_v59  ;;  %v1245_v4 = vunpack.c.h.b16 %v412_v59 }
  0xd6   : > { %v8629_v3 = vor.u32 %v10679_v60, %v8626_v61  ;;  %v1521_v60 = vpack.c.b16 %v1249_v47, %v1249_v47 }
  0xd7   : > { %v1516_v10 = vpack.c.b16 %v1244_v2, %v1244_v2 }
  0xda   : > { %5120 = vmatmul.bf16.vlgmr.msrb.gmra.mxu0 %v1512_v40  ;;  %5133 = vmatmul.bf16.vlgmr.msrb.gmra.mxu1 %v1513_v44  ;;  %v415_v40 = vld [vmem:[%s11710_s22 + $0x98] sm:$0xff] }
  0xdb   : > { %5170 = vmatpush.bf16.xpose.msra.mxu0 %v9697_v17  ;;  %5183 = vmatpush.bf16.xpose.msra.mxu1 %v9701_v18  ;;  %v10953_v17 = vld [vmem:[%s11717_s11 + $0x924] sm:$0xf] }
  0xdc   : > { %5196 = vmatpush.bf16.xpose.msra.mxu2 %v9705_v15  ;;  %5159 = vmatmul.bf16.vlgmr.msrb.gmra.mxu3 %v1515_v48  ;;  %v1517_v15 = vpack.c.b16 %v1245_v4, %v1245_v4  ;;  %v9730_v18 = vld [vmem:[%s11717_s11 + $0xd60] sm:$0xf0]  ;;  %v1250_v48 = vunpack.c.l.b16 %v415_v40 }
  0xdd   : > { %5209 = vmatpush.bf16.xpose.msra.mxu3 %v9709_v16  ;;  %5146 = vmatmul.bf16.vlgmr.msrb.gmra.mxu2 %v1514_v45  ;;  %v1518_v16 = vpack.c.b16 %v1246_v5, %v1246_v5  ;;  %v9733_v25 = vor.u32 %v10953_v17, %v9730_v18  ;;  %v1248_v45 = vunpack.c.l.b16 %v414_v36  ;;  %v9745_v5 = vor.u32 %v11091_v57, %v9744_v56  ;;  %v416_v18 = vld [vmem:[%s11710_s22 + $0xa0] sm:$0xff]  ;;  %v10686_v56 = vld [vmem:[%s11717_s11 + $0xcc] sm:$0xf] }
  0xde   : > { %v1522_v61 = vpack.c.b16 %v1250_v48, %v1250_v48  ;;  %v1252_v27 = vunpack.c.l.b16 %v416_v18 }
  0xdf   : > { %v1520_v54 = vpack.c.b16 %v1248_v45, %v1248_v45  ;;  %v9762_v45 = vld [vmem:[%s11717_s11 + $0xd80] sm:$0xf0] }
  0xe0   : > { %v1524_v36 = vpack.c.b16 %v1252_v27, %v1252_v27  ;;  %v9778_v27 = vld [vmem:[%s11717_s11 + $0xd90] sm:$0xf0] }
  0xe3   : > { %5171 = vmatpush.bf16.xpose.msra.mxu0 %v8609_v31  ;;  %5184 = vmatpush.bf16.xpose.msra.mxu1 %v8613_v33  ;;  %v8640_v31 = vld [vmem:[%s11717_s11 + $0xa0] sm:$0xf] }
  0xe4   : > { %5197 = vmatpush.bf16.xpose.msra.mxu2 %v8617_v29  ;;  %v8641_v44 = vor.u32 %v10817_v32, %v8640_v31  ;;  %v9768_v32 = vld [vmem:[%s11717_s11 + $0x948] sm:$0xf] }
  0xe5   : > { %5210 = vmatpush.bf16.xpose.msra.mxu3 %v8621_v30  ;;  %v8650_v30 = vld [vmem:[%s11717_s11 + $0x4e8] sm:$0xf0] }
  0xe6   : > { %v8653_v43 = vor.u32 %v10682_v28, %v8650_v30 }
  0xe7   : > { %v4757_v14 = vpop.f32.mrf.mxu0  ;;  %v4770_v19 = vpop.f32.mrf.mxu1 }
  0xe8   : > { %v4771_v22 = vadd.f32 %v4770_v19, %v4757_v14  ;;  %v10819_v14 = vld [vmem:[%s11717_s11 + $0x4ec] sm:$0xf0]  ;;  %v10683_v19 = vld [vmem:[%s11717_s11 + $0xb4] sm:$0xf] }
  0xe9   : > { %v8657_v26 = vor.u32 %v10819_v14, %v8656_v13  ;;  %v9784_v14 = vld [vmem:[%s11717_s11 + $0x958] sm:$0xf] }
  0xea   : > { %5172 = vmatmul.bf16.vlgmr.msra.gmra.mxu0 %v1516_v10  ;;  %5185 = vmatmul.bf16.vlgmr.msra.gmra.mxu1 %v1517_v15  ;;  %v10684_v10 = vld [vmem:[%s11717_s11 + $0xbc] sm:$0xf] }
  0xeb   : > { %5222 = vmatpush.bf16.xpose.msrb.mxu0 %v9713_v51  ;;  %5235 = vmatpush.bf16.xpose.msrb.mxu1 %v9717_v52  ;;  %v11092_v51 = vld [vmem:[%s11717_s11 + $0xd74] sm:$0xf0]  ;;  %v10956_v52 = vld [vmem:[%s11717_s11 + $0x93c] sm:$0xf] }
  0xec   : > { %5248 = vmatpush.bf16.xpose.msrb.mxu2 %v9721_v49  ;;  %5211 = vmatmul.bf16.vlgmr.msra.gmra.mxu3 %v1519_v20  ;;  %v1251_v49 = vunpack.c.h.b16 %v415_v40  ;;  %v9757_v4 = vor.u32 %v10956_v52, %v9754_v55  ;;  %v8658_v20 = vld [vmem:[%s11717_s11 + $0x4f0] sm:$0xf0]  ;;  %v10822_v55 = vld [vmem:[%s11717_s11 + $0x504] sm:$0xf0] }
  0xed   : > { %5261 = vmatpush.bf16.xpose.msrb.mxu3 %v9725_v50  ;;  %5198 = vmatmul.bf16.vlgmr.msra.gmra.mxu2 %v1518_v16  ;;  %v9752_v50 = vld [vmem:[%s11717_s11 + $0x938] sm:$0xf]  ;;  %v8661_v28 = vor.u32 %v10683_v19, %v8658_v20  ;;  %v9786_v19 = vld [vmem:[%s11717_s11 + $0xd98] sm:$0xf0]  ;;  %v9776_v20 = vld [vmem:[%s11717_s11 + $0x950] sm:$0xf] }
  0xee   : > { %v1523_v2 = vpack.c.b16 %v1251_v49, %v1251_v49 }
  0xef   : > { %v4796_v34 = vpop.f32.mrf.mxu3  ;;  %v4759_v35 = vpop.f32.mrf.mxu0 }
  0xf0   : > { %v4783_v29 = vpop.f32.mrf.mxu2  ;;  %v4772_v39 = vpop.f32.mrf.mxu1 }
  0xf1   : > { %v4784_v33 = vadd.f32 %v4783_v29, %v4771_v22  ;;  %v417_v22 = vld [vmem:[%s11710_s22 + $0xa8] sm:$0xff]  ;;  %v1253_v29 = vunpack.c.h.b16 %v416_v18  ;;  %v11093_v39 = vld [vmem:[%s11717_s11 + $0xd7c] sm:$0xf0] }
  0xf2   : > { %v1254_v30 = vunpack.c.l.b16 %v417_v22  ;;  %v1255_v31 = vunpack.c.h.b16 %v417_v22 }
  0xf3   : > { %5223 = vmatpush.bf16.xpose.msrb.mxu0 %v8625_v1  ;;  %5236 = vmatpush.bf16.xpose.msrb.mxu1 %v8629_v3  ;;  %v4797_v42 = vadd.f32 %v4796_v34, %v4784_v33  ;;  %v9753_v3 = vor.u32 %v11092_v51, %v9752_v50  ;;  %v11094_v33 = vld [vmem:[%s11717_s11 + $0xd84] sm:$0xf0]  ;;  %v10958_v34 = vld [vmem:[%s11717_s11 + $0x94c] sm:$0xf]  ;;  %v9761_v51 = vor.u32 %v11093_v39, %v9760_v38  ;;  %v10688_v38 = vld [vmem:[%s11717_s11 + $0xdc] sm:$0xf] }
  0xf4   : > { %5249 = vmatpush.bf16.xpose.msrb.mxu2 %v8633_v63  ;;  %v9746_v63 = vld [vmem:[%s11717_s11 + $0xd70] sm:$0xf0]  ;;  %v1527_v48 = vpack.c.b16 %v1255_v31, %v1255_v31  ;;  %v9769_v49 = vor.u32 %v11094_v33, %v9768_v32  ;;  %v9773_v50 = vor.u32 %v10958_v34, %v9770_v37  ;;  %v10824_v37 = vld [vmem:[%s11717_s11 + $0x514] sm:$0xf0] }
  0xf5   : > { %5262 = vmatpush.bf16.xpose.msrb.mxu3 %v8637_v0  ;;  %v9749_v7 = vor.u32 %v10955_v62, %v9746_v63 }
  0xf7   : > { %v4798_v58 = vpop.f32.mrf.mxu3  ;;  %v4809_v59 = vpop.f32.mrf.mxu0 }
  0xf8   : > { %v4785_v53 = vpop.f32.mrf.mxu2  ;;  %v4810_v0 = vadd.f32 %v4809_v59, %v4797_v42  ;;  %v4822_v1 = vpop.f32.mrf.mxu1  ;;  %v1525_v42 = vpack.c.b16 %v1253_v29, %v1253_v29  ;;  %v8682_v58 = vld [vmem:[%s11717_s11 + $0x508] sm:$0xf0]  ;;  %v8672_v59 = vld [vmem:[%s11717_s11 + $0xc0] sm:$0xf] }
  0xfa   : > { %v4823_v6 = vadd.f32 %v4822_v1, %v4810_v0  ;;  %5224 = vmatmul.bf16.vlgmr.msrb.gmra.mxu0 %v1520_v54  ;;  %5237 = vmatmul.bf16.vlgmr.msrb.gmra.mxu1 %v1521_v60  ;;  %v8680_v54 = vld [vmem:[%s11717_s11 + $0xc8] sm:$0xf]  ;;  %v10821_v60 = vld [vmem:[%s11717_s11 + $0x4fc] sm:$0xf0]  ;;  %v418_v0 = vld [vmem:[%s11710_s22 + $0xb0] sm:$0xff] }
  0xfb   : > { %5274 = vmatpush.bf16.xpose.msra.mxu0 %v9729_v24  ;;  %5287 = vmatpush.bf16.xpose.msra.mxu1 %v9733_v25  ;;  %v8669_v25 = vor.u32 %v10684_v10, %v8666_v12  ;;  %v10685_v1 = vld [vmem:[%s11717_s11 + $0xc4] sm:$0xf] }
  0xfc   : > { %5300 = vmatpush.bf16.xpose.msra.mxu2 %v9737_v21  ;;  %5263 = vmatmul.bf16.vlgmr.msrb.gmra.mxu3 %v1523_v2  ;;  %v8674_v2 = vld [vmem:[%s11717_s11 + $0x500] sm:$0xf0] }
  0xfd   : > { %5313 = vmatpush.bf16.xpose.msra.mxu3 %v9741_v23  ;;  %5250 = vmatmul.bf16.vlgmr.msrb.gmra.mxu2 %v1522_v61  ;;  %v8665_v23 = vor.u32 %v10820_v9, %v8664_v8  ;;  %v8673_v8 = vor.u32 %v10821_v60, %v8672_v59  ;;  %v1256_v9 = vunpack.c.l.b16 %v418_v0  ;;  %v8677_v10 = vor.u32 %v10685_v1, %v8674_v2  ;;  %v9800_v60 = vld [vmem:[%s11717_s11 + $0x968] sm:$0xf]  ;;  %v9802_v1 = vld [vmem:[%s11717_s11 + $0xda8] sm:$0xf0]  ;;  %v9792_v2 = vld [vmem:[%s11717_s11 + $0x960] sm:$0xf] }
  0xff   : > { %v4848_v16 = vpop.f32.mrf.mxu3  ;;  %v4811_v17 = vpop.f32.mrf.mxu0  ;;  %v1528_v18 = vpack.c.b16 %v1256_v9, %v1256_v9  ;;  %v9794_v9 = vld [vmem:[%s11717_s11 + $0xda0] sm:$0xf0] }
 0x100   : > { %v4835_v11 = vpop.f32.mrf.mxu2  ;;  %v4824_v21 = vpop.f32.mrf.mxu1 }
 0x101   : > { %v4836_v15 = vadd.f32 %v4835_v11, %v4823_v6  ;;  %v1257_v11 = vunpack.c.h.b16 %v418_v0  ;;  %v11095_v21 = vld [vmem:[%s11717_s11 + $0xd8c] sm:$0xf0] }
 0x102   : > { %v9777_v33 = vor.u32 %v11095_v21, %v9776_v20  ;;  %v10690_v20 = vld [vmem:[%s11717_s11 + $0xec] sm:$0xf] }
 0x103   : > { %5275 = vmatpush.bf16.xpose.msra.mxu0 %v8641_v44  ;;  %5288 = vmatpush.bf16.xpose.msra.mxu1 %v8645_v46  ;;  %v4849_v24 = vadd.f32 %v4848_v16, %v4836_v15  ;;  %v10957_v44 = vld [vmem:[%s11717_s11 + $0x944] sm:$0xf]  ;;  %v11096_v15 = vld [vmem:[%s11717_s11 + $0xd94] sm:$0xf0]  ;;  %v10960_v16 = vld [vmem:[%s11717_s11 + $0x95c] sm:$0xf] }
 0x104   : > { %5301 = vmatpush.bf16.xpose.msra.mxu2 %v8649_v41  ;;  %v9765_v53 = vor.u32 %v10957_v44, %v9762_v45  ;;  %v9785_v31 = vor.u32 %v11096_v15, %v9784_v14  ;;  %v9789_v32 = vor.u32 %v10960_v16, %v9786_v19  ;;  %v10826_v19 = vld [vmem:[%s11717_s11 + $0x524] sm:$0xf0] }
 0x105   : > { %5314 = vmatpush.bf16.xpose.msra.mxu3 %v8653_v43  ;;  %v1526_v43 = vpack.c.b16 %v1254_v30, %v1254_v30 }
 0x107   : > { %v4850_v40 = vpop.f32.mrf.mxu3  ;;  %v4861_v41 = vpop.f32.mrf.mxu0 }
 0x108   : > { %v4837_v35 = vpop.f32.mrf.mxu2  ;;  %v4862_v46 = vadd.f32 %v4861_v41, %v4849_v24  ;;  %v4874_v47 = vpop.f32.mrf.mxu1  ;;  %v1529_v24 = vpack.c.b16 %v1257_v11, %v1257_v11  ;;  %v8698_v40 = vld [vmem:[%s11717_s11 + $0x518] sm:$0xf0]  ;;  %v8688_v41 = vld [vmem:[%s11717_s11 + $0xd0] sm:$0xf] }
 0x10a   : > { %v4875_v52 = vadd.f32 %v4874_v47, %v4862_v46  ;;  %5276 = vmatmul.bf16.vlgmr.msra.gmra.mxu0 %v1524_v36  ;;  %5289 = vmatmul.bf16.vlgmr.msra.gmra.mxu1 %v1525_v42  ;;  %v8696_v36 = vld [vmem:[%s11717_s11 + $0xd8] sm:$0xf]  ;;  %v10823_v42 = vld [vmem:[%s11717_s11 + $0x50c] sm:$0xf0]  ;;  %v420_v46 = vld [vmem:[%s11710_s22 + $0xc0] sm:$0xff] }
 0x10b   : > { %5326 = vmatpush.bf16.xpose.msrb.mxu0 %v9745_v5  ;;  %5339 = vmatpush.bf16.xpose.msrb.mxu1 %v9749_v7  ;;  %v8681_v5 = vor.u32 %v10822_v55, %v8680_v54  ;;  %v8685_v7 = vor.u32 %v10686_v56, %v8682_v58  ;;  %v10687_v47 = vld [vmem:[%s11717_s11 + $0xd4] sm:$0xf]  ;;  %v8689_v54 = vor.u32 %v10823_v42, %v8688_v41  ;;  %v1260_v55 = vunpack.c.l.b16 %v420_v46  ;;  %v9816_v42 = vld [vmem:[%s11717_s11 + $0x978] sm:$0xf] }
 0x10c   : > { %5352 = vmatpush.bf16.xpose.msrb.mxu2 %v9753_v3  ;;  %5315 = vmatmul.bf16.vlgmr.msra.gmra.mxu3 %v1527_v48  ;;  %v8690_v48 = vld [vmem:[%s11717_s11 + $0x510] sm:$0xf0] }
 0x10d   : > { %5365 = vmatpush.bf16.xpose.msrb.mxu3 %v9757_v4  ;;  %5302 = vmatmul.bf16.vlgmr.msra.gmra.mxu2 %v1526_v43  ;;  %v419_v4 = vld [vmem:[%s11710_s22 + $0xb8] sm:$0xff]  ;;  %v8693_v56 = vor.u32 %v10687_v47, %v8690_v48  ;;  %v1532_v0 = vpack.c.b16 %v1260_v55, %v1260_v55  ;;  %v9808_v48 = vld [vmem:[%s11717_s11 + $0x970] sm:$0xf]  ;;  %v9810_v55 = vld [vmem:[%s11717_s11 + $0xdb0] sm:$0xf0] }
 0x10e   : > { %v1258_v12 = vunpack.c.l.b16 %v419_v4  ;;  %v1259_v13 = vunpack.c.h.b16 %v419_v4  ;;  %v9818_v47 = vld [vmem:[%s11717_s11 + $0xdb8] sm:$0xf0] }
 0x10f   : > { %v4900_v62 = vpop.f32.mrf.mxu3  ;;  %v4863_v63 = vpop.f32.mrf.mxu0 }
 0x110   : > { %v4887_v57 = vpop.f32.mrf.mxu2  ;;  %v4876_v3 = vpop.f32.mrf.mxu1  ;;  %v1531_v30 = vpack.c.b16 %v1259_v13, %v1259_v13 }
 0x111   : > { %v4888_v61 = vadd.f32 %v4887_v57, %v4875_v52  ;;  %v1261_v57 = vunpack.c.h.b16 %v420_v46  ;;  %v11097_v3 = vld [vmem:[%s11717_s11 + $0xd9c] sm:$0xf0] }
 0x112   : > { %v9793_v15 = vor.u32 %v11097_v3, %v9792_v2  ;;  %v10692_v2 = vld [vmem:[%s11717_s11 + $0xfc] sm:$0xf] }
 0x113   : > { %5327 = vmatpush.bf16.xpose.msrb.mxu0 %v8657_v26  ;;  %5340 = vmatpush.bf16.xpose.msrb.mxu1 %v8661_v28  ;;  %v4901_v6 = vadd.f32 %v4900_v62, %v4888_v61  ;;  %v10959_v26 = vld [vmem:[%s11717_s11 + $0x954] sm:$0xf]  ;;  %v11098_v61 = vld [vmem:[%s11717_s11 + $0xda4] sm:$0xf0]  ;;  %v10962_v62 = vld [vmem:[%s11717_s11 + $0x96c] sm:$0xf] }
 0x114   : > { %5353 = vmatpush.bf16.xpose.msrb.mxu2 %v8665_v23  ;;  %v9781_v35 = vor.u32 %v10959_v26, %v9778_v27  ;;  %v9801_v13 = vor.u32 %v11098_v61, %v9800_v60  ;;  %v9805_v14 = vor.u32 %v10962_v62, %v9802_v1  ;;  %v10828_v1 = vld [vmem:[%s11717_s11 + $0x534] sm:$0xf0] }
 0x115   : > { %5366 = vmatpush.bf16.xpose.msrb.mxu3 %v8669_v25  ;;  %v1530_v25 = vpack.c.b16 %v1258_v12, %v1258_v12 }
 0x117   : > { %v4902_v22 = vpop.f32.mrf.mxu3  ;;  %v4913_v23 = vpop.f32.mrf.mxu0 }
 0x118   : > { %v4889_v17 = vpop.f32.mrf.mxu2  ;;  %v4914_v28 = vadd.f32 %v4913_v23, %v4901_v6  ;;  %v4926_v29 = vpop.f32.mrf.mxu1  ;;  %v1533_v6 = vpack.c.b16 %v1261_v57, %v1261_v57  ;;  %v8714_v22 = vld [vmem:[%s11717_s11 + $0x528] sm:$0xf0]  ;;  %v8704_v23 = vld [vmem:[%s11717_s11 + $0xe0] sm:$0xf] }
 0x11a   : > { %v4927_v34 = vadd.f32 %v4926_v29, %v4914_v28  ;;  %5328 = vmatmul.bf16.vlgmr.msrb.gmra.mxu0 %v1528_v18  ;;  %5341 = vmatmul.bf16.vlgmr.msrb.gmra.mxu1 %v1529_v24  ;;  %v8712_v18 = vld [vmem:[%s11717_s11 + $0xe8] sm:$0xf]  ;;  %v10825_v24 = vld [vmem:[%s11717_s11 + $0x51c] sm:$0xf0]  ;;  %v422_v28 = vld [vmem:[%s11710_s22 + $0xd0] sm:$0xff] }
 0x11b   : > { %5378 = vmatpush.bf16.xpose.msra.mxu0 %v9761_v51  ;;  %5391 = vmatpush.bf16.xpose.msra.mxu1 %v9765_v53  ;;  %v8697_v51 = vor.u32 %v10824_v37, %v8696_v36  ;;  %v8701_v53 = vor.u32 %v10688_v38, %v8698_v40  ;;  %v10689_v29 = vld [vmem:[%s11717_s11 + $0xe4] sm:$0xf]  ;;  %v8705_v36 = vor.u32 %v10825_v24, %v8704_v23  ;;  %v1264_v37 = vunpack.c.l.b16 %v422_v28  ;;  %v9832_v24 = vld [vmem:[%s11717_s11 + $0x988] sm:$0xf] }
 0x11c   : > { %5404 = vmatpush.bf16.xpose.msra.mxu2 %v9769_v49  ;;  %5367 = vmatmul.bf16.vlgmr.msrb.gmra.mxu3 %v1531_v30  ;;  %v8706_v30 = vld [vmem:[%s11717_s11 + $0x520] sm:$0xf0] }
 0x11d   : > { %5417 = vmatpush.bf16.xpose.msra.mxu3 %v9773_v50  ;;  %5354 = vmatmul.bf16.vlgmr.msrb.gmra.mxu2 %v1530_v25  ;;  %v421_v50 = vld [vmem:[%s11710_s22 + $0xc8] sm:$0xff]  ;;  %v8709_v38 = vor.u32 %v10689_v29, %v8706_v30  ;;  %v1536_v46 = vpack.c.b16 %v1264_v37, %v1264_v37  ;;  %v9824_v30 = vld [vmem:[%s11717_s11 + $0x980] sm:$0xf]  ;;  %v9826_v37 = vld [vmem:[%s11717_s11 + $0xdc0] sm:$0xf0] }
 0x11e   : > { %v1262_v58 = vunpack.c.l.b16 %v421_v50  ;;  %v1263_v59 = vunpack.c.h.b16 %v421_v50  ;;  %v9834_v29 = vld [vmem:[%s11717_s11 + $0xdc8] sm:$0xf0] }
 0x11f   : > { %v4952_v44 = vpop.f32.mrf.mxu3  ;;  %v4915_v45 = vpop.f32.mrf.mxu0 }
 0x120   : > { %v4939_v39 = vpop.f32.mrf.mxu2  ;;  %v4928_v49 = vpop.f32.mrf.mxu1  ;;  %v1535_v12 = vpack.c.b16 %v1263_v59, %v1263_v59 }
 0x121   : > { %v4940_v43 = vadd.f32 %v4939_v39, %v4927_v34  ;;  %v1265_v39 = vunpack.c.h.b16 %v422_v28  ;;  %v11099_v49 = vld [vmem:[%s11717_s11 + $0xdac] sm:$0xf0] }
 0x122   : > { %v9809_v61 = vor.u32 %v11099_v49, %v9808_v48  ;;  %v10694_v48 = vld [vmem:[%s11717_s11 + $0x10c] sm:$0xf] }
 0x123   : > { %5379 = vmatpush.bf16.xpose.msra.mxu0 %v8673_v8  ;;  %5392 = vmatpush.bf16.xpose.msra.mxu1 %v8677_v10  ;;  %v4953_v52 = vadd.f32 %v4952_v44, %v4940_v43  ;;  %v10961_v8 = vld [vmem:[%s11717_s11 + $0x964] sm:$0xf]  ;;  %v11100_v43 = vld [vmem:[%s11717_s11 + $0xdb4] sm:$0xf0]  ;;  %v10964_v44 = vld [vmem:[%s11717_s11 + $0x97c] sm:$0xf] }
 0x124   : > { %5405 = vmatpush.bf16.xpose.msra.mxu2 %v8681_v5  ;;  %v9797_v17 = vor.u32 %v10961_v8, %v9794_v9  ;;  %v9817_v59 = vor.u32 %v11100_v43, %v9816_v42  ;;  %v9821_v60 = vor.u32 %v10964_v44, %v9818_v47  ;;  %v10830_v47 = vld [vmem:[%s11717_s11 + $0x544] sm:$0xf0] }
 0x125   : > { %5418 = vmatpush.bf16.xpose.msra.mxu3 %v8685_v7  ;;  %v1534_v7 = vpack.c.b16 %v1262_v58, %v1262_v58 }
 0x127   : > { %v4954_v4 = vpop.f32.mrf.mxu3  ;;  %v4965_v5 = vpop.f32.mrf.mxu0 }
 0x128   : > { %v4941_v63 = vpop.f32.mrf.mxu2  ;;  %v4966_v10 = vadd.f32 %v4965_v5, %v4953_v52  ;;  %v4978_v11 = vpop.f32.mrf.mxu1  ;;  %v1537_v52 = vpack.c.b16 %v1265_v39, %v1265_v39  ;;  %v8730_v4 = vld [vmem:[%s11717_s11 + $0x538] sm:$0xf0]  ;;  %v8720_v5 = vld [vmem:[%s11717_s11 + $0xf0] sm:$0xf] }
 0x12a   : > { %v4979_v16 = vadd.f32 %v4978_v11, %v4966_v10  ;;  %5380 = vmatmul.bf16.vlgmr.msra.gmra.mxu0 %v1532_v0  ;;  %5393 = vmatmul.bf16.vlgmr.msra.gmra.mxu1 %v1533_v6  ;;  %v8728_v0 = vld [vmem:[%s11717_s11 + $0xf8] sm:$0xf]  ;;  %v10827_v6 = vld [vmem:[%s11717_s11 + $0x52c] sm:$0xf0]  ;;  %v424_v10 = vld [vmem:[%s11710_s22 + $0xe0] sm:$0xff] }
 0x12b   : > { %5430 = vmatpush.bf16.xpose.msrb.mxu0 %v9777_v33  ;;  %5443 = vmatpush.bf16.xpose.msrb.mxu1 %v9781_v35  ;;  %v8713_v33 = vor.u32 %v10826_v19, %v8712_v18  ;;  %v8717_v35 = vor.u32 %v10690_v20, %v8714_v22  ;;  %v10691_v11 = vld [vmem:[%s11717_s11 + $0xf4] sm:$0xf]  ;;  %v8721_v18 = vor.u32 %v10827_v6, %v8720_v5  ;;  %v1268_v19 = vunpack.c.l.b16 %v424_v10  ;;  %v9848_v6 = vld [vmem:[%s11717_s11 + $0x998] sm:$0xf] }
 0x12c   : > { %5456 = vmatpush.bf16.xpose.msrb.mxu2 %v9785_v31  ;;  %5419 = vmatmul.bf16.vlgmr.msra.gmra.mxu3 %v1535_v12  ;;  %v8722_v12 = vld [vmem:[%s11717_s11 + $0x530] sm:$0xf0] }
 0x12d   : > { %5469 = vmatpush.bf16.xpose.msrb.mxu3 %v9789_v32  ;;  %5406 = vmatmul.bf16.vlgmr.msra.gmra.mxu2 %v1534_v7  ;;  %v423_v32 = vld [vmem:[%s11710_s22 + $0xd8] sm:$0xff]  ;;  %v8725_v20 = vor.u32 %v10691_v11, %v8722_v12  ;;  %v1540_v28 = vpack.c.b16 %v1268_v19, %v1268_v19  ;;  %v9840_v12 = vld [vmem:[%s11717_s11 + $0x990] sm:$0xf]  ;;  %v9842_v19 = vld [vmem:[%s11717_s11 + $0xdd0] sm:$0xf0] }
 0x12e   : > { %v1266_v40 = vunpack.c.l.b16 %v423_v32  ;;  %v1267_v41 = vunpack.c.h.b16 %v423_v32  ;;  %v9850_v11 = vld [vmem:[%s11717_s11 + $0xdd8] sm:$0xf0] }
 0x12f   : > { %v5004_v26 = vpop.f32.mrf.mxu3  ;;  %v4967_v27 = vpop.f32.mrf.mxu0 }
 0x130   : > { %v4991_v21 = vpop.f32.mrf.mxu2  ;;  %v4980_v31 = vpop.f32.mrf.mxu1  ;;  %v1539_v58 = vpack.c.b16 %v1267_v41, %v1267_v41 }
 0x131   : > { %v4992_v25 = vadd.f32 %v4991_v21, %v4979_v16  ;;  %v1269_v21 = vunpack.c.h.b16 %v424_v10  ;;  %v11101_v31 = vld [vmem:[%s11717_s11 + $0xdbc] sm:$0xf0] }
 0x132   : > { %v9825_v43 = vor.u32 %v11101_v31, %v9824_v30  ;;  %v10696_v30 = vld [vmem:[%s11717_s11 + $0x11c] sm:$0xf] }
 0x133   : > { %5431 = vmatpush.bf16.xpose.msrb.mxu0 %v8689_v54  ;;  %5444 = vmatpush.bf16.xpose.msrb.mxu1 %v8693_v56  ;;  %v5005_v34 = vadd.f32 %v5004_v26, %v4992_v25  ;;  %v10963_v54 = vld [vmem:[%s11717_s11 + $0x974] sm:$0xf]  ;;  %v11102_v25 = vld [vmem:[%s11717_s11 + $0xdc4] sm:$0xf0]  ;;  %v10966_v26 = vld [vmem:[%s11717_s11 + $0x98c] sm:$0xf] }
 0x134   : > { %5457 = vmatpush.bf16.xpose.msrb.mxu2 %v8697_v51  ;;  %v9813_v63 = vor.u32 %v10963_v54, %v9810_v55  ;;  %v9833_v41 = vor.u32 %v11102_v25, %v9832_v24  ;;  %v9837_v42 = vor.u32 %v10966_v26, %v9834_v29  ;;  %v10832_v29 = vld [vmem:[%s11717_s11 + $0x554] sm:$0xf0] }
 0x135   : > { %5470 = vmatpush.bf16.xpose.msrb.mxu3 %v8701_v53  ;;  %v1538_v53 = vpack.c.b16 %v1266_v40, %v1266_v40 }
 0x137   : > { %v5006_v50 = vpop.f32.mrf.mxu3  ;;  %v5017_v51 = vpop.f32.mrf.mxu0 }
 0x138   : > { %v4993_v45 = vpop.f32.mrf.mxu2  ;;  %v5018_v56 = vadd.f32 %v5017_v51, %v5005_v34  ;;  %v5030_v57 = vpop.f32.mrf.mxu1  ;;  %v1541_v34 = vpack.c.b16 %v1269_v21, %v1269_v21  ;;  %v8746_v50 = vld [vmem:[%s11717_s11 + $0x548] sm:$0xf0]  ;;  %v8736_v51 = vld [vmem:[%s11717_s11 + $0x100] sm:$0xf] }
 0x13a   : > { %v5031_v62 = vadd.f32 %v5030_v57, %v5018_v56  ;;  %5432 = vmatmul.bf16.vlgmr.msrb.gmra.mxu0 %v1536_v46  ;;  %5445 = vmatmul.bf16.vlgmr.msrb.gmra.mxu1 %v1537_v52  ;;  %v8744_v46 = vld [vmem:[%s11717_s11 + $0x108] sm:$0xf]  ;;  %v10829_v52 = vld [vmem:[%s11717_s11 + $0x53c] sm:$0xf0]  ;;  %v426_v56 = vld [vmem:[%s11710_s22 + $0xf0] sm:$0xff] }
 0x13b   : > { %5482 = vmatpush.bf16.xpose.msra.mxu0 %v9793_v15  ;;  %5495 = vmatpush.bf16.xpose.msra.mxu1 %v9797_v17  ;;  %v8729_v15 = vor.u32 %v10828_v1, %v8728_v0  ;;  %v8733_v17 = vor.u32 %v10692_v2, %v8730_v4  ;;  %v10693_v57 = vld [vmem:[%s11717_s11 + $0x104] sm:$0xf]  ;;  %v8737_v0 = vor.u32 %v10829_v52, %v8736_v51  ;;  %v1272_v1 = vunpack.c.l.b16 %v426_v56  ;;  %v9864_v52 = vld [vmem:[%s11717_s11 + $0x9a8] sm:$0xf] }
 0x13c   : > { %5508 = vmatpush.bf16.xpose.msra.mxu2 %v9801_v13  ;;  %5471 = vmatmul.bf16.vlgmr.msrb.gmra.mxu3 %v1539_v58  ;;  %v8738_v58 = vld [vmem:[%s11717_s11 + $0x540] sm:$0xf0] }
 0x13d   : > { %5521 = vmatpush.bf16.xpose.msra.mxu3 %v9805_v14  ;;  %5458 = vmatmul.bf16.vlgmr.msrb.gmra.mxu2 %v1538_v53  ;;  %v425_v14 = vld [vmem:[%s11710_s22 + $0xe8] sm:$0xff]  ;;  %v8741_v2 = vor.u32 %v10693_v57, %v8738_v58  ;;  %v1544_v10 = vpack.c.b16 %v1272_v1, %v1272_v1  ;;  %v9856_v58 = vld [vmem:[%s11717_s11 + $0x9a0] sm:$0xf]  ;;  %v9858_v1 = vld [vmem:[%s11717_s11 + $0xde0] sm:$0xf0] }
 0x13e   : > { %v1270_v22 = vunpack.c.l.b16 %v425_v14  ;;  %v1271_v23 = vunpack.c.h.b16 %v425_v14  ;;  %v9866_v57 = vld [vmem:[%s11717_s11 + $0xde8] sm:$0xf0] }
 0x13f   : > { %v5056_v8 = vpop.f32.mrf.mxu3  ;;  %v5019_v9 = vpop.f32.mrf.mxu0 }
 0x140   : > { %v5043_v3 = vpop.f32.mrf.mxu2  ;;  %v5032_v13 = vpop.f32.mrf.mxu1  ;;  %v1543_v40 = vpack.c.b16 %v1271_v23, %v1271_v23 }
 0x141   : > { %v5044_v7 = vadd.f32 %v5043_v3, %v5031_v62  ;;  %v1273_v3 = vunpack.c.h.b16 %v426_v56  ;;  %v11103_v13 = vld [vmem:[%s11717_s11 + $0xdcc] sm:$0xf0] }
 0x142   : > { %v9841_v25 = vor.u32 %v11103_v13, %v9840_v12  ;;  %v10698_v12 = vld [vmem:[%s11717_s11 + $0x12c] sm:$0xf] }
 0x143   : > { %5483 = vmatpush.bf16.xpose.msra.mxu0 %v8705_v36  ;;  %5496 = vmatpush.bf16.xpose.msra.mxu1 %v8709_v38  ;;  %v5057_v16 = vadd.f32 %v5056_v8, %v5044_v7  ;;  %v10965_v36 = vld [vmem:[%s11717_s11 + $0x984] sm:$0xf]  ;;  %v11104_v7 = vld [vmem:[%s11717_s11 + $0xdd4] sm:$0xf0]  ;;  %v10968_v8 = vld [vmem:[%s11717_s11 + $0x99c] sm:$0xf] }
 0x144   : > { %5509 = vmatpush.bf16.xpose.msra.mxu2 %v8713_v33  ;;  %v9829_v45 = vor.u32 %v10965_v36, %v9826_v37  ;;  %v9849_v23 = vor.u32 %v11104_v7, %v9848_v6  ;;  %v9853_v24 = vor.u32 %v10968_v8, %v9850_v11  ;;  %v10834_v11 = vld [vmem:[%s11717_s11 + $0x564] sm:$0xf0] }
 0x145   : > { %5522 = vmatpush.bf16.xpose.msra.mxu3 %v8717_v35  ;;  %v1542_v35 = vpack.c.b16 %v1270_v22, %v1270_v22 }
 0x147   : > { %v5058_v32 = vpop.f32.mrf.mxu3  ;;  %v5069_v33 = vpop.f32.mrf.mxu0 }
 0x148   : > { %v5045_v27 = vpop.f32.mrf.mxu2  ;;  %v5070_v38 = vadd.f32 %v5069_v33, %v5057_v16  ;;  %v5082_v39 = vpop.f32.mrf.mxu1  ;;  %v1545_v16 = vpack.c.b16 %v1273_v3, %v1273_v3  ;;  %v8762_v32 = vld [vmem:[%s11717_s11 + $0x558] sm:$0xf0]  ;;  %v8752_v33 = vld [vmem:[%s11717_s11 + $0x110] sm:$0xf] }
 0x14a   : > { %v5083_v44 = vadd.f32 %v5082_v39, %v5070_v38  ;;  %5484 = vmatmul.bf16.vlgmr.msra.gmra.mxu0 %v1540_v28  ;;  %5497 = vmatmul.bf16.vlgmr.msra.gmra.mxu1 %v1541_v34  ;;  %v8760_v28 = vld [vmem:[%s11717_s11 + $0x118] sm:$0xf]  ;;  %v10831_v34 = vld [vmem:[%s11717_s11 + $0x54c] sm:$0xf0]  ;;  %v428_v38 = vld [vmem:[%s11710_s22 + $0x100] sm:$0xff] }
 0x14b   : > { %5534 = vmatpush.bf16.xpose.msrb.mxu0 %v9809_v61  ;;  %5547 = vmatpush.bf16.xpose.msrb.mxu1 %v9813_v63  ;;  %v8745_v61 = vor.u32 %v10830_v47, %v8744_v46  ;;  %v8749_v63 = vor.u32 %v10694_v48, %v8746_v50  ;;  %v10695_v39 = vld [vmem:[%s11717_s11 + $0x114] sm:$0xf]  ;;  %v8753_v46 = vor.u32 %v10831_v34, %v8752_v33  ;;  %v1276_v47 = vunpack.c.l.b16 %v428_v38  ;;  %v9880_v34 = vld [vmem:[%s11717_s11 + $0x9b8] sm:$0xf] }
 0x14c   : > { %5560 = vmatpush.bf16.xpose.msrb.mxu2 %v9817_v59  ;;  %5523 = vmatmul.bf16.vlgmr.msra.gmra.mxu3 %v1543_v40  ;;  %v8754_v40 = vld [vmem:[%s11717_s11 + $0x550] sm:$0xf0] }
 0x14d   : > { %5573 = vmatpush.bf16.xpose.msrb.mxu3 %v9821_v60  ;;  %5510 = vmatmul.bf16.vlgmr.msra.gmra.mxu2 %v1542_v35  ;;  %v427_v60 = vld [vmem:[%s11710_s22 + $0xf8] sm:$0xff]  ;;  %v8757_v48 = vor.u32 %v10695_v39, %v8754_v40  ;;  %v1548_v56 = vpack.c.b16 %v1276_v47, %v1276_v47  ;;  %v9872_v40 = vld [vmem:[%s11717_s11 + $0x9b0] sm:$0xf]  ;;  %v9874_v47 = vld [vmem:[%s11717_s11 + $0xdf0] sm:$0xf0] }
 0x14e   : > { %v1274_v4 = vunpack.c.l.b16 %v427_v60  ;;  %v1275_v5 = vunpack.c.h.b16 %v427_v60  ;;  %v9882_v39 = vld [vmem:[%s11717_s11 + $0xdf8] sm:$0xf0] }
 0x14f   : > { %v5108_v54 = vpop.f32.mrf.mxu3  ;;  %v5071_v55 = vpop.f32.mrf.mxu0 }
 0x150   : > { %v5095_v49 = vpop.f32.mrf.mxu2  ;;  %v5084_v59 = vpop.f32.mrf.mxu1  ;;  %v1547_v22 = vpack.c.b16 %v1275_v5, %v1275_v5 }
 0x151   : > { %v5096_v53 = vadd.f32 %v5095_v49, %v5083_v44  ;;  %v1277_v49 = vunpack.c.h.b16 %v428_v38  ;;  %v11105_v59 = vld [vmem:[%s11717_s11 + $0xddc] sm:$0xf0] }
 0x152   : > { %v9857_v7 = vor.u32 %v11105_v59, %v9856_v58  ;;  %v10700_v58 = vld [vmem:[%s11717_s11 + $0x13c] sm:$0xf] }
 0x153   : > { %5535 = vmatpush.bf16.xpose.msrb.mxu0 %v8721_v18  ;;  %5548 = vmatpush.bf16.xpose.msrb.mxu1 %v8725_v20  ;;  %v5109_v62 = vadd.f32 %v5108_v54, %v5096_v53  ;;  %v10967_v18 = vld [vmem:[%s11717_s11 + $0x994] sm:$0xf]  ;;  %v11106_v53 = vld [vmem:[%s11717_s11 + $0xde4] sm:$0xf0]  ;;  %v10970_v54 = vld [vmem:[%s11717_s11 + $0x9ac] sm:$0xf] }
 0x154   : > { %5561 = vmatpush.bf16.xpose.msrb.mxu2 %v8729_v15  ;;  %v9845_v27 = vor.u32 %v10967_v18, %v9842_v19  ;;  %v9865_v5 = vor.u32 %v11106_v53, %v9864_v52  ;;  %v9869_v6 = vor.u32 %v10970_v54, %v9866_v57  ;;  %v10836_v57 = vld [vmem:[%s11717_s11 + $0x574] sm:$0xf0] }
 0x155   : > { %5574 = vmatpush.bf16.xpose.msrb.mxu3 %v8733_v17  ;;  %v1546_v17 = vpack.c.b16 %v1274_v4, %v1274_v4 }
 0x157   : > { %v5110_v14 = vpop.f32.mrf.mxu3  ;;  %v5121_v15 = vpop.f32.mrf.mxu0 }
 0x158   : > { %v5097_v9 = vpop.f32.mrf.mxu2  ;;  %v5122_v20 = vadd.f32 %v5121_v15, %v5109_v62  ;;  %v5134_v21 = vpop.f32.mrf.mxu1  ;;  %v1549_v62 = vpack.c.b16 %v1277_v49, %v1277_v49  ;;  %v8778_v14 = vld [vmem:[%s11717_s11 + $0x568] sm:$0xf0]  ;;  %v8768_v15 = vld [vmem:[%s11717_s11 + $0x120] sm:$0xf] }
 0x15a   : > { %v5135_v26 = vadd.f32 %v5134_v21, %v5122_v20  ;;  %5536 = vmatmul.bf16.vlgmr.msrb.gmra.mxu0 %v1544_v10  ;;  %5549 = vmatmul.bf16.vlgmr.msrb.gmra.mxu1 %v1545_v16  ;;  %v8776_v10 = vld [vmem:[%s11717_s11 + $0x128] sm:$0xf]  ;;  %v10833_v16 = vld [vmem:[%s11717_s11 + $0x55c] sm:$0xf0]  ;;  %v430_v20 = vld [vmem:[%s11710_s22 + $0x110] sm:$0xff] }
 0x15b   : > { %5586 = vmatpush.bf16.xpose.msra.mxu0 %v9825_v43  ;;  %5599 = vmatpush.bf16.xpose.msra.mxu1 %v9829_v45  ;;  %v8761_v43 = vor.u32 %v10832_v29, %v8760_v28  ;;  %v8765_v45 = vor.u32 %v10696_v30, %v8762_v32  ;;  %v10697_v21 = vld [vmem:[%s11717_s11 + $0x124] sm:$0xf]  ;;  %v8769_v28 = vor.u32 %v10833_v16, %v8768_v15  ;;  %v1280_v29 = vunpack.c.l.b16 %v430_v20  ;;  %v9896_v16 = vld [vmem:[%s11717_s11 + $0x9c8] sm:$0xf] }
 0x15c   : > { %5612 = vmatpush.bf16.xpose.msra.mxu2 %v9833_v41  ;;  %5575 = vmatmul.bf16.vlgmr.msrb.gmra.mxu3 %v1547_v22  ;;  %v8770_v22 = vld [vmem:[%s11717_s11 + $0x560] sm:$0xf0] }
 0x15d   : > { %5625 = vmatpush.bf16.xpose.msra.mxu3 %v9837_v42  ;;  %5562 = vmatmul.bf16.vlgmr.msrb.gmra.mxu2 %v1546_v17  ;;  %v429_v42 = vld [vmem:[%s11710_s22 + $0x108] sm:$0xff]  ;;  %v8773_v30 = vor.u32 %v10697_v21, %v8770_v22  ;;  %v1552_v38 = vpack.c.b16 %v1280_v29, %v1280_v29  ;;  %v9888_v22 = vld [vmem:[%s11717_s11 + $0x9c0] sm:$0xf]  ;;  %v9890_v29 = vld [vmem:[%s11717_s11 + $0xe00] sm:$0xf0] }
 0x15e   : > { %v1278_v50 = vunpack.c.l.b16 %v429_v42  ;;  %v1279_v51 = vunpack.c.h.b16 %v429_v42  ;;  %v9898_v21 = vld [vmem:[%s11717_s11 + $0xe08] sm:$0xf0] }
 0x15f   : > { %v5160_v36 = vpop.f32.mrf.mxu3  ;;  %v5123_v37 = vpop.f32.mrf.mxu0 }
 0x160   : > { %v5147_v31 = vpop.f32.mrf.mxu2  ;;  %v5136_v41 = vpop.f32.mrf.mxu1  ;;  %v1551_v4 = vpack.c.b16 %v1279_v51, %v1279_v51 }
 0x161   : > { %v5148_v35 = vadd.f32 %v5147_v31, %v5135_v26  ;;  %v1281_v31 = vunpack.c.h.b16 %v430_v20  ;;  %v11107_v41 = vld [vmem:[%s11717_s11 + $0xdec] sm:$0xf0] }
 0x162   : > { %v9873_v53 = vor.u32 %v11107_v41, %v9872_v40  ;;  %v10702_v40 = vld [vmem:[%s11717_s11 + $0x14c] sm:$0xf] }
 0x163   : > { %5587 = vmatpush.bf16.xpose.msra.mxu0 %v8737_v0  ;;  %5600 = vmatpush.bf16.xpose.msra.mxu1 %v8741_v2  ;;  %v5161_v44 = vadd.f32 %v5160_v36, %v5148_v35  ;;  %v10969_v0 = vld [vmem:[%s11717_s11 + $0x9a4] sm:$0xf]  ;;  %v11108_v35 = vld [vmem:[%s11717_s11 + $0xdf4] sm:$0xf0]  ;;  %v10972_v36 = vld [vmem:[%s11717_s11 + $0x9bc] sm:$0xf] }
 0x164   : > { %5613 = vmatpush.bf16.xpose.msra.mxu2 %v8745_v61  ;;  %v9861_v9 = vor.u32 %v10969_v0, %v9858_v1  ;;  %v9881_v51 = vor.u32 %v11108_v35, %v9880_v34  ;;  %v9885_v52 = vor.u32 %v10972_v36, %v9882_v39  ;;  %v10838_v39 = vld [vmem:[%s11717_s11 + $0x584] sm:$0xf0] }
 0x165   : > { %5626 = vmatpush.bf16.xpose.msra.mxu3 %v8749_v63  ;;  %v1550_v63 = vpack.c.b16 %v1278_v50, %v1278_v50 }
 0x167   : > { %v5162_v60 = vpop.f32.mrf.mxu3  ;;  %v5173_v61 = vpop.f32.mrf.mxu0 }
 0x168   : > { %v5149_v55 = vpop.f32.mrf.mxu2  ;;  %v5174_v2 = vadd.f32 %v5173_v61, %v5161_v44  ;;  %v5186_v3 = vpop.f32.mrf.mxu1  ;;  %v1553_v44 = vpack.c.b16 %v1281_v31, %v1281_v31  ;;  %v8794_v60 = vld [vmem:[%s11717_s11 + $0x578] sm:$0xf0]  ;;  %v8784_v61 = vld [vmem:[%s11717_s11 + $0x130] sm:$0xf] }
 0x16a   : > { %v5187_v8 = vadd.f32 %v5186_v3, %v5174_v2  ;;  %5588 = vmatmul.bf16.vlgmr.msra.gmra.mxu0 %v1548_v56  ;;  %5601 = vmatmul.bf16.vlgmr.msra.gmra.mxu1 %v1549_v62  ;;  %v8792_v56 = vld [vmem:[%s11717_s11 + $0x138] sm:$0xf]  ;;  %v10835_v62 = vld [vmem:[%s11717_s11 + $0x56c] sm:$0xf0]  ;;  %v432_v2 = vld [vmem:[%s11710_s22 + $0x120] sm:$0xff] }
 0x16b   : > { %5638 = vmatpush.bf16.xpose.msrb.mxu0 %v9841_v25  ;;  %5651 = vmatpush.bf16.xpose.msrb.mxu1 %v9845_v27  ;;  %v8777_v25 = vor.u32 %v10834_v11, %v8776_v10  ;;  %v8781_v27 = vor.u32 %v10698_v12, %v8778_v14  ;;  %v10699_v3 = vld [vmem:[%s11717_s11 + $0x134] sm:$0xf]  ;;  %v8785_v10 = vor.u32 %v10835_v62, %v8784_v61  ;;  %v1284_v11 = vunpack.c.l.b16 %v432_v2  ;;  %v9912_v62 = vld [vmem:[%s11717_s11 + $0x9d8] sm:$0xf] }
 0x16c   : > { %5664 = vmatpush.bf16.xpose.msrb.mxu2 %v9849_v23  ;;  %5627 = vmatmul.bf16.vlgmr.msra.gmra.mxu3 %v1551_v4  ;;  %v8786_v4 = vld [vmem:[%s11717_s11 + $0x570] sm:$0xf0] }
 0x16d   : > { %5677 = vmatpush.bf16.xpose.msrb.mxu3 %v9853_v24  ;;  %5614 = vmatmul.bf16.vlgmr.msra.gmra.mxu2 %v1550_v63  ;;  %v431_v24 = vld [vmem:[%s11710_s22 + $0x118] sm:$0xff]  ;;  %v8789_v12 = vor.u32 %v10699_v3, %v8786_v4  ;;  %v1556_v20 = vpack.c.b16 %v1284_v11, %v1284_v11  ;;  %v9904_v4 = vld [vmem:[%s11717_s11 + $0x9d0] sm:$0xf]  ;;  %v9906_v11 = vld [vmem:[%s11717_s11 + $0xe10] sm:$0xf0] }
 0x16e   : > { %v1282_v32 = vunpack.c.l.b16 %v431_v24  ;;  %v1283_v33 = vunpack.c.h.b16 %v431_v24  ;;  %v9914_v3 = vld [vmem:[%s11717_s11 + $0xe18] sm:$0xf0] }
 0x16f   : > { %v5212_v18 = vpop.f32.mrf.mxu3  ;;  %v5175_v19 = vpop.f32.mrf.mxu0 }
 0x170   : > { %v5199_v13 = vpop.f32.mrf.mxu2  ;;  %v5188_v23 = vpop.f32.mrf.mxu1  ;;  %v1555_v50 = vpack.c.b16 %v1283_v33, %v1283_v33 }
 0x171   : > { %v5200_v17 = vadd.f32 %v5199_v13, %v5187_v8  ;;  %v1285_v13 = vunpack.c.h.b16 %v432_v2  ;;  %v11109_v23 = vld [vmem:[%s11717_s11 + $0xdfc] sm:$0xf0] }
 0x172   : > { %v9889_v35 = vor.u32 %v11109_v23, %v9888_v22  ;;  %v10704_v22 = vld [vmem:[%s11717_s11 + $0x15c] sm:$0xf] }
 0x173   : > { %5639 = vmatpush.bf16.xpose.msrb.mxu0 %v8753_v46  ;;  %5652 = vmatpush.bf16.xpose.msrb.mxu1 %v8757_v48  ;;  %v5213_v26 = vadd.f32 %v5212_v18, %v5200_v17  ;;  %v10971_v46 = vld [vmem:[%s11717_s11 + $0x9b4] sm:$0xf]  ;;  %v11110_v17 = vld [vmem:[%s11717_s11 + $0xe04] sm:$0xf0]  ;;  %v10974_v18 = vld [vmem:[%s11717_s11 + $0x9cc] sm:$0xf] }
 0x174   : > { %5665 = vmatpush.bf16.xpose.msrb.mxu2 %v8761_v43  ;;  %v9877_v55 = vor.u32 %v10971_v46, %v9874_v47  ;;  %v9897_v33 = vor.u32 %v11110_v17, %v9896_v16  ;;  %v9901_v34 = vor.u32 %v10974_v18, %v9898_v21  ;;  %v10840_v21 = vld [vmem:[%s11717_s11 + $0x594] sm:$0xf0] }
 0x175   : > { %5678 = vmatpush.bf16.xpose.msrb.mxu3 %v8765_v45  ;;  %v1554_v45 = vpack.c.b16 %v1282_v32, %v1282_v32 }
 0x177   : > { %v5214_v42 = vpop.f32.mrf.mxu3  ;;  %v5225_v43 = vpop.f32.mrf.mxu0 }
 0x178   : > { %v5201_v37 = vpop.f32.mrf.mxu2  ;;  %v5226_v48 = vadd.f32 %v5225_v43, %v5213_v26  ;;  %v5238_v49 = vpop.f32.mrf.mxu1  ;;  %v1557_v26 = vpack.c.b16 %v1285_v13, %v1285_v13  ;;  %v8810_v42 = vld [vmem:[%s11717_s11 + $0x588] sm:$0xf0]  ;;  %v8800_v43 = vld [vmem:[%s11717_s11 + $0x140] sm:$0xf] }
 0x17a   : > { %v5239_v54 = vadd.f32 %v5238_v49, %v5226_v48  ;;  %5640 = vmatmul.bf16.vlgmr.msrb.gmra.mxu0 %v1552_v38  ;;  %5653 = vmatmul.bf16.vlgmr.msrb.gmra.mxu1 %v1553_v44  ;;  %v8808_v38 = vld [vmem:[%s11717_s11 + $0x148] sm:$0xf]  ;;  %v10837_v44 = vld [vmem:[%s11717_s11 + $0x57c] sm:$0xf0]  ;;  %v434_v48 = vld [vmem:[%s11710_s22 + $0x130] sm:$0xff] }
 0x17b   : > { %5690 = vmatpush.bf16.xpose.msra.mxu0 %v9857_v7  ;;  %5703 = vmatpush.bf16.xpose.msra.mxu1 %v9861_v9  ;;  %v8793_v7 = vor.u32 %v10836_v57, %v8792_v56  ;;  %v8797_v9 = vor.u32 %v10700_v58, %v8794_v60  ;;  %v10701_v49 = vld [vmem:[%s11717_s11 + $0x144] sm:$0xf]  ;;  %v8801_v56 = vor.u32 %v10837_v44, %v8800_v43  ;;  %v1288_v57 = vunpack.c.l.b16 %v434_v48  ;;  %v9928_v44 = vld [vmem:[%s11717_s11 + $0x9e8] sm:$0xf] }
 0x17c   : > { %5716 = vmatpush.bf16.xpose.msra.mxu2 %v9865_v5  ;;  %5679 = vmatmul.bf16.vlgmr.msrb.gmra.mxu3 %v1555_v50  ;;  %v8802_v50 = vld [vmem:[%s11717_s11 + $0x580] sm:$0xf0] }
 0x17d   : > { %5729 = vmatpush.bf16.xpose.msra.mxu3 %v9869_v6  ;;  %5666 = vmatmul.bf16.vlgmr.msrb.gmra.mxu2 %v1554_v45  ;;  %v433_v6 = vld [vmem:[%s11710_s22 + $0x128] sm:$0xff]  ;;  %v8805_v58 = vor.u32 %v10701_v49, %v8802_v50  ;;  %v1560_v2 = vpack.c.b16 %v1288_v57, %v1288_v57  ;;  %v9920_v50 = vld [vmem:[%s11717_s11 + $0x9e0] sm:$0xf]  ;;  %v9922_v57 = vld [vmem:[%s11717_s11 + $0xe20] sm:$0xf0] }
 0x17e   : > { %v1286_v14 = vunpack.c.l.b16 %v433_v6  ;;  %v1287_v15 = vunpack.c.h.b16 %v433_v6  ;;  %v9930_v49 = vld [vmem:[%s11717_s11 + $0xe28] sm:$0xf0] }
 0x17f   : > { %v5264_v0 = vpop.f32.mrf.mxu3  ;;  %v5227_v1 = vpop.f32.mrf.mxu0 }
 0x180   : > { %v5251_v59 = vpop.f32.mrf.mxu2  ;;  %v5240_v5 = vpop.f32.mrf.mxu1  ;;  %v1559_v32 = vpack.c.b16 %v1287_v15, %v1287_v15 }
 0x181   : > { %v5252_v63 = vadd.f32 %v5251_v59, %v5239_v54  ;;  %v1289_v59 = vunpack.c.h.b16 %v434_v48  ;;  %v11111_v5 = vld [vmem:[%s11717_s11 + $0xe0c] sm:$0xf0] }
 0x182   : > { %v9905_v17 = vor.u32 %v11111_v5, %v9904_v4  ;;  %v10706_v4 = vld [vmem:[%s11717_s11 + $0x16c] sm:$0xf] }
 0x183   : > { %5691 = vmatpush.bf16.xpose.msra.mxu0 %v8769_v28  ;;  %5704 = vmatpush.bf16.xpose.msra.mxu1 %v8773_v30  ;;  %v5265_v8 = vadd.f32 %v5264_v0, %v5252_v63  ;;  %v10973_v28 = vld [vmem:[%s11717_s11 + $0x9c4] sm:$0xf]  ;;  %v11112_v63 = vld [vmem:[%s11717_s11 + $0xe14] sm:$0xf0]  ;;  %v10976_v0 = vld [vmem:[%s11717_s11 + $0x9dc] sm:$0xf] }
 0x184   : > { %5717 = vmatpush.bf16.xpose.msra.mxu2 %v8777_v25  ;;  %v9893_v37 = vor.u32 %v10973_v28, %v9890_v29  ;;  %v9913_v15 = vor.u32 %v11112_v63, %v9912_v62  ;;  %v9917_v16 = vor.u32 %v10976_v0, %v9914_v3  ;;  %v10842_v3 = vld [vmem:[%s11717_s11 + $0x5a4] sm:$0xf0] }
 0x185   : > { %5730 = vmatpush.bf16.xpose.msra.mxu3 %v8781_v27  ;;  %v1558_v27 = vpack.c.b16 %v1286_v14, %v1286_v14 }
 0x187   : > { %v5266_v24 = vpop.f32.mrf.mxu3  ;;  %v5277_v25 = vpop.f32.mrf.mxu0 }
 0x188   : > { %v5253_v19 = vpop.f32.mrf.mxu2  ;;  %v5278_v30 = vadd.f32 %v5277_v25, %v5265_v8  ;;  %v5290_v31 = vpop.f32.mrf.mxu1  ;;  %v1561_v8 = vpack.c.b16 %v1289_v59, %v1289_v59  ;;  %v8826_v24 = vld [vmem:[%s11717_s11 + $0x598] sm:$0xf0]  ;;  %v8816_v25 = vld [vmem:[%s11717_s11 + $0x150] sm:$0xf] }
 0x18a   : > { %v5291_v36 = vadd.f32 %v5290_v31, %v5278_v30  ;;  %5692 = vmatmul.bf16.vlgmr.msra.gmra.mxu0 %v1556_v20  ;;  %5705 = vmatmul.bf16.vlgmr.msra.gmra.mxu1 %v1557_v26  ;;  %v8824_v20 = vld [vmem:[%s11717_s11 + $0x158] sm:$0xf]  ;;  %v10839_v26 = vld [vmem:[%s11717_s11 + $0x58c] sm:$0xf0]  ;;  %v436_v30 = vld [vmem:[%s11710_s22 + $0x140] sm:$0xff] }
 0x18b   : > { %5742 = vmatpush.bf16.xpose.msrb.mxu0 %v9873_v53  ;;  %5755 = vmatpush.bf16.xpose.msrb.mxu1 %v9877_v55  ;;  %v8809_v53 = vor.u32 %v10838_v39, %v8808_v38  ;;  %v8813_v55 = vor.u32 %v10702_v40, %v8810_v42  ;;  %v10703_v31 = vld [vmem:[%s11717_s11 + $0x154] sm:$0xf]  ;;  %v8817_v38 = vor.u32 %v10839_v26, %v8816_v25  ;;  %v1292_v39 = vunpack.c.l.b16 %v436_v30  ;;  %v9944_v26 = vld [vmem:[%s11717_s11 + $0x9f8] sm:$0xf] }
 0x18c   : > { %5768 = vmatpush.bf16.xpose.msrb.mxu2 %v9881_v51  ;;  %5731 = vmatmul.bf16.vlgmr.msra.gmra.mxu3 %v1559_v32  ;;  %v8818_v32 = vld [vmem:[%s11717_s11 + $0x590] sm:$0xf0] }
 0x18d   : > { %5781 = vmatpush.bf16.xpose.msrb.mxu3 %v9885_v52  ;;  %5718 = vmatmul.bf16.vlgmr.msra.gmra.mxu2 %v1558_v27  ;;  %v435_v52 = vld [vmem:[%s11710_s22 + $0x138] sm:$0xff]  ;;  %v8821_v40 = vor.u32 %v10703_v31, %v8818_v32  ;;  %v1564_v48 = vpack.c.b16 %v1292_v39, %v1292_v39  ;;  %v9936_v32 = vld [vmem:[%s11717_s11 + $0x9f0] sm:$0xf]  ;;  %v9938_v39 = vld [vmem:[%s11717_s11 + $0xe30] sm:$0xf0] }
 0x18e   : > { %v1290_v60 = vunpack.c.l.b16 %v435_v52  ;;  %v1291_v61 = vunpack.c.h.b16 %v435_v52  ;;  %v9946_v31 = vld [vmem:[%s11717_s11 + $0xe38] sm:$0xf0] }
 0x18f   : > { %v5316_v46 = vpop.f32.mrf.mxu3  ;;  %v5279_v47 = vpop.f32.mrf.mxu0 }
 0x190   : > { %v5303_v41 = vpop.f32.mrf.mxu2  ;;  %v5292_v51 = vpop.f32.mrf.mxu1  ;;  %v1563_v14 = vpack.c.b16 %v1291_v61, %v1291_v61 }
 0x191   : > { %v5304_v45 = vadd.f32 %v5303_v41, %v5291_v36  ;;  %v1293_v41 = vunpack.c.h.b16 %v436_v30  ;;  %v11113_v51 = vld [vmem:[%s11717_s11 + $0xe1c] sm:$0xf0] }
 0x192   : > { %v9921_v63 = vor.u32 %v11113_v51, %v9920_v50  ;;  %v10708_v50 = vld [vmem:[%s11717_s11 + $0x17c] sm:$0xf] }
 0x193   : > { %5743 = vmatpush.bf16.xpose.msrb.mxu0 %v8785_v10  ;;  %5756 = vmatpush.bf16.xpose.msrb.mxu1 %v8789_v12  ;;  %v5317_v54 = vadd.f32 %v5316_v46, %v5304_v45  ;;  %v10975_v10 = vld [vmem:[%s11717_s11 + $0x9d4] sm:$0xf]  ;;  %v11114_v45 = vld [vmem:[%s11717_s11 + $0xe24] sm:$0xf0]  ;;  %v10978_v46 = vld [vmem:[%s11717_s11 + $0x9ec] sm:$0xf] }
 0x194   : > { %5769 = vmatpush.bf16.xpose.msrb.mxu2 %v8793_v7  ;;  %v9909_v19 = vor.u32 %v10975_v10, %v9906_v11  ;;  %v9929_v61 = vor.u32 %v11114_v45, %v9928_v44  ;;  %v9933_v62 = vor.u32 %v10978_v46, %v9930_v49  ;;  %v10844_v49 = vld [vmem:[%s11717_s11 + $0x5b4] sm:$0xf0] }
 0x195   : > { %5782 = vmatpush.bf16.xpose.msrb.mxu3 %v8797_v9  ;;  %v1562_v9 = vpack.c.b16 %v1290_v60, %v1290_v60 }
 0x197   : > { %v5318_v6 = vpop.f32.mrf.mxu3  ;;  %v5329_v7 = vpop.f32.mrf.mxu0 }
 0x198   : > { %v5305_v1 = vpop.f32.mrf.mxu2  ;;  %v5330_v12 = vadd.f32 %v5329_v7, %v5317_v54  ;;  %v5342_v13 = vpop.f32.mrf.mxu1  ;;  %v1565_v54 = vpack.c.b16 %v1293_v41, %v1293_v41  ;;  %v8842_v6 = vld [vmem:[%s11717_s11 + $0x5a8] sm:$0xf0]  ;;  %v8832_v7 = vld [vmem:[%s11717_s11 + $0x160] sm:$0xf] }
 0x19a   : > { %v5343_v18 = vadd.f32 %v5342_v13, %v5330_v12  ;;  %5744 = vmatmul.bf16.vlgmr.msrb.gmra.mxu0 %v1560_v2  ;;  %5757 = vmatmul.bf16.vlgmr.msrb.gmra.mxu1 %v1561_v8  ;;  %v8840_v2 = vld [vmem:[%s11717_s11 + $0x168] sm:$0xf]  ;;  %v10841_v8 = vld [vmem:[%s11717_s11 + $0x59c] sm:$0xf0]  ;;  %v438_v12 = vld [vmem:[%s11710_s22 + $0x150] sm:$0xff] }
 0x19b   : > { %5794 = vmatpush.bf16.xpose.msra.mxu0 %v9889_v35  ;;  %5807 = vmatpush.bf16.xpose.msra.mxu1 %v9893_v37  ;;  %v8825_v35 = vor.u32 %v10840_v21, %v8824_v20  ;;  %v8829_v37 = vor.u32 %v10704_v22, %v8826_v24  ;;  %v10705_v13 = vld [vmem:[%s11717_s11 + $0x164] sm:$0xf]  ;;  %v8833_v20 = vor.u32 %v10841_v8, %v8832_v7  ;;  %v1296_v21 = vunpack.c.l.b16 %v438_v12  ;;  %v9960_v8 = vld [vmem:[%s11717_s11 + $0xa08] sm:$0xf] }
 0x19c   : > { %5820 = vmatpush.bf16.xpose.msra.mxu2 %v9897_v33  ;;  %5783 = vmatmul.bf16.vlgmr.msrb.gmra.mxu3 %v1563_v14  ;;  %v8834_v14 = vld [vmem:[%s11717_s11 + $0x5a0] sm:$0xf0] }
 0x19d   : > { %5833 = vmatpush.bf16.xpose.msra.mxu3 %v9901_v34  ;;  %5770 = vmatmul.bf16.vlgmr.msrb.gmra.mxu2 %v1562_v9  ;;  %v437_v34 = vld [vmem:[%s11710_s22 + $0x148] sm:$0xff]  ;;  %v8837_v22 = vor.u32 %v10705_v13, %v8834_v14  ;;  %v1568_v30 = vpack.c.b16 %v1296_v21, %v1296_v21  ;;  %v9952_v14 = vld [vmem:[%s11717_s11 + $0xa00] sm:$0xf]  ;;  %v9954_v21 = vld [vmem:[%s11717_s11 + $0xe40] sm:$0xf0] }
 0x19e   : > { %v1294_v42 = vunpack.c.l.b16 %v437_v34  ;;  %v1295_v43 = vunpack.c.h.b16 %v437_v34  ;;  %v9962_v13 = vld [vmem:[%s11717_s11 + $0xe48] sm:$0xf0] }
 0x19f   : > { %v5368_v28 = vpop.f32.mrf.mxu3  ;;  %v5331_v29 = vpop.f32.mrf.mxu0 }
 0x1a0   : > { %v5355_v23 = vpop.f32.mrf.mxu2  ;;  %v5344_v33 = vpop.f32.mrf.mxu1  ;;  %v1567_v60 = vpack.c.b16 %v1295_v43, %v1295_v43 }
 0x1a1   : > { %v5356_v27 = vadd.f32 %v5355_v23, %v5343_v18  ;;  %v1297_v23 = vunpack.c.h.b16 %v438_v12  ;;  %v11115_v33 = vld [vmem:[%s11717_s11 + $0xe2c] sm:$0xf0] }
 0x1a2   : > { %v9937_v45 = vor.u32 %v11115_v33, %v9936_v32  ;;  %v10710_v32 = vld [vmem:[%s11717_s11 + $0x18c] sm:$0xf] }
 0x1a3   : > { %5795 = vmatpush.bf16.xpose.msra.mxu0 %v8801_v56  ;;  %5808 = vmatpush.bf16.xpose.msra.mxu1 %v8805_v58  ;;  %v5369_v36 = vadd.f32 %v5368_v28, %v5356_v27  ;;  %v10977_v56 = vld [vmem:[%s11717_s11 + $0x9e4] sm:$0xf]  ;;  %v11116_v27 = vld [vmem:[%s11717_s11 + $0xe34] sm:$0xf0]  ;;  %v10980_v28 = vld [vmem:[%s11717_s11 + $0x9fc] sm:$0xf] }
 0x1a4   : > { %5821 = vmatpush.bf16.xpose.msra.mxu2 %v8809_v53  ;;  %v9925_v1 = vor.u32 %v10977_v56, %v9922_v57  ;;  %v9945_v43 = vor.u32 %v11116_v27, %v9944_v26  ;;  %v9949_v44 = vor.u32 %v10980_v28, %v9946_v31  ;;  %v10846_v31 = vld [vmem:[%s11717_s11 + $0x5c4] sm:$0xf0] }
 0x1a5   : > { %5834 = vmatpush.bf16.xpose.msra.mxu3 %v8813_v55  ;;  %v1566_v55 = vpack.c.b16 %v1294_v42, %v1294_v42 }
 0x1a7   : > { %v5370_v52 = vpop.f32.mrf.mxu3  ;;  %v5381_v53 = vpop.f32.mrf.mxu0 }
 0x1a8   : > { %v5357_v47 = vpop.f32.mrf.mxu2  ;;  %v5382_v58 = vadd.f32 %v5381_v53, %v5369_v36  ;;  %v5394_v59 = vpop.f32.mrf.mxu1  ;;  %v1569_v36 = vpack.c.b16 %v1297_v23, %v1297_v23  ;;  %v8858_v52 = vld [vmem:[%s11717_s11 + $0x5b8] sm:$0xf0]  ;;  %v8848_v53 = vld [vmem:[%s11717_s11 + $0x170] sm:$0xf] }
 0x1aa   : > { %v5395_v0 = vadd.f32 %v5394_v59, %v5382_v58  ;;  %5796 = vmatmul.bf16.vlgmr.msra.gmra.mxu0 %v1564_v48  ;;  %5809 = vmatmul.bf16.vlgmr.msra.gmra.mxu1 %v1565_v54  ;;  %v8856_v48 = vld [vmem:[%s11717_s11 + $0x178] sm:$0xf]  ;;  %v10843_v54 = vld [vmem:[%s11717_s11 + $0x5ac] sm:$0xf0]  ;;  %v440_v58 = vld [vmem:[%s11710_s22 + $0x160] sm:$0xff] }
 0x1ab   : > { %5846 = vmatpush.bf16.xpose.msrb.mxu0 %v9905_v17  ;;  %5859 = vmatpush.bf16.xpose.msrb.mxu1 %v9909_v19  ;;  %v8841_v17 = vor.u32 %v10842_v3, %v8840_v2  ;;  %v8845_v19 = vor.u32 %v10706_v4, %v8842_v6  ;;  %v10707_v59 = vld [vmem:[%s11717_s11 + $0x174] sm:$0xf]  ;;  %v8849_v2 = vor.u32 %v10843_v54, %v8848_v53  ;;  %v1300_v3 = vunpack.c.l.b16 %v440_v58  ;;  %v9976_v54 = vld [vmem:[%s11717_s11 + $0xa18] sm:$0xf] }
 0x1ac   : > { %5872 = vmatpush.bf16.xpose.msrb.mxu2 %v9913_v15  ;;  %5835 = vmatmul.bf16.vlgmr.msra.gmra.mxu3 %v1567_v60  ;;  %v8850_v60 = vld [vmem:[%s11717_s11 + $0x5b0] sm:$0xf0] }
 0x1ad   : > { %5885 = vmatpush.bf16.xpose.msrb.mxu3 %v9917_v16  ;;  %5822 = vmatmul.bf16.vlgmr.msra.gmra.mxu2 %v1566_v55  ;;  %v439_v16 = vld [vmem:[%s11710_s22 + $0x158] sm:$0xff]  ;;  %v8853_v4 = vor.u32 %v10707_v59, %v8850_v60  ;;  %v1572_v12 = vpack.c.b16 %v1300_v3, %v1300_v3  ;;  %v9968_v60 = vld [vmem:[%s11717_s11 + $0xa10] sm:$0xf]  ;;  %v9970_v3 = vld [vmem:[%s11717_s11 + $0xe50] sm:$0xf0] }
 0x1ae   : > { %v1298_v24 = vunpack.c.l.b16 %v439_v16  ;;  %v1299_v25 = vunpack.c.h.b16 %v439_v16  ;;  %v9978_v59 = vld [vmem:[%s11717_s11 + $0xe58] sm:$0xf0] }
 0x1af   : > { %v5420_v10 = vpop.f32.mrf.mxu3  ;;  %v5383_v11 = vpop.f32.mrf.mxu0 }
 0x1b0   : > { %v5407_v5 = vpop.f32.mrf.mxu2  ;;  %v5396_v15 = vpop.f32.mrf.mxu1  ;;  %v1571_v42 = vpack.c.b16 %v1299_v25, %v1299_v25 }
 0x1b1   : > { %v5408_v9 = vadd.f32 %v5407_v5, %v5395_v0  ;;  %v1301_v5 = vunpack.c.h.b16 %v440_v58  ;;  %v11117_v15 = vld [vmem:[%s11717_s11 + $0xe3c] sm:$0xf0] }
 0x1b2   : > { %v9953_v27 = vor.u32 %v11117_v15, %v9952_v14  ;;  %v10712_v14 = vld [vmem:[%s11717_s11 + $0x19c] sm:$0xf] }
 0x1b3   : > { %5847 = vmatpush.bf16.xpose.msrb.mxu0 %v8817_v38  ;;  %5860 = vmatpush.bf16.xpose.msrb.mxu1 %v8821_v40  ;;  %v5421_v18 = vadd.f32 %v5420_v10, %v5408_v9  ;;  %v10979_v38 = vld [vmem:[%s11717_s11 + $0x9f4] sm:$0xf]  ;;  %v11118_v9 = vld [vmem:[%s11717_s11 + $0xe44] sm:$0xf0]  ;;  %v10982_v10 = vld [vmem:[%s11717_s11 + $0xa0c] sm:$0xf] }
 0x1b4   : > { %5873 = vmatpush.bf16.xpose.msrb.mxu2 %v8825_v35  ;;  %v9941_v47 = vor.u32 %v10979_v38, %v9938_v39  ;;  %v9961_v25 = vor.u32 %v11118_v9, %v9960_v8  ;;  %v9965_v26 = vor.u32 %v10982_v10, %v9962_v13  ;;  %v10848_v13 = vld [vmem:[%s11717_s11 + $0x5d4] sm:$0xf0] }
 0x1b5   : > { %5886 = vmatpush.bf16.xpose.msrb.mxu3 %v8829_v37  ;;  %v1570_v37 = vpack.c.b16 %v1298_v24, %v1298_v24 }
 0x1b7   : > { %v5422_v34 = vpop.f32.mrf.mxu3  ;;  %v5433_v35 = vpop.f32.mrf.mxu0 }
 0x1b8   : > { %v5409_v29 = vpop.f32.mrf.mxu2  ;;  %v5434_v40 = vadd.f32 %v5433_v35, %v5421_v18  ;;  %v5446_v41 = vpop.f32.mrf.mxu1  ;;  %v1573_v18 = vpack.c.b16 %v1301_v5, %v1301_v5  ;;  %v8874_v34 = vld [vmem:[%s11717_s11 + $0x5c8] sm:$0xf0]  ;;  %v8864_v35 = vld [vmem:[%s11717_s11 + $0x180] sm:$0xf] }
 0x1ba   : > { %v5447_v46 = vadd.f32 %v5446_v41, %v5434_v40  ;;  %5848 = vmatmul.bf16.vlgmr.msrb.gmra.mxu0 %v1568_v30  ;;  %5861 = vmatmul.bf16.vlgmr.msrb.gmra.mxu1 %v1569_v36  ;;  %v8872_v30 = vld [vmem:[%s11717_s11 + $0x188] sm:$0xf]  ;;  %v10845_v36 = vld [vmem:[%s11717_s11 + $0x5bc] sm:$0xf0]  ;;  %v442_v40 = vld [vmem:[%s11710_s22 + $0x170] sm:$0xff] }
 0x1bb   : > { %5898 = vmatpush.bf16.xpose.msra.mxu0 %v9921_v63  ;;  %5911 = vmatpush.bf16.xpose.msra.mxu1 %v9925_v1  ;;  %v8857_v63 = vor.u32 %v10844_v49, %v8856_v48  ;;  %v8861_v1 = vor.u32 %v10708_v50, %v8858_v52  ;;  %v10709_v41 = vld [vmem:[%s11717_s11 + $0x184] sm:$0xf]  ;;  %v8865_v48 = vor.u32 %v10845_v36, %v8864_v35  ;;  %v1304_v49 = vunpack.c.l.b16 %v442_v40  ;;  %v9992_v36 = vld [vmem:[%s11717_s11 + $0xa28] sm:$0xf] }
 0x1bc   : > { %5924 = vmatpush.bf16.xpose.msra.mxu2 %v9929_v61  ;;  %5887 = vmatmul.bf16.vlgmr.msrb.gmra.mxu3 %v1571_v42  ;;  %v8866_v42 = vld [vmem:[%s11717_s11 + $0x5c0] sm:$0xf0] }
 0x1bd   : > { %5937 = vmatpush.bf16.xpose.msra.mxu3 %v9933_v62  ;;  %5874 = vmatmul.bf16.vlgmr.msrb.gmra.mxu2 %v1570_v37  ;;  %v441_v62 = vld [vmem:[%s11710_s22 + $0x168] sm:$0xff]  ;;  %v8869_v50 = vor.u32 %v10709_v41, %v8866_v42  ;;  %v1576_v58 = vpack.c.b16 %v1304_v49, %v1304_v49  ;;  %v9984_v42 = vld [vmem:[%s11717_s11 + $0xa20] sm:$0xf]  ;;  %v9986_v49 = vld [vmem:[%s11717_s11 + $0xe60] sm:$0xf0] }
 0x1be   : > { %v1302_v6 = vunpack.c.l.b16 %v441_v62  ;;  %v1303_v7 = vunpack.c.h.b16 %v441_v62  ;;  %v9994_v41 = vld [vmem:[%s11717_s11 + $0xe68] sm:$0xf0] }
 0x1bf   : > { %v5472_v56 = vpop.f32.mrf.mxu3  ;;  %v5435_v57 = vpop.f32.mrf.mxu0 }
 0x1c0   : > { %v5459_v51 = vpop.f32.mrf.mxu2  ;;  %v5448_v61 = vpop.f32.mrf.mxu1  ;;  %v1575_v24 = vpack.c.b16 %v1303_v7, %v1303_v7 }
 0x1c1   : > { %v5460_v55 = vadd.f32 %v5459_v51, %v5447_v46  ;;  %v1305_v51 = vunpack.c.h.b16 %v442_v40  ;;  %v11119_v61 = vld [vmem:[%s11717_s11 + $0xe4c] sm:$0xf0] }
 0x1c2   : > { %v9969_v9 = vor.u32 %v11119_v61, %v9968_v60  ;;  %v10714_v60 = vld [vmem:[%s11717_s11 + $0x1ac] sm:$0xf] }
 0x1c3   : > { %5899 = vmatpush.bf16.xpose.msra.mxu0 %v8833_v20  ;;  %5912 = vmatpush.bf16.xpose.msra.mxu1 %v8837_v22  ;;  %v5473_v0 = vadd.f32 %v5472_v56, %v5460_v55  ;;  %v10981_v20 = vld [vmem:[%s11717_s11 + $0xa04] sm:$0xf]  ;;  %v11120_v55 = vld [vmem:[%s11717_s11 + $0xe54] sm:$0xf0]  ;;  %v10984_v56 = vld [vmem:[%s11717_s11 + $0xa1c] sm:$0xf] }
 0x1c4   : > { %5925 = vmatpush.bf16.xpose.msra.mxu2 %v8841_v17  ;;  %v9957_v29 = vor.u32 %v10981_v20, %v9954_v21  ;;  %v9977_v7 = vor.u32 %v11120_v55, %v9976_v54  ;;  %v9981_v8 = vor.u32 %v10984_v56, %v9978_v59  ;;  %v10850_v59 = vld [vmem:[%s11717_s11 + $0x5e4] sm:$0xf0] }
 0x1c5   : > { %5938 = vmatpush.bf16.xpose.msra.mxu3 %v8845_v19  ;;  %v1574_v19 = vpack.c.b16 %v1302_v6, %v1302_v6 }
 0x1c7   : > { %v5474_v16 = vpop.f32.mrf.mxu3  ;;  %v5485_v17 = vpop.f32.mrf.mxu0 }
 0x1c8   : > { %v5461_v11 = vpop.f32.mrf.mxu2  ;;  %v5486_v22 = vadd.f32 %v5485_v17, %v5473_v0  ;;  %v5498_v23 = vpop.f32.mrf.mxu1  ;;  %v1577_v0 = vpack.c.b16 %v1305_v51, %v1305_v51  ;;  %v8890_v16 = vld [vmem:[%s11717_s11 + $0x5d8] sm:$0xf0]  ;;  %v8880_v17 = vld [vmem:[%s11717_s11 + $0x190] sm:$0xf] }
 0x1ca   : > { %v5499_v28 = vadd.f32 %v5498_v23, %v5486_v22  ;;  %5900 = vmatmul.bf16.vlgmr.msra.gmra.mxu0 %v1572_v12  ;;  %5913 = vmatmul.bf16.vlgmr.msra.gmra.mxu1 %v1573_v18  ;;  %v8888_v12 = vld [vmem:[%s11717_s11 + $0x198] sm:$0xf]  ;;  %v10847_v18 = vld [vmem:[%s11717_s11 + $0x5cc] sm:$0xf0]  ;;  %v444_v22 = vld [vmem:[%s11710_s22 + $0x180] sm:$0xff] }
 0x1cb   : > { %5950 = vmatpush.bf16.xpose.msrb.mxu0 %v9937_v45  ;;  %5963 = vmatpush.bf16.xpose.msrb.mxu1 %v9941_v47  ;;  %v8873_v45 = vor.u32 %v10846_v31, %v8872_v30  ;;  %v8877_v47 = vor.u32 %v10710_v32, %v8874_v34  ;;  %v10711_v23 = vld [vmem:[%s11717_s11 + $0x194] sm:$0xf]  ;;  %v8881_v30 = vor.u32 %v10847_v18, %v8880_v17  ;;  %v1308_v31 = vunpack.c.l.b16 %v444_v22  ;;  %v10008_v18 = vld [vmem:[%s11717_s11 + $0xa38] sm:$0xf] }
 0x1cc   : > { %5976 = vmatpush.bf16.xpose.msrb.mxu2 %v9945_v43  ;;  %5939 = vmatmul.bf16.vlgmr.msra.gmra.mxu3 %v1575_v24  ;;  %v8882_v24 = vld [vmem:[%s11717_s11 + $0x5d0] sm:$0xf0] }
 0x1cd   : > { %5989 = vmatpush.bf16.xpose.msrb.mxu3 %v9949_v44  ;;  %5926 = vmatmul.bf16.vlgmr.msra.gmra.mxu2 %v1574_v19  ;;  %v443_v44 = vld [vmem:[%s11710_s22 + $0x178] sm:$0xff]  ;;  %v8885_v32 = vor.u32 %v10711_v23, %v8882_v24  ;;  %v1580_v40 = vpack.c.b16 %v1308_v31, %v1308_v31  ;;  %v10000_v24 = vld [vmem:[%s11717_s11 + $0xa30] sm:$0xf]  ;;  %v10002_v31 = vld [vmem:[%s11717_s11 + $0xe70] sm:$0xf0] }
 0x1ce   : > { %v1306_v52 = vunpack.c.l.b16 %v443_v44  ;;  %v1307_v53 = vunpack.c.h.b16 %v443_v44  ;;  %v10010_v23 = vld [vmem:[%s11717_s11 + $0xe78] sm:$0xf0] }
 0x1cf   : > { %v5524_v38 = vpop.f32.mrf.mxu3  ;;  %v5487_v39 = vpop.f32.mrf.mxu0 }
 0x1d0   : > { %v5511_v33 = vpop.f32.mrf.mxu2  ;;  %v5500_v43 = vpop.f32.mrf.mxu1  ;;  %v1579_v6 = vpack.c.b16 %v1307_v53, %v1307_v53 }
 0x1d1   : > { %v5512_v37 = vadd.f32 %v5511_v33, %v5499_v28  ;;  %v1309_v33 = vunpack.c.h.b16 %v444_v22  ;;  %v11121_v43 = vld [vmem:[%s11717_s11 + $0xe5c] sm:$0xf0] }
 0x1d2   : > { %v9985_v55 = vor.u32 %v11121_v43, %v9984_v42  ;;  %v10716_v42 = vld [vmem:[%s11717_s11 + $0x1bc] sm:$0xf] }
 0x1d3   : > { %5951 = vmatpush.bf16.xpose.msrb.mxu0 %v8849_v2  ;;  %5964 = vmatpush.bf16.xpose.msrb.mxu1 %v8853_v4  ;;  %v5525_v46 = vadd.f32 %v5524_v38, %v5512_v37  ;;  %v10983_v2 = vld [vmem:[%s11717_s11 + $0xa14] sm:$0xf]  ;;  %v11122_v37 = vld [vmem:[%s11717_s11 + $0xe64] sm:$0xf0]  ;;  %v10986_v38 = vld [vmem:[%s11717_s11 + $0xa2c] sm:$0xf] }
 0x1d4   : > { %5977 = vmatpush.bf16.xpose.msrb.mxu2 %v8857_v63  ;;  %v9973_v11 = vor.u32 %v10983_v2, %v9970_v3  ;;  %v9993_v53 = vor.u32 %v11122_v37, %v9992_v36  ;;  %v9997_v54 = vor.u32 %v10986_v38, %v9994_v41  ;;  %v10852_v41 = vld [vmem:[%s11717_s11 + $0x5f4] sm:$0xf0] }
 0x1d5   : > { %5990 = vmatpush.bf16.xpose.msrb.mxu3 %v8861_v1  ;;  %v1578_v1 = vpack.c.b16 %v1306_v52, %v1306_v52 }
 0x1d7   : > { %v5526_v62 = vpop.f32.mrf.mxu3  ;;  %v5537_v63 = vpop.f32.mrf.mxu0 }
 0x1d8   : > { %v5513_v57 = vpop.f32.mrf.mxu2  ;;  %v5538_v4 = vadd.f32 %v5537_v63, %v5525_v46  ;;  %v5550_v5 = vpop.f32.mrf.mxu1  ;;  %v1581_v46 = vpack.c.b16 %v1309_v33, %v1309_v33  ;;  %v8906_v62 = vld [vmem:[%s11717_s11 + $0x5e8] sm:$0xf0]  ;;  %v8896_v63 = vld [vmem:[%s11717_s11 + $0x1a0] sm:$0xf] }
 0x1da   : > { %v5551_v10 = vadd.f32 %v5550_v5, %v5538_v4  ;;  %5952 = vmatmul.bf16.vlgmr.msrb.gmra.mxu0 %v1576_v58  ;;  %5965 = vmatmul.bf16.vlgmr.msrb.gmra.mxu1 %v1577_v0  ;;  %v8904_v58 = vld [vmem:[%s11717_s11 + $0x1a8] sm:$0xf]  ;;  %v10849_v0 = vld [vmem:[%s11717_s11 + $0x5dc] sm:$0xf0]  ;;  %v446_v4 = vld [vmem:[%s11710_s22 + $0x190] sm:$0xff] }
 0x1db   : > { %6002 = vmatpush.bf16.xpose.msra.mxu0 %v9953_v27  ;;  %6015 = vmatpush.bf16.xpose.msra.mxu1 %v9957_v29  ;;  %v8889_v27 = vor.u32 %v10848_v13, %v8888_v12  ;;  %v8893_v29 = vor.u32 %v10712_v14, %v8890_v16  ;;  %v10713_v5 = vld [vmem:[%s11717_s11 + $0x1a4] sm:$0xf]  ;;  %v8897_v12 = vor.u32 %v10849_v0, %v8896_v63  ;;  %v1312_v13 = vunpack.c.l.b16 %v446_v4  ;;  %v10024_v0 = vld [vmem:[%s11717_s11 + $0xa48] sm:$0xf] }
 0x1dc   : > { %6028 = vmatpush.bf16.xpose.msra.mxu2 %v9961_v25  ;;  %5991 = vmatmul.bf16.vlgmr.msrb.gmra.mxu3 %v1579_v6  ;;  %v8898_v6 = vld [vmem:[%s11717_s11 + $0x5e0] sm:$0xf0] }
 0x1dd   : > { %6041 = vmatpush.bf16.xpose.msra.mxu3 %v9965_v26  ;;  %5978 = vmatmul.bf16.vlgmr.msrb.gmra.mxu2 %v1578_v1  ;;  %v445_v26 = vld [vmem:[%s11710_s22 + $0x188] sm:$0xff]  ;;  %v8901_v14 = vor.u32 %v10713_v5, %v8898_v6  ;;  %v1584_v22 = vpack.c.b16 %v1312_v13, %v1312_v13  ;;  %v10016_v6 = vld [vmem:[%s11717_s11 + $0xa40] sm:$0xf]  ;;  %v10018_v13 = vld [vmem:[%s11717_s11 + $0xe80] sm:$0xf0] }
 0x1de   : > { %v1310_v34 = vunpack.c.l.b16 %v445_v26  ;;  %v1311_v35 = vunpack.c.h.b16 %v445_v26  ;;  %v10026_v5 = vld [vmem:[%s11717_s11 + $0xe88] sm:$0xf0] }
 0x1df   : > { %v5576_v20 = vpop.f32.mrf.mxu3  ;;  %v5539_v21 = vpop.f32.mrf.mxu0 }
 0x1e0   : > { %v5563_v15 = vpop.f32.mrf.mxu2  ;;  %v5552_v25 = vpop.f32.mrf.mxu1  ;;  %v1583_v52 = vpack.c.b16 %v1311_v35, %v1311_v35 }
 0x1e1   : > { %v5564_v19 = vadd.f32 %v5563_v15, %v5551_v10  ;;  %v1313_v15 = vunpack.c.h.b16 %v446_v4  ;;  %v11123_v25 = vld [vmem:[%s11717_s11 + $0xe6c] sm:$0xf0] }
 0x1e2   : > { %v10001_v37 = vor.u32 %v11123_v25, %v10000_v24  ;;  %v10718_v24 = vld [vmem:[%s11717_s11 + $0x1cc] sm:$0xf] }
 0x1e3   : > { %6003 = vmatpush.bf16.xpose.msra.mxu0 %v8865_v48  ;;  %6016 = vmatpush.bf16.xpose.msra.mxu1 %v8869_v50  ;;  %v5577_v28 = vadd.f32 %v5576_v20, %v5564_v19  ;;  %v10985_v48 = vld [vmem:[%s11717_s11 + $0xa24] sm:$0xf]  ;;  %v11124_v19 = vld [vmem:[%s11717_s11 + $0xe74] sm:$0xf0]  ;;  %v10988_v20 = vld [vmem:[%s11717_s11 + $0xa3c] sm:$0xf] }
 0x1e4   : > { %6029 = vmatpush.bf16.xpose.msra.mxu2 %v8873_v45  ;;  %v9989_v57 = vor.u32 %v10985_v48, %v9986_v49  ;;  %v10009_v35 = vor.u32 %v11124_v19, %v10008_v18  ;;  %v10013_v36 = vor.u32 %v10988_v20, %v10010_v23  ;;  %v10854_v23 = vld [vmem:[%s11717_s11 + $0x604] sm:$0xf0] }
 0x1e5   : > { %6042 = vmatpush.bf16.xpose.msra.mxu3 %v8877_v47  ;;  %v1582_v47 = vpack.c.b16 %v1310_v34, %v1310_v34 }
 0x1e7   : > { %v5578_v44 = vpop.f32.mrf.mxu3  ;;  %v5589_v45 = vpop.f32.mrf.mxu0 }
 0x1e8   : > { %v5565_v39 = vpop.f32.mrf.mxu2  ;;  %v5590_v50 = vadd.f32 %v5589_v45, %v5577_v28  ;;  %v5602_v51 = vpop.f32.mrf.mxu1  ;;  %v1585_v28 = vpack.c.b16 %v1313_v15, %v1313_v15  ;;  %v8922_v44 = vld [vmem:[%s11717_s11 + $0x5f8] sm:$0xf0]  ;;  %v8912_v45 = vld [vmem:[%s11717_s11 + $0x1b0] sm:$0xf] }
 0x1ea   : > { %v5603_v56 = vadd.f32 %v5602_v51, %v5590_v50  ;;  %6004 = vmatmul.bf16.vlgmr.msra.gmra.mxu0 %v1580_v40  ;;  %6017 = vmatmul.bf16.vlgmr.msra.gmra.mxu1 %v1581_v46  ;;  %v8920_v40 = vld [vmem:[%s11717_s11 + $0x1b8] sm:$0xf]  ;;  %v10851_v46 = vld [vmem:[%s11717_s11 + $0x5ec] sm:$0xf0]  ;;  %v448_v50 = vld [vmem:[%s11710_s22 + $0x1a0] sm:$0xff] }
 0x1eb   : > { %6054 = vmatpush.bf16.xpose.msrb.mxu0 %v9969_v9  ;;  %6067 = vmatpush.bf16.xpose.msrb.mxu1 %v9973_v11  ;;  %v8905_v9 = vor.u32 %v10850_v59, %v8904_v58  ;;  %v8909_v11 = vor.u32 %v10714_v60, %v8906_v62  ;;  %v10715_v51 = vld [vmem:[%s11717_s11 + $0x1b4] sm:$0xf]  ;;  %v8913_v58 = vor.u32 %v10851_v46, %v8912_v45  ;;  %v1316_v59 = vunpack.c.l.b16 %v448_v50  ;;  %v10040_v46 = vld [vmem:[%s11717_s11 + $0xa58] sm:$0xf] }
 0x1ec   : > { %6080 = vmatpush.bf16.xpose.msrb.mxu2 %v9977_v7  ;;  %6043 = vmatmul.bf16.vlgmr.msra.gmra.mxu3 %v1583_v52  ;;  %v8914_v52 = vld [vmem:[%s11717_s11 + $0x5f0] sm:$0xf0] }
 0x1ed   : > { %6093 = vmatpush.bf16.xpose.msrb.mxu3 %v9981_v8  ;;  %6030 = vmatmul.bf16.vlgmr.msra.gmra.mxu2 %v1582_v47  ;;  %v447_v8 = vld [vmem:[%s11710_s22 + $0x198] sm:$0xff]  ;;  %v8917_v60 = vor.u32 %v10715_v51, %v8914_v52  ;;  %v1588_v4 = vpack.c.b16 %v1316_v59, %v1316_v59  ;;  %v10032_v52 = vld [vmem:[%s11717_s11 + $0xa50] sm:$0xf]  ;;  %v10034_v59 = vld [vmem:[%s11717_s11 + $0xe90] sm:$0xf0] }
 0x1ee   : > { %v1314_v16 = vunpack.c.l.b16 %v447_v8  ;;  %v1315_v17 = vunpack.c.h.b16 %v447_v8  ;;  %v10042_v51 = vld [vmem:[%s11717_s11 + $0xe98] sm:$0xf0] }
 0x1ef   : > { %v5628_v2 = vpop.f32.mrf.mxu3  ;;  %v5591_v3 = vpop.f32.mrf.mxu0 }
 0x1f0   : > { %v5615_v61 = vpop.f32.mrf.mxu2  ;;  %v5604_v7 = vpop.f32.mrf.mxu1  ;;  %v1587_v34 = vpack.c.b16 %v1315_v17, %v1315_v17 }
 0x1f1   : > { %v5616_v1 = vadd.f32 %v5615_v61, %v5603_v56  ;;  %v1317_v61 = vunpack.c.h.b16 %v448_v50  ;;  %v11125_v7 = vld [vmem:[%s11717_s11 + $0xe7c] sm:$0xf0] }
 0x1f2   : > { %v10017_v19 = vor.u32 %v11125_v7, %v10016_v6  ;;  %v10720_v6 = vld [vmem:[%s11717_s11 + $0x1dc] sm:$0xf] }
 0x1f3   : > { %6055 = vmatpush.bf16.xpose.msrb.mxu0 %v8881_v30  ;;  %6068 = vmatpush.bf16.xpose.msrb.mxu1 %v8885_v32  ;;  %v5629_v10 = vadd.f32 %v5628_v2, %v5616_v1  ;;  %v10987_v30 = vld [vmem:[%s11717_s11 + $0xa34] sm:$0xf]  ;;  %v11126_v1 = vld [vmem:[%s11717_s11 + $0xe84] sm:$0xf0]  ;;  %v10990_v2 = vld [vmem:[%s11717_s11 + $0xa4c] sm:$0xf] }
 0x1f4   : > { %6081 = vmatpush.bf16.xpose.msrb.mxu2 %v8889_v27  ;;  %v10005_v39 = vor.u32 %v10987_v30, %v10002_v31  ;;  %v10025_v17 = vor.u32 %v11126_v1, %v10024_v0  ;;  %v10029_v18 = vor.u32 %v10990_v2, %v10026_v5  ;;  %v10856_v5 = vld [vmem:[%s11717_s11 + $0x614] sm:$0xf0] }
 0x1f5   : > { %6094 = vmatpush.bf16.xpose.msrb.mxu3 %v8893_v29  ;;  %v1586_v29 = vpack.c.b16 %v1314_v16, %v1314_v16 }
 0x1f7   : > { %v5630_v26 = vpop.f32.mrf.mxu3  ;;  %v5641_v27 = vpop.f32.mrf.mxu0 }
 0x1f8   : > { %v5617_v21 = vpop.f32.mrf.mxu2  ;;  %v5642_v32 = vadd.f32 %v5641_v27, %v5629_v10  ;;  %v5654_v33 = vpop.f32.mrf.mxu1  ;;  %v1589_v10 = vpack.c.b16 %v1317_v61, %v1317_v61  ;;  %v8938_v26 = vld [vmem:[%s11717_s11 + $0x608] sm:$0xf0]  ;;  %v8928_v27 = vld [vmem:[%s11717_s11 + $0x1c0] sm:$0xf] }
 0x1fa   : > { %v5655_v38 = vadd.f32 %v5654_v33, %v5642_v32  ;;  %6056 = vmatmul.bf16.vlgmr.msrb.gmra.mxu0 %v1584_v22  ;;  %6069 = vmatmul.bf16.vlgmr.msrb.gmra.mxu1 %v1585_v28  ;;  %v8936_v22 = vld [vmem:[%s11717_s11 + $0x1c8] sm:$0xf]  ;;  %v10853_v28 = vld [vmem:[%s11717_s11 + $0x5fc] sm:$0xf0]  ;;  %v450_v32 = vld [vmem:[%s11710_s22 + $0x1b0] sm:$0xff] }
 0x1fb   : > { %6106 = vmatpush.bf16.xpose.msra.mxu0 %v9985_v55  ;;  %6119 = vmatpush.bf16.xpose.msra.mxu1 %v9989_v57  ;;  %v8921_v55 = vor.u32 %v10852_v41, %v8920_v40  ;;  %v8925_v57 = vor.u32 %v10716_v42, %v8922_v44  ;;  %v10717_v33 = vld [vmem:[%s11717_s11 + $0x1c4] sm:$0xf]  ;;  %v8929_v40 = vor.u32 %v10853_v28, %v8928_v27  ;;  %v1320_v41 = vunpack.c.l.b16 %v450_v32  ;;  %v10056_v28 = vld [vmem:[%s11717_s11 + $0xa68] sm:$0xf] }
 0x1fc   : > { %6132 = vmatpush.bf16.xpose.msra.mxu2 %v9993_v53  ;;  %6095 = vmatmul.bf16.vlgmr.msrb.gmra.mxu3 %v1587_v34  ;;  %v8930_v34 = vld [vmem:[%s11717_s11 + $0x600] sm:$0xf0] }
 0x1fd   : > { %6145 = vmatpush.bf16.xpose.msra.mxu3 %v9997_v54  ;;  %6082 = vmatmul.bf16.vlgmr.msrb.gmra.mxu2 %v1586_v29  ;;  %v449_v54 = vld [vmem:[%s11710_s22 + $0x1a8] sm:$0xff]  ;;  %v8933_v42 = vor.u32 %v10717_v33, %v8930_v34  ;;  %v1592_v50 = vpack.c.b16 %v1320_v41, %v1320_v41  ;;  %v10048_v34 = vld [vmem:[%s11717_s11 + $0xa60] sm:$0xf]  ;;  %v10050_v41 = vld [vmem:[%s11717_s11 + $0xea0] sm:$0xf0] }
 0x1fe   : > { %v1318_v62 = vunpack.c.l.b16 %v449_v54  ;;  %v1319_v63 = vunpack.c.h.b16 %v449_v54  ;;  %v10058_v33 = vld [vmem:[%s11717_s11 + $0xea8] sm:$0xf0] }
 0x1ff   : > { %v5680_v48 = vpop.f32.mrf.mxu3  ;;  %v5643_v49 = vpop.f32.mrf.mxu0 }
 0x200   : > { %v5667_v43 = vpop.f32.mrf.mxu2  ;;  %v5656_v53 = vpop.f32.mrf.mxu1  ;;  %v1591_v16 = vpack.c.b16 %v1319_v63, %v1319_v63 }
 0x201   : > { %v5668_v47 = vadd.f32 %v5667_v43, %v5655_v38  ;;  %v1321_v43 = vunpack.c.h.b16 %v450_v32  ;;  %v11127_v53 = vld [vmem:[%s11717_s11 + $0xe8c] sm:$0xf0] }
 0x202   : > { %v10033_v1 = vor.u32 %v11127_v53, %v10032_v52  ;;  %v10722_v52 = vld [vmem:[%s11717_s11 + $0x1ec] sm:$0xf] }
 0x203   : > { %6107 = vmatpush.bf16.xpose.msra.mxu0 %v8897_v12  ;;  %6120 = vmatpush.bf16.xpose.msra.mxu1 %v8901_v14  ;;  %v5681_v56 = vadd.f32 %v5680_v48, %v5668_v47  ;;  %v10989_v12 = vld [vmem:[%s11717_s11 + $0xa44] sm:$0xf]  ;;  %v11128_v47 = vld [vmem:[%s11717_s11 + $0xe94] sm:$0xf0]  ;;  %v10992_v48 = vld [vmem:[%s11717_s11 + $0xa5c] sm:$0xf] }
 0x204   : > { %6133 = vmatpush.bf16.xpose.msra.mxu2 %v8905_v9  ;;  %v10021_v21 = vor.u32 %v10989_v12, %v10018_v13  ;;  %v10041_v63 = vor.u32 %v11128_v47, %v10040_v46  ;;  %v10045_v0 = vor.u32 %v10992_v48, %v10042_v51  ;;  %v10858_v51 = vld [vmem:[%s11717_s11 + $0x624] sm:$0xf0] }
 0x205   : > { %6146 = vmatpush.bf16.xpose.msra.mxu3 %v8909_v11  ;;  %v1590_v11 = vpack.c.b16 %v1318_v62, %v1318_v62 }
 0x207   : > { %v5682_v8 = vpop.f32.mrf.mxu3  ;;  %v5693_v9 = vpop.f32.mrf.mxu0 }
 0x208   : > { %v5669_v3 = vpop.f32.mrf.mxu2  ;;  %v5694_v14 = vadd.f32 %v5693_v9, %v5681_v56  ;;  %v5706_v15 = vpop.f32.mrf.mxu1  ;;  %v1593_v56 = vpack.c.b16 %v1321_v43, %v1321_v43  ;;  %v8954_v8 = vld [vmem:[%s11717_s11 + $0x618] sm:$0xf0]  ;;  %v8944_v9 = vld [vmem:[%s11717_s11 + $0x1d0] sm:$0xf] }
 0x20a   : > { %v5707_v20 = vadd.f32 %v5706_v15, %v5694_v14  ;;  %6108 = vmatmul.bf16.vlgmr.msra.gmra.mxu0 %v1588_v4  ;;  %6121 = vmatmul.bf16.vlgmr.msra.gmra.mxu1 %v1589_v10  ;;  %v8952_v4 = vld [vmem:[%s11717_s11 + $0x1d8] sm:$0xf]  ;;  %v10855_v10 = vld [vmem:[%s11717_s11 + $0x60c] sm:$0xf0]  ;;  %v452_v14 = vld [vmem:[%s11710_s22 + $0x1c0] sm:$0xff] }
 0x20b   : > { %6158 = vmatpush.bf16.xpose.msrb.mxu0 %v10001_v37  ;;  %6171 = vmatpush.bf16.xpose.msrb.mxu1 %v10005_v39  ;;  %v8937_v37 = vor.u32 %v10854_v23, %v8936_v22  ;;  %v8941_v39 = vor.u32 %v10718_v24, %v8938_v26  ;;  %v10719_v15 = vld [vmem:[%s11717_s11 + $0x1d4] sm:$0xf]  ;;  %v8945_v22 = vor.u32 %v10855_v10, %v8944_v9  ;;  %v1324_v23 = vunpack.c.l.b16 %v452_v14  ;;  %v10072_v10 = vld [vmem:[%s11717_s11 + $0xa78] sm:$0xf] }
 0x20c   : > { %6184 = vmatpush.bf16.xpose.msrb.mxu2 %v10009_v35  ;;  %6147 = vmatmul.bf16.vlgmr.msra.gmra.mxu3 %v1591_v16  ;;  %v8946_v16 = vld [vmem:[%s11717_s11 + $0x610] sm:$0xf0] }
 0x20d   : > { %6197 = vmatpush.bf16.xpose.msrb.mxu3 %v10013_v36  ;;  %6134 = vmatmul.bf16.vlgmr.msra.gmra.mxu2 %v1590_v11  ;;  %v451_v36 = vld [vmem:[%s11710_s22 + $0x1b8] sm:$0xff]  ;;  %v8949_v24 = vor.u32 %v10719_v15, %v8946_v16  ;;  %v1596_v32 = vpack.c.b16 %v1324_v23, %v1324_v23  ;;  %v10064_v16 = vld [vmem:[%s11717_s11 + $0xa70] sm:$0xf]  ;;  %v10066_v23 = vld [vmem:[%s11717_s11 + $0xeb0] sm:$0xf0] }
 0x20e   : > { %v1322_v44 = vunpack.c.l.b16 %v451_v36  ;;  %v1323_v45 = vunpack.c.h.b16 %v451_v36  ;;  %v10074_v15 = vld [vmem:[%s11717_s11 + $0xeb8] sm:$0xf0] }
 0x20f   : > { %v5732_v30 = vpop.f32.mrf.mxu3  ;;  %v5695_v31 = vpop.f32.mrf.mxu0 }
 0x210   : > { %v5719_v25 = vpop.f32.mrf.mxu2  ;;  %v5708_v35 = vpop.f32.mrf.mxu1  ;;  %v1595_v62 = vpack.c.b16 %v1323_v45, %v1323_v45 }
 0x211   : > { %v5720_v29 = vadd.f32 %v5719_v25, %v5707_v20  ;;  %v1325_v25 = vunpack.c.h.b16 %v452_v14  ;;  %v11129_v35 = vld [vmem:[%s11717_s11 + $0xe9c] sm:$0xf0] }
 0x212   : > { %v10049_v47 = vor.u32 %v11129_v35, %v10048_v34  ;;  %v10724_v34 = vld [vmem:[%s11717_s11 + $0x1fc] sm:$0xf] }
 0x213   : > { %6159 = vmatpush.bf16.xpose.msrb.mxu0 %v8913_v58  ;;  %6172 = vmatpush.bf16.xpose.msrb.mxu1 %v8917_v60  ;;  %v5733_v38 = vadd.f32 %v5732_v30, %v5720_v29  ;;  %v10991_v58 = vld [vmem:[%s11717_s11 + $0xa54] sm:$0xf]  ;;  %v11130_v29 = vld [vmem:[%s11717_s11 + $0xea4] sm:$0xf0]  ;;  %v10994_v30 = vld [vmem:[%s11717_s11 + $0xa6c] sm:$0xf] }
 0x214   : > { %6185 = vmatpush.bf16.xpose.msrb.mxu2 %v8921_v55  ;;  %v10037_v3 = vor.u32 %v10991_v58, %v10034_v59  ;;  %v10057_v45 = vor.u32 %v11130_v29, %v10056_v28  ;;  %v10061_v46 = vor.u32 %v10994_v30, %v10058_v33  ;;  %v10860_v33 = vld [vmem:[%s11717_s11 + $0x634] sm:$0xf0] }
 0x215   : > { %6198 = vmatpush.bf16.xpose.msrb.mxu3 %v8925_v57  ;;  %v1594_v57 = vpack.c.b16 %v1322_v44, %v1322_v44 }
 0x217   : > { %v5734_v54 = vpop.f32.mrf.mxu3  ;;  %v5745_v55 = vpop.f32.mrf.mxu0 }
 0x218   : > { %v5721_v49 = vpop.f32.mrf.mxu2  ;;  %v5746_v60 = vadd.f32 %v5745_v55, %v5733_v38  ;;  %v5758_v61 = vpop.f32.mrf.mxu1  ;;  %v1597_v38 = vpack.c.b16 %v1325_v25, %v1325_v25  ;;  %v8970_v54 = vld [vmem:[%s11717_s11 + $0x628] sm:$0xf0]  ;;  %v8960_v55 = vld [vmem:[%s11717_s11 + $0x1e0] sm:$0xf] }
 0x21a   : > { %v5759_v2 = vadd.f32 %v5758_v61, %v5746_v60  ;;  %6160 = vmatmul.bf16.vlgmr.msrb.gmra.mxu0 %v1592_v50  ;;  %6173 = vmatmul.bf16.vlgmr.msrb.gmra.mxu1 %v1593_v56  ;;  %v8968_v50 = vld [vmem:[%s11717_s11 + $0x1e8] sm:$0xf]  ;;  %v10857_v56 = vld [vmem:[%s11717_s11 + $0x61c] sm:$0xf0]  ;;  %v454_v60 = vld [vmem:[%s11710_s22 + $0x1d0] sm:$0xff] }
 0x21b   : > { %6210 = vmatpush.bf16.xpose.msra.mxu0 %v10017_v19  ;;  %6223 = vmatpush.bf16.xpose.msra.mxu1 %v10021_v21  ;;  %v8953_v19 = vor.u32 %v10856_v5, %v8952_v4  ;;  %v8957_v21 = vor.u32 %v10720_v6, %v8954_v8  ;;  %v10721_v61 = vld [vmem:[%s11717_s11 + $0x1e4] sm:$0xf]  ;;  %v8961_v4 = vor.u32 %v10857_v56, %v8960_v55  ;;  %v1328_v5 = vunpack.c.l.b16 %v454_v60  ;;  %v10088_v56 = vld [vmem:[%s11717_s11 + $0xa88] sm:$0xf] }
 0x21c   : > { %6236 = vmatpush.bf16.xpose.msra.mxu2 %v10025_v17  ;;  %6199 = vmatmul.bf16.vlgmr.msrb.gmra.mxu3 %v1595_v62  ;;  %v8962_v62 = vld [vmem:[%s11717_s11 + $0x620] sm:$0xf0] }
 0x21d   : > { %6249 = vmatpush.bf16.xpose.msra.mxu3 %v10029_v18  ;;  %6186 = vmatmul.bf16.vlgmr.msrb.gmra.mxu2 %v1594_v57  ;;  %v453_v18 = vld [vmem:[%s11710_s22 + $0x1c8] sm:$0xff]  ;;  %v8965_v6 = vor.u32 %v10721_v61, %v8962_v62  ;;  %v1600_v14 = vpack.c.b16 %v1328_v5, %v1328_v5  ;;  %v10080_v62 = vld [vmem:[%s11717_s11 + $0xa80] sm:$0xf]  ;;  %v10082_v5 = vld [vmem:[%s11717_s11 + $0xec0] sm:$0xf0] }
 0x21e   : > { %v1326_v26 = vunpack.c.l.b16 %v453_v18  ;;  %v1327_v27 = vunpack.c.h.b16 %v453_v18  ;;  %v10090_v61 = vld [vmem:[%s11717_s11 + $0xec8] sm:$0xf0] }
 0x21f   : > { %v5784_v12 = vpop.f32.mrf.mxu3  ;;  %v5747_v13 = vpop.f32.mrf.mxu0 }
 0x220   : > { %v5771_v7 = vpop.f32.mrf.mxu2  ;;  %v5760_v17 = vpop.f32.mrf.mxu1  ;;  %v1599_v44 = vpack.c.b16 %v1327_v27, %v1327_v27 }
 0x221   : > { %v5772_v11 = vadd.f32 %v5771_v7, %v5759_v2  ;;  %v1329_v7 = vunpack.c.h.b16 %v454_v60  ;;  %v11131_v17 = vld [vmem:[%s11717_s11 + $0xeac] sm:$0xf0] }
 0x222   : > { %v10065_v29 = vor.u32 %v11131_v17, %v10064_v16  ;;  %v10726_v16 = vld [vmem:[%s11717_s11 + $0x20c] sm:$0xf] }
 0x223   : > { %6211 = vmatpush.bf16.xpose.msra.mxu0 %v8929_v40  ;;  %6224 = vmatpush.bf16.xpose.msra.mxu1 %v8933_v42  ;;  %v5785_v20 = vadd.f32 %v5784_v12, %v5772_v11  ;;  %v10993_v40 = vld [vmem:[%s11717_s11 + $0xa64] sm:$0xf]  ;;  %v11132_v11 = vld [vmem:[%s11717_s11 + $0xeb4] sm:$0xf0]  ;;  %v10996_v12 = vld [vmem:[%s11717_s11 + $0xa7c] sm:$0xf] }
 0x224   : > { %6237 = vmatpush.bf16.xpose.msra.mxu2 %v8937_v37  ;;  %v10053_v49 = vor.u32 %v10993_v40, %v10050_v41  ;;  %v10073_v27 = vor.u32 %v11132_v11, %v10072_v10  ;;  %v10077_v28 = vor.u32 %v10996_v12, %v10074_v15  ;;  %v10862_v15 = vld [vmem:[%s11717_s11 + $0x644] sm:$0xf0] }
 0x225   : > { %6250 = vmatpush.bf16.xpose.msra.mxu3 %v8941_v39  ;;  %v1598_v39 = vpack.c.b16 %v1326_v26, %v1326_v26 }
 0x227   : > { %v5786_v36 = vpop.f32.mrf.mxu3  ;;  %v5797_v37 = vpop.f32.mrf.mxu0 }
 0x228   : > { %v5773_v31 = vpop.f32.mrf.mxu2  ;;  %v5798_v42 = vadd.f32 %v5797_v37, %v5785_v20  ;;  %v5810_v43 = vpop.f32.mrf.mxu1  ;;  %v1601_v20 = vpack.c.b16 %v1329_v7, %v1329_v7  ;;  %v8986_v36 = vld [vmem:[%s11717_s11 + $0x638] sm:$0xf0]  ;;  %v8976_v37 = vld [vmem:[%s11717_s11 + $0x1f0] sm:$0xf] }
 0x22a   : > { %v5811_v48 = vadd.f32 %v5810_v43, %v5798_v42  ;;  %6212 = vmatmul.bf16.vlgmr.msra.gmra.mxu0 %v1596_v32  ;;  %6225 = vmatmul.bf16.vlgmr.msra.gmra.mxu1 %v1597_v38  ;;  %v8984_v32 = vld [vmem:[%s11717_s11 + $0x1f8] sm:$0xf]  ;;  %v10859_v38 = vld [vmem:[%s11717_s11 + $0x62c] sm:$0xf0]  ;;  %v456_v42 = vld [vmem:[%s11710_s22 + $0x1e0] sm:$0xff] }
 0x22b   : > { %6262 = vmatpush.bf16.xpose.msrb.mxu0 %v10033_v1  ;;  %6275 = vmatpush.bf16.xpose.msrb.mxu1 %v10037_v3  ;;  %v8969_v1 = vor.u32 %v10858_v51, %v8968_v50  ;;  %v8973_v3 = vor.u32 %v10722_v52, %v8970_v54  ;;  %v10723_v43 = vld [vmem:[%s11717_s11 + $0x1f4] sm:$0xf]  ;;  %v8977_v50 = vor.u32 %v10859_v38, %v8976_v37  ;;  %v1332_v51 = vunpack.c.l.b16 %v456_v42  ;;  %v10104_v38 = vld [vmem:[%s11717_s11 + $0xa98] sm:$0xf] }
 0x22c   : > { %6288 = vmatpush.bf16.xpose.msrb.mxu2 %v10041_v63  ;;  %6251 = vmatmul.bf16.vlgmr.msra.gmra.mxu3 %v1599_v44  ;;  %v8978_v44 = vld [vmem:[%s11717_s11 + $0x630] sm:$0xf0] }
 0x22d   : > { %6301 = vmatpush.bf16.xpose.msrb.mxu3 %v10045_v0  ;;  %6238 = vmatmul.bf16.vlgmr.msra.gmra.mxu2 %v1598_v39  ;;  %v455_v0 = vld [vmem:[%s11710_s22 + $0x1d8] sm:$0xff]  ;;  %v8981_v52 = vor.u32 %v10723_v43, %v8978_v44  ;;  %v1604_v60 = vpack.c.b16 %v1332_v51, %v1332_v51  ;;  %v10096_v44 = vld [vmem:[%s11717_s11 + $0xa90] sm:$0xf]  ;;  %v10098_v51 = vld [vmem:[%s11717_s11 + $0xed0] sm:$0xf0] }
 0x22e   : > { %v1330_v8 = vunpack.c.l.b16 %v455_v0  ;;  %v1331_v9 = vunpack.c.h.b16 %v455_v0  ;;  %v10106_v43 = vld [vmem:[%s11717_s11 + $0xed8] sm:$0xf0] }
 0x22f   : > { %v5836_v58 = vpop.f32.mrf.mxu3  ;;  %v5799_v59 = vpop.f32.mrf.mxu0 }
 0x230   : > { %v5823_v53 = vpop.f32.mrf.mxu2  ;;  %v5812_v63 = vpop.f32.mrf.mxu1  ;;  %v1603_v26 = vpack.c.b16 %v1331_v9, %v1331_v9 }
 0x231   : > { %v5824_v57 = vadd.f32 %v5823_v53, %v5811_v48  ;;  %v1333_v53 = vunpack.c.h.b16 %v456_v42  ;;  %v11133_v63 = vld [vmem:[%s11717_s11 + $0xebc] sm:$0xf0] }
 0x232   : > { %v10081_v11 = vor.u32 %v11133_v63, %v10080_v62  ;;  %v10728_v62 = vld [vmem:[%s11717_s11 + $0x21c] sm:$0xf] }
 0x233   : > { %6263 = vmatpush.bf16.xpose.msrb.mxu0 %v8945_v22  ;;  %6276 = vmatpush.bf16.xpose.msrb.mxu1 %v8949_v24  ;;  %v5837_v2 = vadd.f32 %v5836_v58, %v5824_v57  ;;  %v10995_v22 = vld [vmem:[%s11717_s11 + $0xa74] sm:$0xf]  ;;  %v11134_v57 = vld [vmem:[%s11717_s11 + $0xec4] sm:$0xf0]  ;;  %v10998_v58 = vld [vmem:[%s11717_s11 + $0xa8c] sm:$0xf] }
 0x234   : > { %6289 = vmatpush.bf16.xpose.msrb.mxu2 %v8953_v19  ;;  %v10069_v31 = vor.u32 %v10995_v22, %v10066_v23  ;;  %v10089_v9 = vor.u32 %v11134_v57, %v10088_v56  ;;  %v10093_v10 = vor.u32 %v10998_v58, %v10090_v61  ;;  %v10864_v61 = vld [vmem:[%s11717_s11 + $0x654] sm:$0xf0] }
 0x235   : > { %6302 = vmatpush.bf16.xpose.msrb.mxu3 %v8957_v21  ;;  %v1602_v21 = vpack.c.b16 %v1330_v8, %v1330_v8 }
 0x237   : > { %v5838_v18 = vpop.f32.mrf.mxu3  ;;  %v5849_v19 = vpop.f32.mrf.mxu0 }
 0x238   : > { %v5825_v13 = vpop.f32.mrf.mxu2  ;;  %v5850_v24 = vadd.f32 %v5849_v19, %v5837_v2  ;;  %v5862_v25 = vpop.f32.mrf.mxu1  ;;  %v1605_v2 = vpack.c.b16 %v1333_v53, %v1333_v53  ;;  %v9002_v18 = vld [vmem:[%s11717_s11 + $0x648] sm:$0xf0]  ;;  %v8992_v19 = vld [vmem:[%s11717_s11 + $0x200] sm:$0xf] }
 0x23a   : > { %v5863_v30 = vadd.f32 %v5862_v25, %v5850_v24  ;;  %6264 = vmatmul.bf16.vlgmr.msrb.gmra.mxu0 %v1600_v14  ;;  %6277 = vmatmul.bf16.vlgmr.msrb.gmra.mxu1 %v1601_v20  ;;  %v9000_v14 = vld [vmem:[%s11717_s11 + $0x208] sm:$0xf]  ;;  %v10861_v20 = vld [vmem:[%s11717_s11 + $0x63c] sm:$0xf0]  ;;  %v458_v24 = vld [vmem:[%s11710_s22 + $0x1f0] sm:$0xff] }
 0x23b   : > { %6314 = vmatpush.bf16.xpose.msra.mxu0 %v10049_v47  ;;  %6327 = vmatpush.bf16.xpose.msra.mxu1 %v10053_v49  ;;  %v8985_v47 = vor.u32 %v10860_v33, %v8984_v32  ;;  %v8989_v49 = vor.u32 %v10724_v34, %v8986_v36  ;;  %v10725_v25 = vld [vmem:[%s11717_s11 + $0x204] sm:$0xf]  ;;  %v8993_v32 = vor.u32 %v10861_v20, %v8992_v19  ;;  %v1336_v33 = vunpack.c.l.b16 %v458_v24  ;;  %v10120_v20 = vld [vmem:[%s11717_s11 + $0xaa8] sm:$0xf] }
 0x23c   : > { %6340 = vmatpush.bf16.xpose.msra.mxu2 %v10057_v45  ;;  %6303 = vmatmul.bf16.vlgmr.msrb.gmra.mxu3 %v1603_v26  ;;  %v8994_v26 = vld [vmem:[%s11717_s11 + $0x640] sm:$0xf0] }
 0x23d   : > { %6353 = vmatpush.bf16.xpose.msra.mxu3 %v10061_v46  ;;  %6290 = vmatmul.bf16.vlgmr.msrb.gmra.mxu2 %v1602_v21  ;;  %v457_v46 = vld [vmem:[%s11710_s22 + $0x1e8] sm:$0xff]  ;;  %v8997_v34 = vor.u32 %v10725_v25, %v8994_v26  ;;  %v1608_v42 = vpack.c.b16 %v1336_v33, %v1336_v33  ;;  %v10112_v26 = vld [vmem:[%s11717_s11 + $0xaa0] sm:$0xf]  ;;  %v10114_v33 = vld [vmem:[%s11717_s11 + $0xee0] sm:$0xf0] }
 0x23e   : > { %v1334_v54 = vunpack.c.l.b16 %v457_v46  ;;  %v1335_v55 = vunpack.c.h.b16 %v457_v46  ;;  %v10122_v25 = vld [vmem:[%s11717_s11 + $0xee8] sm:$0xf0] }
 0x23f   : > { %v5888_v40 = vpop.f32.mrf.mxu3  ;;  %v5851_v41 = vpop.f32.mrf.mxu0 }
 0x240   : > { %v5875_v35 = vpop.f32.mrf.mxu2  ;;  %v5864_v45 = vpop.f32.mrf.mxu1  ;;  %v1607_v8 = vpack.c.b16 %v1335_v55, %v1335_v55 }
 0x241   : > { %v5876_v39 = vadd.f32 %v5875_v35, %v5863_v30  ;;  %v1337_v35 = vunpack.c.h.b16 %v458_v24  ;;  %v11135_v45 = vld [vmem:[%s11717_s11 + $0xecc] sm:$0xf0] }
 0x242   : > { %v10097_v57 = vor.u32 %v11135_v45, %v10096_v44  ;;  %v10730_v44 = vld [vmem:[%s11717_s11 + $0x22c] sm:$0xf] }
 0x243   : > { %6315 = vmatpush.bf16.xpose.msra.mxu0 %v8961_v4  ;;  %6328 = vmatpush.bf16.xpose.msra.mxu1 %v8965_v6  ;;  %v5889_v48 = vadd.f32 %v5888_v40, %v5876_v39  ;;  %v10997_v4 = vld [vmem:[%s11717_s11 + $0xa84] sm:$0xf]  ;;  %v11136_v39 = vld [vmem:[%s11717_s11 + $0xed4] sm:$0xf0]  ;;  %v11000_v40 = vld [vmem:[%s11717_s11 + $0xa9c] sm:$0xf] }
 0x244   : > { %6341 = vmatpush.bf16.xpose.msra.mxu2 %v8969_v1  ;;  %v10085_v13 = vor.u32 %v10997_v4, %v10082_v5  ;;  %v10105_v55 = vor.u32 %v11136_v39, %v10104_v38  ;;  %v10109_v56 = vor.u32 %v11000_v40, %v10106_v43  ;;  %v10866_v43 = vld [vmem:[%s11717_s11 + $0x664] sm:$0xf0] }
 0x245   : > { %6354 = vmatpush.bf16.xpose.msra.mxu3 %v8973_v3  ;;  %v1606_v3 = vpack.c.b16 %v1334_v54, %v1334_v54 }
 0x247   : > { %v5890_v0 = vpop.f32.mrf.mxu3  ;;  %v5901_v1 = vpop.f32.mrf.mxu0 }
 0x248   : > { %v5877_v59 = vpop.f32.mrf.mxu2  ;;  %v5902_v6 = vadd.f32 %v5901_v1, %v5889_v48  ;;  %v5914_v7 = vpop.f32.mrf.mxu1  ;;  %v1609_v48 = vpack.c.b16 %v1337_v35, %v1337_v35  ;;  %v9018_v0 = vld [vmem:[%s11717_s11 + $0x658] sm:$0xf0]  ;;  %v9008_v1 = vld [vmem:[%s11717_s11 + $0x210] sm:$0xf] }
 0x24a   : > { %v5915_v12 = vadd.f32 %v5914_v7, %v5902_v6  ;;  %6316 = vmatmul.bf16.vlgmr.msra.gmra.mxu0 %v1604_v60  ;;  %6329 = vmatmul.bf16.vlgmr.msra.gmra.mxu1 %v1605_v2  ;;  %v9016_v60 = vld [vmem:[%s11717_s11 + $0x218] sm:$0xf]  ;;  %v10863_v2 = vld [vmem:[%s11717_s11 + $0x64c] sm:$0xf0]  ;;  %v460_v6 = vld [vmem:[%s11710_s22 + $0x200] sm:$0xff] }
 0x24b   : > { %6366 = vmatpush.bf16.xpose.msrb.mxu0 %v10065_v29  ;;  %6379 = vmatpush.bf16.xpose.msrb.mxu1 %v10069_v31  ;;  %v9001_v29 = vor.u32 %v10862_v15, %v9000_v14  ;;  %v9005_v31 = vor.u32 %v10726_v16, %v9002_v18  ;;  %v10727_v7 = vld [vmem:[%s11717_s11 + $0x214] sm:$0xf]  ;;  %v9009_v14 = vor.u32 %v10863_v2, %v9008_v1  ;;  %v1340_v15 = vunpack.c.l.b16 %v460_v6  ;;  %v10136_v2 = vld [vmem:[%s11717_s11 + $0xab8] sm:$0xf] }
 0x24c   : > { %6392 = vmatpush.bf16.xpose.msrb.mxu2 %v10073_v27  ;;  %6355 = vmatmul.bf16.vlgmr.msra.gmra.mxu3 %v1607_v8  ;;  %v9010_v8 = vld [vmem:[%s11717_s11 + $0x650] sm:$0xf0] }
 0x24d   : > { %6405 = vmatpush.bf16.xpose.msrb.mxu3 %v10077_v28  ;;  %6342 = vmatmul.bf16.vlgmr.msra.gmra.mxu2 %v1606_v3  ;;  %v459_v28 = vld [vmem:[%s11710_s22 + $0x1f8] sm:$0xff]  ;;  %v9013_v16 = vor.u32 %v10727_v7, %v9010_v8  ;;  %v1612_v24 = vpack.c.b16 %v1340_v15, %v1340_v15  ;;  %v10128_v8 = vld [vmem:[%s11717_s11 + $0xab0] sm:$0xf]  ;;  %v10130_v15 = vld [vmem:[%s11717_s11 + $0xef0] sm:$0xf0] }
 0x24e   : > { %v1338_v36 = vunpack.c.l.b16 %v459_v28  ;;  %v1339_v37 = vunpack.c.h.b16 %v459_v28  ;;  %v10138_v7 = vld [vmem:[%s11717_s11 + $0xef8] sm:$0xf0] }
 0x24f   : > { %v5940_v22 = vpop.f32.mrf.mxu3  ;;  %v5903_v23 = vpop.f32.mrf.mxu0 }
 0x250   : > { %v5927_v17 = vpop.f32.mrf.mxu2  ;;  %v5916_v27 = vpop.f32.mrf.mxu1  ;;  %v1611_v54 = vpack.c.b16 %v1339_v37, %v1339_v37 }
 0x251   : > { %v5928_v21 = vadd.f32 %v5927_v17, %v5915_v12  ;;  %v1341_v17 = vunpack.c.h.b16 %v460_v6  ;;  %v11137_v27 = vld [vmem:[%s11717_s11 + $0xedc] sm:$0xf0] }
 0x252   : > { %v10113_v39 = vor.u32 %v11137_v27, %v10112_v26  ;;  %v10732_v26 = vld [vmem:[%s11717_s11 + $0x23c] sm:$0xf] }
 0x253   : > { %6367 = vmatpush.bf16.xpose.msrb.mxu0 %v8977_v50  ;;  %6380 = vmatpush.bf16.xpose.msrb.mxu1 %v8981_v52  ;;  %v5941_v30 = vadd.f32 %v5940_v22, %v5928_v21  ;;  %v10999_v50 = vld [vmem:[%s11717_s11 + $0xa94] sm:$0xf]  ;;  %v11138_v21 = vld [vmem:[%s11717_s11 + $0xee4] sm:$0xf0]  ;;  %v11002_v22 = vld [vmem:[%s11717_s11 + $0xaac] sm:$0xf] }
 0x254   : > { %6393 = vmatpush.bf16.xpose.msrb.mxu2 %v8985_v47  ;;  %v10101_v59 = vor.u32 %v10999_v50, %v10098_v51  ;;  %v10121_v37 = vor.u32 %v11138_v21, %v10120_v20  ;;  %v10125_v38 = vor.u32 %v11002_v22, %v10122_v25  ;;  %v10868_v25 = vld [vmem:[%s11717_s11 + $0x674] sm:$0xf0] }
 0x255   : > { %6406 = vmatpush.bf16.xpose.msrb.mxu3 %v8989_v49  ;;  %v1610_v49 = vpack.c.b16 %v1338_v36, %v1338_v36 }
 0x257   : > { %v5942_v46 = vpop.f32.mrf.mxu3  ;;  %v5953_v47 = vpop.f32.mrf.mxu0 }
 0x258   : > { %v5929_v41 = vpop.f32.mrf.mxu2  ;;  %v5954_v52 = vadd.f32 %v5953_v47, %v5941_v30  ;;  %v5966_v53 = vpop.f32.mrf.mxu1  ;;  %v1613_v30 = vpack.c.b16 %v1341_v17, %v1341_v17  ;;  %v9034_v46 = vld [vmem:[%s11717_s11 + $0x668] sm:$0xf0]  ;;  %v9024_v47 = vld [vmem:[%s11717_s11 + $0x220] sm:$0xf] }
 0x25a   : > { %v5967_v58 = vadd.f32 %v5966_v53, %v5954_v52  ;;  %6368 = vmatmul.bf16.vlgmr.msrb.gmra.mxu0 %v1608_v42  ;;  %6381 = vmatmul.bf16.vlgmr.msrb.gmra.mxu1 %v1609_v48  ;;  %v9032_v42 = vld [vmem:[%s11717_s11 + $0x228] sm:$0xf]  ;;  %v10865_v48 = vld [vmem:[%s11717_s11 + $0x65c] sm:$0xf0]  ;;  %v462_v52 = vld [vmem:[%s11710_s22 + $0x210] sm:$0xff] }
 0x25b   : > { %6418 = vmatpush.bf16.xpose.msra.mxu0 %v10081_v11  ;;  %6431 = vmatpush.bf16.xpose.msra.mxu1 %v10085_v13  ;;  %v9017_v11 = vor.u32 %v10864_v61, %v9016_v60  ;;  %v9021_v13 = vor.u32 %v10728_v62, %v9018_v0  ;;  %v10729_v53 = vld [vmem:[%s11717_s11 + $0x224] sm:$0xf]  ;;  %v9025_v60 = vor.u32 %v10865_v48, %v9024_v47  ;;  %v1344_v61 = vunpack.c.l.b16 %v462_v52  ;;  %v10152_v48 = vld [vmem:[%s11717_s11 + $0xac8] sm:$0xf] }
 0x25c   : > { %6444 = vmatpush.bf16.xpose.msra.mxu2 %v10089_v9  ;;  %6407 = vmatmul.bf16.vlgmr.msrb.gmra.mxu3 %v1611_v54  ;;  %v9026_v54 = vld [vmem:[%s11717_s11 + $0x660] sm:$0xf0] }
 0x25d   : > { %6457 = vmatpush.bf16.xpose.msra.mxu3 %v10093_v10  ;;  %6394 = vmatmul.bf16.vlgmr.msrb.gmra.mxu2 %v1610_v49  ;;  %v461_v10 = vld [vmem:[%s11710_s22 + $0x208] sm:$0xff]  ;;  %v9029_v62 = vor.u32 %v10729_v53, %v9026_v54  ;;  %v1616_v6 = vpack.c.b16 %v1344_v61, %v1344_v61  ;;  %v10144_v54 = vld [vmem:[%s11717_s11 + $0xac0] sm:$0xf]  ;;  %v10146_v61 = vld [vmem:[%s11717_s11 + $0xf00] sm:$0xf0] }
 0x25e   : > { %v1342_v18 = vunpack.c.l.b16 %v461_v10  ;;  %v1343_v19 = vunpack.c.h.b16 %v461_v10  ;;  %v10154_v53 = vld [vmem:[%s11717_s11 + $0xf08] sm:$0xf0] }
 0x25f   : > { %v5992_v4 = vpop.f32.mrf.mxu3  ;;  %v5955_v5 = vpop.f32.mrf.mxu0 }
 0x260   : > { %v5979_v63 = vpop.f32.mrf.mxu2  ;;  %v5968_v9 = vpop.f32.mrf.mxu1  ;;  %v1615_v36 = vpack.c.b16 %v1343_v19, %v1343_v19 }
 0x261   : > { %v5980_v3 = vadd.f32 %v5979_v63, %v5967_v58  ;;  %v1345_v63 = vunpack.c.h.b16 %v462_v52  ;;  %v11139_v9 = vld [vmem:[%s11717_s11 + $0xeec] sm:$0xf0] }
 0x262   : > { %v10129_v21 = vor.u32 %v11139_v9, %v10128_v8  ;;  %v10734_v8 = vld [vmem:[%s11717_s11 + $0x24c] sm:$0xf] }
 0x263   : > { %6419 = vmatpush.bf16.xpose.msra.mxu0 %v8993_v32  ;;  %6432 = vmatpush.bf16.xpose.msra.mxu1 %v8997_v34  ;;  %v5993_v12 = vadd.f32 %v5992_v4, %v5980_v3  ;;  %v11001_v32 = vld [vmem:[%s11717_s11 + $0xaa4] sm:$0xf]  ;;  %v11140_v3 = vld [vmem:[%s11717_s11 + $0xef4] sm:$0xf0]  ;;  %v11004_v4 = vld [vmem:[%s11717_s11 + $0xabc] sm:$0xf] }
 0x264   : > { %6445 = vmatpush.bf16.xpose.msra.mxu2 %v9001_v29  ;;  %v10117_v41 = vor.u32 %v11001_v32, %v10114_v33  ;;  %v10137_v19 = vor.u32 %v11140_v3, %v10136_v2  ;;  %v10141_v20 = vor.u32 %v11004_v4, %v10138_v7  ;;  %v10870_v7 = vld [vmem:[%s11717_s11 + $0x684] sm:$0xf0] }
 0x265   : > { %6458 = vmatpush.bf16.xpose.msra.mxu3 %v9005_v31  ;;  %v1614_v31 = vpack.c.b16 %v1342_v18, %v1342_v18 }
 0x267   : > { %v5994_v28 = vpop.f32.mrf.mxu3  ;;  %v6005_v29 = vpop.f32.mrf.mxu0 }
 0x268   : > { %v5981_v23 = vpop.f32.mrf.mxu2  ;;  %v6006_v34 = vadd.f32 %v6005_v29, %v5993_v12  ;;  %v6018_v35 = vpop.f32.mrf.mxu1  ;;  %v1617_v12 = vpack.c.b16 %v1345_v63, %v1345_v63  ;;  %v9050_v28 = vld [vmem:[%s11717_s11 + $0x678] sm:$0xf0]  ;;  %v9040_v29 = vld [vmem:[%s11717_s11 + $0x230] sm:$0xf] }
 0x26a   : > { %v6019_v40 = vadd.f32 %v6018_v35, %v6006_v34  ;;  %6420 = vmatmul.bf16.vlgmr.msra.gmra.mxu0 %v1612_v24  ;;  %6433 = vmatmul.bf16.vlgmr.msra.gmra.mxu1 %v1613_v30  ;;  %v9048_v24 = vld [vmem:[%s11717_s11 + $0x238] sm:$0xf]  ;;  %v10867_v30 = vld [vmem:[%s11717_s11 + $0x66c] sm:$0xf0]  ;;  %v464_v34 = vld [vmem:[%s11710_s22 + $0x220] sm:$0xff] }
 0x26b   : > { %6470 = vmatpush.bf16.xpose.msrb.mxu0 %v10097_v57  ;;  %6483 = vmatpush.bf16.xpose.msrb.mxu1 %v10101_v59  ;;  %v9033_v57 = vor.u32 %v10866_v43, %v9032_v42  ;;  %v9037_v59 = vor.u32 %v10730_v44, %v9034_v46  ;;  %v10731_v35 = vld [vmem:[%s11717_s11 + $0x234] sm:$0xf]  ;;  %v9041_v42 = vor.u32 %v10867_v30, %v9040_v29  ;;  %v1348_v43 = vunpack.c.l.b16 %v464_v34  ;;  %v10168_v30 = vld [vmem:[%s11717_s11 + $0xad8] sm:$0xf] }
 0x26c   : > { %6496 = vmatpush.bf16.xpose.msrb.mxu2 %v10105_v55  ;;  %6459 = vmatmul.bf16.vlgmr.msra.gmra.mxu3 %v1615_v36  ;;  %v9042_v36 = vld [vmem:[%s11717_s11 + $0x670] sm:$0xf0] }
 0x26d   : > { %6509 = vmatpush.bf16.xpose.msrb.mxu3 %v10109_v56  ;;  %6446 = vmatmul.bf16.vlgmr.msra.gmra.mxu2 %v1614_v31  ;;  %v463_v56 = vld [vmem:[%s11710_s22 + $0x218] sm:$0xff]  ;;  %v9045_v44 = vor.u32 %v10731_v35, %v9042_v36  ;;  %v1620_v52 = vpack.c.b16 %v1348_v43, %v1348_v43  ;;  %v10160_v36 = vld [vmem:[%s11717_s11 + $0xad0] sm:$0xf]  ;;  %v10162_v43 = vld [vmem:[%s11717_s11 + $0xf10] sm:$0xf0] }
 0x26e   : > { %v1346_v0 = vunpack.c.l.b16 %v463_v56  ;;  %v1347_v1 = vunpack.c.h.b16 %v463_v56  ;;  %v10170_v35 = vld [vmem:[%s11717_s11 + $0xf18] sm:$0xf0] }
 0x26f   : > { %v6044_v50 = vpop.f32.mrf.mxu3  ;;  %v6007_v51 = vpop.f32.mrf.mxu0 }
 0x270   : > { %v6031_v45 = vpop.f32.mrf.mxu2  ;;  %v6020_v55 = vpop.f32.mrf.mxu1  ;;  %v1619_v18 = vpack.c.b16 %v1347_v1, %v1347_v1 }
 0x271   : > { %v6032_v49 = vadd.f32 %v6031_v45, %v6019_v40  ;;  %v1349_v45 = vunpack.c.h.b16 %v464_v34  ;;  %v11141_v55 = vld [vmem:[%s11717_s11 + $0xefc] sm:$0xf0] }
 0x272   : > { %v10145_v3 = vor.u32 %v11141_v55, %v10144_v54  ;;  %v10736_v54 = vld [vmem:[%s11717_s11 + $0x25c] sm:$0xf] }
 0x273   : > { %6471 = vmatpush.bf16.xpose.msrb.mxu0 %v9009_v14  ;;  %6484 = vmatpush.bf16.xpose.msrb.mxu1 %v9013_v16  ;;  %v6045_v58 = vadd.f32 %v6044_v50, %v6032_v49  ;;  %v11003_v14 = vld [vmem:[%s11717_s11 + $0xab4] sm:$0xf]  ;;  %v11142_v49 = vld [vmem:[%s11717_s11 + $0xf04] sm:$0xf0]  ;;  %v11006_v50 = vld [vmem:[%s11717_s11 + $0xacc] sm:$0xf] }
 0x274   : > { %6497 = vmatpush.bf16.xpose.msrb.mxu2 %v9017_v11  ;;  %v10133_v23 = vor.u32 %v11003_v14, %v10130_v15  ;;  %v10153_v1 = vor.u32 %v11142_v49, %v10152_v48  ;;  %v10157_v2 = vor.u32 %v11006_v50, %v10154_v53  ;;  %v10872_v53 = vld [vmem:[%s11717_s11 + $0x694] sm:$0xf0] }
 0x275   : > { %6510 = vmatpush.bf16.xpose.msrb.mxu3 %v9021_v13  ;;  %v1618_v13 = vpack.c.b16 %v1346_v0, %v1346_v0 }
 0x277   : > { %v6046_v10 = vpop.f32.mrf.mxu3  ;;  %v6057_v11 = vpop.f32.mrf.mxu0 }
 0x278   : > { %v6033_v5 = vpop.f32.mrf.mxu2  ;;  %v6058_v16 = vadd.f32 %v6057_v11, %v6045_v58  ;;  %v6070_v17 = vpop.f32.mrf.mxu1  ;;  %v1621_v58 = vpack.c.b16 %v1349_v45, %v1349_v45  ;;  %v9066_v10 = vld [vmem:[%s11717_s11 + $0x688] sm:$0xf0]  ;;  %v9056_v11 = vld [vmem:[%s11717_s11 + $0x240] sm:$0xf] }
 0x27a   : > { %v6071_v22 = vadd.f32 %v6070_v17, %v6058_v16  ;;  %6472 = vmatmul.bf16.vlgmr.msrb.gmra.mxu0 %v1616_v6  ;;  %6485 = vmatmul.bf16.vlgmr.msrb.gmra.mxu1 %v1617_v12  ;;  %v9064_v6 = vld [vmem:[%s11717_s11 + $0x248] sm:$0xf]  ;;  %v10869_v12 = vld [vmem:[%s11717_s11 + $0x67c] sm:$0xf0]  ;;  %v466_v16 = vld [vmem:[%s11710_s22 + $0x230] sm:$0xff] }
 0x27b   : > { %6522 = vmatpush.bf16.xpose.msra.mxu0 %v10113_v39  ;;  %6535 = vmatpush.bf16.xpose.msra.mxu1 %v10117_v41  ;;  %v9049_v39 = vor.u32 %v10868_v25, %v9048_v24  ;;  %v9053_v41 = vor.u32 %v10732_v26, %v9050_v28  ;;  %v10733_v17 = vld [vmem:[%s11717_s11 + $0x244] sm:$0xf]  ;;  %v9057_v24 = vor.u32 %v10869_v12, %v9056_v11  ;;  %v1352_v25 = vunpack.c.l.b16 %v466_v16  ;;  %v10184_v12 = vld [vmem:[%s11717_s11 + $0xae8] sm:$0xf] }
 0x27c   : > { %6548 = vmatpush.bf16.xpose.msra.mxu2 %v10121_v37  ;;  %6511 = vmatmul.bf16.vlgmr.msrb.gmra.mxu3 %v1619_v18  ;;  %v9058_v18 = vld [vmem:[%s11717_s11 + $0x680] sm:$0xf0] }
 0x27d   : > { %6561 = vmatpush.bf16.xpose.msra.mxu3 %v10125_v38  ;;  %6498 = vmatmul.bf16.vlgmr.msrb.gmra.mxu2 %v1618_v13  ;;  %v465_v38 = vld [vmem:[%s11710_s22 + $0x228] sm:$0xff]  ;;  %v9061_v26 = vor.u32 %v10733_v17, %v9058_v18  ;;  %v1624_v34 = vpack.c.b16 %v1352_v25, %v1352_v25  ;;  %v10176_v18 = vld [vmem:[%s11717_s11 + $0xae0] sm:$0xf]  ;;  %v10178_v25 = vld [vmem:[%s11717_s11 + $0xf20] sm:$0xf0] }
 0x27e   : > { %v1350_v46 = vunpack.c.l.b16 %v465_v38  ;;  %v1351_v47 = vunpack.c.h.b16 %v465_v38  ;;  %v10186_v17 = vld [vmem:[%s11717_s11 + $0xf28] sm:$0xf0] }
 0x27f   : > { %v6096_v32 = vpop.f32.mrf.mxu3  ;;  %v6059_v33 = vpop.f32.mrf.mxu0 }
 0x280   : > { %v6083_v27 = vpop.f32.mrf.mxu2  ;;  %v6072_v37 = vpop.f32.mrf.mxu1  ;;  %v1623_v0 = vpack.c.b16 %v1351_v47, %v1351_v47 }
 0x281   : > { %v6084_v31 = vadd.f32 %v6083_v27, %v6071_v22  ;;  %v1353_v27 = vunpack.c.h.b16 %v466_v16  ;;  %v11143_v37 = vld [vmem:[%s11717_s11 + $0xf0c] sm:$0xf0] }
 0x282   : > { %v10161_v49 = vor.u32 %v11143_v37, %v10160_v36  ;;  %v10738_v36 = vld [vmem:[%s11717_s11 + $0x26c] sm:$0xf] }
 0x283   : > { %6523 = vmatpush.bf16.xpose.msra.mxu0 %v9025_v60  ;;  %6536 = vmatpush.bf16.xpose.msra.mxu1 %v9029_v62  ;;  %v6097_v40 = vadd.f32 %v6096_v32, %v6084_v31  ;;  %v11005_v60 = vld [vmem:[%s11717_s11 + $0xac4] sm:$0xf]  ;;  %v11144_v31 = vld [vmem:[%s11717_s11 + $0xf14] sm:$0xf0]  ;;  %v11008_v32 = vld [vmem:[%s11717_s11 + $0xadc] sm:$0xf] }
 0x284   : > { %6549 = vmatpush.bf16.xpose.msra.mxu2 %v9033_v57  ;;  %v10149_v5 = vor.u32 %v11005_v60, %v10146_v61  ;;  %v10169_v47 = vor.u32 %v11144_v31, %v10168_v30  ;;  %v10173_v48 = vor.u32 %v11008_v32, %v10170_v35  ;;  %v10874_v35 = vld [vmem:[%s11717_s11 + $0x6a4] sm:$0xf0] }
 0x285   : > { %6562 = vmatpush.bf16.xpose.msra.mxu3 %v9037_v59  ;;  %v1622_v59 = vpack.c.b16 %v1350_v46, %v1350_v46 }
 0x287   : > { %v6098_v56 = vpop.f32.mrf.mxu3  ;;  %v6109_v57 = vpop.f32.mrf.mxu0 }
 0x288   : > { %v6085_v51 = vpop.f32.mrf.mxu2  ;;  %v6110_v62 = vadd.f32 %v6109_v57, %v6097_v40  ;;  %v6122_v63 = vpop.f32.mrf.mxu1  ;;  %v1625_v40 = vpack.c.b16 %v1353_v27, %v1353_v27  ;;  %v9082_v56 = vld [vmem:[%s11717_s11 + $0x698] sm:$0xf0]  ;;  %v9072_v57 = vld [vmem:[%s11717_s11 + $0x250] sm:$0xf] }
 0x28a   : > { %v6123_v4 = vadd.f32 %v6122_v63, %v6110_v62  ;;  %6524 = vmatmul.bf16.vlgmr.msra.gmra.mxu0 %v1620_v52  ;;  %6537 = vmatmul.bf16.vlgmr.msra.gmra.mxu1 %v1621_v58  ;;  %v9080_v52 = vld [vmem:[%s11717_s11 + $0x258] sm:$0xf]  ;;  %v10871_v58 = vld [vmem:[%s11717_s11 + $0x68c] sm:$0xf0]  ;;  %v468_v62 = vld [vmem:[%s11710_s22 + $0x240] sm:$0xff] }
 0x28b   : > { %6574 = vmatpush.bf16.xpose.msrb.mxu0 %v10129_v21  ;;  %6587 = vmatpush.bf16.xpose.msrb.mxu1 %v10133_v23  ;;  %v9065_v21 = vor.u32 %v10870_v7, %v9064_v6  ;;  %v9069_v23 = vor.u32 %v10734_v8, %v9066_v10  ;;  %v10735_v63 = vld [vmem:[%s11717_s11 + $0x254] sm:$0xf]  ;;  %v9073_v6 = vor.u32 %v10871_v58, %v9072_v57  ;;  %v1356_v7 = vunpack.c.l.b16 %v468_v62  ;;  %v10200_v58 = vld [vmem:[%s11717_s11 + $0xaf8] sm:$0xf] }
 0x28c   : > { %6600 = vmatpush.bf16.xpose.msrb.mxu2 %v10137_v19  ;;  %6563 = vmatmul.bf16.vlgmr.msra.gmra.mxu3 %v1623_v0  ;;  %v9074_v0 = vld [vmem:[%s11717_s11 + $0x690] sm:$0xf0] }
 0x28d   : > { %6613 = vmatpush.bf16.xpose.msrb.mxu3 %v10141_v20  ;;  %6550 = vmatmul.bf16.vlgmr.msra.gmra.mxu2 %v1622_v59  ;;  %v467_v20 = vld [vmem:[%s11710_s22 + $0x238] sm:$0xff]  ;;  %v9077_v8 = vor.u32 %v10735_v63, %v9074_v0  ;;  %v1628_v16 = vpack.c.b16 %v1356_v7, %v1356_v7  ;;  %v10192_v0 = vld [vmem:[%s11717_s11 + $0xaf0] sm:$0xf]  ;;  %v10194_v7 = vld [vmem:[%s11717_s11 + $0xf30] sm:$0xf0] }
 0x28e   : > { %v1354_v28 = vunpack.c.l.b16 %v467_v20  ;;  %v1355_v29 = vunpack.c.h.b16 %v467_v20  ;;  %v10202_v63 = vld [vmem:[%s11717_s11 + $0xf38] sm:$0xf0] }
 0x28f   : > { %v6148_v14 = vpop.f32.mrf.mxu3  ;;  %v6111_v15 = vpop.f32.mrf.mxu0 }
 0x290   : > { %v6135_v9 = vpop.f32.mrf.mxu2  ;;  %v6124_v19 = vpop.f32.mrf.mxu1  ;;  %v1627_v46 = vpack.c.b16 %v1355_v29, %v1355_v29 }
 0x291   : > { %v6136_v13 = vadd.f32 %v6135_v9, %v6123_v4  ;;  %v1357_v9 = vunpack.c.h.b16 %v468_v62  ;;  %v11145_v19 = vld [vmem:[%s11717_s11 + $0xf1c] sm:$0xf0] }
 0x292   : > { %v10177_v31 = vor.u32 %v11145_v19, %v10176_v18  ;;  %v10740_v18 = vld [vmem:[%s11717_s11 + $0x27c] sm:$0xf] }
 0x293   : > { %6575 = vmatpush.bf16.xpose.msrb.mxu0 %v9041_v42  ;;  %6588 = vmatpush.bf16.xpose.msrb.mxu1 %v9045_v44  ;;  %v6149_v22 = vadd.f32 %v6148_v14, %v6136_v13  ;;  %v11007_v42 = vld [vmem:[%s11717_s11 + $0xad4] sm:$0xf]  ;;  %v11146_v13 = vld [vmem:[%s11717_s11 + $0xf24] sm:$0xf0]  ;;  %v11010_v14 = vld [vmem:[%s11717_s11 + $0xaec] sm:$0xf] }
 0x294   : > { %6601 = vmatpush.bf16.xpose.msrb.mxu2 %v9049_v39  ;;  %v10165_v51 = vor.u32 %v11007_v42, %v10162_v43  ;;  %v10185_v29 = vor.u32 %v11146_v13, %v10184_v12  ;;  %v10189_v30 = vor.u32 %v11010_v14, %v10186_v17  ;;  %v10876_v17 = vld [vmem:[%s11717_s11 + $0x6b4] sm:$0xf0] }
 0x295   : > { %6614 = vmatpush.bf16.xpose.msrb.mxu3 %v9053_v41  ;;  %v1626_v41 = vpack.c.b16 %v1354_v28, %v1354_v28 }
 0x297   : > { %v6150_v38 = vpop.f32.mrf.mxu3  ;;  %v6161_v39 = vpop.f32.mrf.mxu0 }
 0x298   : > { %v6137_v33 = vpop.f32.mrf.mxu2  ;;  %v6162_v44 = vadd.f32 %v6161_v39, %v6149_v22  ;;  %v6174_v45 = vpop.f32.mrf.mxu1  ;;  %v1629_v22 = vpack.c.b16 %v1357_v9, %v1357_v9  ;;  %v9098_v38 = vld [vmem:[%s11717_s11 + $0x6a8] sm:$0xf0]  ;;  %v9088_v39 = vld [vmem:[%s11717_s11 + $0x260] sm:$0xf] }
 0x29a   : > { %v6175_v50 = vadd.f32 %v6174_v45, %v6162_v44  ;;  %6576 = vmatmul.bf16.vlgmr.msrb.gmra.mxu0 %v1624_v34  ;;  %6589 = vmatmul.bf16.vlgmr.msrb.gmra.mxu1 %v1625_v40  ;;  %v9096_v34 = vld [vmem:[%s11717_s11 + $0x268] sm:$0xf]  ;;  %v10873_v40 = vld [vmem:[%s11717_s11 + $0x69c] sm:$0xf0]  ;;  %v470_v44 = vld [vmem:[%s11710_s22 + $0x250] sm:$0xff] }
 0x29b   : > { %6626 = vmatpush.bf16.xpose.msra.mxu0 %v10145_v3  ;;  %6639 = vmatpush.bf16.xpose.msra.mxu1 %v10149_v5  ;;  %v9081_v3 = vor.u32 %v10872_v53, %v9080_v52  ;;  %v9085_v5 = vor.u32 %v10736_v54, %v9082_v56  ;;  %v10737_v45 = vld [vmem:[%s11717_s11 + $0x264] sm:$0xf]  ;;  %v9089_v52 = vor.u32 %v10873_v40, %v9088_v39  ;;  %v1360_v53 = vunpack.c.l.b16 %v470_v44  ;;  %v10216_v40 = vld [vmem:[%s11717_s11 + $0xb08] sm:$0xf] }
 0x29c   : > { %6652 = vmatpush.bf16.xpose.msra.mxu2 %v10153_v1  ;;  %6615 = vmatmul.bf16.vlgmr.msrb.gmra.mxu3 %v1627_v46  ;;  %v9090_v46 = vld [vmem:[%s11717_s11 + $0x6a0] sm:$0xf0] }
 0x29d   : > { %6665 = vmatpush.bf16.xpose.msra.mxu3 %v10157_v2  ;;  %6602 = vmatmul.bf16.vlgmr.msrb.gmra.mxu2 %v1626_v41  ;;  %v469_v2 = vld [vmem:[%s11710_s22 + $0x248] sm:$0xff]  ;;  %v9093_v54 = vor.u32 %v10737_v45, %v9090_v46  ;;  %v1632_v62 = vpack.c.b16 %v1360_v53, %v1360_v53  ;;  %v10208_v46 = vld [vmem:[%s11717_s11 + $0xb00] sm:$0xf]  ;;  %v10210_v53 = vld [vmem:[%s11717_s11 + $0xf40] sm:$0xf0] }
 0x29e   : > { %v1358_v10 = vunpack.c.l.b16 %v469_v2  ;;  %v1359_v11 = vunpack.c.h.b16 %v469_v2  ;;  %v10218_v45 = vld [vmem:[%s11717_s11 + $0xf48] sm:$0xf0] }
 0x29f   : > { %v6200_v60 = vpop.f32.mrf.mxu3  ;;  %v6163_v61 = vpop.f32.mrf.mxu0 }
 0x2a0   : > { %v6187_v55 = vpop.f32.mrf.mxu2  ;;  %v6176_v1 = vpop.f32.mrf.mxu1  ;;  %v1631_v28 = vpack.c.b16 %v1359_v11, %v1359_v11 }
 0x2a1   : > { %v6188_v59 = vadd.f32 %v6187_v55, %v6175_v50  ;;  %v1361_v55 = vunpack.c.h.b16 %v470_v44  ;;  %v11147_v1 = vld [vmem:[%s11717_s11 + $0xf2c] sm:$0xf0] }
 0x2a2   : > { %v10193_v13 = vor.u32 %v11147_v1, %v10192_v0  ;;  %v10742_v0 = vld [vmem:[%s11717_s11 + $0x28c] sm:$0xf] }
 0x2a3   : > { %6627 = vmatpush.bf16.xpose.msra.mxu0 %v9057_v24  ;;  %6640 = vmatpush.bf16.xpose.msra.mxu1 %v9061_v26  ;;  %v6201_v4 = vadd.f32 %v6200_v60, %v6188_v59  ;;  %v11009_v24 = vld [vmem:[%s11717_s11 + $0xae4] sm:$0xf]  ;;  %v11148_v59 = vld [vmem:[%s11717_s11 + $0xf34] sm:$0xf0]  ;;  %v11012_v60 = vld [vmem:[%s11717_s11 + $0xafc] sm:$0xf] }
 0x2a4   : > { %6653 = vmatpush.bf16.xpose.msra.mxu2 %v9065_v21  ;;  %v10181_v33 = vor.u32 %v11009_v24, %v10178_v25  ;;  %v10201_v11 = vor.u32 %v11148_v59, %v10200_v58  ;;  %v10205_v12 = vor.u32 %v11012_v60, %v10202_v63  ;;  %v10878_v63 = vld [vmem:[%s11717_s11 + $0x6c4] sm:$0xf0] }
 0x2a5   : > { %6666 = vmatpush.bf16.xpose.msra.mxu3 %v9069_v23  ;;  %v1630_v23 = vpack.c.b16 %v1358_v10, %v1358_v10 }
 0x2a7   : > { %v6202_v20 = vpop.f32.mrf.mxu3  ;;  %v6213_v21 = vpop.f32.mrf.mxu0 }
 0x2a8   : > { %v6189_v15 = vpop.f32.mrf.mxu2  ;;  %v6214_v26 = vadd.f32 %v6213_v21, %v6201_v4  ;;  %v6226_v27 = vpop.f32.mrf.mxu1  ;;  %v1633_v4 = vpack.c.b16 %v1361_v55, %v1361_v55  ;;  %v9114_v20 = vld [vmem:[%s11717_s11 + $0x6b8] sm:$0xf0]  ;;  %v9104_v21 = vld [vmem:[%s11717_s11 + $0x270] sm:$0xf] }
 0x2aa   : > { %v6227_v32 = vadd.f32 %v6226_v27, %v6214_v26  ;;  %6628 = vmatmul.bf16.vlgmr.msra.gmra.mxu0 %v1628_v16  ;;  %6641 = vmatmul.bf16.vlgmr.msra.gmra.mxu1 %v1629_v22  ;;  %v9112_v16 = vld [vmem:[%s11717_s11 + $0x278] sm:$0xf]  ;;  %v10875_v22 = vld [vmem:[%s11717_s11 + $0x6ac] sm:$0xf0]  ;;  %v472_v26 = vld [vmem:[%s11710_s22 + $0x260] sm:$0xff] }
 0x2ab   : > { %6678 = vmatpush.bf16.xpose.msrb.mxu0 %v10161_v49  ;;  %6691 = vmatpush.bf16.xpose.msrb.mxu1 %v10165_v51  ;;  %v9097_v49 = vor.u32 %v10874_v35, %v9096_v34  ;;  %v9101_v51 = vor.u32 %v10738_v36, %v9098_v38  ;;  %v10739_v27 = vld [vmem:[%s11717_s11 + $0x274] sm:$0xf]  ;;  %v9105_v34 = vor.u32 %v10875_v22, %v9104_v21  ;;  %v1364_v35 = vunpack.c.l.b16 %v472_v26  ;;  %v10232_v22 = vld [vmem:[%s11717_s11 + $0xb18] sm:$0xf] }
 0x2ac   : > { %6704 = vmatpush.bf16.xpose.msrb.mxu2 %v10169_v47  ;;  %6667 = vmatmul.bf16.vlgmr.msra.gmra.mxu3 %v1631_v28  ;;  %v9106_v28 = vld [vmem:[%s11717_s11 + $0x6b0] sm:$0xf0] }
 0x2ad   : > { %6717 = vmatpush.bf16.xpose.msrb.mxu3 %v10173_v48  ;;  %6654 = vmatmul.bf16.vlgmr.msra.gmra.mxu2 %v1630_v23  ;;  %v471_v48 = vld [vmem:[%s11710_s22 + $0x258] sm:$0xff]  ;;  %v9109_v36 = vor.u32 %v10739_v27, %v9106_v28  ;;  %v1636_v44 = vpack.c.b16 %v1364_v35, %v1364_v35  ;;  %v10224_v28 = vld [vmem:[%s11717_s11 + $0xb10] sm:$0xf]  ;;  %v10226_v35 = vld [vmem:[%s11717_s11 + $0xf50] sm:$0xf0] }
 0x2ae   : > { %v1362_v56 = vunpack.c.l.b16 %v471_v48  ;;  %v1363_v57 = vunpack.c.h.b16 %v471_v48  ;;  %v10234_v27 = vld [vmem:[%s11717_s11 + $0xf58] sm:$0xf0] }
 0x2af   : > { %v6252_v42 = vpop.f32.mrf.mxu3  ;;  %v6215_v43 = vpop.f32.mrf.mxu0 }
 0x2b0   : > { %v6239_v37 = vpop.f32.mrf.mxu2  ;;  %v6228_v47 = vpop.f32.mrf.mxu1  ;;  %v1635_v10 = vpack.c.b16 %v1363_v57, %v1363_v57 }
 0x2b1   : > { %v6240_v41 = vadd.f32 %v6239_v37, %v6227_v32  ;;  %v1365_v37 = vunpack.c.h.b16 %v472_v26  ;;  %v11149_v47 = vld [vmem:[%s11717_s11 + $0xf3c] sm:$0xf0] }
 0x2b2   : > { %v10209_v59 = vor.u32 %v11149_v47, %v10208_v46  ;;  %v10744_v46 = vld [vmem:[%s11717_s11 + $0x29c] sm:$0xf] }
 0x2b3   : > { %6679 = vmatpush.bf16.xpose.msrb.mxu0 %v9073_v6  ;;  %6692 = vmatpush.bf16.xpose.msrb.mxu1 %v9077_v8  ;;  %v6253_v50 = vadd.f32 %v6252_v42, %v6240_v41  ;;  %v11011_v6 = vld [vmem:[%s11717_s11 + $0xaf4] sm:$0xf]  ;;  %v11150_v41 = vld [vmem:[%s11717_s11 + $0xf44] sm:$0xf0]  ;;  %v11014_v42 = vld [vmem:[%s11717_s11 + $0xb0c] sm:$0xf] }
 0x2b4   : > { %6705 = vmatpush.bf16.xpose.msrb.mxu2 %v9081_v3  ;;  %v10197_v15 = vor.u32 %v11011_v6, %v10194_v7  ;;  %v10217_v57 = vor.u32 %v11150_v41, %v10216_v40  ;;  %v10221_v58 = vor.u32 %v11014_v42, %v10218_v45  ;;  %v10880_v45 = vld [vmem:[%s11717_s11 + $0x6d4] sm:$0xf0] }
 0x2b5   : > { %6718 = vmatpush.bf16.xpose.msrb.mxu3 %v9085_v5  ;;  %v1634_v5 = vpack.c.b16 %v1362_v56, %v1362_v56 }
 0x2b7   : > { %v6254_v2 = vpop.f32.mrf.mxu3  ;;  %v6265_v3 = vpop.f32.mrf.mxu0 }
 0x2b8   : > { %v6241_v61 = vpop.f32.mrf.mxu2  ;;  %v6266_v8 = vadd.f32 %v6265_v3, %v6253_v50  ;;  %v6278_v9 = vpop.f32.mrf.mxu1  ;;  %v1637_v50 = vpack.c.b16 %v1365_v37, %v1365_v37  ;;  %v9130_v2 = vld [vmem:[%s11717_s11 + $0x6c8] sm:$0xf0]  ;;  %v9120_v3 = vld [vmem:[%s11717_s11 + $0x280] sm:$0xf] }
 0x2ba   : > { %v6279_v14 = vadd.f32 %v6278_v9, %v6266_v8  ;;  %6680 = vmatmul.bf16.vlgmr.msrb.gmra.mxu0 %v1632_v62  ;;  %6693 = vmatmul.bf16.vlgmr.msrb.gmra.mxu1 %v1633_v4  ;;  %v9128_v62 = vld [vmem:[%s11717_s11 + $0x288] sm:$0xf]  ;;  %v10877_v4 = vld [vmem:[%s11717_s11 + $0x6bc] sm:$0xf0]  ;;  %v474_v8 = vld [vmem:[%s11710_s22 + $0x270] sm:$0xff] }
 0x2bb   : > { %6730 = vmatpush.bf16.xpose.msra.mxu0 %v10177_v31  ;;  %6743 = vmatpush.bf16.xpose.msra.mxu1 %v10181_v33  ;;  %v9113_v31 = vor.u32 %v10876_v17, %v9112_v16  ;;  %v9117_v33 = vor.u32 %v10740_v18, %v9114_v20  ;;  %v10741_v9 = vld [vmem:[%s11717_s11 + $0x284] sm:$0xf]  ;;  %v9121_v16 = vor.u32 %v10877_v4, %v9120_v3  ;;  %v1368_v17 = vunpack.c.l.b16 %v474_v8  ;;  %v10248_v4 = vld [vmem:[%s11717_s11 + $0xb28] sm:$0xf] }
 0x2bc   : > { %6756 = vmatpush.bf16.xpose.msra.mxu2 %v10185_v29  ;;  %6719 = vmatmul.bf16.vlgmr.msrb.gmra.mxu3 %v1635_v10  ;;  %v9122_v10 = vld [vmem:[%s11717_s11 + $0x6c0] sm:$0xf0] }
 0x2bd   : > { %6769 = vmatpush.bf16.xpose.msra.mxu3 %v10189_v30  ;;  %6706 = vmatmul.bf16.vlgmr.msrb.gmra.mxu2 %v1634_v5  ;;  %v473_v30 = vld [vmem:[%s11710_s22 + $0x268] sm:$0xff]  ;;  %v9125_v18 = vor.u32 %v10741_v9, %v9122_v10  ;;  %v1640_v26 = vpack.c.b16 %v1368_v17, %v1368_v17  ;;  %v10240_v10 = vld [vmem:[%s11717_s11 + $0xb20] sm:$0xf]  ;;  %v10242_v17 = vld [vmem:[%s11717_s11 + $0xf60] sm:$0xf0] }
 0x2be   : > { %v1366_v38 = vunpack.c.l.b16 %v473_v30  ;;  %v1367_v39 = vunpack.c.h.b16 %v473_v30  ;;  %v10250_v9 = vld [vmem:[%s11717_s11 + $0xf68] sm:$0xf0] }
 0x2bf   : > { %v6304_v24 = vpop.f32.mrf.mxu3  ;;  %v6267_v25 = vpop.f32.mrf.mxu0 }
 0x2c0   : > { %v6291_v19 = vpop.f32.mrf.mxu2  ;;  %v6280_v29 = vpop.f32.mrf.mxu1  ;;  %v1639_v56 = vpack.c.b16 %v1367_v39, %v1367_v39 }
 0x2c1   : > { %v6292_v23 = vadd.f32 %v6291_v19, %v6279_v14  ;;  %v1369_v19 = vunpack.c.h.b16 %v474_v8  ;;  %v11151_v29 = vld [vmem:[%s11717_s11 + $0xf4c] sm:$0xf0] }
 0x2c2   : > { %v10225_v41 = vor.u32 %v11151_v29, %v10224_v28  ;;  %v10746_v28 = vld [vmem:[%s11717_s11 + $0x2ac] sm:$0xf] }
 0x2c3   : > { %6731 = vmatpush.bf16.xpose.msra.mxu0 %v9089_v52  ;;  %6744 = vmatpush.bf16.xpose.msra.mxu1 %v9093_v54  ;;  %v6305_v32 = vadd.f32 %v6304_v24, %v6292_v23  ;;  %v11013_v52 = vld [vmem:[%s11717_s11 + $0xb04] sm:$0xf]  ;;  %v11152_v23 = vld [vmem:[%s11717_s11 + $0xf54] sm:$0xf0]  ;;  %v11016_v24 = vld [vmem:[%s11717_s11 + $0xb1c] sm:$0xf] }
 0x2c4   : > { %6757 = vmatpush.bf16.xpose.msra.mxu2 %v9097_v49  ;;  %v10213_v61 = vor.u32 %v11013_v52, %v10210_v53  ;;  %v10233_v39 = vor.u32 %v11152_v23, %v10232_v22  ;;  %v10237_v40 = vor.u32 %v11016_v24, %v10234_v27  ;;  %v10882_v27 = vld [vmem:[%s11717_s11 + $0x6e4] sm:$0xf0] }
 0x2c5   : > { %6770 = vmatpush.bf16.xpose.msra.mxu3 %v9101_v51  ;;  %v1638_v51 = vpack.c.b16 %v1366_v38, %v1366_v38 }
 0x2c7   : > { %v6306_v48 = vpop.f32.mrf.mxu3  ;;  %v6317_v49 = vpop.f32.mrf.mxu0 }
 0x2c8   : > { %v6293_v43 = vpop.f32.mrf.mxu2  ;;  %v6318_v54 = vadd.f32 %v6317_v49, %v6305_v32  ;;  %v6330_v55 = vpop.f32.mrf.mxu1  ;;  %v1641_v32 = vpack.c.b16 %v1369_v19, %v1369_v19  ;;  %v9146_v48 = vld [vmem:[%s11717_s11 + $0x6d8] sm:$0xf0]  ;;  %v9136_v49 = vld [vmem:[%s11717_s11 + $0x290] sm:$0xf] }
 0x2ca   : > { %v6331_v60 = vadd.f32 %v6330_v55, %v6318_v54  ;;  %6732 = vmatmul.bf16.vlgmr.msra.gmra.mxu0 %v1636_v44  ;;  %6745 = vmatmul.bf16.vlgmr.msra.gmra.mxu1 %v1637_v50  ;;  %v9144_v44 = vld [vmem:[%s11717_s11 + $0x298] sm:$0xf]  ;;  %v10879_v50 = vld [vmem:[%s11717_s11 + $0x6cc] sm:$0xf0]  ;;  %v476_v54 = vld [vmem:[%s11710_s22 + $0x280] sm:$0xff] }
 0x2cb   : > { %6782 = vmatpush.bf16.xpose.msrb.mxu0 %v10193_v13  ;;  %6795 = vmatpush.bf16.xpose.msrb.mxu1 %v10197_v15  ;;  %v9129_v13 = vor.u32 %v10878_v63, %v9128_v62  ;;  %v9133_v15 = vor.u32 %v10742_v0, %v9130_v2  ;;  %v10743_v55 = vld [vmem:[%s11717_s11 + $0x294] sm:$0xf]  ;;  %v9137_v62 = vor.u32 %v10879_v50, %v9136_v49  ;;  %v1372_v63 = vunpack.c.l.b16 %v476_v54  ;;  %v10264_v50 = vld [vmem:[%s11717_s11 + $0xb38] sm:$0xf] }
 0x2cc   : > { %6808 = vmatpush.bf16.xpose.msrb.mxu2 %v10201_v11  ;;  %6771 = vmatmul.bf16.vlgmr.msra.gmra.mxu3 %v1639_v56  ;;  %v9138_v56 = vld [vmem:[%s11717_s11 + $0x6d0] sm:$0xf0] }
 0x2cd   : > { %6821 = vmatpush.bf16.xpose.msrb.mxu3 %v10205_v12  ;;  %6758 = vmatmul.bf16.vlgmr.msra.gmra.mxu2 %v1638_v51  ;;  %v475_v12 = vld [vmem:[%s11710_s22 + $0x278] sm:$0xff]  ;;  %v9141_v0 = vor.u32 %v10743_v55, %v9138_v56  ;;  %v1644_v8 = vpack.c.b16 %v1372_v63, %v1372_v63  ;;  %v10256_v56 = vld [vmem:[%s11717_s11 + $0xb30] sm:$0xf]  ;;  %v10258_v63 = vld [vmem:[%s11717_s11 + $0xf70] sm:$0xf0] }
 0x2ce   : > { %v1370_v20 = vunpack.c.l.b16 %v475_v12  ;;  %v1371_v21 = vunpack.c.h.b16 %v475_v12  ;;  %v10266_v55 = vld [vmem:[%s11717_s11 + $0xf78] sm:$0xf0] }
 0x2cf   : > { %v6356_v6 = vpop.f32.mrf.mxu3  ;;  %v6319_v7 = vpop.f32.mrf.mxu0 }
 0x2d0   : > { %v6343_v1 = vpop.f32.mrf.mxu2  ;;  %v6332_v11 = vpop.f32.mrf.mxu1  ;;  %v1643_v38 = vpack.c.b16 %v1371_v21, %v1371_v21 }
 0x2d1   : > { %v6344_v5 = vadd.f32 %v6343_v1, %v6331_v60  ;;  %v1373_v1 = vunpack.c.h.b16 %v476_v54  ;;  %v11153_v11 = vld [vmem:[%s11717_s11 + $0xf5c] sm:$0xf0] }
 0x2d2   : > { %v10241_v23 = vor.u32 %v11153_v11, %v10240_v10  ;;  %v10748_v10 = vld [vmem:[%s11717_s11 + $0x2bc] sm:$0xf] }
 0x2d3   : > { %6783 = vmatpush.bf16.xpose.msrb.mxu0 %v9105_v34  ;;  %6796 = vmatpush.bf16.xpose.msrb.mxu1 %v9109_v36  ;;  %v6357_v14 = vadd.f32 %v6356_v6, %v6344_v5  ;;  %v11015_v34 = vld [vmem:[%s11717_s11 + $0xb14] sm:$0xf]  ;;  %v11154_v5 = vld [vmem:[%s11717_s11 + $0xf64] sm:$0xf0]  ;;  %v11018_v6 = vld [vmem:[%s11717_s11 + $0xb2c] sm:$0xf] }
 0x2d4   : > { %6809 = vmatpush.bf16.xpose.msrb.mxu2 %v9113_v31  ;;  %v10229_v43 = vor.u32 %v11015_v34, %v10226_v35  ;;  %v10249_v21 = vor.u32 %v11154_v5, %v10248_v4  ;;  %v10253_v22 = vor.u32 %v11018_v6, %v10250_v9  ;;  %v10884_v9 = vld [vmem:[%s11717_s11 + $0x6f4] sm:$0xf0] }
 0x2d5   : > { %6822 = vmatpush.bf16.xpose.msrb.mxu3 %v9117_v33  ;;  %v1642_v33 = vpack.c.b16 %v1370_v20, %v1370_v20 }
 0x2d7   : > { %v6358_v30 = vpop.f32.mrf.mxu3  ;;  %v6369_v31 = vpop.f32.mrf.mxu0 }
 0x2d8   : > { %v6345_v25 = vpop.f32.mrf.mxu2  ;;  %v6370_v36 = vadd.f32 %v6369_v31, %v6357_v14  ;;  %v6382_v37 = vpop.f32.mrf.mxu1  ;;  %v1645_v14 = vpack.c.b16 %v1373_v1, %v1373_v1  ;;  %v9162_v30 = vld [vmem:[%s11717_s11 + $0x6e8] sm:$0xf0]  ;;  %v9152_v31 = vld [vmem:[%s11717_s11 + $0x2a0] sm:$0xf] }
 0x2da   : > { %v6383_v42 = vadd.f32 %v6382_v37, %v6370_v36  ;;  %6784 = vmatmul.bf16.vlgmr.msrb.gmra.mxu0 %v1640_v26  ;;  %6797 = vmatmul.bf16.vlgmr.msrb.gmra.mxu1 %v1641_v32  ;;  %v9160_v26 = vld [vmem:[%s11717_s11 + $0x2a8] sm:$0xf]  ;;  %v10881_v32 = vld [vmem:[%s11717_s11 + $0x6dc] sm:$0xf0]  ;;  %v478_v36 = vld [vmem:[%s11710_s22 + $0x290] sm:$0xff] }
 0x2db   : > { %6834 = vmatpush.bf16.xpose.msra.mxu0 %v10209_v59  ;;  %6847 = vmatpush.bf16.xpose.msra.mxu1 %v10213_v61  ;;  %v9145_v59 = vor.u32 %v10880_v45, %v9144_v44  ;;  %v9149_v61 = vor.u32 %v10744_v46, %v9146_v48  ;;  %v10745_v37 = vld [vmem:[%s11717_s11 + $0x2a4] sm:$0xf]  ;;  %v9153_v44 = vor.u32 %v10881_v32, %v9152_v31  ;;  %v1376_v45 = vunpack.c.l.b16 %v478_v36  ;;  %v10280_v32 = vld [vmem:[%s11717_s11 + $0xb48] sm:$0xf] }
 0x2dc   : > { %6860 = vmatpush.bf16.xpose.msra.mxu2 %v10217_v57  ;;  %6823 = vmatmul.bf16.vlgmr.msrb.gmra.mxu3 %v1643_v38  ;;  %v9154_v38 = vld [vmem:[%s11717_s11 + $0x6e0] sm:$0xf0] }
 0x2dd   : > { %6873 = vmatpush.bf16.xpose.msra.mxu3 %v10221_v58  ;;  %6810 = vmatmul.bf16.vlgmr.msrb.gmra.mxu2 %v1642_v33  ;;  %v477_v58 = vld [vmem:[%s11710_s22 + $0x288] sm:$0xff]  ;;  %v9157_v46 = vor.u32 %v10745_v37, %v9154_v38  ;;  %v1648_v54 = vpack.c.b16 %v1376_v45, %v1376_v45  ;;  %v10272_v38 = vld [vmem:[%s11717_s11 + $0xb40] sm:$0xf]  ;;  %v10274_v45 = vld [vmem:[%s11717_s11 + $0xf80] sm:$0xf0] }
 0x2de   : > { %v1374_v2 = vunpack.c.l.b16 %v477_v58  ;;  %v1375_v3 = vunpack.c.h.b16 %v477_v58  ;;  %v10282_v37 = vld [vmem:[%s11717_s11 + $0xf88] sm:$0xf0] }
 0x2df   : > { %v6408_v52 = vpop.f32.mrf.mxu3  ;;  %v6371_v53 = vpop.f32.mrf.mxu0 }
 0x2e0   : > { %v6395_v47 = vpop.f32.mrf.mxu2  ;;  %v6384_v57 = vpop.f32.mrf.mxu1  ;;  %v1647_v20 = vpack.c.b16 %v1375_v3, %v1375_v3 }
 0x2e1   : > { %v6396_v51 = vadd.f32 %v6395_v47, %v6383_v42  ;;  %v1377_v47 = vunpack.c.h.b16 %v478_v36  ;;  %v11155_v57 = vld [vmem:[%s11717_s11 + $0xf6c] sm:$0xf0] }
 0x2e2   : > { %v10257_v5 = vor.u32 %v11155_v57, %v10256_v56  ;;  %v10750_v56 = vld [vmem:[%s11717_s11 + $0x2cc] sm:$0xf] }
 0x2e3   : > { %6835 = vmatpush.bf16.xpose.msra.mxu0 %v9121_v16  ;;  %6848 = vmatpush.bf16.xpose.msra.mxu1 %v9125_v18  ;;  %v6409_v60 = vadd.f32 %v6408_v52, %v6396_v51  ;;  %v11017_v16 = vld [vmem:[%s11717_s11 + $0xb24] sm:$0xf]  ;;  %v11156_v51 = vld [vmem:[%s11717_s11 + $0xf74] sm:$0xf0]  ;;  %v11020_v52 = vld [vmem:[%s11717_s11 + $0xb3c] sm:$0xf] }
 0x2e4   : > { %6861 = vmatpush.bf16.xpose.msra.mxu2 %v9129_v13  ;;  %v10245_v25 = vor.u32 %v11017_v16, %v10242_v17  ;;  %v10265_v3 = vor.u32 %v11156_v51, %v10264_v50  ;;  %v10269_v4 = vor.u32 %v11020_v52, %v10266_v55  ;;  %v10886_v55 = vld [vmem:[%s11717_s11 + $0x704] sm:$0xf0] }
 0x2e5   : > { %6874 = vmatpush.bf16.xpose.msra.mxu3 %v9133_v15  ;;  %v1646_v15 = vpack.c.b16 %v1374_v2, %v1374_v2 }
 0x2e7   : > { %v6410_v12 = vpop.f32.mrf.mxu3  ;;  %v6421_v13 = vpop.f32.mrf.mxu0 }
 0x2e8   : > { %v6397_v7 = vpop.f32.mrf.mxu2  ;;  %v6422_v18 = vadd.f32 %v6421_v13, %v6409_v60  ;;  %v6434_v19 = vpop.f32.mrf.mxu1  ;;  %v1649_v60 = vpack.c.b16 %v1377_v47, %v1377_v47  ;;  %v9178_v12 = vld [vmem:[%s11717_s11 + $0x6f8] sm:$0xf0]  ;;  %v9168_v13 = vld [vmem:[%s11717_s11 + $0x2b0] sm:$0xf] }
 0x2ea   : > { %v6435_v24 = vadd.f32 %v6434_v19, %v6422_v18  ;;  %6836 = vmatmul.bf16.vlgmr.msra.gmra.mxu0 %v1644_v8  ;;  %6849 = vmatmul.bf16.vlgmr.msra.gmra.mxu1 %v1645_v14  ;;  %v9176_v8 = vld [vmem:[%s11717_s11 + $0x2b8] sm:$0xf]  ;;  %v10883_v14 = vld [vmem:[%s11717_s11 + $0x6ec] sm:$0xf0]  ;;  %v480_v18 = vld [vmem:[%s11710_s22 + $0x2a0] sm:$0xff] }
 0x2eb   : > { %6886 = vmatpush.bf16.xpose.msrb.mxu0 %v10225_v41  ;;  %6899 = vmatpush.bf16.xpose.msrb.mxu1 %v10229_v43  ;;  %v9161_v41 = vor.u32 %v10882_v27, %v9160_v26  ;;  %v9165_v43 = vor.u32 %v10746_v28, %v9162_v30  ;;  %v10747_v19 = vld [vmem:[%s11717_s11 + $0x2b4] sm:$0xf]  ;;  %v9169_v26 = vor.u32 %v10883_v14, %v9168_v13  ;;  %v1380_v27 = vunpack.c.l.b16 %v480_v18  ;;  %v10296_v14 = vld [vmem:[%s11717_s11 + $0xb58] sm:$0xf] }
 0x2ec   : > { %6912 = vmatpush.bf16.xpose.msrb.mxu2 %v10233_v39  ;;  %6875 = vmatmul.bf16.vlgmr.msra.gmra.mxu3 %v1647_v20  ;;  %v9170_v20 = vld [vmem:[%s11717_s11 + $0x6f0] sm:$0xf0] }
 0x2ed   : > { %6925 = vmatpush.bf16.xpose.msrb.mxu3 %v10237_v40  ;;  %6862 = vmatmul.bf16.vlgmr.msra.gmra.mxu2 %v1646_v15  ;;  %v479_v40 = vld [vmem:[%s11710_s22 + $0x298] sm:$0xff]  ;;  %v9173_v28 = vor.u32 %v10747_v19, %v9170_v20  ;;  %v1652_v36 = vpack.c.b16 %v1380_v27, %v1380_v27  ;;  %v10288_v20 = vld [vmem:[%s11717_s11 + $0xb50] sm:$0xf]  ;;  %v10290_v27 = vld [vmem:[%s11717_s11 + $0xf90] sm:$0xf0] }
 0x2ee   : > { %v1378_v48 = vunpack.c.l.b16 %v479_v40  ;;  %v1379_v49 = vunpack.c.h.b16 %v479_v40  ;;  %v10298_v19 = vld [vmem:[%s11717_s11 + $0xf98] sm:$0xf0] }
 0x2ef   : > { %v6460_v34 = vpop.f32.mrf.mxu3  ;;  %v6423_v35 = vpop.f32.mrf.mxu0 }
 0x2f0   : > { %v6447_v29 = vpop.f32.mrf.mxu2  ;;  %v6436_v39 = vpop.f32.mrf.mxu1  ;;  %v1651_v2 = vpack.c.b16 %v1379_v49, %v1379_v49 }
 0x2f1   : > { %v6448_v33 = vadd.f32 %v6447_v29, %v6435_v24  ;;  %v1381_v29 = vunpack.c.h.b16 %v480_v18  ;;  %v11157_v39 = vld [vmem:[%s11717_s11 + $0xf7c] sm:$0xf0] }
 0x2f2   : > { %v10273_v51 = vor.u32 %v11157_v39, %v10272_v38  ;;  %v10752_v38 = vld [vmem:[%s11717_s11 + $0x2dc] sm:$0xf] }
 0x2f3   : > { %6887 = vmatpush.bf16.xpose.msrb.mxu0 %v9137_v62  ;;  %6900 = vmatpush.bf16.xpose.msrb.mxu1 %v9141_v0  ;;  %v6461_v42 = vadd.f32 %v6460_v34, %v6448_v33  ;;  %v11019_v62 = vld [vmem:[%s11717_s11 + $0xb34] sm:$0xf]  ;;  %v11158_v33 = vld [vmem:[%s11717_s11 + $0xf84] sm:$0xf0]  ;;  %v11022_v34 = vld [vmem:[%s11717_s11 + $0xb4c] sm:$0xf] }
 0x2f4   : > { %6913 = vmatpush.bf16.xpose.msrb.mxu2 %v9145_v59  ;;  %v10261_v7 = vor.u32 %v11019_v62, %v10258_v63  ;;  %v10281_v49 = vor.u32 %v11158_v33, %v10280_v32  ;;  %v10285_v50 = vor.u32 %v11022_v34, %v10282_v37  ;;  %v10888_v37 = vld [vmem:[%s11717_s11 + $0x714] sm:$0xf0] }
 0x2f5   : > { %6926 = vmatpush.bf16.xpose.msrb.mxu3 %v9149_v61  ;;  %v1650_v61 = vpack.c.b16 %v1378_v48, %v1378_v48 }
 0x2f7   : > { %v6462_v58 = vpop.f32.mrf.mxu3  ;;  %v6473_v59 = vpop.f32.mrf.mxu0 }
 0x2f8   : > { %v6449_v53 = vpop.f32.mrf.mxu2  ;;  %v6474_v0 = vadd.f32 %v6473_v59, %v6461_v42  ;;  %v6486_v1 = vpop.f32.mrf.mxu1  ;;  %v1653_v42 = vpack.c.b16 %v1381_v29, %v1381_v29  ;;  %v9194_v58 = vld [vmem:[%s11717_s11 + $0x708] sm:$0xf0]  ;;  %v9184_v59 = vld [vmem:[%s11717_s11 + $0x2c0] sm:$0xf] }
 0x2fa   : > { %v6487_v6 = vadd.f32 %v6486_v1, %v6474_v0  ;;  %6888 = vmatmul.bf16.vlgmr.msrb.gmra.mxu0 %v1648_v54  ;;  %6901 = vmatmul.bf16.vlgmr.msrb.gmra.mxu1 %v1649_v60  ;;  %v9192_v54 = vld [vmem:[%s11717_s11 + $0x2c8] sm:$0xf]  ;;  %v10885_v60 = vld [vmem:[%s11717_s11 + $0x6fc] sm:$0xf0]  ;;  %v482_v0 = vld [vmem:[%s11710_s22 + $0x2b0] sm:$0xff] }
 0x2fb   : > { %6938 = vmatpush.bf16.xpose.msra.mxu0 %v10241_v23  ;;  %6951 = vmatpush.bf16.xpose.msra.mxu1 %v10245_v25  ;;  %v9177_v23 = vor.u32 %v10884_v9, %v9176_v8  ;;  %v9181_v25 = vor.u32 %v10748_v10, %v9178_v12  ;;  %v10749_v1 = vld [vmem:[%s11717_s11 + $0x2c4] sm:$0xf]  ;;  %v9185_v8 = vor.u32 %v10885_v60, %v9184_v59  ;;  %v1384_v9 = vunpack.c.l.b16 %v482_v0  ;;  %v10312_v60 = vld [vmem:[%s11717_s11 + $0xb68] sm:$0xf] }
 0x2fc   : > { %6964 = vmatpush.bf16.xpose.msra.mxu2 %v10249_v21  ;;  %6927 = vmatmul.bf16.vlgmr.msrb.gmra.mxu3 %v1651_v2  ;;  %v9186_v2 = vld [vmem:[%s11717_s11 + $0x700] sm:$0xf0] }
 0x2fd   : > { %6977 = vmatpush.bf16.xpose.msra.mxu3 %v10253_v22  ;;  %6914 = vmatmul.bf16.vlgmr.msrb.gmra.mxu2 %v1650_v61  ;;  %v481_v22 = vld [vmem:[%s11710_s22 + $0x2a8] sm:$0xff]  ;;  %v9189_v10 = vor.u32 %v10749_v1, %v9186_v2  ;;  %v1656_v18 = vpack.c.b16 %v1384_v9, %v1384_v9  ;;  %v10304_v2 = vld [vmem:[%s11717_s11 + $0xb60] sm:$0xf]  ;;  %v10306_v9 = vld [vmem:[%s11717_s11 + $0xfa0] sm:$0xf0] }
 0x2fe   : > { %v1382_v30 = vunpack.c.l.b16 %v481_v22  ;;  %v1383_v31 = vunpack.c.h.b16 %v481_v22  ;;  %v10314_v1 = vld [vmem:[%s11717_s11 + $0xfa8] sm:$0xf0] }
 0x2ff   : > { %v6512_v16 = vpop.f32.mrf.mxu3  ;;  %v6475_v17 = vpop.f32.mrf.mxu0 }
 0x300   : > { %v6499_v11 = vpop.f32.mrf.mxu2  ;;  %v6488_v21 = vpop.f32.mrf.mxu1  ;;  %v1655_v48 = vpack.c.b16 %v1383_v31, %v1383_v31 }
 0x301   : > { %v6500_v15 = vadd.f32 %v6499_v11, %v6487_v6  ;;  %v1385_v11 = vunpack.c.h.b16 %v482_v0  ;;  %v11159_v21 = vld [vmem:[%s11717_s11 + $0xf8c] sm:$0xf0] }
 0x302   : > { %v10289_v33 = vor.u32 %v11159_v21, %v10288_v20  ;;  %v10754_v20 = vld [vmem:[%s11717_s11 + $0x2ec] sm:$0xf] }
 0x303   : > { %6939 = vmatpush.bf16.xpose.msra.mxu0 %v9153_v44  ;;  %6952 = vmatpush.bf16.xpose.msra.mxu1 %v9157_v46  ;;  %v6513_v24 = vadd.f32 %v6512_v16, %v6500_v15  ;;  %v11021_v44 = vld [vmem:[%s11717_s11 + $0xb44] sm:$0xf]  ;;  %v11160_v15 = vld [vmem:[%s11717_s11 + $0xf94] sm:$0xf0]  ;;  %v11024_v16 = vld [vmem:[%s11717_s11 + $0xb5c] sm:$0xf] }
 0x304   : > { %6965 = vmatpush.bf16.xpose.msra.mxu2 %v9161_v41  ;;  %v10277_v53 = vor.u32 %v11021_v44, %v10274_v45  ;;  %v10297_v31 = vor.u32 %v11160_v15, %v10296_v14  ;;  %v10301_v32 = vor.u32 %v11024_v16, %v10298_v19  ;;  %v10890_v19 = vld [vmem:[%s11717_s11 + $0x724] sm:$0xf0] }
 0x305   : > { %6978 = vmatpush.bf16.xpose.msra.mxu3 %v9165_v43  ;;  %v1654_v43 = vpack.c.b16 %v1382_v30, %v1382_v30 }
 0x307   : > { %v6514_v40 = vpop.f32.mrf.mxu3  ;;  %v6525_v41 = vpop.f32.mrf.mxu0 }
 0x308   : > { %v6501_v35 = vpop.f32.mrf.mxu2  ;;  %v6526_v46 = vadd.f32 %v6525_v41, %v6513_v24  ;;  %v6538_v47 = vpop.f32.mrf.mxu1  ;;  %v1657_v24 = vpack.c.b16 %v1385_v11, %v1385_v11  ;;  %v9210_v40 = vld [vmem:[%s11717_s11 + $0x718] sm:$0xf0]  ;;  %v9200_v41 = vld [vmem:[%s11717_s11 + $0x2d0] sm:$0xf] }
 0x30a   : > { %v6539_v52 = vadd.f32 %v6538_v47, %v6526_v46  ;;  %6940 = vmatmul.bf16.vlgmr.msra.gmra.mxu0 %v1652_v36  ;;  %6953 = vmatmul.bf16.vlgmr.msra.gmra.mxu1 %v1653_v42  ;;  %v9208_v36 = vld [vmem:[%s11717_s11 + $0x2d8] sm:$0xf]  ;;  %v10887_v42 = vld [vmem:[%s11717_s11 + $0x70c] sm:$0xf0]  ;;  %v484_v46 = vld [vmem:[%s11710_s22 + $0x2c0] sm:$0xff] }
 0x30b   : > { %6990 = vmatpush.bf16.xpose.msrb.mxu0 %v10257_v5  ;;  %7003 = vmatpush.bf16.xpose.msrb.mxu1 %v10261_v7  ;;  %v9193_v5 = vor.u32 %v10886_v55, %v9192_v54  ;;  %v9197_v7 = vor.u32 %v10750_v56, %v9194_v58  ;;  %v10751_v47 = vld [vmem:[%s11717_s11 + $0x2d4] sm:$0xf]  ;;  %v9201_v54 = vor.u32 %v10887_v42, %v9200_v41  ;;  %v1388_v55 = vunpack.c.l.b16 %v484_v46  ;;  %v10328_v42 = vld [vmem:[%s11717_s11 + $0xb78] sm:$0xf] }
 0x30c   : > { %7016 = vmatpush.bf16.xpose.msrb.mxu2 %v10265_v3  ;;  %6979 = vmatmul.bf16.vlgmr.msra.gmra.mxu3 %v1655_v48  ;;  %v9202_v48 = vld [vmem:[%s11717_s11 + $0x710] sm:$0xf0] }
 0x30d   : > { %7029 = vmatpush.bf16.xpose.msrb.mxu3 %v10269_v4  ;;  %6966 = vmatmul.bf16.vlgmr.msra.gmra.mxu2 %v1654_v43  ;;  %v483_v4 = vld [vmem:[%s11710_s22 + $0x2b8] sm:$0xff]  ;;  %v9205_v56 = vor.u32 %v10751_v47, %v9202_v48  ;;  %v1660_v0 = vpack.c.b16 %v1388_v55, %v1388_v55  ;;  %v10320_v48 = vld [vmem:[%s11717_s11 + $0xb70] sm:$0xf]  ;;  %v10322_v55 = vld [vmem:[%s11717_s11 + $0xfb0] sm:$0xf0] }
 0x30e   : > { %v1386_v12 = vunpack.c.l.b16 %v483_v4  ;;  %v1387_v13 = vunpack.c.h.b16 %v483_v4  ;;  %v10330_v47 = vld [vmem:[%s11717_s11 + $0xfb8] sm:$0xf0] }
 0x30f   : > { %v6564_v62 = vpop.f32.mrf.mxu3  ;;  %v6527_v63 = vpop.f32.mrf.mxu0 }
 0x310   : > { %v6551_v57 = vpop.f32.mrf.mxu2  ;;  %v6540_v3 = vpop.f32.mrf.mxu1  ;;  %v1659_v30 = vpack.c.b16 %v1387_v13, %v1387_v13 }
 0x311   : > { %v6552_v61 = vadd.f32 %v6551_v57, %v6539_v52  ;;  %v1389_v57 = vunpack.c.h.b16 %v484_v46  ;;  %v11161_v3 = vld [vmem:[%s11717_s11 + $0xf9c] sm:$0xf0] }
 0x312   : > { %v10305_v15 = vor.u32 %v11161_v3, %v10304_v2  ;;  %v10756_v2 = vld [vmem:[%s11717_s11 + $0x2fc] sm:$0xf] }
 0x313   : > { %6991 = vmatpush.bf16.xpose.msrb.mxu0 %v9169_v26  ;;  %7004 = vmatpush.bf16.xpose.msrb.mxu1 %v9173_v28  ;;  %v6565_v6 = vadd.f32 %v6564_v62, %v6552_v61  ;;  %v11023_v26 = vld [vmem:[%s11717_s11 + $0xb54] sm:$0xf]  ;;  %v11162_v61 = vld [vmem:[%s11717_s11 + $0xfa4] sm:$0xf0]  ;;  %v11026_v62 = vld [vmem:[%s11717_s11 + $0xb6c] sm:$0xf] }
 0x314   : > { %7017 = vmatpush.bf16.xpose.msrb.mxu2 %v9177_v23  ;;  %v10293_v35 = vor.u32 %v11023_v26, %v10290_v27  ;;  %v10313_v13 = vor.u32 %v11162_v61, %v10312_v60  ;;  %v10317_v14 = vor.u32 %v11026_v62, %v10314_v1  ;;  %v10892_v1 = vld [vmem:[%s11717_s11 + $0x734] sm:$0xf0] }
 0x315   : > { %7030 = vmatpush.bf16.xpose.msrb.mxu3 %v9181_v25  ;;  %v1658_v25 = vpack.c.b16 %v1386_v12, %v1386_v12 }
 0x317   : > { %v6566_v22 = vpop.f32.mrf.mxu3  ;;  %v6577_v23 = vpop.f32.mrf.mxu0 }
 0x318   : > { %v6553_v17 = vpop.f32.mrf.mxu2  ;;  %v6578_v28 = vadd.f32 %v6577_v23, %v6565_v6  ;;  %v6590_v29 = vpop.f32.mrf.mxu1  ;;  %v1661_v6 = vpack.c.b16 %v1389_v57, %v1389_v57  ;;  %v9226_v22 = vld [vmem:[%s11717_s11 + $0x728] sm:$0xf0]  ;;  %v9216_v23 = vld [vmem:[%s11717_s11 + $0x2e0] sm:$0xf] }
 0x31a   : > { %v6591_v34 = vadd.f32 %v6590_v29, %v6578_v28  ;;  %6992 = vmatmul.bf16.vlgmr.msrb.gmra.mxu0 %v1656_v18  ;;  %7005 = vmatmul.bf16.vlgmr.msrb.gmra.mxu1 %v1657_v24  ;;  %v9224_v18 = vld [vmem:[%s11717_s11 + $0x2e8] sm:$0xf]  ;;  %v10889_v24 = vld [vmem:[%s11717_s11 + $0x71c] sm:$0xf0]  ;;  %v486_v28 = vld [vmem:[%s11710_s22 + $0x2d0] sm:$0xff] }
 0x31b   : > { %7042 = vmatpush.bf16.xpose.msra.mxu0 %v10273_v51  ;;  %7055 = vmatpush.bf16.xpose.msra.mxu1 %v10277_v53  ;;  %v9209_v51 = vor.u32 %v10888_v37, %v9208_v36  ;;  %v9213_v53 = vor.u32 %v10752_v38, %v9210_v40  ;;  %v10753_v29 = vld [vmem:[%s11717_s11 + $0x2e4] sm:$0xf]  ;;  %v9217_v36 = vor.u32 %v10889_v24, %v9216_v23  ;;  %v1392_v37 = vunpack.c.l.b16 %v486_v28  ;;  %v10344_v24 = vld [vmem:[%s11717_s11 + $0xb88] sm:$0xf] }
 0x31c   : > { %7068 = vmatpush.bf16.xpose.msra.mxu2 %v10281_v49  ;;  %7031 = vmatmul.bf16.vlgmr.msrb.gmra.mxu3 %v1659_v30  ;;  %v9218_v30 = vld [vmem:[%s11717_s11 + $0x720] sm:$0xf0] }
 0x31d   : > { %7081 = vmatpush.bf16.xpose.msra.mxu3 %v10285_v50  ;;  %7018 = vmatmul.bf16.vlgmr.msrb.gmra.mxu2 %v1658_v25  ;;  %v485_v50 = vld [vmem:[%s11710_s22 + $0x2c8] sm:$0xff]  ;;  %v9221_v38 = vor.u32 %v10753_v29, %v9218_v30  ;;  %v1664_v46 = vpack.c.b16 %v1392_v37, %v1392_v37  ;;  %v10336_v30 = vld [vmem:[%s11717_s11 + $0xb80] sm:$0xf]  ;;  %v10338_v37 = vld [vmem:[%s11717_s11 + $0xfc0] sm:$0xf0] }
 0x31e   : > { %v1390_v58 = vunpack.c.l.b16 %v485_v50  ;;  %v1391_v59 = vunpack.c.h.b16 %v485_v50  ;;  %v10346_v29 = vld [vmem:[%s11717_s11 + $0xfc8] sm:$0xf0] }
 0x31f   : > { %v6616_v44 = vpop.f32.mrf.mxu3  ;;  %v6579_v45 = vpop.f32.mrf.mxu0 }
 0x320   : > { %v6603_v39 = vpop.f32.mrf.mxu2  ;;  %v6592_v49 = vpop.f32.mrf.mxu1  ;;  %v1663_v12 = vpack.c.b16 %v1391_v59, %v1391_v59 }
 0x321   : > { %v6604_v43 = vadd.f32 %v6603_v39, %v6591_v34  ;;  %v1393_v39 = vunpack.c.h.b16 %v486_v28  ;;  %v11163_v49 = vld [vmem:[%s11717_s11 + $0xfac] sm:$0xf0] }
 0x322   : > { %v10321_v61 = vor.u32 %v11163_v49, %v10320_v48  ;;  %v10758_v48 = vld [vmem:[%s11717_s11 + $0x30c] sm:$0xf] }
 0x323   : > { %7043 = vmatpush.bf16.xpose.msra.mxu0 %v9185_v8  ;;  %7056 = vmatpush.bf16.xpose.msra.mxu1 %v9189_v10  ;;  %v6617_v52 = vadd.f32 %v6616_v44, %v6604_v43  ;;  %v11025_v8 = vld [vmem:[%s11717_s11 + $0xb64] sm:$0xf]  ;;  %v11164_v43 = vld [vmem:[%s11717_s11 + $0xfb4] sm:$0xf0]  ;;  %v11028_v44 = vld [vmem:[%s11717_s11 + $0xb7c] sm:$0xf] }
 0x324   : > { %7069 = vmatpush.bf16.xpose.msra.mxu2 %v9193_v5  ;;  %v10309_v17 = vor.u32 %v11025_v8, %v10306_v9  ;;  %v10329_v59 = vor.u32 %v11164_v43, %v10328_v42  ;;  %v10333_v60 = vor.u32 %v11028_v44, %v10330_v47  ;;  %v10894_v47 = vld [vmem:[%s11717_s11 + $0x744] sm:$0xf0] }
 0x325   : > { %7082 = vmatpush.bf16.xpose.msra.mxu3 %v9197_v7  ;;  %v1662_v7 = vpack.c.b16 %v1390_v58, %v1390_v58 }
 0x327   : > { %v6618_v4 = vpop.f32.mrf.mxu3  ;;  %v6629_v5 = vpop.f32.mrf.mxu0 }
 0x328   : > { %v6605_v63 = vpop.f32.mrf.mxu2  ;;  %v6630_v10 = vadd.f32 %v6629_v5, %v6617_v52  ;;  %v6642_v11 = vpop.f32.mrf.mxu1  ;;  %v1665_v52 = vpack.c.b16 %v1393_v39, %v1393_v39  ;;  %v9242_v4 = vld [vmem:[%s11717_s11 + $0x738] sm:$0xf0]  ;;  %v9232_v5 = vld [vmem:[%s11717_s11 + $0x2f0] sm:$0xf] }
 0x32a   : > { %v6643_v16 = vadd.f32 %v6642_v11, %v6630_v10  ;;  %7044 = vmatmul.bf16.vlgmr.msra.gmra.mxu0 %v1660_v0  ;;  %7057 = vmatmul.bf16.vlgmr.msra.gmra.mxu1 %v1661_v6  ;;  %v9240_v0 = vld [vmem:[%s11717_s11 + $0x2f8] sm:$0xf]  ;;  %v10891_v6 = vld [vmem:[%s11717_s11 + $0x72c] sm:$0xf0]  ;;  %v488_v10 = vld [vmem:[%s11710_s22 + $0x2e0] sm:$0xff] }
 0x32b   : > { %7094 = vmatpush.bf16.xpose.msrb.mxu0 %v10289_v33  ;;  %7107 = vmatpush.bf16.xpose.msrb.mxu1 %v10293_v35  ;;  %v9225_v33 = vor.u32 %v10890_v19, %v9224_v18  ;;  %v9229_v35 = vor.u32 %v10754_v20, %v9226_v22  ;;  %v10755_v11 = vld [vmem:[%s11717_s11 + $0x2f4] sm:$0xf]  ;;  %v9233_v18 = vor.u32 %v10891_v6, %v9232_v5  ;;  %v1396_v19 = vunpack.c.l.b16 %v488_v10  ;;  %v10360_v6 = vld [vmem:[%s11717_s11 + $0xb98] sm:$0xf] }
 0x32c   : > { %7120 = vmatpush.bf16.xpose.msrb.mxu2 %v10297_v31  ;;  %7083 = vmatmul.bf16.vlgmr.msra.gmra.mxu3 %v1663_v12  ;;  %v9234_v12 = vld [vmem:[%s11717_s11 + $0x730] sm:$0xf0] }
 0x32d   : > { %7133 = vmatpush.bf16.xpose.msrb.mxu3 %v10301_v32  ;;  %7070 = vmatmul.bf16.vlgmr.msra.gmra.mxu2 %v1662_v7  ;;  %v487_v32 = vld [vmem:[%s11710_s22 + $0x2d8] sm:$0xff]  ;;  %v9237_v20 = vor.u32 %v10755_v11, %v9234_v12  ;;  %v1668_v28 = vpack.c.b16 %v1396_v19, %v1396_v19  ;;  %v10352_v12 = vld [vmem:[%s11717_s11 + $0xb90] sm:$0xf]  ;;  %v10354_v19 = vld [vmem:[%s11717_s11 + $0xfd0] sm:$0xf0] }
 0x32e   : > { %v1394_v40 = vunpack.c.l.b16 %v487_v32  ;;  %v1395_v41 = vunpack.c.h.b16 %v487_v32  ;;  %v10362_v11 = vld [vmem:[%s11717_s11 + $0xfd8] sm:$0xf0] }
 0x32f   : > { %v6668_v26 = vpop.f32.mrf.mxu3  ;;  %v6631_v27 = vpop.f32.mrf.mxu0 }
 0x330   : > { %v6655_v21 = vpop.f32.mrf.mxu2  ;;  %v6644_v31 = vpop.f32.mrf.mxu1  ;;  %v1667_v58 = vpack.c.b16 %v1395_v41, %v1395_v41 }
 0x331   : > { %v6656_v25 = vadd.f32 %v6655_v21, %v6643_v16  ;;  %v1397_v21 = vunpack.c.h.b16 %v488_v10  ;;  %v11165_v31 = vld [vmem:[%s11717_s11 + $0xfbc] sm:$0xf0] }
 0x332   : > { %v10337_v43 = vor.u32 %v11165_v31, %v10336_v30  ;;  %v10760_v30 = vld [vmem:[%s11717_s11 + $0x31c] sm:$0xf] }
 0x333   : > { %7095 = vmatpush.bf16.xpose.msrb.mxu0 %v9201_v54  ;;  %7108 = vmatpush.bf16.xpose.msrb.mxu1 %v9205_v56  ;;  %v6669_v34 = vadd.f32 %v6668_v26, %v6656_v25  ;;  %v11027_v54 = vld [vmem:[%s11717_s11 + $0xb74] sm:$0xf]  ;;  %v11166_v25 = vld [vmem:[%s11717_s11 + $0xfc4] sm:$0xf0]  ;;  %v11030_v26 = vld [vmem:[%s11717_s11 + $0xb8c] sm:$0xf] }
 0x334   : > { %7121 = vmatpush.bf16.xpose.msrb.mxu2 %v9209_v51  ;;  %v10325_v63 = vor.u32 %v11027_v54, %v10322_v55  ;;  %v10345_v41 = vor.u32 %v11166_v25, %v10344_v24  ;;  %v10349_v42 = vor.u32 %v11030_v26, %v10346_v29  ;;  %v10896_v29 = vld [vmem:[%s11717_s11 + $0x754] sm:$0xf0] }
 0x335   : > { %7134 = vmatpush.bf16.xpose.msrb.mxu3 %v9213_v53  ;;  %v1666_v53 = vpack.c.b16 %v1394_v40, %v1394_v40 }
 0x337   : > { %v6670_v50 = vpop.f32.mrf.mxu3  ;;  %v6681_v51 = vpop.f32.mrf.mxu0 }
 0x338   : > { %v6657_v45 = vpop.f32.mrf.mxu2  ;;  %v6682_v56 = vadd.f32 %v6681_v51, %v6669_v34  ;;  %v6694_v57 = vpop.f32.mrf.mxu1  ;;  %v1669_v34 = vpack.c.b16 %v1397_v21, %v1397_v21  ;;  %v9258_v50 = vld [vmem:[%s11717_s11 + $0x748] sm:$0xf0]  ;;  %v9248_v51 = vld [vmem:[%s11717_s11 + $0x300] sm:$0xf] }
 0x33a   : > { %v6695_v62 = vadd.f32 %v6694_v57, %v6682_v56  ;;  %7096 = vmatmul.bf16.vlgmr.msrb.gmra.mxu0 %v1664_v46  ;;  %7109 = vmatmul.bf16.vlgmr.msrb.gmra.mxu1 %v1665_v52  ;;  %v9256_v46 = vld [vmem:[%s11717_s11 + $0x308] sm:$0xf]  ;;  %v10893_v52 = vld [vmem:[%s11717_s11 + $0x73c] sm:$0xf0]  ;;  %v490_v56 = vld [vmem:[%s11710_s22 + $0x2f0] sm:$0xff] }
 0x33b   : > { %7146 = vmatpush.bf16.xpose.msra.mxu0 %v10305_v15  ;;  %7159 = vmatpush.bf16.xpose.msra.mxu1 %v10309_v17  ;;  %v9241_v15 = vor.u32 %v10892_v1, %v9240_v0  ;;  %v9245_v17 = vor.u32 %v10756_v2, %v9242_v4  ;;  %v10757_v57 = vld [vmem:[%s11717_s11 + $0x304] sm:$0xf]  ;;  %v9249_v0 = vor.u32 %v10893_v52, %v9248_v51  ;;  %v1400_v1 = vunpack.c.l.b16 %v490_v56  ;;  %v10376_v52 = vld [vmem:[%s11717_s11 + $0xba8] sm:$0xf] }
 0x33c   : > { %7172 = vmatpush.bf16.xpose.msra.mxu2 %v10313_v13  ;;  %7135 = vmatmul.bf16.vlgmr.msrb.gmra.mxu3 %v1667_v58  ;;  %v9250_v58 = vld [vmem:[%s11717_s11 + $0x740] sm:$0xf0] }
 0x33d   : > { %7185 = vmatpush.bf16.xpose.msra.mxu3 %v10317_v14  ;;  %7122 = vmatmul.bf16.vlgmr.msrb.gmra.mxu2 %v1666_v53  ;;  %v489_v14 = vld [vmem:[%s11710_s22 + $0x2e8] sm:$0xff]  ;;  %v9253_v2 = vor.u32 %v10757_v57, %v9250_v58  ;;  %v1672_v10 = vpack.c.b16 %v1400_v1, %v1400_v1  ;;  %v10368_v58 = vld [vmem:[%s11717_s11 + $0xba0] sm:$0xf]  ;;  %v10370_v1 = vld [vmem:[%s11717_s11 + $0xfe0] sm:$0xf0] }
 0x33e   : > { %v1398_v22 = vunpack.c.l.b16 %v489_v14  ;;  %v1399_v23 = vunpack.c.h.b16 %v489_v14  ;;  %v10378_v57 = vld [vmem:[%s11717_s11 + $0xfe8] sm:$0xf0] }
 0x33f   : > { %v6720_v8 = vpop.f32.mrf.mxu3  ;;  %v6683_v9 = vpop.f32.mrf.mxu0 }
 0x340   : > { %v6707_v3 = vpop.f32.mrf.mxu2  ;;  %v6696_v13 = vpop.f32.mrf.mxu1  ;;  %v1671_v40 = vpack.c.b16 %v1399_v23, %v1399_v23 }
 0x341   : > { %v6708_v7 = vadd.f32 %v6707_v3, %v6695_v62  ;;  %v1401_v3 = vunpack.c.h.b16 %v490_v56  ;;  %v11167_v13 = vld [vmem:[%s11717_s11 + $0xfcc] sm:$0xf0] }
 0x342   : > { %v10353_v25 = vor.u32 %v11167_v13, %v10352_v12  ;;  %v10762_v12 = vld [vmem:[%s11717_s11 + $0x32c] sm:$0xf] }
 0x343   : > { %7147 = vmatpush.bf16.xpose.msra.mxu0 %v9217_v36  ;;  %7160 = vmatpush.bf16.xpose.msra.mxu1 %v9221_v38  ;;  %v6721_v16 = vadd.f32 %v6720_v8, %v6708_v7  ;;  %v11029_v36 = vld [vmem:[%s11717_s11 + $0xb84] sm:$0xf]  ;;  %v11168_v7 = vld [vmem:[%s11717_s11 + $0xfd4] sm:$0xf0]  ;;  %v11032_v8 = vld [vmem:[%s11717_s11 + $0xb9c] sm:$0xf] }
 0x344   : > { %7173 = vmatpush.bf16.xpose.msra.mxu2 %v9225_v33  ;;  %v10341_v45 = vor.u32 %v11029_v36, %v10338_v37  ;;  %v10361_v23 = vor.u32 %v11168_v7, %v10360_v6  ;;  %v10365_v24 = vor.u32 %v11032_v8, %v10362_v11  ;;  %v10898_v11 = vld [vmem:[%s11717_s11 + $0x764] sm:$0xf0] }
 0x345   : > { %7186 = vmatpush.bf16.xpose.msra.mxu3 %v9229_v35  ;;  %v1670_v35 = vpack.c.b16 %v1398_v22, %v1398_v22 }
 0x347   : > { %v6722_v32 = vpop.f32.mrf.mxu3  ;;  %v6733_v33 = vpop.f32.mrf.mxu0 }
 0x348   : > { %v6709_v27 = vpop.f32.mrf.mxu2  ;;  %v6734_v38 = vadd.f32 %v6733_v33, %v6721_v16  ;;  %v6746_v39 = vpop.f32.mrf.mxu1  ;;  %v1673_v16 = vpack.c.b16 %v1401_v3, %v1401_v3  ;;  %v9274_v32 = vld [vmem:[%s11717_s11 + $0x758] sm:$0xf0]  ;;  %v9264_v33 = vld [vmem:[%s11717_s11 + $0x310] sm:$0xf] }
 0x34a   : > { %v6747_v44 = vadd.f32 %v6746_v39, %v6734_v38  ;;  %7148 = vmatmul.bf16.vlgmr.msra.gmra.mxu0 %v1668_v28  ;;  %7161 = vmatmul.bf16.vlgmr.msra.gmra.mxu1 %v1669_v34  ;;  %v9272_v28 = vld [vmem:[%s11717_s11 + $0x318] sm:$0xf]  ;;  %v10895_v34 = vld [vmem:[%s11717_s11 + $0x74c] sm:$0xf0]  ;;  %v492_v38 = vld [vmem:[%s11710_s22 + $0x300] sm:$0xff] }
 0x34b   : > { %7198 = vmatpush.bf16.xpose.msrb.mxu0 %v10321_v61  ;;  %7211 = vmatpush.bf16.xpose.msrb.mxu1 %v10325_v63  ;;  %v9257_v61 = vor.u32 %v10894_v47, %v9256_v46  ;;  %v9261_v63 = vor.u32 %v10758_v48, %v9258_v50  ;;  %v10759_v39 = vld [vmem:[%s11717_s11 + $0x314] sm:$0xf]  ;;  %v9265_v46 = vor.u32 %v10895_v34, %v9264_v33  ;;  %v1404_v47 = vunpack.c.l.b16 %v492_v38  ;;  %v10392_v34 = vld [vmem:[%s11717_s11 + $0xbb8] sm:$0xf] }
 0x34c   : > { %7224 = vmatpush.bf16.xpose.msrb.mxu2 %v10329_v59  ;;  %7187 = vmatmul.bf16.vlgmr.msra.gmra.mxu3 %v1671_v40  ;;  %v9266_v40 = vld [vmem:[%s11717_s11 + $0x750] sm:$0xf0] }
 0x34d   : > { %7237 = vmatpush.bf16.xpose.msrb.mxu3 %v10333_v60  ;;  %7174 = vmatmul.bf16.vlgmr.msra.gmra.mxu2 %v1670_v35  ;;  %v491_v60 = vld [vmem:[%s11710_s22 + $0x2f8] sm:$0xff]  ;;  %v9269_v48 = vor.u32 %v10759_v39, %v9266_v40  ;;  %v1676_v56 = vpack.c.b16 %v1404_v47, %v1404_v47  ;;  %v10384_v40 = vld [vmem:[%s11717_s11 + $0xbb0] sm:$0xf]  ;;  %v10386_v47 = vld [vmem:[%s11717_s11 + $0xff0] sm:$0xf0] }
 0x34e   : > { %v1402_v4 = vunpack.c.l.b16 %v491_v60  ;;  %v1403_v5 = vunpack.c.h.b16 %v491_v60  ;;  %v10394_v39 = vld [vmem:[%s11717_s11 + $0xff8] sm:$0xf0] }
 0x34f   : > { %v6772_v54 = vpop.f32.mrf.mxu3  ;;  %v6735_v55 = vpop.f32.mrf.mxu0 }
 0x350   : > { %v6759_v49 = vpop.f32.mrf.mxu2  ;;  %v6748_v59 = vpop.f32.mrf.mxu1  ;;  %v1675_v22 = vpack.c.b16 %v1403_v5, %v1403_v5 }
 0x351   : > { %v6760_v53 = vadd.f32 %v6759_v49, %v6747_v44  ;;  %v1405_v49 = vunpack.c.h.b16 %v492_v38  ;;  %v11169_v59 = vld [vmem:[%s11717_s11 + $0xfdc] sm:$0xf0] }
 0x352   : > { %v10369_v7 = vor.u32 %v11169_v59, %v10368_v58  ;;  %v10764_v58 = vld [vmem:[%s11717_s11 + $0x33c] sm:$0xf] }
 0x353   : > { %7199 = vmatpush.bf16.xpose.msrb.mxu0 %v9233_v18  ;;  %7212 = vmatpush.bf16.xpose.msrb.mxu1 %v9237_v20  ;;  %v6773_v62 = vadd.f32 %v6772_v54, %v6760_v53  ;;  %v11031_v18 = vld [vmem:[%s11717_s11 + $0xb94] sm:$0xf]  ;;  %v11170_v53 = vld [vmem:[%s11717_s11 + $0xfe4] sm:$0xf0]  ;;  %v11034_v54 = vld [vmem:[%s11717_s11 + $0xbac] sm:$0xf] }
 0x354   : > { %7225 = vmatpush.bf16.xpose.msrb.mxu2 %v9241_v15  ;;  %v10357_v27 = vor.u32 %v11031_v18, %v10354_v19  ;;  %v10377_v5 = vor.u32 %v11170_v53, %v10376_v52  ;;  %v10381_v6 = vor.u32 %v11034_v54, %v10378_v57  ;;  %v10900_v57 = vld [vmem:[%s11717_s11 + $0x774] sm:$0xf0] }
 0x355   : > { %7238 = vmatpush.bf16.xpose.msrb.mxu3 %v9245_v17  ;;  %v1674_v17 = vpack.c.b16 %v1402_v4, %v1402_v4 }
 0x357   : > { %v6774_v14 = vpop.f32.mrf.mxu3  ;;  %v6785_v15 = vpop.f32.mrf.mxu0 }
 0x358   : > { %v6761_v9 = vpop.f32.mrf.mxu2  ;;  %v6786_v20 = vadd.f32 %v6785_v15, %v6773_v62  ;;  %v6798_v21 = vpop.f32.mrf.mxu1  ;;  %v1677_v62 = vpack.c.b16 %v1405_v49, %v1405_v49  ;;  %v9290_v14 = vld [vmem:[%s11717_s11 + $0x768] sm:$0xf0]  ;;  %v9280_v15 = vld [vmem:[%s11717_s11 + $0x320] sm:$0xf] }
 0x35a   : > { %v6799_v26 = vadd.f32 %v6798_v21, %v6786_v20  ;;  %7200 = vmatmul.bf16.vlgmr.msrb.gmra.mxu0 %v1672_v10  ;;  %7213 = vmatmul.bf16.vlgmr.msrb.gmra.mxu1 %v1673_v16  ;;  %v9288_v10 = vld [vmem:[%s11717_s11 + $0x328] sm:$0xf]  ;;  %v10897_v16 = vld [vmem:[%s11717_s11 + $0x75c] sm:$0xf0]  ;;  %v494_v20 = vld [vmem:[%s11710_s22 + $0x310] sm:$0xff] }
 0x35b   : > { %7250 = vmatpush.bf16.xpose.msra.mxu0 %v10337_v43  ;;  %7263 = vmatpush.bf16.xpose.msra.mxu1 %v10341_v45  ;;  %v9273_v43 = vor.u32 %v10896_v29, %v9272_v28  ;;  %v9277_v45 = vor.u32 %v10760_v30, %v9274_v32  ;;  %v10761_v21 = vld [vmem:[%s11717_s11 + $0x324] sm:$0xf]  ;;  %v9281_v28 = vor.u32 %v10897_v16, %v9280_v15  ;;  %v1408_v29 = vunpack.c.l.b16 %v494_v20  ;;  %v10408_v16 = vld [vmem:[%s11717_s11 + $0xbc8] sm:$0xf] }
 0x35c   : > { %7276 = vmatpush.bf16.xpose.msra.mxu2 %v10345_v41  ;;  %7239 = vmatmul.bf16.vlgmr.msrb.gmra.mxu3 %v1675_v22  ;;  %v9282_v22 = vld [vmem:[%s11717_s11 + $0x760] sm:$0xf0] }
 0x35d   : > { %7289 = vmatpush.bf16.xpose.msra.mxu3 %v10349_v42  ;;  %7226 = vmatmul.bf16.vlgmr.msrb.gmra.mxu2 %v1674_v17  ;;  %v493_v42 = vld [vmem:[%s11710_s22 + $0x308] sm:$0xff]  ;;  %v9285_v30 = vor.u32 %v10761_v21, %v9282_v22  ;;  %v1680_v38 = vpack.c.b16 %v1408_v29, %v1408_v29  ;;  %v10400_v22 = vld [vmem:[%s11717_s11 + $0xbc0] sm:$0xf]  ;;  %v10402_v29 = vld [vmem:[%s11717_s11 + $0x1000] sm:$0xf0] }
 0x35e   : > { %v1406_v50 = vunpack.c.l.b16 %v493_v42  ;;  %v1407_v51 = vunpack.c.h.b16 %v493_v42  ;;  %v10410_v21 = vld [vmem:[%s11717_s11 + $0x1008] sm:$0xf0] }
 0x35f   : > { %v6824_v36 = vpop.f32.mrf.mxu3  ;;  %v6787_v37 = vpop.f32.mrf.mxu0 }
 0x360   : > { %v6811_v31 = vpop.f32.mrf.mxu2  ;;  %v6800_v41 = vpop.f32.mrf.mxu1  ;;  %v1679_v4 = vpack.c.b16 %v1407_v51, %v1407_v51 }
 0x361   : > { %v6812_v35 = vadd.f32 %v6811_v31, %v6799_v26  ;;  %v1409_v31 = vunpack.c.h.b16 %v494_v20  ;;  %v11171_v41 = vld [vmem:[%s11717_s11 + $0xfec] sm:$0xf0] }
 0x362   : > { %v10385_v53 = vor.u32 %v11171_v41, %v10384_v40  ;;  %v10766_v40 = vld [vmem:[%s11717_s11 + $0x34c] sm:$0xf] }
 0x363   : > { %7251 = vmatpush.bf16.xpose.msra.mxu0 %v9249_v0  ;;  %7264 = vmatpush.bf16.xpose.msra.mxu1 %v9253_v2  ;;  %v6825_v44 = vadd.f32 %v6824_v36, %v6812_v35  ;;  %v11033_v0 = vld [vmem:[%s11717_s11 + $0xba4] sm:$0xf]  ;;  %v11172_v35 = vld [vmem:[%s11717_s11 + $0xff4] sm:$0xf0]  ;;  %v11036_v36 = vld [vmem:[%s11717_s11 + $0xbbc] sm:$0xf] }
 0x364   : > { %7277 = vmatpush.bf16.xpose.msra.mxu2 %v9257_v61  ;;  %v10373_v9 = vor.u32 %v11033_v0, %v10370_v1  ;;  %v10393_v51 = vor.u32 %v11172_v35, %v10392_v34  ;;  %v10397_v52 = vor.u32 %v11036_v36, %v10394_v39  ;;  %v10902_v39 = vld [vmem:[%s11717_s11 + $0x784] sm:$0xf0] }
 0x365   : > { %7290 = vmatpush.bf16.xpose.msra.mxu3 %v9261_v63  ;;  %v1678_v63 = vpack.c.b16 %v1406_v50, %v1406_v50 }
 0x367   : > { %v6826_v60 = vpop.f32.mrf.mxu3  ;;  %v6837_v61 = vpop.f32.mrf.mxu0 }
 0x368   : > { %v6813_v55 = vpop.f32.mrf.mxu2  ;;  %v6838_v2 = vadd.f32 %v6837_v61, %v6825_v44  ;;  %v6850_v3 = vpop.f32.mrf.mxu1  ;;  %v1681_v44 = vpack.c.b16 %v1409_v31, %v1409_v31  ;;  %v9306_v60 = vld [vmem:[%s11717_s11 + $0x778] sm:$0xf0]  ;;  %v9296_v61 = vld [vmem:[%s11717_s11 + $0x330] sm:$0xf] }
 0x36a   : > { %v6851_v8 = vadd.f32 %v6850_v3, %v6838_v2  ;;  %7252 = vmatmul.bf16.vlgmr.msra.gmra.mxu0 %v1676_v56  ;;  %7265 = vmatmul.bf16.vlgmr.msra.gmra.mxu1 %v1677_v62  ;;  %v9304_v56 = vld [vmem:[%s11717_s11 + $0x338] sm:$0xf]  ;;  %v10899_v62 = vld [vmem:[%s11717_s11 + $0x76c] sm:$0xf0]  ;;  %v496_v2 = vld [vmem:[%s11710_s22 + $0x320] sm:$0xff] }
 0x36b   : > { %7302 = vmatpush.bf16.xpose.msrb.mxu0 %v10353_v25  ;;  %7315 = vmatpush.bf16.xpose.msrb.mxu1 %v10357_v27  ;;  %v9289_v25 = vor.u32 %v10898_v11, %v9288_v10  ;;  %v9293_v27 = vor.u32 %v10762_v12, %v9290_v14  ;;  %v10763_v3 = vld [vmem:[%s11717_s11 + $0x334] sm:$0xf]  ;;  %v9297_v10 = vor.u32 %v10899_v62, %v9296_v61  ;;  %v1412_v11 = vunpack.c.l.b16 %v496_v2  ;;  %v10424_v62 = vld [vmem:[%s11717_s11 + $0xbd8] sm:$0xf] }
 0x36c   : > { %7328 = vmatpush.bf16.xpose.msrb.mxu2 %v10361_v23  ;;  %7291 = vmatmul.bf16.vlgmr.msra.gmra.mxu3 %v1679_v4  ;;  %v9298_v4 = vld [vmem:[%s11717_s11 + $0x770] sm:$0xf0] }
 0x36d   : > { %7341 = vmatpush.bf16.xpose.msrb.mxu3 %v10365_v24  ;;  %7278 = vmatmul.bf16.vlgmr.msra.gmra.mxu2 %v1678_v63  ;;  %v495_v24 = vld [vmem:[%s11710_s22 + $0x318] sm:$0xff]  ;;  %v9301_v12 = vor.u32 %v10763_v3, %v9298_v4  ;;  %v1684_v20 = vpack.c.b16 %v1412_v11, %v1412_v11  ;;  %v10416_v4 = vld [vmem:[%s11717_s11 + $0xbd0] sm:$0xf]  ;;  %v10418_v11 = vld [vmem:[%s11717_s11 + $0x1010] sm:$0xf0] }
 0x36e   : > { %v1410_v32 = vunpack.c.l.b16 %v495_v24  ;;  %v1411_v33 = vunpack.c.h.b16 %v495_v24  ;;  %v10426_v3 = vld [vmem:[%s11717_s11 + $0x1018] sm:$0xf0] }
 0x36f   : > { %v6876_v18 = vpop.f32.mrf.mxu3  ;;  %v6839_v19 = vpop.f32.mrf.mxu0 }
 0x370   : > { %v6863_v13 = vpop.f32.mrf.mxu2  ;;  %v6852_v23 = vpop.f32.mrf.mxu1  ;;  %v1683_v50 = vpack.c.b16 %v1411_v33, %v1411_v33 }
 0x371   : > { %v6864_v17 = vadd.f32 %v6863_v13, %v6851_v8  ;;  %v1413_v13 = vunpack.c.h.b16 %v496_v2  ;;  %v11173_v23 = vld [vmem:[%s11717_s11 + $0xffc] sm:$0xf0] }
 0x372   : > { %v10401_v35 = vor.u32 %v11173_v23, %v10400_v22  ;;  %v10768_v22 = vld [vmem:[%s11717_s11 + $0x35c] sm:$0xf] }
 0x373   : > { %7303 = vmatpush.bf16.xpose.msrb.mxu0 %v9265_v46  ;;  %7316 = vmatpush.bf16.xpose.msrb.mxu1 %v9269_v48  ;;  %v6877_v26 = vadd.f32 %v6876_v18, %v6864_v17  ;;  %v11035_v46 = vld [vmem:[%s11717_s11 + $0xbb4] sm:$0xf]  ;;  %v11174_v17 = vld [vmem:[%s11717_s11 + $0x1004] sm:$0xf0]  ;;  %v11038_v18 = vld [vmem:[%s11717_s11 + $0xbcc] sm:$0xf] }
 0x374   : > { %7329 = vmatpush.bf16.xpose.msrb.mxu2 %v9273_v43  ;;  %v10389_v55 = vor.u32 %v11035_v46, %v10386_v47  ;;  %v10409_v33 = vor.u32 %v11174_v17, %v10408_v16  ;;  %v10413_v34 = vor.u32 %v11038_v18, %v10410_v21  ;;  %v10904_v21 = vld [vmem:[%s11717_s11 + $0x794] sm:$0xf0] }
 0x375   : > { %7342 = vmatpush.bf16.xpose.msrb.mxu3 %v9277_v45  ;;  %v1682_v45 = vpack.c.b16 %v1410_v32, %v1410_v32 }
 0x377   : > { %v6878_v42 = vpop.f32.mrf.mxu3  ;;  %v6889_v43 = vpop.f32.mrf.mxu0 }
 0x378   : > { %v6865_v37 = vpop.f32.mrf.mxu2  ;;  %v6890_v48 = vadd.f32 %v6889_v43, %v6877_v26  ;;  %v6902_v49 = vpop.f32.mrf.mxu1  ;;  %v1685_v26 = vpack.c.b16 %v1413_v13, %v1413_v13  ;;  %v9322_v42 = vld [vmem:[%s11717_s11 + $0x788] sm:$0xf0]  ;;  %v9312_v43 = vld [vmem:[%s11717_s11 + $0x340] sm:$0xf] }
 0x37a   : > { %v6903_v54 = vadd.f32 %v6902_v49, %v6890_v48  ;;  %7304 = vmatmul.bf16.vlgmr.msrb.gmra.mxu0 %v1680_v38  ;;  %7317 = vmatmul.bf16.vlgmr.msrb.gmra.mxu1 %v1681_v44  ;;  %v9320_v38 = vld [vmem:[%s11717_s11 + $0x348] sm:$0xf]  ;;  %v10901_v44 = vld [vmem:[%s11717_s11 + $0x77c] sm:$0xf0]  ;;  %v498_v48 = vld [vmem:[%s11710_s22 + $0x330] sm:$0xff] }
 0x37b   : > { %7354 = vmatpush.bf16.xpose.msra.mxu0 %v10369_v7  ;;  %7367 = vmatpush.bf16.xpose.msra.mxu1 %v10373_v9  ;;  %v9305_v7 = vor.u32 %v10900_v57, %v9304_v56  ;;  %v9309_v9 = vor.u32 %v10764_v58, %v9306_v60  ;;  %v10765_v49 = vld [vmem:[%s11717_s11 + $0x344] sm:$0xf]  ;;  %v9313_v56 = vor.u32 %v10901_v44, %v9312_v43  ;;  %v1416_v57 = vunpack.c.l.b16 %v498_v48  ;;  %v10440_v44 = vld [vmem:[%s11717_s11 + $0xbe8] sm:$0xf] }
 0x37c   : > { %7380 = vmatpush.bf16.xpose.msra.mxu2 %v10377_v5  ;;  %7343 = vmatmul.bf16.vlgmr.msrb.gmra.mxu3 %v1683_v50  ;;  %v9314_v50 = vld [vmem:[%s11717_s11 + $0x780] sm:$0xf0] }
 0x37d   : > { %7393 = vmatpush.bf16.xpose.msra.mxu3 %v10381_v6  ;;  %7330 = vmatmul.bf16.vlgmr.msrb.gmra.mxu2 %v1682_v45  ;;  %v497_v6 = vld [vmem:[%s11710_s22 + $0x328] sm:$0xff]  ;;  %v9317_v58 = vor.u32 %v10765_v49, %v9314_v50  ;;  %v1688_v2 = vpack.c.b16 %v1416_v57, %v1416_v57  ;;  %v10432_v50 = vld [vmem:[%s11717_s11 + $0xbe0] sm:$0xf]  ;;  %v10434_v57 = vld [vmem:[%s11717_s11 + $0x1020] sm:$0xf0] }
 0x37e   : > { %v1414_v14 = vunpack.c.l.b16 %v497_v6  ;;  %v1415_v15 = vunpack.c.h.b16 %v497_v6  ;;  %v10442_v49 = vld [vmem:[%s11717_s11 + $0x1028] sm:$0xf0] }
 0x37f   : > { %v6928_v0 = vpop.f32.mrf.mxu3  ;;  %v6891_v1 = vpop.f32.mrf.mxu0 }
 0x380   : > { %v6915_v59 = vpop.f32.mrf.mxu2  ;;  %v6904_v5 = vpop.f32.mrf.mxu1  ;;  %v1687_v32 = vpack.c.b16 %v1415_v15, %v1415_v15 }
 0x381   : > { %v6916_v63 = vadd.f32 %v6915_v59, %v6903_v54  ;;  %v1417_v59 = vunpack.c.h.b16 %v498_v48  ;;  %v11175_v5 = vld [vmem:[%s11717_s11 + $0x100c] sm:$0xf0] }
 0x382   : > { %v10417_v17 = vor.u32 %v11175_v5, %v10416_v4  ;;  %v10770_v4 = vld [vmem:[%s11717_s11 + $0x36c] sm:$0xf] }
 0x383   : > { %7355 = vmatpush.bf16.xpose.msra.mxu0 %v9281_v28  ;;  %7368 = vmatpush.bf16.xpose.msra.mxu1 %v9285_v30  ;;  %v6929_v8 = vadd.f32 %v6928_v0, %v6916_v63  ;;  %v11037_v28 = vld [vmem:[%s11717_s11 + $0xbc4] sm:$0xf]  ;;  %v11176_v63 = vld [vmem:[%s11717_s11 + $0x1014] sm:$0xf0]  ;;  %v11040_v0 = vld [vmem:[%s11717_s11 + $0xbdc] sm:$0xf] }
 0x384   : > { %7381 = vmatpush.bf16.xpose.msra.mxu2 %v9289_v25  ;;  %v10405_v37 = vor.u32 %v11037_v28, %v10402_v29  ;;  %v10425_v15 = vor.u32 %v11176_v63, %v10424_v62  ;;  %v10429_v16 = vor.u32 %v11040_v0, %v10426_v3  ;;  %v10906_v3 = vld [vmem:[%s11717_s11 + $0x7a4] sm:$0xf0] }
 0x385   : > { %7394 = vmatpush.bf16.xpose.msra.mxu3 %v9293_v27  ;;  %v1686_v27 = vpack.c.b16 %v1414_v14, %v1414_v14 }
 0x387   : > { %v6930_v24 = vpop.f32.mrf.mxu3  ;;  %v6941_v25 = vpop.f32.mrf.mxu0 }
 0x388   : > { %v6917_v19 = vpop.f32.mrf.mxu2  ;;  %v6942_v30 = vadd.f32 %v6941_v25, %v6929_v8  ;;  %v6954_v31 = vpop.f32.mrf.mxu1  ;;  %v1689_v8 = vpack.c.b16 %v1417_v59, %v1417_v59  ;;  %v9338_v24 = vld [vmem:[%s11717_s11 + $0x798] sm:$0xf0]  ;;  %v9328_v25 = vld [vmem:[%s11717_s11 + $0x350] sm:$0xf] }
 0x38a   : > { %v6955_v36 = vadd.f32 %v6954_v31, %v6942_v30  ;;  %7356 = vmatmul.bf16.vlgmr.msra.gmra.mxu0 %v1684_v20  ;;  %7369 = vmatmul.bf16.vlgmr.msra.gmra.mxu1 %v1685_v26  ;;  %v9336_v20 = vld [vmem:[%s11717_s11 + $0x358] sm:$0xf]  ;;  %v10903_v26 = vld [vmem:[%s11717_s11 + $0x78c] sm:$0xf0]  ;;  %v500_v30 = vld [vmem:[%s11710_s22 + $0x340] sm:$0xff] }
 0x38b   : > { %7406 = vmatpush.bf16.xpose.msrb.mxu0 %v10385_v53  ;;  %7419 = vmatpush.bf16.xpose.msrb.mxu1 %v10389_v55  ;;  %v9321_v53 = vor.u32 %v10902_v39, %v9320_v38  ;;  %v9325_v55 = vor.u32 %v10766_v40, %v9322_v42  ;;  %v10767_v31 = vld [vmem:[%s11717_s11 + $0x354] sm:$0xf]  ;;  %v9329_v38 = vor.u32 %v10903_v26, %v9328_v25  ;;  %v1420_v39 = vunpack.c.l.b16 %v500_v30  ;;  %v10456_v26 = vld [vmem:[%s11717_s11 + $0xbf8] sm:$0xf] }
 0x38c   : > { %7432 = vmatpush.bf16.xpose.msrb.mxu2 %v10393_v51  ;;  %7395 = vmatmul.bf16.vlgmr.msra.gmra.mxu3 %v1687_v32  ;;  %v9330_v32 = vld [vmem:[%s11717_s11 + $0x790] sm:$0xf0] }
 0x38d   : > { %7445 = vmatpush.bf16.xpose.msrb.mxu3 %v10397_v52  ;;  %7382 = vmatmul.bf16.vlgmr.msra.gmra.mxu2 %v1686_v27  ;;  %v499_v52 = vld [vmem:[%s11710_s22 + $0x338] sm:$0xff]  ;;  %v9333_v40 = vor.u32 %v10767_v31, %v9330_v32  ;;  %v1692_v48 = vpack.c.b16 %v1420_v39, %v1420_v39  ;;  %v10448_v32 = vld [vmem:[%s11717_s11 + $0xbf0] sm:$0xf]  ;;  %v10450_v39 = vld [vmem:[%s11717_s11 + $0x1030] sm:$0xf0] }
 0x38e   : > { %v1418_v60 = vunpack.c.l.b16 %v499_v52  ;;  %v1419_v61 = vunpack.c.h.b16 %v499_v52  ;;  %v10458_v31 = vld [vmem:[%s11717_s11 + $0x1038] sm:$0xf0] }
 0x38f   : > { %v6980_v46 = vpop.f32.mrf.mxu3  ;;  %v6943_v47 = vpop.f32.mrf.mxu0 }
 0x390   : > { %v6967_v41 = vpop.f32.mrf.mxu2  ;;  %v6956_v51 = vpop.f32.mrf.mxu1  ;;  %v1691_v14 = vpack.c.b16 %v1419_v61, %v1419_v61 }
 0x391   : > { %v6968_v45 = vadd.f32 %v6967_v41, %v6955_v36  ;;  %v1421_v41 = vunpack.c.h.b16 %v500_v30  ;;  %v11177_v51 = vld [vmem:[%s11717_s11 + $0x101c] sm:$0xf0] }
 0x392   : > { %v10433_v63 = vor.u32 %v11177_v51, %v10432_v50  ;;  %v10772_v50 = vld [vmem:[%s11717_s11 + $0x37c] sm:$0xf] }
 0x393   : > { %7407 = vmatpush.bf16.xpose.msrb.mxu0 %v9297_v10  ;;  %7420 = vmatpush.bf16.xpose.msrb.mxu1 %v9301_v12  ;;  %v6981_v54 = vadd.f32 %v6980_v46, %v6968_v45  ;;  %v11039_v10 = vld [vmem:[%s11717_s11 + $0xbd4] sm:$0xf]  ;;  %v11178_v45 = vld [vmem:[%s11717_s11 + $0x1024] sm:$0xf0]  ;;  %v11042_v46 = vld [vmem:[%s11717_s11 + $0xbec] sm:$0xf] }
 0x394   : > { %7433 = vmatpush.bf16.xpose.msrb.mxu2 %v9305_v7  ;;  %v10421_v19 = vor.u32 %v11039_v10, %v10418_v11  ;;  %v10441_v61 = vor.u32 %v11178_v45, %v10440_v44  ;;  %v10445_v62 = vor.u32 %v11042_v46, %v10442_v49  ;;  %v10908_v49 = vld [vmem:[%s11717_s11 + $0x7b4] sm:$0xf0] }
 0x395   : > { %7446 = vmatpush.bf16.xpose.msrb.mxu3 %v9309_v9  ;;  %v1690_v9 = vpack.c.b16 %v1418_v60, %v1418_v60 }
 0x397   : > { %v6982_v6 = vpop.f32.mrf.mxu3  ;;  %v6993_v7 = vpop.f32.mrf.mxu0 }
 0x398   : > { %v6969_v1 = vpop.f32.mrf.mxu2  ;;  %v6994_v12 = vadd.f32 %v6993_v7, %v6981_v54  ;;  %v7006_v13 = vpop.f32.mrf.mxu1  ;;  %v1693_v54 = vpack.c.b16 %v1421_v41, %v1421_v41  ;;  %v9354_v6 = vld [vmem:[%s11717_s11 + $0x7a8] sm:$0xf0]  ;;  %v9344_v7 = vld [vmem:[%s11717_s11 + $0x360] sm:$0xf] }
 0x39a   : > { %v7007_v18 = vadd.f32 %v7006_v13, %v6994_v12  ;;  %7408 = vmatmul.bf16.vlgmr.msrb.gmra.mxu0 %v1688_v2  ;;  %7421 = vmatmul.bf16.vlgmr.msrb.gmra.mxu1 %v1689_v8  ;;  %v9352_v2 = vld [vmem:[%s11717_s11 + $0x368] sm:$0xf]  ;;  %v10905_v8 = vld [vmem:[%s11717_s11 + $0x79c] sm:$0xf0]  ;;  %v502_v12 = vld [vmem:[%s11710_s22 + $0x350] sm:$0xff] }
 0x39b   : > { %7458 = vmatpush.bf16.xpose.msra.mxu0 %v10401_v35  ;;  %7471 = vmatpush.bf16.xpose.msra.mxu1 %v10405_v37  ;;  %v9337_v35 = vor.u32 %v10904_v21, %v9336_v20  ;;  %v9341_v37 = vor.u32 %v10768_v22, %v9338_v24  ;;  %v10769_v13 = vld [vmem:[%s11717_s11 + $0x364] sm:$0xf]  ;;  %v9345_v20 = vor.u32 %v10905_v8, %v9344_v7  ;;  %v1424_v21 = vunpack.c.l.b16 %v502_v12  ;;  %v10472_v8 = vld [vmem:[%s11717_s11 + $0xc08] sm:$0xf] }
 0x39c   : > { %7484 = vmatpush.bf16.xpose.msra.mxu2 %v10409_v33  ;;  %7447 = vmatmul.bf16.vlgmr.msrb.gmra.mxu3 %v1691_v14  ;;  %v9346_v14 = vld [vmem:[%s11717_s11 + $0x7a0] sm:$0xf0] }
 0x39d   : > { %7497 = vmatpush.bf16.xpose.msra.mxu3 %v10413_v34  ;;  %7434 = vmatmul.bf16.vlgmr.msrb.gmra.mxu2 %v1690_v9  ;;  %v501_v34 = vld [vmem:[%s11710_s22 + $0x348] sm:$0xff]  ;;  %v9349_v22 = vor.u32 %v10769_v13, %v9346_v14  ;;  %v1696_v30 = vpack.c.b16 %v1424_v21, %v1424_v21  ;;  %v10464_v14 = vld [vmem:[%s11717_s11 + $0xc00] sm:$0xf]  ;;  %v10466_v21 = vld [vmem:[%s11717_s11 + $0x1040] sm:$0xf0] }
 0x39e   : > { %v1422_v42 = vunpack.c.l.b16 %v501_v34  ;;  %v1423_v43 = vunpack.c.h.b16 %v501_v34  ;;  %v10474_v13 = vld [vmem:[%s11717_s11 + $0x1048] sm:$0xf0] }
 0x39f   : > { %v7032_v28 = vpop.f32.mrf.mxu3  ;;  %v6995_v29 = vpop.f32.mrf.mxu0 }
 0x3a0   : > { %v7019_v23 = vpop.f32.mrf.mxu2  ;;  %v7008_v33 = vpop.f32.mrf.mxu1  ;;  %v1695_v60 = vpack.c.b16 %v1423_v43, %v1423_v43 }
 0x3a1   : > { %v7020_v27 = vadd.f32 %v7019_v23, %v7007_v18  ;;  %v1425_v23 = vunpack.c.h.b16 %v502_v12  ;;  %v11179_v33 = vld [vmem:[%s11717_s11 + $0x102c] sm:$0xf0] }
 0x3a2   : > { %v10449_v45 = vor.u32 %v11179_v33, %v10448_v32  ;;  %v10774_v32 = vld [vmem:[%s11717_s11 + $0x38c] sm:$0xf] }
 0x3a3   : > { %7459 = vmatpush.bf16.xpose.msra.mxu0 %v9313_v56  ;;  %7472 = vmatpush.bf16.xpose.msra.mxu1 %v9317_v58  ;;  %v7033_v36 = vadd.f32 %v7032_v28, %v7020_v27  ;;  %v11041_v56 = vld [vmem:[%s11717_s11 + $0xbe4] sm:$0xf]  ;;  %v11180_v27 = vld [vmem:[%s11717_s11 + $0x1034] sm:$0xf0]  ;;  %v11044_v28 = vld [vmem:[%s11717_s11 + $0xbfc] sm:$0xf] }
 0x3a4   : > { %7485 = vmatpush.bf16.xpose.msra.mxu2 %v9321_v53  ;;  %v10437_v1 = vor.u32 %v11041_v56, %v10434_v57  ;;  %v10457_v43 = vor.u32 %v11180_v27, %v10456_v26  ;;  %v10461_v44 = vor.u32 %v11044_v28, %v10458_v31  ;;  %v10910_v31 = vld [vmem:[%s11717_s11 + $0x7c4] sm:$0xf0] }
 0x3a5   : > { %7498 = vmatpush.bf16.xpose.msra.mxu3 %v9325_v55  ;;  %v1694_v55 = vpack.c.b16 %v1422_v42, %v1422_v42 }
 0x3a7   : > { %v7034_v52 = vpop.f32.mrf.mxu3  ;;  %v7045_v53 = vpop.f32.mrf.mxu0 }
 0x3a8   : > { %v7021_v47 = vpop.f32.mrf.mxu2  ;;  %v7046_v58 = vadd.f32 %v7045_v53, %v7033_v36  ;;  %v7058_v59 = vpop.f32.mrf.mxu1  ;;  %v1697_v36 = vpack.c.b16 %v1425_v23, %v1425_v23  ;;  %v9370_v52 = vld [vmem:[%s11717_s11 + $0x7b8] sm:$0xf0]  ;;  %v9360_v53 = vld [vmem:[%s11717_s11 + $0x370] sm:$0xf] }
 0x3aa   : > { %v7059_v0 = vadd.f32 %v7058_v59, %v7046_v58  ;;  %7460 = vmatmul.bf16.vlgmr.msra.gmra.mxu0 %v1692_v48  ;;  %7473 = vmatmul.bf16.vlgmr.msra.gmra.mxu1 %v1693_v54  ;;  %v9368_v48 = vld [vmem:[%s11717_s11 + $0x378] sm:$0xf]  ;;  %v10907_v54 = vld [vmem:[%s11717_s11 + $0x7ac] sm:$0xf0]  ;;  %v504_v58 = vld [vmem:[%s11710_s22 + $0x360] sm:$0xff] }
 0x3ab   : > { %7510 = vmatpush.bf16.xpose.msrb.mxu0 %v10417_v17  ;;  %7523 = vmatpush.bf16.xpose.msrb.mxu1 %v10421_v19  ;;  %v9353_v17 = vor.u32 %v10906_v3, %v9352_v2  ;;  %v9357_v19 = vor.u32 %v10770_v4, %v9354_v6  ;;  %v10771_v59 = vld [vmem:[%s11717_s11 + $0x374] sm:$0xf]  ;;  %v9361_v2 = vor.u32 %v10907_v54, %v9360_v53  ;;  %v1428_v3 = vunpack.c.l.b16 %v504_v58  ;;  %v10488_v54 = vld [vmem:[%s11717_s11 + $0xc18] sm:$0xf] }
 0x3ac   : > { %7536 = vmatpush.bf16.xpose.msrb.mxu2 %v10425_v15  ;;  %7499 = vmatmul.bf16.vlgmr.msra.gmra.mxu3 %v1695_v60  ;;  %v9362_v60 = vld [vmem:[%s11717_s11 + $0x7b0] sm:$0xf0] }
 0x3ad   : > { %7549 = vmatpush.bf16.xpose.msrb.mxu3 %v10429_v16  ;;  %7486 = vmatmul.bf16.vlgmr.msra.gmra.mxu2 %v1694_v55  ;;  %v503_v16 = vld [vmem:[%s11710_s22 + $0x358] sm:$0xff]  ;;  %v9365_v4 = vor.u32 %v10771_v59, %v9362_v60  ;;  %v1700_v12 = vpack.c.b16 %v1428_v3, %v1428_v3  ;;  %v10480_v60 = vld [vmem:[%s11717_s11 + $0xc10] sm:$0xf]  ;;  %v10482_v3 = vld [vmem:[%s11717_s11 + $0x1050] sm:$0xf0] }
 0x3ae   : > { %v1426_v24 = vunpack.c.l.b16 %v503_v16  ;;  %v1427_v25 = vunpack.c.h.b16 %v503_v16  ;;  %v10490_v59 = vld [vmem:[%s11717_s11 + $0x1058] sm:$0xf0] }
 0x3af   : > { %v7084_v10 = vpop.f32.mrf.mxu3  ;;  %v7047_v11 = vpop.f32.mrf.mxu0 }
 0x3b0   : > { %v7071_v5 = vpop.f32.mrf.mxu2  ;;  %v7060_v15 = vpop.f32.mrf.mxu1  ;;  %v1699_v42 = vpack.c.b16 %v1427_v25, %v1427_v25 }
 0x3b1   : > { %v7072_v9 = vadd.f32 %v7071_v5, %v7059_v0  ;;  %v1429_v5 = vunpack.c.h.b16 %v504_v58  ;;  %v11181_v15 = vld [vmem:[%s11717_s11 + $0x103c] sm:$0xf0] }
 0x3b2   : > { %v10465_v27 = vor.u32 %v11181_v15, %v10464_v14  ;;  %v10776_v14 = vld [vmem:[%s11717_s11 + $0x39c] sm:$0xf] }
 0x3b3   : > { %7511 = vmatpush.bf16.xpose.msrb.mxu0 %v9329_v38  ;;  %7524 = vmatpush.bf16.xpose.msrb.mxu1 %v9333_v40  ;;  %v7085_v18 = vadd.f32 %v7084_v10, %v7072_v9  ;;  %v11043_v38 = vld [vmem:[%s11717_s11 + $0xbf4] sm:$0xf]  ;;  %v11182_v9 = vld [vmem:[%s11717_s11 + $0x1044] sm:$0xf0]  ;;  %v11046_v10 = vld [vmem:[%s11717_s11 + $0xc0c] sm:$0xf] }
 0x3b4   : > { %7537 = vmatpush.bf16.xpose.msrb.mxu2 %v9337_v35  ;;  %v10453_v47 = vor.u32 %v11043_v38, %v10450_v39  ;;  %v10473_v25 = vor.u32 %v11182_v9, %v10472_v8  ;;  %v10477_v26 = vor.u32 %v11046_v10, %v10474_v13  ;;  %v10912_v13 = vld [vmem:[%s11717_s11 + $0x7d4] sm:$0xf0] }
 0x3b5   : > { %7550 = vmatpush.bf16.xpose.msrb.mxu3 %v9341_v37  ;;  %v1698_v37 = vpack.c.b16 %v1426_v24, %v1426_v24 }
 0x3b7   : > { %v7086_v34 = vpop.f32.mrf.mxu3  ;;  %v7097_v35 = vpop.f32.mrf.mxu0 }
 0x3b8   : > { %v7073_v29 = vpop.f32.mrf.mxu2  ;;  %v7098_v40 = vadd.f32 %v7097_v35, %v7085_v18  ;;  %v7110_v41 = vpop.f32.mrf.mxu1  ;;  %v1701_v18 = vpack.c.b16 %v1429_v5, %v1429_v5  ;;  %v9386_v34 = vld [vmem:[%s11717_s11 + $0x7c8] sm:$0xf0]  ;;  %v9376_v35 = vld [vmem:[%s11717_s11 + $0x380] sm:$0xf] }
 0x3ba   : > { %v7111_v46 = vadd.f32 %v7110_v41, %v7098_v40  ;;  %7512 = vmatmul.bf16.vlgmr.msrb.gmra.mxu0 %v1696_v30  ;;  %7525 = vmatmul.bf16.vlgmr.msrb.gmra.mxu1 %v1697_v36  ;;  %v9384_v30 = vld [vmem:[%s11717_s11 + $0x388] sm:$0xf]  ;;  %v10909_v36 = vld [vmem:[%s11717_s11 + $0x7bc] sm:$0xf0]  ;;  %v506_v40 = vld [vmem:[%s11710_s22 + $0x370] sm:$0xff] }
 0x3bb   : > { %7562 = vmatpush.bf16.xpose.msra.mxu0 %v10433_v63  ;;  %7575 = vmatpush.bf16.xpose.msra.mxu1 %v10437_v1  ;;  %v9369_v63 = vor.u32 %v10908_v49, %v9368_v48  ;;  %v9373_v1 = vor.u32 %v10772_v50, %v9370_v52  ;;  %v10773_v41 = vld [vmem:[%s11717_s11 + $0x384] sm:$0xf]  ;;  %v9377_v48 = vor.u32 %v10909_v36, %v9376_v35  ;;  %v1432_v49 = vunpack.c.l.b16 %v506_v40  ;;  %v10504_v36 = vld [vmem:[%s11717_s11 + $0xc28] sm:$0xf] }
 0x3bc   : > { %7588 = vmatpush.bf16.xpose.msra.mxu2 %v10441_v61  ;;  %7551 = vmatmul.bf16.vlgmr.msrb.gmra.mxu3 %v1699_v42  ;;  %v9378_v42 = vld [vmem:[%s11717_s11 + $0x7c0] sm:$0xf0] }
 0x3bd   : > { %7601 = vmatpush.bf16.xpose.msra.mxu3 %v10445_v62  ;;  %7538 = vmatmul.bf16.vlgmr.msrb.gmra.mxu2 %v1698_v37  ;;  %v505_v62 = vld [vmem:[%s11710_s22 + $0x368] sm:$0xff]  ;;  %v9381_v50 = vor.u32 %v10773_v41, %v9378_v42  ;;  %v1704_v58 = vpack.c.b16 %v1432_v49, %v1432_v49  ;;  %v10496_v42 = vld [vmem:[%s11717_s11 + $0xc20] sm:$0xf]  ;;  %v10498_v49 = vld [vmem:[%s11717_s11 + $0x1060] sm:$0xf0] }
 0x3be   : > { %v1430_v6 = vunpack.c.l.b16 %v505_v62  ;;  %v1431_v7 = vunpack.c.h.b16 %v505_v62  ;;  %v10506_v41 = vld [vmem:[%s11717_s11 + $0x1068] sm:$0xf0] }
 0x3bf   : > { %v7136_v56 = vpop.f32.mrf.mxu3  ;;  %v7099_v57 = vpop.f32.mrf.mxu0 }
 0x3c0   : > { %v7123_v51 = vpop.f32.mrf.mxu2  ;;  %v7112_v61 = vpop.f32.mrf.mxu1  ;;  %v1703_v24 = vpack.c.b16 %v1431_v7, %v1431_v7 }
 0x3c1   : > { %v7124_v55 = vadd.f32 %v7123_v51, %v7111_v46  ;;  %v1433_v51 = vunpack.c.h.b16 %v506_v40  ;;  %v11183_v61 = vld [vmem:[%s11717_s11 + $0x104c] sm:$0xf0] }
 0x3c2   : > { %v10481_v9 = vor.u32 %v11183_v61, %v10480_v60  ;;  %v10778_v60 = vld [vmem:[%s11717_s11 + $0x3ac] sm:$0xf] }
 0x3c3   : > { %7563 = vmatpush.bf16.xpose.msra.mxu0 %v9345_v20  ;;  %7576 = vmatpush.bf16.xpose.msra.mxu1 %v9349_v22  ;;  %v7137_v0 = vadd.f32 %v7136_v56, %v7124_v55  ;;  %v11045_v20 = vld [vmem:[%s11717_s11 + $0xc04] sm:$0xf]  ;;  %v11184_v55 = vld [vmem:[%s11717_s11 + $0x1054] sm:$0xf0]  ;;  %v11048_v56 = vld [vmem:[%s11717_s11 + $0xc1c] sm:$0xf] }
 0x3c4   : > { %7589 = vmatpush.bf16.xpose.msra.mxu2 %v9353_v17  ;;  %v10469_v29 = vor.u32 %v11045_v20, %v10466_v21  ;;  %v10489_v7 = vor.u32 %v11184_v55, %v10488_v54  ;;  %v10493_v8 = vor.u32 %v11048_v56, %v10490_v59  ;;  %v10914_v59 = vld [vmem:[%s11717_s11 + $0x7e4] sm:$0xf0] }
 0x3c5   : > { %7602 = vmatpush.bf16.xpose.msra.mxu3 %v9357_v19  ;;  %v1702_v19 = vpack.c.b16 %v1430_v6, %v1430_v6 }
 0x3c7   : > { %v7138_v16 = vpop.f32.mrf.mxu3  ;;  %v7149_v17 = vpop.f32.mrf.mxu0 }
 0x3c8   : > { %v7125_v11 = vpop.f32.mrf.mxu2  ;;  %v7150_v22 = vadd.f32 %v7149_v17, %v7137_v0  ;;  %v7162_v23 = vpop.f32.mrf.mxu1  ;;  %v1705_v0 = vpack.c.b16 %v1433_v51, %v1433_v51  ;;  %v9402_v16 = vld [vmem:[%s11717_s11 + $0x7d8] sm:$0xf0]  ;;  %v9392_v17 = vld [vmem:[%s11717_s11 + $0x390] sm:$0xf] }
 0x3ca   : > { %v7163_v28 = vadd.f32 %v7162_v23, %v7150_v22  ;;  %7564 = vmatmul.bf16.vlgmr.msra.gmra.mxu0 %v1700_v12  ;;  %7577 = vmatmul.bf16.vlgmr.msra.gmra.mxu1 %v1701_v18  ;;  %v9400_v12 = vld [vmem:[%s11717_s11 + $0x398] sm:$0xf]  ;;  %v10911_v18 = vld [vmem:[%s11717_s11 + $0x7cc] sm:$0xf0]  ;;  %v508_v22 = vld [vmem:[%s11710_s22 + $0x380] sm:$0xff] }
 0x3cb   : > { %7614 = vmatpush.bf16.xpose.msrb.mxu0 %v10449_v45  ;;  %7627 = vmatpush.bf16.xpose.msrb.mxu1 %v10453_v47  ;;  %v9385_v45 = vor.u32 %v10910_v31, %v9384_v30  ;;  %v9389_v47 = vor.u32 %v10774_v32, %v9386_v34  ;;  %v10775_v23 = vld [vmem:[%s11717_s11 + $0x394] sm:$0xf]  ;;  %v9393_v30 = vor.u32 %v10911_v18, %v9392_v17  ;;  %v1436_v31 = vunpack.c.l.b16 %v508_v22  ;;  %v10520_v18 = vld [vmem:[%s11717_s11 + $0xc38] sm:$0xf] }
 0x3cc   : > { %7640 = vmatpush.bf16.xpose.msrb.mxu2 %v10457_v43  ;;  %7603 = vmatmul.bf16.vlgmr.msra.gmra.mxu3 %v1703_v24  ;;  %v9394_v24 = vld [vmem:[%s11717_s11 + $0x7d0] sm:$0xf0] }
 0x3cd   : > { %7653 = vmatpush.bf16.xpose.msrb.mxu3 %v10461_v44  ;;  %7590 = vmatmul.bf16.vlgmr.msra.gmra.mxu2 %v1702_v19  ;;  %v507_v44 = vld [vmem:[%s11710_s22 + $0x378] sm:$0xff]  ;;  %v9397_v32 = vor.u32 %v10775_v23, %v9394_v24  ;;  %v1708_v40 = vpack.c.b16 %v1436_v31, %v1436_v31  ;;  %v10512_v24 = vld [vmem:[%s11717_s11 + $0xc30] sm:$0xf]  ;;  %v10514_v31 = vld [vmem:[%s11717_s11 + $0x1070] sm:$0xf0] }
 0x3ce   : > { %v1434_v52 = vunpack.c.l.b16 %v507_v44  ;;  %v1435_v53 = vunpack.c.h.b16 %v507_v44  ;;  %v10522_v23 = vld [vmem:[%s11717_s11 + $0x1078] sm:$0xf0] }
 0x3cf   : > { %v7188_v38 = vpop.f32.mrf.mxu3  ;;  %v7151_v39 = vpop.f32.mrf.mxu0 }
 0x3d0   : > { %v7175_v33 = vpop.f32.mrf.mxu2  ;;  %v7164_v43 = vpop.f32.mrf.mxu1  ;;  %v1707_v6 = vpack.c.b16 %v1435_v53, %v1435_v53 }
 0x3d1   : > { %v7176_v37 = vadd.f32 %v7175_v33, %v7163_v28  ;;  %v1437_v33 = vunpack.c.h.b16 %v508_v22  ;;  %v11185_v43 = vld [vmem:[%s11717_s11 + $0x105c] sm:$0xf0] }
 0x3d2   : > { %v10497_v55 = vor.u32 %v11185_v43, %v10496_v42  ;;  %v10780_v42 = vld [vmem:[%s11717_s11 + $0x3bc] sm:$0xf] }
 0x3d3   : > { %7615 = vmatpush.bf16.xpose.msrb.mxu0 %v9361_v2  ;;  %7628 = vmatpush.bf16.xpose.msrb.mxu1 %v9365_v4  ;;  %v7189_v46 = vadd.f32 %v7188_v38, %v7176_v37  ;;  %v11047_v2 = vld [vmem:[%s11717_s11 + $0xc14] sm:$0xf]  ;;  %v11186_v37 = vld [vmem:[%s11717_s11 + $0x1064] sm:$0xf0]  ;;  %v11050_v38 = vld [vmem:[%s11717_s11 + $0xc2c] sm:$0xf] }
 0x3d4   : > { %7641 = vmatpush.bf16.xpose.msrb.mxu2 %v9369_v63  ;;  %v10485_v11 = vor.u32 %v11047_v2, %v10482_v3  ;;  %v10505_v53 = vor.u32 %v11186_v37, %v10504_v36  ;;  %v10509_v54 = vor.u32 %v11050_v38, %v10506_v41  ;;  %v10916_v41 = vld [vmem:[%s11717_s11 + $0x7f4] sm:$0xf0] }
 0x3d5   : > { %7654 = vmatpush.bf16.xpose.msrb.mxu3 %v9373_v1  ;;  %v1706_v1 = vpack.c.b16 %v1434_v52, %v1434_v52 }
 0x3d7   : > { %v7190_v62 = vpop.f32.mrf.mxu3  ;;  %v7201_v63 = vpop.f32.mrf.mxu0 }
 0x3d8   : > { %v7177_v57 = vpop.f32.mrf.mxu2  ;;  %v7202_v4 = vadd.f32 %v7201_v63, %v7189_v46  ;;  %v7214_v5 = vpop.f32.mrf.mxu1  ;;  %v1709_v46 = vpack.c.b16 %v1437_v33, %v1437_v33  ;;  %v9418_v62 = vld [vmem:[%s11717_s11 + $0x7e8] sm:$0xf0]  ;;  %v9408_v63 = vld [vmem:[%s11717_s11 + $0x3a0] sm:$0xf] }
 0x3da   : > { %v7215_v10 = vadd.f32 %v7214_v5, %v7202_v4  ;;  %7616 = vmatmul.bf16.vlgmr.msrb.gmra.mxu0 %v1704_v58  ;;  %7629 = vmatmul.bf16.vlgmr.msrb.gmra.mxu1 %v1705_v0  ;;  %v9416_v58 = vld [vmem:[%s11717_s11 + $0x3a8] sm:$0xf]  ;;  %v10913_v0 = vld [vmem:[%s11717_s11 + $0x7dc] sm:$0xf0]  ;;  %v510_v4 = vld [vmem:[%s11710_s22 + $0x390] sm:$0xff] }
 0x3db   : > { %7666 = vmatpush.bf16.xpose.msra.mxu0 %v10465_v27  ;;  %7679 = vmatpush.bf16.xpose.msra.mxu1 %v10469_v29  ;;  %v9401_v27 = vor.u32 %v10912_v13, %v9400_v12  ;;  %v9405_v29 = vor.u32 %v10776_v14, %v9402_v16  ;;  %v10777_v5 = vld [vmem:[%s11717_s11 + $0x3a4] sm:$0xf]  ;;  %v9409_v12 = vor.u32 %v10913_v0, %v9408_v63  ;;  %v1440_v13 = vunpack.c.l.b16 %v510_v4  ;;  %v10536_v0 = vld [vmem:[%s11717_s11 + $0xc48] sm:$0xf] }
 0x3dc   : > { %7692 = vmatpush.bf16.xpose.msra.mxu2 %v10473_v25  ;;  %7655 = vmatmul.bf16.vlgmr.msrb.gmra.mxu3 %v1707_v6  ;;  %v9410_v6 = vld [vmem:[%s11717_s11 + $0x7e0] sm:$0xf0] }
 0x3dd   : > { %7705 = vmatpush.bf16.xpose.msra.mxu3 %v10477_v26  ;;  %7642 = vmatmul.bf16.vlgmr.msrb.gmra.mxu2 %v1706_v1  ;;  %v509_v26 = vld [vmem:[%s11710_s22 + $0x388] sm:$0xff]  ;;  %v9413_v14 = vor.u32 %v10777_v5, %v9410_v6  ;;  %v1712_v22 = vpack.c.b16 %v1440_v13, %v1440_v13  ;;  %v10528_v6 = vld [vmem:[%s11717_s11 + $0xc40] sm:$0xf]  ;;  %v10530_v13 = vld [vmem:[%s11717_s11 + $0x1080] sm:$0xf0] }
 0x3de   : > { %v1438_v34 = vunpack.c.l.b16 %v509_v26  ;;  %v1439_v35 = vunpack.c.h.b16 %v509_v26  ;;  %v10538_v5 = vld [vmem:[%s11717_s11 + $0x1088] sm:$0xf0] }
 0x3df   : > { %v7240_v20 = vpop.f32.mrf.mxu3  ;;  %v7203_v21 = vpop.f32.mrf.mxu0 }
 0x3e0   : > { %v7227_v15 = vpop.f32.mrf.mxu2  ;;  %v7216_v25 = vpop.f32.mrf.mxu1  ;;  %v1711_v52 = vpack.c.b16 %v1439_v35, %v1439_v35 }
 0x3e1   : > { %v7228_v19 = vadd.f32 %v7227_v15, %v7215_v10  ;;  %v1441_v15 = vunpack.c.h.b16 %v510_v4  ;;  %v11187_v25 = vld [vmem:[%s11717_s11 + $0x106c] sm:$0xf0] }
 0x3e2   : > { %v10513_v37 = vor.u32 %v11187_v25, %v10512_v24  ;;  %v10782_v24 = vld [vmem:[%s11717_s11 + $0x3cc] sm:$0xf] }
 0x3e3   : > { %7667 = vmatpush.bf16.xpose.msra.mxu0 %v9377_v48  ;;  %7680 = vmatpush.bf16.xpose.msra.mxu1 %v9381_v50  ;;  %v7241_v28 = vadd.f32 %v7240_v20, %v7228_v19  ;;  %v11049_v48 = vld [vmem:[%s11717_s11 + $0xc24] sm:$0xf]  ;;  %v11188_v19 = vld [vmem:[%s11717_s11 + $0x1074] sm:$0xf0]  ;;  %v11052_v20 = vld [vmem:[%s11717_s11 + $0xc3c] sm:$0xf] }
 0x3e4   : > { %7693 = vmatpush.bf16.xpose.msra.mxu2 %v9385_v45  ;;  %v10501_v57 = vor.u32 %v11049_v48, %v10498_v49  ;;  %v10521_v35 = vor.u32 %v11188_v19, %v10520_v18  ;;  %v10525_v36 = vor.u32 %v11052_v20, %v10522_v23  ;;  %v10918_v23 = vld [vmem:[%s11717_s11 + $0x804] sm:$0xf0] }
 0x3e5   : > { %7706 = vmatpush.bf16.xpose.msra.mxu3 %v9389_v47  ;;  %v1710_v47 = vpack.c.b16 %v1438_v34, %v1438_v34 }
 0x3e7   : > { %v7242_v44 = vpop.f32.mrf.mxu3  ;;  %v7253_v45 = vpop.f32.mrf.mxu0 }
 0x3e8   : > { %v7229_v39 = vpop.f32.mrf.mxu2  ;;  %v7254_v50 = vadd.f32 %v7253_v45, %v7241_v28  ;;  %v7266_v51 = vpop.f32.mrf.mxu1  ;;  %v1713_v28 = vpack.c.b16 %v1441_v15, %v1441_v15  ;;  %v9434_v44 = vld [vmem:[%s11717_s11 + $0x7f8] sm:$0xf0]  ;;  %v9424_v45 = vld [vmem:[%s11717_s11 + $0x3b0] sm:$0xf] }
 0x3ea   : > { %v7267_v56 = vadd.f32 %v7266_v51, %v7254_v50  ;;  %7668 = vmatmul.bf16.vlgmr.msra.gmra.mxu0 %v1708_v40  ;;  %7681 = vmatmul.bf16.vlgmr.msra.gmra.mxu1 %v1709_v46  ;;  %v9432_v40 = vld [vmem:[%s11717_s11 + $0x3b8] sm:$0xf]  ;;  %v10915_v46 = vld [vmem:[%s11717_s11 + $0x7ec] sm:$0xf0]  ;;  %v512_v50 = vld [vmem:[%s11710_s22 + $0x3a0] sm:$0xff] }
 0x3eb   : > { %7718 = vmatpush.bf16.xpose.msrb.mxu0 %v10481_v9  ;;  %7731 = vmatpush.bf16.xpose.msrb.mxu1 %v10485_v11  ;;  %v9417_v9 = vor.u32 %v10914_v59, %v9416_v58  ;;  %v9421_v11 = vor.u32 %v10778_v60, %v9418_v62  ;;  %v10779_v51 = vld [vmem:[%s11717_s11 + $0x3b4] sm:$0xf]  ;;  %v9425_v58 = vor.u32 %v10915_v46, %v9424_v45  ;;  %v1444_v59 = vunpack.c.l.b16 %v512_v50  ;;  %v10552_v46 = vld [vmem:[%s11717_s11 + $0xc58] sm:$0xf] }
 0x3ec   : > { %7744 = vmatpush.bf16.xpose.msrb.mxu2 %v10489_v7  ;;  %7707 = vmatmul.bf16.vlgmr.msra.gmra.mxu3 %v1711_v52  ;;  %v9426_v52 = vld [vmem:[%s11717_s11 + $0x7f0] sm:$0xf0] }
 0x3ed   : > { %7757 = vmatpush.bf16.xpose.msrb.mxu3 %v10493_v8  ;;  %7694 = vmatmul.bf16.vlgmr.msra.gmra.mxu2 %v1710_v47  ;;  %v511_v8 = vld [vmem:[%s11710_s22 + $0x398] sm:$0xff]  ;;  %v9429_v60 = vor.u32 %v10779_v51, %v9426_v52  ;;  %v1716_v4 = vpack.c.b16 %v1444_v59, %v1444_v59  ;;  %v10544_v52 = vld [vmem:[%s11717_s11 + $0xc50] sm:$0xf]  ;;  %v10546_v59 = vld [vmem:[%s11717_s11 + $0x1090] sm:$0xf0] }
 0x3ee   : > { %v1442_v16 = vunpack.c.l.b16 %v511_v8  ;;  %v1443_v17 = vunpack.c.h.b16 %v511_v8  ;;  %v10554_v51 = vld [vmem:[%s11717_s11 + $0x1098] sm:$0xf0] }
 0x3ef   : > { %v7292_v2 = vpop.f32.mrf.mxu3  ;;  %v7255_v3 = vpop.f32.mrf.mxu0 }
 0x3f0   : > { %v7279_v61 = vpop.f32.mrf.mxu2  ;;  %v7268_v7 = vpop.f32.mrf.mxu1  ;;  %v1715_v34 = vpack.c.b16 %v1443_v17, %v1443_v17 }
 0x3f1   : > { %v7280_v1 = vadd.f32 %v7279_v61, %v7267_v56  ;;  %v1445_v61 = vunpack.c.h.b16 %v512_v50  ;;  %v11189_v7 = vld [vmem:[%s11717_s11 + $0x107c] sm:$0xf0] }
 0x3f2   : > { %v10529_v19 = vor.u32 %v11189_v7, %v10528_v6  ;;  %v10784_v6 = vld [vmem:[%s11717_s11 + $0x3dc] sm:$0xf] }
 0x3f3   : > { %7719 = vmatpush.bf16.xpose.msrb.mxu0 %v9393_v30  ;;  %7732 = vmatpush.bf16.xpose.msrb.mxu1 %v9397_v32  ;;  %v7293_v10 = vadd.f32 %v7292_v2, %v7280_v1  ;;  %v11051_v30 = vld [vmem:[%s11717_s11 + $0xc34] sm:$0xf]  ;;  %v11190_v1 = vld [vmem:[%s11717_s11 + $0x1084] sm:$0xf0]  ;;  %v11054_v2 = vld [vmem:[%s11717_s11 + $0xc4c] sm:$0xf] }
 0x3f4   : > { %7745 = vmatpush.bf16.xpose.msrb.mxu2 %v9401_v27  ;;  %v10517_v39 = vor.u32 %v11051_v30, %v10514_v31  ;;  %v10537_v17 = vor.u32 %v11190_v1, %v10536_v0  ;;  %v10541_v18 = vor.u32 %v11054_v2, %v10538_v5  ;;  %v10920_v5 = vld [vmem:[%s11717_s11 + $0x814] sm:$0xf0] }
 0x3f5   : > { %7758 = vmatpush.bf16.xpose.msrb.mxu3 %v9405_v29  ;;  %v1714_v29 = vpack.c.b16 %v1442_v16, %v1442_v16 }
 0x3f7   : > { %v7294_v26 = vpop.f32.mrf.mxu3  ;;  %v7305_v27 = vpop.f32.mrf.mxu0 }
 0x3f8   : > { %v7281_v21 = vpop.f32.mrf.mxu2  ;;  %v7306_v32 = vadd.f32 %v7305_v27, %v7293_v10  ;;  %v7318_v33 = vpop.f32.mrf.mxu1  ;;  %v1717_v10 = vpack.c.b16 %v1445_v61, %v1445_v61  ;;  %v9450_v26 = vld [vmem:[%s11717_s11 + $0x808] sm:$0xf0]  ;;  %v9440_v27 = vld [vmem:[%s11717_s11 + $0x3c0] sm:$0xf] }
 0x3fa   : > { %v7319_v38 = vadd.f32 %v7318_v33, %v7306_v32  ;;  %7720 = vmatmul.bf16.vlgmr.msrb.gmra.mxu0 %v1712_v22  ;;  %7733 = vmatmul.bf16.vlgmr.msrb.gmra.mxu1 %v1713_v28  ;;  %v9448_v22 = vld [vmem:[%s11717_s11 + $0x3c8] sm:$0xf]  ;;  %v10917_v28 = vld [vmem:[%s11717_s11 + $0x7fc] sm:$0xf0]  ;;  %v514_v32 = vld [vmem:[%s11710_s22 + $0x3b0] sm:$0xff] }
 0x3fb   : > { %7770 = vmatpush.bf16.xpose.msra.mxu0 %v10497_v55  ;;  %7783 = vmatpush.bf16.xpose.msra.mxu1 %v10501_v57  ;;  %v9433_v55 = vor.u32 %v10916_v41, %v9432_v40  ;;  %v9437_v57 = vor.u32 %v10780_v42, %v9434_v44  ;;  %v10781_v33 = vld [vmem:[%s11717_s11 + $0x3c4] sm:$0xf]  ;;  %v9441_v40 = vor.u32 %v10917_v28, %v9440_v27  ;;  %v1448_v41 = vunpack.c.l.b16 %v514_v32  ;;  %v10568_v28 = vld [vmem:[%s11717_s11 + $0xc68] sm:$0xf] }
 0x3fc   : > { %7796 = vmatpush.bf16.xpose.msra.mxu2 %v10505_v53  ;;  %7759 = vmatmul.bf16.vlgmr.msrb.gmra.mxu3 %v1715_v34  ;;  %v9442_v34 = vld [vmem:[%s11717_s11 + $0x800] sm:$0xf0] }
 0x3fd   : > { %7809 = vmatpush.bf16.xpose.msra.mxu3 %v10509_v54  ;;  %7746 = vmatmul.bf16.vlgmr.msrb.gmra.mxu2 %v1714_v29  ;;  %v513_v54 = vld [vmem:[%s11710_s22 + $0x3a8] sm:$0xff]  ;;  %v9445_v42 = vor.u32 %v10781_v33, %v9442_v34  ;;  %v1720_v50 = vpack.c.b16 %v1448_v41, %v1448_v41  ;;  %v10560_v34 = vld [vmem:[%s11717_s11 + $0xc60] sm:$0xf]  ;;  %v10562_v41 = vld [vmem:[%s11717_s11 + $0x10a0] sm:$0xf0] }
 0x3fe   : > { %v1446_v62 = vunpack.c.l.b16 %v513_v54  ;;  %v1447_v63 = vunpack.c.h.b16 %v513_v54  ;;  %v10570_v33 = vld [vmem:[%s11717_s11 + $0x10a8] sm:$0xf0] }
 0x3ff   : > { %v7344_v48 = vpop.f32.mrf.mxu3  ;;  %v7307_v49 = vpop.f32.mrf.mxu0 }
 0x400   : > { %v7331_v43 = vpop.f32.mrf.mxu2  ;;  %v7320_v53 = vpop.f32.mrf.mxu1  ;;  %v1719_v16 = vpack.c.b16 %v1447_v63, %v1447_v63 }
 0x401   : > { %v7332_v47 = vadd.f32 %v7331_v43, %v7319_v38  ;;  %v1449_v43 = vunpack.c.h.b16 %v514_v32  ;;  %v11191_v53 = vld [vmem:[%s11717_s11 + $0x108c] sm:$0xf0] }
 0x402   : > { %v10545_v1 = vor.u32 %v11191_v53, %v10544_v52  ;;  %v10786_v52 = vld [vmem:[%s11717_s11 + $0x3ec] sm:$0xf] }
 0x403   : > { %7771 = vmatpush.bf16.xpose.msra.mxu0 %v9409_v12  ;;  %7784 = vmatpush.bf16.xpose.msra.mxu1 %v9413_v14  ;;  %v7345_v56 = vadd.f32 %v7344_v48, %v7332_v47  ;;  %v11053_v12 = vld [vmem:[%s11717_s11 + $0xc44] sm:$0xf]  ;;  %v11192_v47 = vld [vmem:[%s11717_s11 + $0x1094] sm:$0xf0]  ;;  %v11056_v48 = vld [vmem:[%s11717_s11 + $0xc5c] sm:$0xf] }
 0x404   : > { %7797 = vmatpush.bf16.xpose.msra.mxu2 %v9417_v9  ;;  %v10533_v21 = vor.u32 %v11053_v12, %v10530_v13  ;;  %v10553_v63 = vor.u32 %v11192_v47, %v10552_v46  ;;  %v10557_v0 = vor.u32 %v11056_v48, %v10554_v51  ;;  %v10922_v51 = vld [vmem:[%s11717_s11 + $0x824] sm:$0xf0] }
 0x405   : > { %7810 = vmatpush.bf16.xpose.msra.mxu3 %v9421_v11  ;;  %v1718_v11 = vpack.c.b16 %v1446_v62, %v1446_v62 }
 0x407   : > { %v7346_v8 = vpop.f32.mrf.mxu3  ;;  %v7357_v9 = vpop.f32.mrf.mxu0 }
 0x408   : > { %v7333_v3 = vpop.f32.mrf.mxu2  ;;  %v7358_v14 = vadd.f32 %v7357_v9, %v7345_v56  ;;  %v7370_v15 = vpop.f32.mrf.mxu1  ;;  %v1721_v56 = vpack.c.b16 %v1449_v43, %v1449_v43  ;;  %v9466_v8 = vld [vmem:[%s11717_s11 + $0x818] sm:$0xf0]  ;;  %v9456_v9 = vld [vmem:[%s11717_s11 + $0x3d0] sm:$0xf] }
 0x40a   : > { %v7371_v20 = vadd.f32 %v7370_v15, %v7358_v14  ;;  %7772 = vmatmul.bf16.vlgmr.msra.gmra.mxu0 %v1716_v4  ;;  %7785 = vmatmul.bf16.vlgmr.msra.gmra.mxu1 %v1717_v10  ;;  %v9464_v4 = vld [vmem:[%s11717_s11 + $0x3d8] sm:$0xf]  ;;  %v10919_v10 = vld [vmem:[%s11717_s11 + $0x80c] sm:$0xf0]  ;;  %v516_v14 = vld [vmem:[%s11710_s22 + $0x3c0] sm:$0xff] }
 0x40b   : > { %7822 = vmatpush.bf16.xpose.msrb.mxu0 %v10513_v37  ;;  %7835 = vmatpush.bf16.xpose.msrb.mxu1 %v10517_v39  ;;  %v9449_v37 = vor.u32 %v10918_v23, %v9448_v22  ;;  %v9453_v39 = vor.u32 %v10782_v24, %v9450_v26  ;;  %v10783_v15 = vld [vmem:[%s11717_s11 + $0x3d4] sm:$0xf]  ;;  %v9457_v22 = vor.u32 %v10919_v10, %v9456_v9  ;;  %v1452_v23 = vunpack.c.l.b16 %v516_v14  ;;  %v10584_v10 = vld [vmem:[%s11717_s11 + $0xc78] sm:$0xf] }
 0x40c   : > { %7848 = vmatpush.bf16.xpose.msrb.mxu2 %v10521_v35  ;;  %7811 = vmatmul.bf16.vlgmr.msra.gmra.mxu3 %v1719_v16  ;;  %v9458_v16 = vld [vmem:[%s11717_s11 + $0x810] sm:$0xf0] }
 0x40d   : > { %7861 = vmatpush.bf16.xpose.msrb.mxu3 %v10525_v36  ;;  %7798 = vmatmul.bf16.vlgmr.msra.gmra.mxu2 %v1718_v11  ;;  %v515_v36 = vld [vmem:[%s11710_s22 + $0x3b8] sm:$0xff]  ;;  %v9461_v24 = vor.u32 %v10783_v15, %v9458_v16  ;;  %v1724_v32 = vpack.c.b16 %v1452_v23, %v1452_v23  ;;  %v10576_v16 = vld [vmem:[%s11717_s11 + $0xc70] sm:$0xf]  ;;  %v10578_v23 = vld [vmem:[%s11717_s11 + $0x10b0] sm:$0xf0] }
 0x40e   : > { %v1450_v44 = vunpack.c.l.b16 %v515_v36  ;;  %v1451_v45 = vunpack.c.h.b16 %v515_v36  ;;  %v10586_v15 = vld [vmem:[%s11717_s11 + $0x10b8] sm:$0xf0] }
 0x40f   : > { %v7396_v30 = vpop.f32.mrf.mxu3  ;;  %v7359_v31 = vpop.f32.mrf.mxu0 }
 0x410   : > { %v7383_v25 = vpop.f32.mrf.mxu2  ;;  %v7372_v35 = vpop.f32.mrf.mxu1  ;;  %v1723_v62 = vpack.c.b16 %v1451_v45, %v1451_v45 }
 0x411   : > { %v7384_v29 = vadd.f32 %v7383_v25, %v7371_v20  ;;  %v1453_v25 = vunpack.c.h.b16 %v516_v14  ;;  %v11193_v35 = vld [vmem:[%s11717_s11 + $0x109c] sm:$0xf0] }
 0x412   : > { %v10561_v47 = vor.u32 %v11193_v35, %v10560_v34  ;;  %v10788_v34 = vld [vmem:[%s11717_s11 + $0x3fc] sm:$0xf] }
 0x413   : > { %7823 = vmatpush.bf16.xpose.msrb.mxu0 %v9425_v58  ;;  %7836 = vmatpush.bf16.xpose.msrb.mxu1 %v9429_v60  ;;  %v7397_v38 = vadd.f32 %v7396_v30, %v7384_v29  ;;  %v11055_v58 = vld [vmem:[%s11717_s11 + $0xc54] sm:$0xf]  ;;  %v11194_v29 = vld [vmem:[%s11717_s11 + $0x10a4] sm:$0xf0]  ;;  %v11058_v30 = vld [vmem:[%s11717_s11 + $0xc6c] sm:$0xf] }
 0x414   : > { %7849 = vmatpush.bf16.xpose.msrb.mxu2 %v9433_v55  ;;  %v10549_v3 = vor.u32 %v11055_v58, %v10546_v59  ;;  %v10569_v45 = vor.u32 %v11194_v29, %v10568_v28  ;;  %v10573_v46 = vor.u32 %v11058_v30, %v10570_v33  ;;  %v10924_v33 = vld [vmem:[%s11717_s11 + $0x834] sm:$0xf0] }
 0x415   : > { %7862 = vmatpush.bf16.xpose.msrb.mxu3 %v9437_v57  ;;  %v1722_v57 = vpack.c.b16 %v1450_v44, %v1450_v44 }
 0x417   : > { %v7398_v54 = vpop.f32.mrf.mxu3  ;;  %v7409_v55 = vpop.f32.mrf.mxu0 }
 0x418   : > { %v7385_v49 = vpop.f32.mrf.mxu2  ;;  %v7410_v60 = vadd.f32 %v7409_v55, %v7397_v38  ;;  %v7422_v61 = vpop.f32.mrf.mxu1  ;;  %v1725_v38 = vpack.c.b16 %v1453_v25, %v1453_v25  ;;  %v9482_v54 = vld [vmem:[%s11717_s11 + $0x828] sm:$0xf0]  ;;  %v9472_v55 = vld [vmem:[%s11717_s11 + $0x3e0] sm:$0xf] }
 0x41a   : > { %v7423_v2 = vadd.f32 %v7422_v61, %v7410_v60  ;;  %7824 = vmatmul.bf16.vlgmr.msrb.gmra.mxu0 %v1720_v50  ;;  %7837 = vmatmul.bf16.vlgmr.msrb.gmra.mxu1 %v1721_v56  ;;  %v9480_v50 = vld [vmem:[%s11717_s11 + $0x3e8] sm:$0xf]  ;;  %v10921_v56 = vld [vmem:[%s11717_s11 + $0x81c] sm:$0xf0]  ;;  %v518_v60 = vld [vmem:[%s11710_s22 + $0x3d0] sm:$0xff] }
 0x41b   : > { %7874 = vmatpush.bf16.xpose.msra.mxu0 %v10529_v19  ;;  %7887 = vmatpush.bf16.xpose.msra.mxu1 %v10533_v21  ;;  %v9465_v19 = vor.u32 %v10920_v5, %v9464_v4  ;;  %v9469_v21 = vor.u32 %v10784_v6, %v9466_v8  ;;  %v10785_v61 = vld [vmem:[%s11717_s11 + $0x3e4] sm:$0xf]  ;;  %v9473_v4 = vor.u32 %v10921_v56, %v9472_v55  ;;  %v1456_v5 = vunpack.c.l.b16 %v518_v60  ;;  %v10600_v56 = vld [vmem:[%s11717_s11 + $0xc88] sm:$0xf] }
 0x41c   : > { %7900 = vmatpush.bf16.xpose.msra.mxu2 %v10537_v17  ;;  %7863 = vmatmul.bf16.vlgmr.msrb.gmra.mxu3 %v1723_v62  ;;  %v9474_v62 = vld [vmem:[%s11717_s11 + $0x820] sm:$0xf0] }
 0x41d   : > { %7913 = vmatpush.bf16.xpose.msra.mxu3 %v10541_v18  ;;  %7850 = vmatmul.bf16.vlgmr.msrb.gmra.mxu2 %v1722_v57  ;;  %v517_v18 = vld [vmem:[%s11710_s22 + $0x3c8] sm:$0xff]  ;;  %v9477_v6 = vor.u32 %v10785_v61, %v9474_v62  ;;  %v1728_v14 = vpack.c.b16 %v1456_v5, %v1456_v5  ;;  %v10592_v62 = vld [vmem:[%s11717_s11 + $0xc80] sm:$0xf]  ;;  %v10594_v5 = vld [vmem:[%s11717_s11 + $0x10c0] sm:$0xf0] }
 0x41e   : > { %v1454_v26 = vunpack.c.l.b16 %v517_v18  ;;  %v1455_v27 = vunpack.c.h.b16 %v517_v18  ;;  %v10602_v61 = vld [vmem:[%s11717_s11 + $0x10c8] sm:$0xf0] }
 0x41f   : > { %v7448_v12 = vpop.f32.mrf.mxu3  ;;  %v7411_v13 = vpop.f32.mrf.mxu0 }
 0x420   : > { %v7435_v7 = vpop.f32.mrf.mxu2  ;;  %v7424_v17 = vpop.f32.mrf.mxu1  ;;  %v1727_v44 = vpack.c.b16 %v1455_v27, %v1455_v27 }
 0x421   : > { %v7436_v11 = vadd.f32 %v7435_v7, %v7423_v2  ;;  %v1457_v7 = vunpack.c.h.b16 %v518_v60  ;;  %v11195_v17 = vld [vmem:[%s11717_s11 + $0x10ac] sm:$0xf0] }
 0x422   : > { %v10577_v29 = vor.u32 %v11195_v17, %v10576_v16  ;;  %v10790_v16 = vld [vmem:[%s11717_s11 + $0x40c] sm:$0xf] }
 0x423   : > { %7875 = vmatpush.bf16.xpose.msra.mxu0 %v9441_v40  ;;  %7888 = vmatpush.bf16.xpose.msra.mxu1 %v9445_v42  ;;  %v7449_v20 = vadd.f32 %v7448_v12, %v7436_v11  ;;  %v11057_v40 = vld [vmem:[%s11717_s11 + $0xc64] sm:$0xf]  ;;  %v11196_v11 = vld [vmem:[%s11717_s11 + $0x10b4] sm:$0xf0]  ;;  %v11060_v12 = vld [vmem:[%s11717_s11 + $0xc7c] sm:$0xf] }
 0x424   : > { %7901 = vmatpush.bf16.xpose.msra.mxu2 %v9449_v37  ;;  %v10565_v49 = vor.u32 %v11057_v40, %v10562_v41  ;;  %v10585_v27 = vor.u32 %v11196_v11, %v10584_v10  ;;  %v10589_v28 = vor.u32 %v11060_v12, %v10586_v15  ;;  %v10926_v15 = vld [vmem:[%s11717_s11 + $0x844] sm:$0xf0] }
 0x425   : > { %7914 = vmatpush.bf16.xpose.msra.mxu3 %v9453_v39  ;;  %v1726_v39 = vpack.c.b16 %v1454_v26, %v1454_v26 }
 0x427   : > { %v7450_v36 = vpop.f32.mrf.mxu3  ;;  %v7461_v37 = vpop.f32.mrf.mxu0 }
 0x428   : > { %v7437_v31 = vpop.f32.mrf.mxu2  ;;  %v7462_v42 = vadd.f32 %v7461_v37, %v7449_v20  ;;  %v7474_v43 = vpop.f32.mrf.mxu1  ;;  %v1729_v20 = vpack.c.b16 %v1457_v7, %v1457_v7  ;;  %v9498_v36 = vld [vmem:[%s11717_s11 + $0x838] sm:$0xf0]  ;;  %v9488_v37 = vld [vmem:[%s11717_s11 + $0x3f0] sm:$0xf] }
 0x42a   : > { %v7475_v48 = vadd.f32 %v7474_v43, %v7462_v42  ;;  %7876 = vmatmul.bf16.vlgmr.msra.gmra.mxu0 %v1724_v32  ;;  %7889 = vmatmul.bf16.vlgmr.msra.gmra.mxu1 %v1725_v38  ;;  %v9496_v32 = vld [vmem:[%s11717_s11 + $0x3f8] sm:$0xf]  ;;  %v10923_v38 = vld [vmem:[%s11717_s11 + $0x82c] sm:$0xf0]  ;;  %v520_v42 = vld [vmem:[%s11710_s22 + $0x3e0] sm:$0xff] }
 0x42b   : > { %7926 = vmatpush.bf16.xpose.msrb.mxu0 %v10545_v1  ;;  %7939 = vmatpush.bf16.xpose.msrb.mxu1 %v10549_v3  ;;  %v9481_v1 = vor.u32 %v10922_v51, %v9480_v50  ;;  %v9485_v3 = vor.u32 %v10786_v52, %v9482_v54  ;;  %v10787_v43 = vld [vmem:[%s11717_s11 + $0x3f4] sm:$0xf]  ;;  %v9489_v50 = vor.u32 %v10923_v38, %v9488_v37  ;;  %v1460_v51 = vunpack.c.l.b16 %v520_v42  ;;  %v10616_v38 = vld [vmem:[%s11717_s11 + $0xc98] sm:$0xf] }
 0x42c   : > { %7952 = vmatpush.bf16.xpose.msrb.mxu2 %v10553_v63  ;;  %7915 = vmatmul.bf16.vlgmr.msra.gmra.mxu3 %v1727_v44  ;;  %v9490_v44 = vld [vmem:[%s11717_s11 + $0x830] sm:$0xf0] }
 0x42d   : > { %7965 = vmatpush.bf16.xpose.msrb.mxu3 %v10557_v0  ;;  %7902 = vmatmul.bf16.vlgmr.msra.gmra.mxu2 %v1726_v39  ;;  %v519_v0 = vld [vmem:[%s11710_s22 + $0x3d8] sm:$0xff]  ;;  %v9493_v52 = vor.u32 %v10787_v43, %v9490_v44  ;;  %v1732_v60 = vpack.c.b16 %v1460_v51, %v1460_v51  ;;  %v10608_v44 = vld [vmem:[%s11717_s11 + $0xc90] sm:$0xf]  ;;  %v10610_v51 = vld [vmem:[%s11717_s11 + $0x10d0] sm:$0xf0] }
 0x42e   : > { %v1458_v8 = vunpack.c.l.b16 %v519_v0  ;;  %v1459_v9 = vunpack.c.h.b16 %v519_v0  ;;  %v10618_v43 = vld [vmem:[%s11717_s11 + $0x10d8] sm:$0xf0] }
 0x42f   : > { %v7500_v58 = vpop.f32.mrf.mxu3  ;;  %v7463_v59 = vpop.f32.mrf.mxu0 }
 0x430   : > { %v7487_v53 = vpop.f32.mrf.mxu2  ;;  %v7476_v63 = vpop.f32.mrf.mxu1  ;;  %v1731_v26 = vpack.c.b16 %v1459_v9, %v1459_v9 }
 0x431   : > { %v7488_v57 = vadd.f32 %v7487_v53, %v7475_v48  ;;  %v1461_v53 = vunpack.c.h.b16 %v520_v42  ;;  %v11197_v63 = vld [vmem:[%s11717_s11 + $0x10bc] sm:$0xf0] }
 0x432   : > { %v10593_v11 = vor.u32 %v11197_v63, %v10592_v62  ;;  %v10792_v62 = vld [vmem:[%s11717_s11 + $0x41c] sm:$0xf] }
 0x433   : > { %7927 = vmatpush.bf16.xpose.msrb.mxu0 %v9457_v22  ;;  %7940 = vmatpush.bf16.xpose.msrb.mxu1 %v9461_v24  ;;  %v7501_v2 = vadd.f32 %v7500_v58, %v7488_v57  ;;  %v11059_v22 = vld [vmem:[%s11717_s11 + $0xc74] sm:$0xf]  ;;  %v11198_v57 = vld [vmem:[%s11717_s11 + $0x10c4] sm:$0xf0]  ;;  %v11062_v58 = vld [vmem:[%s11717_s11 + $0xc8c] sm:$0xf] }
 0x434   : > { %7953 = vmatpush.bf16.xpose.msrb.mxu2 %v9465_v19  ;;  %v10581_v31 = vor.u32 %v11059_v22, %v10578_v23  ;;  %v10601_v9 = vor.u32 %v11198_v57, %v10600_v56  ;;  %v10605_v10 = vor.u32 %v11062_v58, %v10602_v61  ;;  %v10928_v61 = vld [vmem:[%s11717_s11 + $0x854] sm:$0xf0] }
 0x435   : > { %7966 = vmatpush.bf16.xpose.msrb.mxu3 %v9469_v21  ;;  %v1730_v21 = vpack.c.b16 %v1458_v8, %v1458_v8 }
 0x437   : > { %v7502_v18 = vpop.f32.mrf.mxu3  ;;  %v7513_v19 = vpop.f32.mrf.mxu0 }
 0x438   : > { %v7489_v13 = vpop.f32.mrf.mxu2  ;;  %v7514_v24 = vadd.f32 %v7513_v19, %v7501_v2  ;;  %v7526_v25 = vpop.f32.mrf.mxu1  ;;  %v1733_v2 = vpack.c.b16 %v1461_v53, %v1461_v53  ;;  %v9514_v18 = vld [vmem:[%s11717_s11 + $0x848] sm:$0xf0]  ;;  %v9504_v19 = vld [vmem:[%s11717_s11 + $0x400] sm:$0xf] }
 0x43a   : > { %v7527_v30 = vadd.f32 %v7526_v25, %v7514_v24  ;;  %7928 = vmatmul.bf16.vlgmr.msrb.gmra.mxu0 %v1728_v14  ;;  %7941 = vmatmul.bf16.vlgmr.msrb.gmra.mxu1 %v1729_v20  ;;  %v9512_v14 = vld [vmem:[%s11717_s11 + $0x408] sm:$0xf]  ;;  %v10925_v20 = vld [vmem:[%s11717_s11 + $0x83c] sm:$0xf0]  ;;  %v522_v24 = vld [vmem:[%s11710_s22 + $0x3f0] sm:$0xff] }
 0x43b   : > { %7978 = vmatpush.bf16.xpose.msra.mxu0 %v10561_v47  ;;  %7991 = vmatpush.bf16.xpose.msra.mxu1 %v10565_v49  ;;  %v9497_v47 = vor.u32 %v10924_v33, %v9496_v32  ;;  %v9501_v49 = vor.u32 %v10788_v34, %v9498_v36  ;;  %v10789_v25 = vld [vmem:[%s11717_s11 + $0x404] sm:$0xf]  ;;  %v9505_v32 = vor.u32 %v10925_v20, %v9504_v19  ;;  %v1464_v33 = vunpack.c.l.b16 %v522_v24  ;;  %v10632_v20 = vld [vmem:[%s11717_s11 + $0xca8] sm:$0xf] }
 0x43c   : > { %8004 = vmatpush.bf16.xpose.msra.mxu2 %v10569_v45  ;;  %7967 = vmatmul.bf16.vlgmr.msrb.gmra.mxu3 %v1731_v26  ;;  %v9506_v26 = vld [vmem:[%s11717_s11 + $0x840] sm:$0xf0] }
 0x43d   : > { %8017 = vmatpush.bf16.xpose.msra.mxu3 %v10573_v46  ;;  %7954 = vmatmul.bf16.vlgmr.msrb.gmra.mxu2 %v1730_v21  ;;  %v521_v46 = vld [vmem:[%s11710_s22 + $0x3e8] sm:$0xff]  ;;  %v9509_v34 = vor.u32 %v10789_v25, %v9506_v26  ;;  %v1736_v42 = vpack.c.b16 %v1464_v33, %v1464_v33  ;;  %v10624_v26 = vld [vmem:[%s11717_s11 + $0xca0] sm:$0xf]  ;;  %v10626_v33 = vld [vmem:[%s11717_s11 + $0x10e0] sm:$0xf0] }
 0x43e   : > { %v1462_v54 = vunpack.c.l.b16 %v521_v46  ;;  %v1463_v55 = vunpack.c.h.b16 %v521_v46  ;;  %v10634_v25 = vld [vmem:[%s11717_s11 + $0x10e8] sm:$0xf0] }
 0x43f   : > { %v7552_v40 = vpop.f32.mrf.mxu3  ;;  %v7515_v41 = vpop.f32.mrf.mxu0 }
 0x440   : > { %v7539_v35 = vpop.f32.mrf.mxu2  ;;  %v7528_v45 = vpop.f32.mrf.mxu1  ;;  %v1735_v8 = vpack.c.b16 %v1463_v55, %v1463_v55 }
 0x441   : > { %v7540_v39 = vadd.f32 %v7539_v35, %v7527_v30  ;;  %v1465_v35 = vunpack.c.h.b16 %v522_v24  ;;  %v11199_v45 = vld [vmem:[%s11717_s11 + $0x10cc] sm:$0xf0] }
 0x442   : > { %v10609_v57 = vor.u32 %v11199_v45, %v10608_v44  ;;  %v10794_v44 = vld [vmem:[%s11717_s11 + $0x42c] sm:$0xf] }
 0x443   : > { %7979 = vmatpush.bf16.xpose.msra.mxu0 %v9473_v4  ;;  %7992 = vmatpush.bf16.xpose.msra.mxu1 %v9477_v6  ;;  %v7553_v48 = vadd.f32 %v7552_v40, %v7540_v39  ;;  %v11061_v4 = vld [vmem:[%s11717_s11 + $0xc84] sm:$0xf]  ;;  %v11200_v39 = vld [vmem:[%s11717_s11 + $0x10d4] sm:$0xf0]  ;;  %v11064_v40 = vld [vmem:[%s11717_s11 + $0xc9c] sm:$0xf] }
 0x444   : > { %8005 = vmatpush.bf16.xpose.msra.mxu2 %v9481_v1  ;;  %v10597_v13 = vor.u32 %v11061_v4, %v10594_v5  ;;  %v10617_v55 = vor.u32 %v11200_v39, %v10616_v38  ;;  %v10621_v56 = vor.u32 %v11064_v40, %v10618_v43  ;;  %v10930_v43 = vld [vmem:[%s11717_s11 + $0x864] sm:$0xf0] }
 0x445   : > { %8018 = vmatpush.bf16.xpose.msra.mxu3 %v9485_v3  ;;  %v1734_v3 = vpack.c.b16 %v1462_v54, %v1462_v54 }
 0x447   : > { %v7554_v0 = vpop.f32.mrf.mxu3  ;;  %v7565_v1 = vpop.f32.mrf.mxu0 }
 0x448   : > { %v7541_v59 = vpop.f32.mrf.mxu2  ;;  %v7566_v6 = vadd.f32 %v7565_v1, %v7553_v48  ;;  %v7578_v7 = vpop.f32.mrf.mxu1  ;;  %v1737_v48 = vpack.c.b16 %v1465_v35, %v1465_v35  ;;  %v9530_v0 = vld [vmem:[%s11717_s11 + $0x858] sm:$0xf0]  ;;  %v9520_v1 = vld [vmem:[%s11717_s11 + $0x410] sm:$0xf] }
 0x44a   : > { %v7579_v12 = vadd.f32 %v7578_v7, %v7566_v6  ;;  %7980 = vmatmul.bf16.vlgmr.msra.gmra.mxu0 %v1732_v60  ;;  %7993 = vmatmul.bf16.vlgmr.msra.gmra.mxu1 %v1733_v2  ;;  %v9528_v60 = vld [vmem:[%s11717_s11 + $0x418] sm:$0xf]  ;;  %v10927_v2 = vld [vmem:[%s11717_s11 + $0x84c] sm:$0xf0]  ;;  %v524_v6 = vld [vmem:[%s11710_s22 + $0x400] sm:$0xff] }
 0x44b   : > { %8030 = vmatpush.bf16.xpose.msrb.mxu0 %v10577_v29  ;;  %8043 = vmatpush.bf16.xpose.msrb.mxu1 %v10581_v31  ;;  %v9513_v29 = vor.u32 %v10926_v15, %v9512_v14  ;;  %v9517_v31 = vor.u32 %v10790_v16, %v9514_v18  ;;  %v10791_v7 = vld [vmem:[%s11717_s11 + $0x414] sm:$0xf]  ;;  %v9521_v14 = vor.u32 %v10927_v2, %v9520_v1  ;;  %v1468_v15 = vunpack.c.l.b16 %v524_v6  ;;  %v10648_v2 = vld [vmem:[%s11717_s11 + $0xcb8] sm:$0xf] }
 0x44c   : > { %8056 = vmatpush.bf16.xpose.msrb.mxu2 %v10585_v27  ;;  %8019 = vmatmul.bf16.vlgmr.msra.gmra.mxu3 %v1735_v8  ;;  %v9522_v8 = vld [vmem:[%s11717_s11 + $0x850] sm:$0xf0] }
 0x44d   : > { %8069 = vmatpush.bf16.xpose.msrb.mxu3 %v10589_v28  ;;  %8006 = vmatmul.bf16.vlgmr.msra.gmra.mxu2 %v1734_v3  ;;  %v523_v28 = vld [vmem:[%s11710_s22 + $0x3f8] sm:$0xff]  ;;  %v9525_v16 = vor.u32 %v10791_v7, %v9522_v8  ;;  %v1740_v24 = vpack.c.b16 %v1468_v15, %v1468_v15  ;;  %v10640_v8 = vld [vmem:[%s11717_s11 + $0xcb0] sm:$0xf]  ;;  %v10642_v15 = vld [vmem:[%s11717_s11 + $0x10f0] sm:$0xf0] }
 0x44e   : > { %v1466_v36 = vunpack.c.l.b16 %v523_v28  ;;  %v1467_v37 = vunpack.c.h.b16 %v523_v28  ;;  %v10650_v7 = vld [vmem:[%s11717_s11 + $0x10f8] sm:$0xf0] }
 0x44f   : > { %v7604_v22 = vpop.f32.mrf.mxu3  ;;  %v7567_v23 = vpop.f32.mrf.mxu0 }
 0x450   : > { %v7591_v17 = vpop.f32.mrf.mxu2  ;;  %v7580_v27 = vpop.f32.mrf.mxu1  ;;  %v1739_v54 = vpack.c.b16 %v1467_v37, %v1467_v37 }
 0x451   : > { %v7592_v21 = vadd.f32 %v7591_v17, %v7579_v12  ;;  %v1469_v17 = vunpack.c.h.b16 %v524_v6  ;;  %v11201_v27 = vld [vmem:[%s11717_s11 + $0x10dc] sm:$0xf0] }
 0x452   : > { %v10625_v39 = vor.u32 %v11201_v27, %v10624_v26  ;;  %v10796_v26 = vld [vmem:[%s11717_s11 + $0x43c] sm:$0xf] }
 0x453   : > { %8031 = vmatpush.bf16.xpose.msrb.mxu0 %v9489_v50  ;;  %8044 = vmatpush.bf16.xpose.msrb.mxu1 %v9493_v52  ;;  %v7605_v30 = vadd.f32 %v7604_v22, %v7592_v21  ;;  %v11063_v50 = vld [vmem:[%s11717_s11 + $0xc94] sm:$0xf]  ;;  %v11202_v21 = vld [vmem:[%s11717_s11 + $0x10e4] sm:$0xf0]  ;;  %v11066_v22 = vld [vmem:[%s11717_s11 + $0xcac] sm:$0xf] }
 0x454   : > { %8057 = vmatpush.bf16.xpose.msrb.mxu2 %v9497_v47  ;;  %v10613_v59 = vor.u32 %v11063_v50, %v10610_v51  ;;  %v10633_v37 = vor.u32 %v11202_v21, %v10632_v20  ;;  %v10637_v38 = vor.u32 %v11066_v22, %v10634_v25  ;;  %v10932_v25 = vld [vmem:[%s11717_s11 + $0x874] sm:$0xf0] }
 0x455   : > { %8070 = vmatpush.bf16.xpose.msrb.mxu3 %v9501_v49  ;;  %v1738_v49 = vpack.c.b16 %v1466_v36, %v1466_v36 }
 0x457   : > { %v7606_v46 = vpop.f32.mrf.mxu3  ;;  %v7617_v47 = vpop.f32.mrf.mxu0 }
 0x458   : > { %v7593_v41 = vpop.f32.mrf.mxu2  ;;  %v7618_v52 = vadd.f32 %v7617_v47, %v7605_v30  ;;  %v7630_v53 = vpop.f32.mrf.mxu1  ;;  %v1741_v30 = vpack.c.b16 %v1469_v17, %v1469_v17  ;;  %v9546_v46 = vld [vmem:[%s11717_s11 + $0x868] sm:$0xf0]  ;;  %v9536_v47 = vld [vmem:[%s11717_s11 + $0x420] sm:$0xf] }
 0x45a   : > { %v7631_v58 = vadd.f32 %v7630_v53, %v7618_v52  ;;  %8032 = vmatmul.bf16.vlgmr.msrb.gmra.mxu0 %v1736_v42  ;;  %8045 = vmatmul.bf16.vlgmr.msrb.gmra.mxu1 %v1737_v48  ;;  %v9544_v42 = vld [vmem:[%s11717_s11 + $0x428] sm:$0xf]  ;;  %v10929_v48 = vld [vmem:[%s11717_s11 + $0x85c] sm:$0xf0]  ;;  %v526_v52 = vld [vmem:[%s11710_s22 + $0x410] sm:$0xff] }
 0x45b   : > { %8082 = vmatpush.bf16.xpose.msra.mxu0 %v10593_v11  ;;  %8095 = vmatpush.bf16.xpose.msra.mxu1 %v10597_v13  ;;  %v9529_v11 = vor.u32 %v10928_v61, %v9528_v60  ;;  %v9533_v13 = vor.u32 %v10792_v62, %v9530_v0  ;;  %v10793_v53 = vld [vmem:[%s11717_s11 + $0x424] sm:$0xf]  ;;  %v9537_v60 = vor.u32 %v10929_v48, %v9536_v47  ;;  %v1472_v61 = vunpack.c.l.b16 %v526_v52 }
 0x45c   : > { %8108 = vmatpush.bf16.xpose.msra.mxu2 %v10601_v9  ;;  %8071 = vmatmul.bf16.vlgmr.msrb.gmra.mxu3 %v1739_v54  ;;  %v9538_v54 = vld [vmem:[%s11717_s11 + $0x860] sm:$0xf0] }
 0x45d   : > { %8121 = vmatpush.bf16.xpose.msra.mxu3 %v10605_v10  ;;  %8058 = vmatmul.bf16.vlgmr.msrb.gmra.mxu2 %v1738_v49  ;;  %v525_v10 = vld [vmem:[%s11710_s22 + $0x408] sm:$0xff]  ;;  %v9541_v62 = vor.u32 %v10793_v53, %v9538_v54  ;;  %v1744_v6 = vpack.c.b16 %v1472_v61, %v1472_v61 }
 0x45e   : > { %v1470_v18 = vunpack.c.l.b16 %v525_v10  ;;  %v1471_v19 = vunpack.c.h.b16 %v525_v10 }
 0x45f   : > { %v7656_v4 = vpop.f32.mrf.mxu3  ;;  %v7619_v5 = vpop.f32.mrf.mxu0 }
 0x460   : > { %v7643_v63 = vpop.f32.mrf.mxu2  ;;  %v7632_v9 = vpop.f32.mrf.mxu1  ;;  %v1743_v36 = vpack.c.b16 %v1471_v19, %v1471_v19 }
 0x461   : > { %v7644_v3 = vadd.f32 %v7643_v63, %v7631_v58  ;;  %v1473_v63 = vunpack.c.h.b16 %v526_v52  ;;  %v11203_v9 = vld [vmem:[%s11717_s11 + $0x10ec] sm:$0xf0] }
 0x462   : > { %v10641_v21 = vor.u32 %v11203_v9, %v10640_v8 }
 0x463   : > { %8083 = vmatpush.bf16.xpose.msra.mxu0 %v9505_v32  ;;  %8096 = vmatpush.bf16.xpose.msra.mxu1 %v9509_v34  ;;  %v7657_v12 = vadd.f32 %v7656_v4, %v7644_v3  ;;  %v11065_v32 = vld [vmem:[%s11717_s11 + $0xca4] sm:$0xf]  ;;  %v11204_v3 = vld [vmem:[%s11717_s11 + $0x10f4] sm:$0xf0]  ;;  %v11068_v4 = vld [vmem:[%s11717_s11 + $0xcbc] sm:$0xf] }
 0x464   : > { %8109 = vmatpush.bf16.xpose.msra.mxu2 %v9513_v29  ;;  %v10629_v41 = vor.u32 %v11065_v32, %v10626_v33  ;;  %v10649_v19 = vor.u32 %v11204_v3, %v10648_v2  ;;  %v10653_v20 = vor.u32 %v11068_v4, %v10650_v7 }
 0x465   : > { %8122 = vmatpush.bf16.xpose.msra.mxu3 %v9517_v31  ;;  %v1742_v31 = vpack.c.b16 %v1470_v18, %v1470_v18 }
 0x467   : > { %v7658_v28 = vpop.f32.mrf.mxu3  ;;  %v7669_v29 = vpop.f32.mrf.mxu0 }
 0x468   : > { %v7645_v23 = vpop.f32.mrf.mxu2  ;;  %v7670_v34 = vadd.f32 %v7669_v29, %v7657_v12  ;;  %v7682_v35 = vpop.f32.mrf.mxu1  ;;  %v1745_v12 = vpack.c.b16 %v1473_v63, %v1473_v63  ;;  %v9562_v28 = vld [vmem:[%s11717_s11 + $0x878] sm:$0xf0]  ;;  %v9552_v29 = vld [vmem:[%s11717_s11 + $0x430] sm:$0xf] }
 0x46a   : > { %v7683_v40 = vadd.f32 %v7682_v35, %v7670_v34  ;;  %8084 = vmatmul.bf16.vlgmr.msra.gmra.mxu0 %v1740_v24  ;;  %8097 = vmatmul.bf16.vlgmr.msra.gmra.mxu1 %v1741_v30  ;;  %v9560_v24 = vld [vmem:[%s11717_s11 + $0x438] sm:$0xf]  ;;  %v10931_v30 = vld [vmem:[%s11717_s11 + $0x86c] sm:$0xf0]  ;;  %v528_v34 = vld [vmem:[%s11710_s22 + $0x420] sm:$0xff] }
 0x46b   : > { %8134 = vmatpush.bf16.xpose.msrb.mxu0 %v10609_v57  ;;  %8147 = vmatpush.bf16.xpose.msrb.mxu1 %v10613_v59  ;;  %v9545_v57 = vor.u32 %v10930_v43, %v9544_v42  ;;  %v9549_v59 = vor.u32 %v10794_v44, %v9546_v46  ;;  %v10795_v35 = vld [vmem:[%s11717_s11 + $0x434] sm:$0xf]  ;;  %v9553_v42 = vor.u32 %v10931_v30, %v9552_v29  ;;  %v1476_v43 = vunpack.c.l.b16 %v528_v34 }
 0x46c   : > { %8160 = vmatpush.bf16.xpose.msrb.mxu2 %v10617_v55  ;;  %8123 = vmatmul.bf16.vlgmr.msra.gmra.mxu3 %v1743_v36  ;;  %v9554_v36 = vld [vmem:[%s11717_s11 + $0x870] sm:$0xf0] }
 0x46d   : > { %8173 = vmatpush.bf16.xpose.msrb.mxu3 %v10621_v56  ;;  %8110 = vmatmul.bf16.vlgmr.msra.gmra.mxu2 %v1742_v31  ;;  %v527_v56 = vld [vmem:[%s11710_s22 + $0x418] sm:$0xff]  ;;  %v9557_v44 = vor.u32 %v10795_v35, %v9554_v36 }
 0x46e   : > { %v1474_v0 = vunpack.c.l.b16 %v527_v56  ;;  %v1475_v1 = vunpack.c.h.b16 %v527_v56 }
 0x46f   : > { %v7708_v50 = vpop.f32.mrf.mxu3  ;;  %v7671_v51 = vpop.f32.mrf.mxu0 }
 0x470   : > { %v7695_v45 = vpop.f32.mrf.mxu2  ;;  %v7684_v55 = vpop.f32.mrf.mxu1  ;;  %v1747_v18 = vpack.c.b16 %v1475_v1, %v1475_v1 }
 0x471   : > { %v7696_v49 = vadd.f32 %v7695_v45, %v7683_v40  ;;  %v1477_v45 = vunpack.c.h.b16 %v528_v34 }
 0x473   : > { %8135 = vmatpush.bf16.xpose.msrb.mxu0 %v9521_v14  ;;  %8148 = vmatpush.bf16.xpose.msrb.mxu1 %v9525_v16  ;;  %v7709_v58 = vadd.f32 %v7708_v50, %v7696_v49  ;;  %v11067_v14 = vld [vmem:[%s11717_s11 + $0xcb4] sm:$0xf]  ;;  %v1748_v49 = vpack.c.b16 %v1476_v43, %v1476_v43  ;;  %v1749_v52 = vpack.c.b16 %v1477_v45, %v1477_v45 }
 0x474   : > { %8161 = vmatpush.bf16.xpose.msrb.mxu2 %v9529_v11  ;;  %v10645_v23 = vor.u32 %v11067_v14, %v10642_v15 }
 0x475   : > { %8174 = vmatpush.bf16.xpose.msrb.mxu3 %v9533_v13  ;;  %v1746_v13 = vpack.c.b16 %v1474_v0, %v1474_v0  ;;  %v531_v0 = vld [vmem:[%s11710_s22 + $0x438] sm:$0xff] }
 0x476   : > { %v1482_v4 = vunpack.c.l.b16 %v531_v0 }
 0x477   : > { %v7710_v10 = vpop.f32.mrf.mxu3  ;;  %v7721_v11 = vpop.f32.mrf.mxu0 }
 0x478   : > { %v7697_v5 = vpop.f32.mrf.mxu2  ;;  %v7722_v16 = vadd.f32 %v7721_v11, %v7709_v58  ;;  %v7734_v17 = vpop.f32.mrf.mxu1  ;;  %v1754_v11 = vpack.c.b16 %v1482_v4, %v1482_v4 }
 0x479   : > { %v1483_v5 = vunpack.c.h.b16 %v531_v0 }
 0x47a   : > { %v7735_v22 = vadd.f32 %v7734_v17, %v7722_v16  ;;  %8136 = vmatmul.bf16.vlgmr.msrb.gmra.mxu0 %v1744_v6  ;;  %8149 = vmatmul.bf16.vlgmr.msrb.gmra.mxu1 %v1745_v12 }
 0x47b   : > { %8186 = vmatpush.bf16.xpose.msra.mxu0 %v10625_v39  ;;  %8199 = vmatpush.bf16.xpose.msra.mxu1 %v10629_v41  ;;  %v9561_v39 = vor.u32 %v10932_v25, %v9560_v24  ;;  %v9565_v41 = vor.u32 %v10796_v26, %v9562_v28  ;;  %v1755_v14 = vpack.c.b16 %v1483_v5, %v1483_v5 }
 0x47c   : > { %8212 = vmatpush.bf16.xpose.msra.mxu2 %v10633_v37  ;;  %8175 = vmatmul.bf16.vlgmr.msrb.gmra.mxu3 %v1747_v18 }
 0x47d   : > { %8225 = vmatpush.bf16.xpose.msra.mxu3 %v10637_v38  ;;  %8162 = vmatmul.bf16.vlgmr.msrb.gmra.mxu2 %v1746_v13  ;;  %v529_v38 = vld [vmem:[%s11710_s22 + $0x428] sm:$0xff] }
 0x47e   : > { %v1478_v46 = vunpack.c.l.b16 %v529_v38  ;;  %v1479_v47 = vunpack.c.h.b16 %v529_v38 }
 0x47f   : > { %v7760_v32 = vpop.f32.mrf.mxu3  ;;  %v7723_v33 = vpop.f32.mrf.mxu0 }
 0x480   : > { %v7747_v27 = vpop.f32.mrf.mxu2  ;;  %v7736_v37 = vpop.f32.mrf.mxu1  ;;  %v1750_v53 = vpack.c.b16 %v1478_v46, %v1478_v46  ;;  %v1751_v56 = vpack.c.b16 %v1479_v47, %v1479_v47 }
 0x481   : > { %v7748_v31 = vadd.f32 %v7747_v27, %v7735_v22 }
 0x483   : > { %8187 = vmatpush.bf16.xpose.msra.mxu0 %v9537_v60  ;;  %8200 = vmatpush.bf16.xpose.msra.mxu1 %v9541_v62  ;;  %v7761_v40 = vadd.f32 %v7760_v32, %v7748_v31  ;;  %v530_v62 = vld [vmem:[%s11710_s22 + $0x430] sm:$0xff] }
 0x484   : > { %8213 = vmatpush.bf16.xpose.msra.mxu2 %v9545_v57  ;;  %v1480_v2 = vunpack.c.l.b16 %v530_v62  ;;  %v1481_v3 = vunpack.c.h.b16 %v530_v62 }
 0x485   : > { %8226 = vmatpush.bf16.xpose.msra.mxu3 %v9549_v59 }
 0x486   : > { %v1752_v7 = vpack.c.b16 %v1480_v2, %v1480_v2  ;;  %v1753_v10 = vpack.c.b16 %v1481_v3, %v1481_v3 }
 0x487   : > { %v7762_v50 = vpop.f32.mrf.mxu3  ;;  %v7773_v51 = vpop.f32.mrf.mxu0 }
 0x488   : > { %v7749_v48 = vpop.f32.mrf.mxu2  ;;  %v7774_v54 = vadd.f32 %v7773_v51, %v7761_v40  ;;  %v7786_v55 = vpop.f32.mrf.mxu1 }
 0x48a   : > { %v7787_v57 = vadd.f32 %v7786_v55, %v7774_v54  ;;  %8188 = vmatmul.bf16.vlgmr.msra.gmra.mxu0 %v1748_v49  ;;  %8201 = vmatmul.bf16.vlgmr.msra.gmra.mxu1 %v1749_v52 }
 0x48b   : > { %8238 = vmatpush.bf16.xpose.msrb.mxu0 %v10641_v21  ;;  %8251 = vmatpush.bf16.xpose.msrb.mxu1 %v10645_v23 }
 0x48c   : > { %8264 = vmatpush.bf16.xpose.msrb.mxu2 %v10649_v19  ;;  %8227 = vmatmul.bf16.vlgmr.msra.gmra.mxu3 %v1751_v56 }
 0x48d   : > { %8277 = vmatpush.bf16.xpose.msrb.mxu3 %v10653_v20  ;;  %8214 = vmatmul.bf16.vlgmr.msra.gmra.mxu2 %v1750_v53 }
 0x48f   : > { %v7812_v60 = vpop.f32.mrf.mxu3  ;;  %v7775_v61 = vpop.f32.mrf.mxu0 }
 0x490   : > { %v7799_v58 = vpop.f32.mrf.mxu2  ;;  %v7788_v63 = vpop.f32.mrf.mxu1 }
 0x491   : > { %v7800_v59 = vadd.f32 %v7799_v58, %v7787_v57 }
 0x493   : > { %8239 = vmatpush.bf16.xpose.msrb.mxu0 %v9553_v42  ;;  %8252 = vmatpush.bf16.xpose.msrb.mxu1 %v9557_v44  ;;  %v7813_v1 = vadd.f32 %v7812_v60, %v7800_v59 }
 0x494   : > { %8265 = vmatpush.bf16.xpose.msrb.mxu2 %v9561_v39 }
 0x495   : > { %8278 = vmatpush.bf16.xpose.msrb.mxu3 %v9565_v41 }
 0x497   : > { %v7814_v8 = vpop.f32.mrf.mxu3  ;;  %v7825_v9 = vpop.f32.mrf.mxu0 }
 0x498   : > { %v7801_v6 = vpop.f32.mrf.mxu2  ;;  %v7826_v12 = vadd.f32 %v7825_v9, %v7813_v1  ;;  %v7838_v13 = vpop.f32.mrf.mxu1 }
 0x49a   : > { %v7839_v15 = vadd.f32 %v7838_v13, %v7826_v12  ;;  %8240 = vmatmul.bf16.vlgmr.msrb.gmra.mxu0 %v1752_v7  ;;  %8253 = vmatmul.bf16.vlgmr.msrb.gmra.mxu1 %v1753_v10 }
 0x49c   : > { %8279 = vmatmul.bf16.vlgmr.msrb.gmra.mxu3 %v1755_v14 }
 0x49d   : > { %8266 = vmatmul.bf16.vlgmr.msrb.gmra.mxu2 %v1754_v11 }
 0x49f   : > { %v7864_v18 = vpop.f32.mrf.mxu3  ;;  %v7827_v19 = vpop.f32.mrf.mxu0 }
 0x4a0   : > { %v7851_v16 = vpop.f32.mrf.mxu2  ;;  %v7840_v20 = vpop.f32.mrf.mxu1 }
 0x4a1   : > { %v7852_v17 = vadd.f32 %v7851_v16, %v7839_v15 }
 0x4a3   : > { %v7865_v21 = vadd.f32 %v7864_v18, %v7852_v17 }
 0x4a7   : > { %v7866_v23 = vpop.f32.mrf.mxu3  ;;  %v7877_v24 = vpop.f32.mrf.mxu0 }
 0x4a8   : > { %v7853_v22 = vpop.f32.mrf.mxu2  ;;  %v7890_v25 = vpop.f32.mrf.mxu1  ;;  %v7878_v38 = vadd.f32 %v7877_v24, %v7865_v21 }
 0x4aa   : > { %v7891_v43 = vadd.f32 %v7890_v25, %v7878_v38 }
 0x4af   : > { %v7916_v27 = vpop.f32.mrf.mxu3  ;;  %v7879_v28 = vpop.f32.mrf.mxu0 }
 0x4b0   : > { %v7903_v26 = vpop.f32.mrf.mxu2  ;;  %v7892_v29 = vpop.f32.mrf.mxu1 }
 0x4b1   : > { %v7904_v44 = vadd.f32 %v7903_v26, %v7891_v43 }
 0x4b3   : > { %v7917_v46 = vadd.f32 %v7916_v27, %v7904_v44 }
 0x4b7   : > { %v7918_v31 = vpop.f32.mrf.mxu3  ;;  %v7929_v32 = vpop.f32.mrf.mxu0 }
 0x4b8   : > { %v7905_v30 = vpop.f32.mrf.mxu2  ;;  %v7942_v33 = vpop.f32.mrf.mxu1  ;;  %v7930_v50 = vadd.f32 %v7929_v32, %v7917_v46 }
 0x4ba   : > { %v7943_v51 = vadd.f32 %v7942_v33, %v7930_v50 }
 0x4bf   : > { %v7968_v35 = vpop.f32.mrf.mxu3  ;;  %v7931_v36 = vpop.f32.mrf.mxu0 }
 0x4c0   : > { %v7955_v34 = vpop.f32.mrf.mxu2  ;;  %v7944_v37 = vpop.f32.mrf.mxu1 }
 0x4c1   : > { %v7956_v53 = vadd.f32 %v7955_v34, %v7943_v51 }
 0x4c3   : > { %v7969_v57 = vadd.f32 %v7968_v35, %v7956_v53 }
 0x4c7   : > { %v7970_v40 = vpop.f32.mrf.mxu3  ;;  %v7981_v41 = vpop.f32.mrf.mxu0 }
 0x4c8   : > { %v7957_v39 = vpop.f32.mrf.mxu2  ;;  %v7994_v42 = vpop.f32.mrf.mxu1  ;;  %v7982_v58 = vadd.f32 %v7981_v41, %v7969_v57 }
 0x4ca   : > { %v7995_v63 = vadd.f32 %v7994_v42, %v7982_v58 }
 0x4cf   : > { %v8020_v47 = vpop.f32.mrf.mxu3  ;;  %v7983_v48 = vpop.f32.mrf.mxu0 }
 0x4d0   : > { %v8007_v45 = vpop.f32.mrf.mxu2  ;;  %v7996_v49 = vpop.f32.mrf.mxu1 }
 0x4d1   : > { %v8008_v0 = vadd.f32 %v8007_v45, %v7995_v63 }
 0x4d3   : > { %v8021_v2 = vadd.f32 %v8020_v47, %v8008_v0 }
 0x4d7   : > { %v8022_v54 = vpop.f32.mrf.mxu3  ;;  %v8033_v55 = vpop.f32.mrf.mxu0 }
 0x4d8   : > { %v8009_v52 = vpop.f32.mrf.mxu2  ;;  %v8046_v56 = vpop.f32.mrf.mxu1  ;;  %v8034_v6 = vadd.f32 %v8033_v55, %v8021_v2 }
 0x4d9   : > { %v395_v52 = vld [vmem:[#allocation2] sm:$0xff] }
 0x4da   : > { %v8047_v7 = vadd.f32 %v8046_v56, %v8034_v6 }
 0x4df   : > { %v8072_v60 = vpop.f32.mrf.mxu3  ;;  %v8035_v61 = vpop.f32.mrf.mxu0 }
 0x4e0   : > { %v8059_v59 = vpop.f32.mrf.mxu2  ;;  %v8048_v62 = vpop.f32.mrf.mxu1 }
 0x4e1   : > { %v8060_v9 = vadd.f32 %v8059_v59, %v8047_v7 }
 0x4e3   : > { %v8073_v13 = vadd.f32 %v8072_v60, %v8060_v9 }
 0x4e7   : > { %v8074_v3 = vpop.f32.mrf.mxu3  ;;  %v8085_v4 = vpop.f32.mrf.mxu0 }
 0x4e8   : > { %v8061_v1 = vpop.f32.mrf.mxu2  ;;  %v8098_v5 = vpop.f32.mrf.mxu1  ;;  %v8086_v14 = vadd.f32 %v8085_v4, %v8073_v13 }
 0x4ea   : > { %v8099_v19 = vadd.f32 %v8098_v5, %v8086_v14 }
 0x4ef   : > { %v8124_v10 = vpop.f32.mrf.mxu3  ;;  %v8087_v11 = vpop.f32.mrf.mxu0 }
 0x4f0   : > { %v8111_v8 = vpop.f32.mrf.mxu2  ;;  %v8100_v12 = vpop.f32.mrf.mxu1 }
 0x4f1   : > { %v8112_v20 = vadd.f32 %v8111_v8, %v8099_v19 }
 0x4f3   : > { %v8125_v22 = vadd.f32 %v8124_v10, %v8112_v20 }
 0x4f7   : > { %v8126_v16 = vpop.f32.mrf.mxu3  ;;  %v8137_v17 = vpop.f32.mrf.mxu0 }
 0x4f8   : > { %v8113_v15 = vpop.f32.mrf.mxu2  ;;  %v8150_v18 = vpop.f32.mrf.mxu1  ;;  %v8138_v26 = vadd.f32 %v8137_v17, %v8125_v22 }
 0x4fa   : > { %v8151_v27 = vadd.f32 %v8150_v18, %v8138_v26 }
 0x4ff   : > { %v8176_v23 = vpop.f32.mrf.mxu3  ;;  %v8139_v24 = vpop.f32.mrf.mxu0 }
 0x500   : > { %v8163_v21 = vpop.f32.mrf.mxu2  ;;  %v8152_v25 = vpop.f32.mrf.mxu1 }
 0x501   : > { %v8164_v29 = vadd.f32 %v8163_v21, %v8151_v27 }
 0x503   : > { %v8177_v33 = vadd.f32 %v8176_v23, %v8164_v29 }
 0x507   : > { %v8178_v30 = vpop.f32.mrf.mxu3  ;;  %v8189_v31 = vpop.f32.mrf.mxu0 }
 0x508   : > { %v8165_v28 = vpop.f32.mrf.mxu2  ;;  %v8202_v32 = vpop.f32.mrf.mxu1  ;;  %v8190_v34 = vadd.f32 %v8189_v31, %v8177_v33 }
 0x50a   : > { %v8203_v39 = vadd.f32 %v8202_v32, %v8190_v34 }
 0x50f   : > { %v8228_v36 = vpop.f32.mrf.mxu3  ;;  %v8191_v37 = vpop.f32.mrf.mxu0 }
 0x510   : > { %v8215_v35 = vpop.f32.mrf.mxu2  ;;  %v8204_v38 = vpop.f32.mrf.mxu1 }
 0x511   : > { %v8216_v40 = vadd.f32 %v8215_v35, %v8203_v39 }
 0x513   : > { %v8229_v42 = vadd.f32 %v8228_v36, %v8216_v40 }
 0x517   : > { %v8230_v43 = vpop.f32.mrf.mxu3  ;;  %v8241_v44 = vpop.f32.mrf.mxu0 }
 0x518   : > { %v8217_v41 = vpop.f32.mrf.mxu2  ;;  %v8254_v45 = vpop.f32.mrf.mxu1  ;;  %v8242_v46 = vadd.f32 %v8241_v44, %v8229_v42 }
 0x51a   : > { %v8255_v47 = vadd.f32 %v8254_v45, %v8242_v46 }
 0x51f   : > { %v8280_v50 = vpop.f32.mrf.mxu3  ;;  %v8243_v51 = vpop.f32.mrf.mxu0 }
 0x520   : > { %v8267_v48 = vpop.f32.mrf.mxu2  ;;  %v8256_v53 = vpop.f32.mrf.mxu1 }
 0x521   : > { %v8268_v49 = vadd.f32 %v8267_v48, %v8255_v47 }
 0x523   : > { %v8281_v54 = vadd.f32 %v8280_v50, %v8268_v49 }
 0x524   : > { %8290 = sbr.rel (%p10654_p1) target bundleno = 1590 (0x636), region = 80 }
 0x525   : > { %v8284_v55 = vadd.f32 %v8281_v54, %v395_v52 }
 0x527   : > { %8286 = vst.msk [vmem:[#allocation2] sm:$0xff] %vm8285_vm1, %v8284_v55  ;;  %v8282_v57 = vpop.f32.mrf.mxu3 }
 0x528   : > { %v8269_v56 = vpop.f32.mrf.mxu2 }
 0x529   : > { %v8301_v58 = vld [vmem:[#allocation8 + $0x18] sm:$0xff]  ;;  %v8300_v59 = vld [vmem:[#allocation8 + $0x10] sm:$0xff]  ;;  %v8299_v60 = vld [vmem:[#allocation8 + $0x8] sm:$0xff]  ;;  %vm8361_vm2 = vcmask 15360  }
 0x52a   : > { %8321 = vmatpush.msra.mxu0 %v8301_v58  ;;  %v11300_v62 = vld [vmem:[#allocation7] ss:$0 sm:$0xff]  ;;  %v8333_v63 = vld [vmem:[%s12998_s5 + $0x18] sm:$0xff]  ;;  %v8298_v0 = vld [vmem:[#allocation8] sm:$0xff] }
 0x52b   : > { %8353 = vmatpush.msra.mxu1 %v8333_v63  ;;  %v8332_v3 = vld [vmem:[%s12998_s5 + $0x10] sm:$0xff]  ;;  %v8331_v4 = vld [vmem:[%s12998_s5 + $0x8] sm:$0xff]  ;;  %v8330_v5 = vld [vmem:[%s12998_s5] sm:$0xff] }
 0x52c   : > { %8322 = vmatpush.msra.mxu0 %v8300_v59  ;;  %v11301_v6 = vld [vmem:[#allocation10] ss:$0 sm:$0xff]  ;;  %v11302_v10 = vld [vmem:[#allocation11] ss:$0 sm:$0xff] }
 0x52d   : > { %8354 = vmatpush.msra.mxu1 %v8332_v3 }
 0x52e   : > { %v8291_v61 = vld [vmem:[#allocation2] sm:$0xff]  ;;  %8323 = vmatpush.msra.mxu0 %v8299_v60 }
 0x52f   : > { %v8296_v1 = vadd.f32 %v11300_v62, %v8291_v61  ;;  %8355 = vmatpush.msra.mxu1 %v8331_v4 }
 0x530   : > { %8324 = vmatpush.msra.mxu0 %v8298_v0 }
 0x531   : > { %v8297_v2 = vmax.f32 %v8296_v1, 0.0  ;;  %8356 = vmatpush.msra.mxu1 %v8330_v5 }
 0x533   : > { %10655 = vmatmul.msk.f32.vlgmr.msra.gmra.mxu0 %vm8285_vm1, %v8297_v2 }
 0x5b0   : > { %v8326_v7 = vpop.f32.mrf.mxu0 }
 0x5b1   : > { %v8327_v8 = vadd.f32 %v11301_v6, %v8326_v7 }
 0x5b3   : > { %v8329_v9 = vmax.f32 %v8327_v8, 0.0 }
 0x5b5   : > { %10656 = vmatmul.msk.f32.vlgmr.msra.gmra.mxu1 %vm8285_vm1, %v8329_v9 }
 0x632   : > { %v8358_v11 = vpop.f32.mrf.mxu1 }
 0x633   : > { %v8359_v12 = vadd.f32 %v11302_v10, %v8358_v11 }
 0x635   : > { %8362 = vst.msk [vmem:[%s13000_s7] sm:$0xff] %vm8361_vm2, %v8359_v12 }
 0x636 PF: > { %p22_p3 = scmp.ge.s32.totalorder %s11645_s13, 4   ;;  %s13009_s24 = smov %s11525_s25 }
 0x637   : > { %s13010_s25 = smov %s11529_s26  ;;  %s13011_s26 = smov %s11657_s17 }
 0x638   : > { %s13012_s27 = smov %s11645_s13  ;;  %24 = sbr.rel (!%p22_p3) target bundleno = 10 (0xa), region = 121 }
 0x63d   :  { %8374 = vsyncpa [#allocation4], 1 }
 0x63e   :  { %8376 = vsyncpa [#allocation4 + $0x1], 1 }
 0x63f   :  { %8377 = vsyncpa [#allocation6], 1 }
 0x640   :  { %8379 = vsyncpa [#allocation6 + $0x1], 1 }
 0x641   :  { %8380 = vsyncpa [#allocation9], 1 }
 0x642   :  { %8381 = vsyncpa [#allocation12], 1 }

</bundles_post_ra>
